<compile_context>
chip_gen: v7x
topology: tpu7x:2x2x1
jax: 0.10.0
libtpu: 0.0.40
codegen_flags: <defaults>
</compile_context>

<pallas_src>
import functools

import jax
import jax.numpy as jnp
from jax import lax
from jax.experimental import pallas as pl
from jax.experimental.pallas import tpu as pltpu


def targetnet_head_kernel(x_ref, w1_ref, b1_ref, w2_ref, b2_ref, out_ref, acc_ref,
                          *, inv_s, total_s, tile_s, lane_width, n_chunks,
                          s_axis, has_ragged):
    # x_ref:  (bb, C, tile_s)        streamed feature-map tile (spatial on lanes)
    # w1_ref: (C, H1), b1_ref: (1, H1), w2_ref: (H1, NC), b2_ref: (1, NC)
    # out_ref:(bb, 1, NC)
    # acc_ref:(bb, C, lane_width) f32 lane-shaped running spatial sum
    s = pl.program_id(s_axis)
    n_steps = pl.num_programs(s_axis)

    @pl.when(s == 0)
    def _init():
        acc_ref[...] = jnp.zeros_like(acc_ref)

    def _accumulate(mask_oob):
        acc = acc_ref[...]
        for j in range(n_chunks):                       # static, aligned 128-lane chunks
            chunk = x_ref[:, :, j * lane_width:(j + 1) * lane_width].astype(jnp.float32)
            if mask_oob:
                lane = lax.broadcasted_iota(jnp.int32, chunk.shape, chunk.ndim - 1)
                valid = (s * tile_s + j * lane_width + lane) < total_s
                chunk = jnp.where(valid, chunk, 0.0)
            acc = acc + chunk                           # VPU adds only (XLU stays idle)
        acc_ref[...] = acc

    if has_ragged:
        @pl.when(s < n_steps - 1)
        def _bulk():
            _accumulate(False)

        @pl.when(s == n_steps - 1)
        def _tail():
            _accumulate(True)                           # mask lanes past the true S
    else:
        _accumulate(False)

    @pl.when(s == n_steps - 1)
    def _finalize():
        # Single cross-lane reduce of the lane-shaped accumulator == global avg pool.
        pooled = jnp.sum(acc_ref[...], axis=-1) * inv_s              # (bb, C) f32
        # dense_1 + ReLU (MXU, f32 accumulation; LHS kept in f32)
        h = jnp.dot(pooled, w1_ref[...], preferred_element_type=jnp.float32)
        h = jnp.maximum(h + b1_ref[...].astype(jnp.float32), 0.0)
        # dense_2
        out = jnp.dot(h, w2_ref[...], preferred_element_type=jnp.float32)
        out = out + b2_ref[...].astype(jnp.float32)
        out_ref[...] = out[:, None, :].astype(out_ref.dtype)


def _device_kind():
    try:
        return jax.devices()[0].device_kind.lower()
    except Exception:
        return ""


def targetnet_head(feat_ncdhw, w1, b1, w2, b2, *, tile_s=None):
    """feat_ncdhw: (B, 512, D, H, W). w1:(512,1024), w2:(1024,n_class) in (in,out) layout.

    Returns (B, n_class) float32 logits (matches the PyTorch f32 head)."""
    B, C, D, H, W = feat_ncdhw.shape
    S = D * H * W
    # NCDHW -> (B, C, S): pure reshape, NO transpose, NO pad — one HBM read of the tensor.
    x = feat_ncdhw.reshape(B, C, S)
    itemsize = jnp.dtype(x.dtype).itemsize

    kind = _device_kind()
    is_v7 = "v7" in kind
    is_v5 = "v5" in kind
    split_batch = is_v7 and B > 1          # v7x: 2 TCs/chip -> shard the batch axis
    block_b = 1 if split_batch else B

    if S <= 128:
        tile_s = S
        lane_width = S
    else:
        if tile_s is None:
            # Generation-aware streamed-block target (amortize ~0.35us/step overhead).
            target_bytes = (8 << 20) if is_v7 else ((3 << 20) if is_v5 else (6 << 20))
            tile_s = target_bytes // (block_b * C * itemsize)
        tile_s = (int(tile_s) // 128) * 128
        tile_s = max(128, min(tile_s, (S // 128) * 128))
        lane_width = 128
    n_chunks = tile_s // lane_width
    num_tiles = -(-S // tile_s)
    has_ragged = (S % tile_s) != 0

    hidden = w1.shape[1]
    n_class = w2.shape[1]
    b1_2d = b1.reshape(1, hidden)
    b2_2d = b2.reshape(1, n_class)

    s_axis = 1 if split_batch else 0
    kernel = functools.partial(
        targetnet_head_kernel, inv_s=1.0 / float(S), total_s=S, tile_s=tile_s,
        lane_width=lane_width, n_chunks=n_chunks, s_axis=s_axis, has_ragged=has_ragged)

    if split_batch:
        grid = (B, num_tiles)
        x_spec = pl.BlockSpec((1, C, tile_s), lambda b, s: (b, 0, s))
        out_spec = pl.BlockSpec((1, 1, n_class), lambda b, s: (b, 0, 0))
        dim_sem = ("parallel", "arbitrary")
    else:
        grid = (num_tiles,)
        x_spec = pl.BlockSpec((B, C, tile_s), lambda s: (0, 0, s))
        out_spec = pl.BlockSpec((B, 1, n_class), lambda s: (0, 0, 0))
        dim_sem = ("arbitrary",)

    weight_bytes = sum(int(a.size) * jnp.dtype(a.dtype).itemsize for a in (w1, b1, w2, b2))
    cost = pl.CostEstimate(
        flops=2 * B * (C * hidden + hidden * n_class) + B * C * S,
        transcendentals=0,
        bytes_accessed=int(x.size) * itemsize + weight_bytes + B * n_class * 4,
    )
    vmem_limit = (48 << 20) if is_v7 else (64 << 20)

    def _make_call(single_buffer_weights):
        def const_spec(shape):
            # Grid-invariant weights/biases: DMA'd once, resident across all steps.
            if single_buffer_weights:
                return pl.BlockSpec(shape, lambda *_: (0,) * len(shape),
                                    pipeline_mode=pl.Buffered(1))
            return pl.BlockSpec(shape, lambda *_: (0,) * len(shape))

        return pl.pallas_call(
            kernel,
            out_shape=jax.ShapeDtypeStruct((B, 1, n_class), jnp.float32),
            grid_spec=pltpu.PrefetchScalarGridSpec(
                num_scalar_prefetch=0,
                grid=grid,
                in_specs=[
                    x_spec,
                    const_spec((C, hidden)),
                    const_spec((1, hidden)),
                    const_spec((hidden, n_class)),
                    const_spec((1, n_class)),
                ],
                out_specs=out_spec,
                scratch_shapes=[pltpu.VMEM((block_b, C, lane_width), jnp.float32)],
            ),
            compiler_params=pltpu.CompilerParams(
                dimension_semantics=dim_sem,
                vmem_limit_bytes=vmem_limit,
            ),
            cost_estimate=cost,
        )

    try:
        out = _make_call(True)(x, w1, b1_2d, w2, b2_2d)
    except Exception:
        # TODO(synk): pipeline_mode=pl.Buffered(1) unsupported on this build; fall back
        # to default double-buffered resident weights (costs ~2 MiB extra VMEM only).
        out = _make_call(False)(x, w1, b1_2d, w2, b2_2d)
    return out.reshape(B, n_class)


def reference_head(feat_ncdhw, w1, b1, w2, b2):
    B = feat_ncdhw.shape[0]
    pooled = jnp.mean(feat_ncdhw, axis=(2, 3, 4)).reshape(B, -1)      # (B, 512)
    h = jnp.maximum(pooled @ w1 + b1, 0.0)                            # (B, 1024)
    return h @ w2 + b2                                                # (B, n_class)


if __name__ == "__main__":
    key = jax.random.PRNGKey(0)
    k_x, k_w1, k_b1, k_w2, k_b2 = jax.random.split(key, 5)

    # dense_1 expects 512 input features -> C must be 512; keep batch/spatial small.
    # S = D*H*W = 192 with tile_s=128 -> 2 grid steps and a ragged (masked) last tile,
    # exercising the streamed reduction, in-kernel tail masking, and finalize matmuls.
    B, C, D, H, W = 2, 512, 4, 8, 6
    n_class = 1

    feat = jax.random.normal(k_x, (B, C, D, H, W), dtype=jnp.float32)

    # Deterministic params for Linear(512,1024) and Linear(1024,n_class), (in,out) layout.
    w1 = jax.random.normal(k_w1, (512, 1024), dtype=jnp.float32) * (1.0 / jnp.sqrt(512.0))
    b1 = jax.random.normal(k_b1, (1024,), dtype=jnp.float32) * 0.01
    w2 = jax.random.normal(k_w2, (1024, n_class), dtype=jnp.float32) * (1.0 / jnp.sqrt(1024.0))
    b2 = jax.random.normal(k_b2, (n_class,), dtype=jnp.float32) * 0.01

    out = jax.block_until_ready(targetnet_head(feat, w1, b1, w2, b2, tile_s=128))
    ref = jax.block_until_ready(reference_head(feat, w1, b1, w2, b2))

    assert out.shape == (B, n_class), out.shape
    assert jnp.allclose(out, ref, atol=1e-4, rtol=1e-4), (out, ref)
    print("KERNEL_OK")
</pallas_src>

<mosaic_0001>
module attributes {stable_mosaic.version = 11 : i64} {
  func.func @targetnet_head_kernel(%arg0: i32, %arg1: memref<2x512x128xf32, #tpu.memory_space<vmem>>, %arg2: memref<512x1024xf32, #tpu.memory_space<vmem>>, %arg3: memref<1x1024xf32, #tpu.memory_space<vmem>>, %arg4: memref<1024x1xf32, #tpu.memory_space<vmem>>, %arg5: memref<1x1xf32, #tpu.memory_space<vmem>>, %arg6: memref<2x1x1xf32, #tpu.memory_space<vmem>>, %arg7: memref<2x512x128xf32, #tpu.memory_space<vmem>>) attributes {dimension_semantics = [#tpu.dimension_semantics<arbitrary>], iteration_bounds = array<i64: 2>, scalar_prefetch = 0 : i64, scratch_operands = 1 : i64, tpu.core_type = #tpu.core_type<tc>, window_params = [{transform_indices = @transform_0, window_bounds = array<i64: 2, 512, 128>}, {pipeline_mode = #tpu.pipeline_mode<synchronous>, transform_indices = @transform_1, window_bounds = array<i64: 512, 1024>}, {pipeline_mode = #tpu.pipeline_mode<synchronous>, transform_indices = @transform_2, window_bounds = array<i64: 1, 1024>}, {pipeline_mode = #tpu.pipeline_mode<synchronous>, transform_indices = @transform_3, window_bounds = array<i64: 1024, 1>}, {pipeline_mode = #tpu.pipeline_mode<synchronous>, transform_indices = @transform_4, window_bounds = array<i64: 1, 1>}, {pipeline_mode = #tpu.pipeline_mode<synchronous>, transform_indices = @transform_5, window_bounds = array<i64: 2, 1, 1>}]} {
    %c0_i32 = arith.constant 0 : i32
    %0 = arith.cmpi eq, %arg0, %c0_i32 : i32
    %1 = arith.extui %0 : i1 to i32
    %c0_i32_0 = arith.constant 0 : i32
    %2 = arith.cmpi ne, %1, %c0_i32_0 : i32
    scf.if %2 {
      %cst = arith.constant 0.000000e+00 : f32
      %12 = vector.broadcast %cst : f32 to vector<2x512x128xf32>
      %c0 = arith.constant 0 : index
      %c0_6 = arith.constant 0 : index
      %c0_7 = arith.constant 0 : index
      %13 = vector.load %arg7[%c0, %c0_6, %c0_7] : memref<2x512x128xf32, #tpu.memory_space<vmem>>, vector<2x512x128xf32>
      tpu.vector_store %arg7[%c0, %c0_6, %c0_7], %12 {strides = array<i32>} : memref<2x512x128xf32, #tpu.memory_space<vmem>>, vector<2x512x128xf32>,
    } else {
    }
    %c1_i32 = arith.constant 1 : i32
    %3 = arith.cmpi slt, %arg0, %c1_i32 : i32
    %4 = arith.extui %3 : i1 to i32
    %c0_i32_1 = arith.constant 0 : i32
    %5 = arith.cmpi ne, %4, %c0_i32_1 : i32
    scf.if %5 {
      %c0 = arith.constant 0 : index
      %c0_6 = arith.constant 0 : index
      %c0_7 = arith.constant 0 : index
      %12 = vector.load %arg7[%c0, %c0_6, %c0_7] : memref<2x512x128xf32, #tpu.memory_space<vmem>>, vector<2x512x128xf32>
      %c0_8 = arith.constant 0 : index
      %c0_9 = arith.constant 0 : index
      %c0_10 = arith.constant 0 : index
      %13 = vector.load %arg1[%c0_8, %c0_9, %c0_10] : memref<2x512x128xf32, #tpu.memory_space<vmem>>, vector<2x512x128xf32>
      %14 = arith.addf %12, %13 : vector<2x512x128xf32>
      %c0_11 = arith.constant 0 : index
      %c0_12 = arith.constant 0 : index
      %c0_13 = arith.constant 0 : index
      %15 = vector.load %arg7[%c0_11, %c0_12, %c0_13] : memref<2x512x128xf32, #tpu.memory_space<vmem>>, vector<2x512x128xf32>
      tpu.vector_store %arg7[%c0_11, %c0_12, %c0_13], %14 {strides = array<i32>} : memref<2x512x128xf32, #tpu.memory_space<vmem>>, vector<2x512x128xf32>,
    } else {
    }
    %c1_i32_2 = arith.constant 1 : i32
    %6 = arith.cmpi eq, %arg0, %c1_i32_2 : i32
    %7 = arith.extui %6 : i1 to i32
    %c0_i32_3 = arith.constant 0 : i32
    %8 = arith.cmpi ne, %7, %c0_i32_3 : i32
    scf.if %8 {
      %c0 = arith.constant 0 : index
      %c0_6 = arith.constant 0 : index
      %c0_7 = arith.constant 0 : index
      %12 = vector.load %arg7[%c0, %c0_6, %c0_7] : memref<2x512x128xf32, #tpu.memory_space<vmem>>, vector<2x512x128xf32>
      %c0_8 = arith.constant 0 : index
      %c0_9 = arith.constant 0 : index
      %c0_10 = arith.constant 0 : index
      %13 = vector.load %arg1[%c0_8, %c0_9, %c0_10] : memref<2x512x128xf32, #tpu.memory_space<vmem>>, vector<2x512x128xf32>
      %14 = tpu.iota {dimensions = array<i32: 2>} : vector<2x512x128xi32>
      %c128_i32 = arith.constant 128 : i32
      %15 = arith.muli %arg0, %c128_i32 : i32
      %c0_i32_11 = arith.constant 0 : i32
      %16 = arith.addi %15, %c0_i32_11 : i32
      %17 = vector.broadcast %16 : i32 to vector<2x512x128xi32>
      %18 = arith.addi %17, %14 : vector<2x512x128xi32>
      %c192_i32 = arith.constant 192 : i32
      %19 = vector.broadcast %c192_i32 : i32 to vector<2x512x128xi32>
      %20 = arith.cmpi slt, %18, %19 : vector<2x512x128xi32>
      %cst = arith.constant 0.000000e+00 : f32
      %21 = vector.broadcast %cst : f32 to vector<2x512x128xf32>
      %22 = arith.select %20, %13, %21 : vector<2x512x128xi1>, vector<2x512x128xf32>
      %23 = arith.addf %12, %22 : vector<2x512x128xf32>
      %c0_12 = arith.constant 0 : index
      %c0_13 = arith.constant 0 : index
      %c0_14 = arith.constant 0 : index
      %24 = vector.load %arg7[%c0_12, %c0_13, %c0_14] : memref<2x512x128xf32, #tpu.memory_space<vmem>>, vector<2x512x128xf32>
      tpu.vector_store %arg7[%c0_12, %c0_13, %c0_14], %23 {strides = array<i32>} : memref<2x512x128xf32, #tpu.memory_space<vmem>>, vector<2x512x128xf32>,
    } else {
    }
    %c1_i32_4 = arith.constant 1 : i32
    %9 = arith.cmpi eq, %arg0, %c1_i32_4 : i32
    %10 = arith.extui %9 : i1 to i32
    %c0_i32_5 = arith.constant 0 : i32
    %11 = arith.cmpi ne, %10, %c0_i32_5 : i32
    scf.if %11 {
      %c0 = arith.constant 0 : index
      %c0_6 = arith.constant 0 : index
      %c0_7 = arith.constant 0 : index
      %12 = vector.load %arg7[%c0, %c0_6, %c0_7] : memref<2x512x128xf32, #tpu.memory_space<vmem>>, vector<2x512x128xf32>
      %cst = arith.constant dense<0.000000e+00> : vector<2x512xf32>
      %13 = vector.multi_reduction <add>, %12, %cst [2] : vector<2x512x128xf32> to vector<2x512xf32>
      %cst_8 = arith.constant 0.00520833349 : f32
      %14 = vector.broadcast %cst_8 : f32 to vector<2x512xf32>
      %15 = arith.mulf %13, %14 : vector<2x512xf32>
      %c0_9 = arith.constant 0 : index
      %c0_10 = arith.constant 0 : index
      %16 = vector.load %arg2[%c0_9, %c0_10] : memref<512x1024xf32, #tpu.memory_space<vmem>>, vector<512x1024xf32>
      %cst_11 = arith.constant dense<0.000000e+00> : vector<2x1024xf32>
      %17 = tpu.matmul %15, %16, %cst_11 {dimension_numbers = #tpu.dot_dimension_numbers<[1], [0], [0], [1], [0, 0, 1, 1], [], []>} : vector<2x512xf32>, vector<512x1024xf32>, vector<2x1024xf32> -> vector<2x1024xf32>
      %c0_12 = arith.constant 0 : index
      %c0_13 = arith.constant 0 : index
      %18 = vector.load %arg3[%c0_12, %c0_13] : memref<1x1024xf32, #tpu.memory_space<vmem>>, vector<1x1024xf32>
      %19 = vector.broadcast %18 : vector<1x1024xf32> to vector<2x1024xf32>
      %20 = arith.addf %17, %19 : vector<2x1024xf32>
      %cst_14 = arith.constant 0.000000e+00 : f32
      %21 = vector.broadcast %cst_14 : f32 to vector<2x1024xf32>
      %22 = arith.maximumf %20, %21 : vector<2x1024xf32>
      %c0_15 = arith.constant 0 : index
      %c0_16 = arith.constant 0 : index
      %23 = vector.load %arg4[%c0_15, %c0_16] : memref<1024x1xf32, #tpu.memory_space<vmem>>, vector<1024x1xf32>
      %cst_17 = arith.constant dense<0.000000e+00> : vector<2x1xf32>
      %24 = tpu.matmul %22, %23, %cst_17 {dimension_numbers = #tpu.dot_dimension_numbers<[1], [0], [0], [1], [0, 0, 1, 1], [], []>} : vector<2x1024xf32>, vector<1024x1xf32>, vector<2x1xf32> -> vector<2x1xf32>
      %c0_18 = arith.constant 0 : index
      %c0_19 = arith.constant 0 : index
      %25 = vector.load %arg5[%c0_18, %c0_19] : memref<1x1xf32, #tpu.memory_space<vmem>>, vector<1x1xf32>
      %26 = vector.broadcast %25 : vector<1x1xf32> to vector<2x1xf32>
      %27 = arith.addf %24, %26 : vector<2x1xf32>
      %28 = vector.shape_cast %27 : vector<2x1xf32> to vector<2x1x1xf32>
      %c0_20 = arith.constant 0 : index
      %c0_21 = arith.constant 0 : index
      %c0_22 = arith.constant 0 : index
      %29 = vector.load %arg6[%c0_20, %c0_21, %c0_22] : memref<2x1x1xf32, #tpu.memory_space<vmem>>, vector<2x1x1xf32>
      tpu.vector_store %arg6[%c0_20, %c0_21, %c0_22], %28 {strides = array<i32>} : memref<2x1x1xf32, #tpu.memory_space<vmem>>, vector<2x1x1xf32>,
    } else {
    }
    return
  }
  func.func @transform_0(%arg0: i32) -> (i32, i32, i32) {
    %c0_i32 = arith.constant 0 : i32
    %c0_i32_0 = arith.constant 0 : i32
    %c0_i32_1 = arith.constant 0 : i32
    return %c0_i32, %c0_i32_0, %arg0 : i32, i32, i32
  }
  func.func @transform_1(%arg0: i32) -> (i32, i32) {
    %c0_i32 = arith.constant 0 : i32
    %c0_i32_0 = arith.constant 0 : i32
    %c0_i32_1 = arith.constant 0 : i32
    return %c0_i32, %c0_i32_0 : i32, i32
  }
  func.func @transform_2(%arg0: i32) -> (i32, i32) {
    %c0_i32 = arith.constant 0 : i32
    %c0_i32_0 = arith.constant 0 : i32
    %c0_i32_1 = arith.constant 0 : i32
    return %c0_i32, %c0_i32_0 : i32, i32
  }
  func.func @transform_3(%arg0: i32) -> (i32, i32) {
    %c0_i32 = arith.constant 0 : i32
    %c0_i32_0 = arith.constant 0 : i32
    %c0_i32_1 = arith.constant 0 : i32
    return %c0_i32, %c0_i32_0 : i32, i32
  }
  func.func @transform_4(%arg0: i32) -> (i32, i32) {
    %c0_i32 = arith.constant 0 : i32
    %c0_i32_0 = arith.constant 0 : i32
    %c0_i32_1 = arith.constant 0 : i32
    return %c0_i32, %c0_i32_0 : i32, i32
  }
  func.func @transform_5(%arg0: i32) -> (i32, i32, i32) {
    %c0_i32 = arith.constant 0 : i32
    %c0_i32_0 = arith.constant 0 : i32
    %c0_i32_1 = arith.constant 0 : i32
    %c0_i32_2 = arith.constant 0 : i32
    return %c0_i32, %c0_i32_0, %c0_i32_1 : i32, i32, i32
  }
}

module attributes {stable_mosaic.version = 11 : i64} {
  func.func @targetnet_head_kernel(%arg0: i32, %arg1: memref<2x512x128xf32, #tpu.memory_space<vmem>>, %arg2: memref<512x1024xf32, #tpu.memory_space<vmem>>, %arg3: memref<1x1024xf32, #tpu.memory_space<vmem>>, %arg4: memref<1024x1xf32, #tpu.memory_space<vmem>>, %arg5: memref<1x1xf32, #tpu.memory_space<vmem>>, %arg6: memref<2x1x1xf32, #tpu.memory_space<vmem>>, %arg7: memref<2x512x128xf32, #tpu.memory_space<vmem>>) attributes {dimension_semantics = [#tpu.dimension_semantics<arbitrary>], iteration_bounds = array<i64: 2>, scalar_prefetch = 0 : i64, scratch_operands = 1 : i64, tpu.core_type = #tpu.core_type<tc>, window_params = [{transform_indices = @transform_0, window_bounds = array<i64: 2, 512, 128>}, {pipeline_mode = #tpu.pipeline_mode<synchronous>, transform_indices = @transform_1, window_bounds = array<i64: 512, 1024>}, {pipeline_mode = #tpu.pipeline_mode<synchronous>, transform_indices = @transform_2, window_bounds = array<i64: 1, 1024>}, {pipeline_mode = #tpu.pipeline_mode<synchronous>, transform_indices = @transform_3, window_bounds = array<i64: 1024, 1>}, {pipeline_mode = #tpu.pipeline_mode<synchronous>, transform_indices = @transform_4, window_bounds = array<i64: 1, 1>}, {pipeline_mode = #tpu.pipeline_mode<synchronous>, transform_indices = @transform_5, window_bounds = array<i64: 2, 1, 1>}]} {
    %c0_i32 = arith.constant 0 : i32
    %0 = arith.cmpi eq, %arg0, %c0_i32 : i32
    %1 = arith.extui %0 : i1 to i32
    %c0_i32_0 = arith.constant 0 : i32
    %2 = arith.cmpi ne, %1, %c0_i32_0 : i32
    scf.if %2 {
      %cst = arith.constant 0.000000e+00 : f32
      %12 = vector.broadcast %cst : f32 to vector<2x512x128xf32>
      %c0 = arith.constant 0 : index
      %c0_6 = arith.constant 0 : index
      %c0_7 = arith.constant 0 : index
      %13 = vector.load %arg7[%c0, %c0_6, %c0_7] : memref<2x512x128xf32, #tpu.memory_space<vmem>>, vector<2x512x128xf32>
      tpu.vector_store %arg7[%c0, %c0_6, %c0_7], %12 {strides = array<i32>} : memref<2x512x128xf32, #tpu.memory_space<vmem>>, vector<2x512x128xf32>,
    } else {
    }
    %c1_i32 = arith.constant 1 : i32
    %3 = arith.cmpi slt, %arg0, %c1_i32 : i32
    %4 = arith.extui %3 : i1 to i32
    %c0_i32_1 = arith.constant 0 : i32
    %5 = arith.cmpi ne, %4, %c0_i32_1 : i32
    scf.if %5 {
      %c0 = arith.constant 0 : index
      %c0_6 = arith.constant 0 : index
      %c0_7 = arith.constant 0 : index
      %12 = vector.load %arg7[%c0, %c0_6, %c0_7] : memref<2x512x128xf32, #tpu.memory_space<vmem>>, vector<2x512x128xf32>
      %c0_8 = arith.constant 0 : index
      %c0_9 = arith.constant 0 : index
      %c0_10 = arith.constant 0 : index
      %13 = vector.load %arg1[%c0_8, %c0_9, %c0_10] : memref<2x512x128xf32, #tpu.memory_space<vmem>>, vector<2x512x128xf32>
      %14 = arith.addf %12, %13 : vector<2x512x128xf32>
      %c0_11 = arith.constant 0 : index
      %c0_12 = arith.constant 0 : index
      %c0_13 = arith.constant 0 : index
      %15 = vector.load %arg7[%c0_11, %c0_12, %c0_13] : memref<2x512x128xf32, #tpu.memory_space<vmem>>, vector<2x512x128xf32>
      tpu.vector_store %arg7[%c0_11, %c0_12, %c0_13], %14 {strides = array<i32>} : memref<2x512x128xf32, #tpu.memory_space<vmem>>, vector<2x512x128xf32>,
    } else {
    }
    %c1_i32_2 = arith.constant 1 : i32
    %6 = arith.cmpi eq, %arg0, %c1_i32_2 : i32
    %7 = arith.extui %6 : i1 to i32
    %c0_i32_3 = arith.constant 0 : i32
    %8 = arith.cmpi ne, %7, %c0_i32_3 : i32
    scf.if %8 {
      %c0 = arith.constant 0 : index
      %c0_6 = arith.constant 0 : index
      %c0_7 = arith.constant 0 : index
      %12 = vector.load %arg7[%c0, %c0_6, %c0_7] : memref<2x512x128xf32, #tpu.memory_space<vmem>>, vector<2x512x128xf32>
      %c0_8 = arith.constant 0 : index
      %c0_9 = arith.constant 0 : index
      %c0_10 = arith.constant 0 : index
      %13 = vector.load %arg1[%c0_8, %c0_9, %c0_10] : memref<2x512x128xf32, #tpu.memory_space<vmem>>, vector<2x512x128xf32>
      %14 = tpu.iota {dimensions = array<i32: 2>} : vector<2x512x128xi32>
      %c128_i32 = arith.constant 128 : i32
      %15 = arith.muli %arg0, %c128_i32 : i32
      %c0_i32_11 = arith.constant 0 : i32
      %16 = arith.addi %15, %c0_i32_11 : i32
      %17 = vector.broadcast %16 : i32 to vector<2x512x128xi32>
      %18 = arith.addi %17, %14 : vector<2x512x128xi32>
      %c192_i32 = arith.constant 192 : i32
      %19 = vector.broadcast %c192_i32 : i32 to vector<2x512x128xi32>
      %20 = arith.cmpi slt, %18, %19 : vector<2x512x128xi32>
      %cst = arith.constant 0.000000e+00 : f32
      %21 = vector.broadcast %cst : f32 to vector<2x512x128xf32>
      %22 = arith.select %20, %13, %21 : vector<2x512x128xi1>, vector<2x512x128xf32>
      %23 = arith.addf %12, %22 : vector<2x512x128xf32>
      %c0_12 = arith.constant 0 : index
      %c0_13 = arith.constant 0 : index
      %c0_14 = arith.constant 0 : index
      %24 = vector.load %arg7[%c0_12, %c0_13, %c0_14] : memref<2x512x128xf32, #tpu.memory_space<vmem>>, vector<2x512x128xf32>
      tpu.vector_store %arg7[%c0_12, %c0_13, %c0_14], %23 {strides = array<i32>} : memref<2x512x128xf32, #tpu.memory_space<vmem>>, vector<2x512x128xf32>,
    } else {
    }
    %c1_i32_4 = arith.constant 1 : i32
    %9 = arith.cmpi eq, %arg0, %c1_i32_4 : i32
    %10 = arith.extui %9 : i1 to i32
    %c0_i32_5 = arith.constant 0 : i32
    %11 = arith.cmpi ne, %10, %c0_i32_5 : i32
    scf.if %11 {
      %c0 = arith.constant 0 : index
      %c0_6 = arith.constant 0 : index
      %c0_7 = arith.constant 0 : index
      %12 = vector.load %arg7[%c0, %c0_6, %c0_7] : memref<2x512x128xf32, #tpu.memory_space<vmem>>, vector<2x512x128xf32>
      %cst = arith.constant dense<0.000000e+00> : vector<2x512xf32>
      %13 = vector.multi_reduction <add>, %12, %cst [2] : vector<2x512x128xf32> to vector<2x512xf32>
      %cst_8 = arith.constant 0.00520833349 : f32
      %14 = vector.broadcast %cst_8 : f32 to vector<2x512xf32>
      %15 = arith.mulf %13, %14 : vector<2x512xf32>
      %c0_9 = arith.constant 0 : index
      %c0_10 = arith.constant 0 : index
      %16 = vector.load %arg2[%c0_9, %c0_10] : memref<512x1024xf32, #tpu.memory_space<vmem>>, vector<512x1024xf32>
      %cst_11 = arith.constant dense<0.000000e+00> : vector<2x1024xf32>
      %17 = tpu.matmul %15, %16, %cst_11 {dimension_numbers = #tpu.dot_dimension_numbers<[1], [0], [0], [1], [0, 0, 1, 1], [], []>} : vector<2x512xf32>, vector<512x1024xf32>, vector<2x1024xf32> -> vector<2x1024xf32>
      %c0_12 = arith.constant 0 : index
      %c0_13 = arith.constant 0 : index
      %18 = vector.load %arg3[%c0_12, %c0_13] : memref<1x1024xf32, #tpu.memory_space<vmem>>, vector<1x1024xf32>
      %19 = vector.broadcast %18 : vector<1x1024xf32> to vector<2x1024xf32>
      %20 = arith.addf %17, %19 : vector<2x1024xf32>
      %cst_14 = arith.constant 0.000000e+00 : f32
      %21 = vector.broadcast %cst_14 : f32 to vector<2x1024xf32>
      %22 = arith.maximumf %20, %21 : vector<2x1024xf32>
      %c0_15 = arith.constant 0 : index
      %c0_16 = arith.constant 0 : index
      %23 = vector.load %arg4[%c0_15, %c0_16] : memref<1024x1xf32, #tpu.memory_space<vmem>>, vector<1024x1xf32>
      %cst_17 = arith.constant dense<0.000000e+00> : vector<2x1xf32>
      %24 = tpu.matmul %22, %23, %cst_17 {dimension_numbers = #tpu.dot_dimension_numbers<[1], [0], [0], [1], [0, 0, 1, 1], [], []>} : vector<2x1024xf32>, vector<1024x1xf32>, vector<2x1xf32> -> vector<2x1xf32>
      %c0_18 = arith.constant 0 : index
      %c0_19 = arith.constant 0 : index
      %25 = vector.load %arg5[%c0_18, %c0_19] : memref<1x1xf32, #tpu.memory_space<vmem>>, vector<1x1xf32>
      %26 = vector.broadcast %25 : vector<1x1xf32> to vector<2x1xf32>
      %27 = arith.addf %24, %26 : vector<2x1xf32>
      %28 = vector.shape_cast %27 : vector<2x1xf32> to vector<2x1x1xf32>
      %c0_20 = arith.constant 0 : index
      %c0_21 = arith.constant 0 : index
      %c0_22 = arith.constant 0 : index
      %29 = vector.load %arg6[%c0_20, %c0_21, %c0_22] : memref<2x1x1xf32, #tpu.memory_space<vmem>>, vector<2x1x1xf32>
      tpu.vector_store %arg6[%c0_20, %c0_21, %c0_22], %28 {strides = array<i32>} : memref<2x1x1xf32, #tpu.memory_space<vmem>>, vector<2x1x1xf32>,
    } else {
    }
    return
  }
  func.func @transform_0(%arg0: i32) -> (i32, i32, i32) {
    %c0_i32 = arith.constant 0 : i32
    %c0_i32_0 = arith.constant 0 : i32
    %c0_i32_1 = arith.constant 0 : i32
    return %c0_i32, %c0_i32_0, %arg0 : i32, i32, i32
  }
  func.func @transform_1(%arg0: i32) -> (i32, i32) {
    %c0_i32 = arith.constant 0 : i32
    %c0_i32_0 = arith.constant 0 : i32
    %c0_i32_1 = arith.constant 0 : i32
    return %c0_i32, %c0_i32_0 : i32, i32
  }
  func.func @transform_2(%arg0: i32) -> (i32, i32) {
    %c0_i32 = arith.constant 0 : i32
    %c0_i32_0 = arith.constant 0 : i32
    %c0_i32_1 = arith.constant 0 : i32
    return %c0_i32, %c0_i32_0 : i32, i32
  }
  func.func @transform_3(%arg0: i32) -> (i32, i32) {
    %c0_i32 = arith.constant 0 : i32
    %c0_i32_0 = arith.constant 0 : i32
    %c0_i32_1 = arith.constant 0 : i32
    return %c0_i32, %c0_i32_0 : i32, i32
  }
  func.func @transform_4(%arg0: i32) -> (i32, i32) {
    %c0_i32 = arith.constant 0 : i32
    %c0_i32_0 = arith.constant 0 : i32
    %c0_i32_1 = arith.constant 0 : i32
    return %c0_i32, %c0_i32_0 : i32, i32
  }
  func.func @transform_5(%arg0: i32) -> (i32, i32, i32) {
    %c0_i32 = arith.constant 0 : i32
    %c0_i32_0 = arith.constant 0 : i32
    %c0_i32_1 = arith.constant 0 : i32
    %c0_i32_2 = arith.constant 0 : i32
    return %c0_i32, %c0_i32_0, %c0_i32_1 : i32, i32, i32
  }
}

</mosaic_0001>

<bundles_post_ra>
// kernel: tpu_custom_call.1
= control target key start
LH: loop header
LB: loop body
LE: loop exit
PB: predicated region body
PF: predicated region fallthrough
CT: control target
= control target key end

     0   :  { %s7418_s0 = inlined_call_operand.hbm [shape: f32[2,512,192], index: 0, kind: input, shape index: {}]   ;;  %s7419_s1 = inlined_call_operand.hbm [shape: f32[512,1024], index: 1, kind: input, shape index: {}]   ;;  %s7420_s2 = inlined_call_operand.hbm [shape: f32[1,1024], index: 2, kind: input, shape index: {}]   ;;  %s7421_s3 = inlined_call_operand.hbm [shape: f32[1024,1], index: 3, kind: input, shape index: {}]   ;;  %s7422_s4 = inlined_call_operand.<no memory space> [shape: f32[1,1], index: 4, kind: input, shape index: {}]   ;;  %s7423_s5 = inlined_call_operand.hbm [shape: f32[2,1,1], index: 5, kind: output, shape index: {}]  }
   0x1   :  { %v10_v0 = vstv %s7422_s4 }
   0x2   :  { %11 = vst [vmem:[#allocation3] sm:$0x1] %v10_v0 }
   0x3   :  { %12 = vsyncpa [#allocation5], 0 }
   0x4   :  { %14 = vsyncpa [#allocation5 + $0x1], 0 }
   0x5   :  { %15 = vsyncpa [#allocation8], 0 }
   0x6   :  { %16 = vsyncpa [#allocation11], 0 }
   0x7   :  { %17 = vsyncpa [#allocation6], 0  ;;  %s5731_s20 = smov 0   ;;  %s5733_s21 = smov 0  }
   0x8   :  { %s5735_s22 = smov 0   ;;  %s5737_s23 = smov 0  }
   0x9 LB: > { %s5750_s4 = sadd.s32 4294967295, %s5682_s23   ;;  %s5753_s24 = sadd.s32 1, %s5682_s23   ;;  %s5682_s23 = sphi %s5737_s23, %s7447_s23   ;;  %s5678_s22 = sphi %s5735_s22, %s7446_s22   ;;  %s5674_s21 = sphi %s5733_s21, %s7445_s21   ;;  %s5670_s20 = sphi %s5731_s20, %s7444_s20  }
   0xa   : > { %s27_s25 = ssub.s32 %s5682_s23, %s5753_s24  ;;  %s30_s26 = sadd.s32 1, %s5678_s22 }
   0xb   : > { %p28_p0 = scmp.eq.s32.totalorder %s27_s25, 0  ;;  %p37_p1 = scmp.ne.s32.totalorder %s5678_s22, %s5674_s21 }
   0xc   : > { %p38_p2 = scmp.eq.s32.totalorder %s5682_s23, 0  ;;  %p43_p3 = scmp.ne.s32.totalorder %s5674_s21, %s5670_s20 }
   0xd   : > { %s5763_s27 = scalar_select %p28_p0, %s5678_s22, %s30_s26  }
   0xe   : > { %p5765_p4 = por %p38_p2, %p37_p1  ;;  %p7424_p5 = scmp.eq.s32.totalorder %s5750_s4, 0 }
   0xf   : > { %7428 = sst [smem:[#allocation17_spill]] %s5763_s27  ;;  %p4545_p6 = scmp.ge.s32.totalorder %s5682_s23, 1 }
  0x10   : > { %p159_p7 = scmp.lt.s32.totalorder %s5682_s23, 3  ;;  %p5774_p8 = por %p7424_p5, %p43_p3 }
  0x11   : > { %s5684_s6 = smov [#allocation7]   ;;  %p5397_p13 = scmp.lt.s32.totalorder %s5682_s23, 2 }
  0x12   : > { %s7430_s29 = scalar_select %p5774_p8, 1, 0 }
  0x13   : > { %p5779_p10 = pnand %p4545_p6, %p159_p7  ;;  %s171_s7 = sshll.u32 %s5684_s6, 4  ;;  %s172_s7 = int_to_ptr.vmem [resolvable:$true] %s171_s7 }
  0x14   : > { %p5794_p0 = pnand %p5397_p13, %p5765_p4  ;;  %s5496_s12 = scalar_lea.hbm %s7419_s1, 65536 }
  0x15   : > { %s7431_s30 = scalar_select %p5779_p10, 1, 0 }
  0x16   : > { %p5380_p11 = pneg %p5779_p10  ;;  %p5497_p1 = scmp.ne.s32.totalorder %s7419_s1, %s5496_s12 }
  0x17   : > { %s7433_s9 = scalar_select %p5794_p0, 1, 0 }
  0x18   : > { %p5787_p12 = pnand %p5380_p11, %p7424_p5  ;;  %p5503_p6 = scmp.lt.u32.totalorder %s5496_s12, %s7419_s1 }
  0x1a   : > { %p5806_p2 = pneg %p5787_p12 }
  0x1c   : > { %p5499_p3 = pnand %p5806_p2, %p5497_p1 }
  0x1e   : > { %p5500_p4 = pneg %p5499_p3 }
  0x20   : > { %p5505_p7 = pnand %p5503_p6, %p5500_p4 }
  0x22   : > { %5508 = shalt.err (!%p5505_p7)
}
  0x23   : > { %s5509_s18 = scalar_lea.vmem %s172_s7, 65536  ;;  %p5517_p5 = scmp.lt.s32.totalorder %s172_s7, %s172_s7 }
  0x24   : > { %p5510_p11 = scmp.ne.s32.totalorder %s172_s7, %s5509_s18  ;;  %p5518_p8 = scmp.lt.s32.totalorder %s5509_s18, %s5509_s18 }
  0x26   : > { %p5512_p13 = pnand %p5510_p11, %p5806_p2  ;;  %p5519_p10 = por %p5518_p8, %p5517_p5 }
  0x28   : > { %p5513_p9 = pneg %p5512_p13 }
  0x2a   : > { %p5520_p0 = pnand %p5519_p10, %p5513_p9 }
  0x2c   : > { %5523 = shalt.err (!%p5520_p0)
}
  0x2d   : > { %s5685_s19 = smov 1024   ;;  %s5686_s20 = smov 64  }
  0x2e   : > { %5383 = dma.hbm_to_vmem [thread:$0]  (!%p5787_p12), %s7419_s1, 65536, %s172_s7, [#allocation8], %s5685_s19, %s5685_s19, %s5686_s20  }
  0x2f   : > { %s5687_s28 = smov [#allocation9]   ;;  %s5688_s10 = smov [#allocation10]  }
  0x30   : > { %s185_s6 = sshll.u32 %s5687_s28, 4  ;;  %s195_s11 = sshll.u32 %s5688_s10, 4  ;;  %s186_s6 = int_to_ptr.vmem [resolvable:$true] %s185_s6  ;;  %s196_s11 = int_to_ptr.vmem [resolvable:$true] %s195_s11 }
  0x31   : > { %s5524_s14 = scalar_lea.hbm %s7420_s2, 128 }
  0x32   : > { %p5525_p5 = scmp.ne.s32.totalorder %s7420_s2, %s5524_s14  ;;  %p5531_p10 = scmp.lt.u32.totalorder %s5524_s14, %s7420_s2 }
  0x34   : > { %p5527_p8 = pnand %p5525_p5, %p5806_p2 }
  0x36   : > { %p5528_p9 = pneg %p5527_p8 }
  0x38   : > { %p5533_p0 = pnand %p5531_p10, %p5528_p9 }
  0x3a   : > { %5536 = shalt.err (!%p5533_p0)
}
  0x3b   : > { %s5537_s7 = scalar_lea.vmem %s186_s6, 128  ;;  %p5545_p6 = scmp.lt.s32.totalorder %s186_s6, %s186_s6 }
  0x3c   : > { %p5538_p1 = scmp.ne.s32.totalorder %s186_s6, %s5537_s7  ;;  %p5546_p7 = scmp.lt.s32.totalorder %s5537_s7, %s5537_s7 }
  0x3e   : > { %p5540_p3 = pnand %p5538_p1, %p5806_p2  ;;  %p5547_p11 = por %p5546_p7, %p5545_p6 }
  0x40   : > { %p5541_p4 = pneg %p5540_p3 }
  0x42   : > { %p5548_p13 = pnand %p5547_p11, %p5541_p4 }
  0x44   : > { %5551 = shalt.err (!%p5548_p13)
}
  0x45   : > { %5386 = dma.hbm_to_vmem [thread:$0]  (!%p5787_p12), %s7420_s2, 128, %s186_s6, [#allocation8]  }
  0x46   : > { %s212_s27 = sand.u32 1, %s5678_s22   ;;  %s5552_s28 = scalar_lea.hbm %s7421_s3, 16384 }
  0x47   : > { %p5553_p5 = scmp.ne.s32.totalorder %s7421_s3, %s5552_s28  ;;  %p5559_p10 = scmp.lt.u32.totalorder %s5552_s28, %s7421_s3 }
  0x49   : > { %p5555_p8 = pnand %p5553_p5, %p5806_p2 }
  0x4b   : > { %p5556_p9 = pneg %p5555_p8 }
  0x4d   : > { %p5561_p0 = pnand %p5559_p10, %p5556_p9 }
  0x4f   : > { %5564 = shalt.err (!%p5561_p0)
}
  0x50   : > { %s5565_s6 = scalar_lea.vmem %s196_s11, 16384  ;;  %p5573_p6 = scmp.lt.s32.totalorder %s196_s11, %s196_s11 }
  0x51   : > { %p5566_p1 = scmp.ne.s32.totalorder %s196_s11, %s5565_s6  ;;  %p5574_p7 = scmp.lt.s32.totalorder %s5565_s6, %s5565_s6 }
  0x53   : > { %p5568_p3 = pnand %p5566_p1, %p5806_p2  ;;  %p5575_p11 = por %p5574_p7, %p5573_p6 }
  0x55   : > { %p5569_p4 = pneg %p5568_p3 }
  0x57   : > { %p5576_p13 = pnand %p5575_p11, %p5569_p4 }
  0x59   : > { %5579 = shalt.err (!%p5576_p13)
}
  0x5a   : > { %s5689_s16 = smov 128   ;;  %s5690_s17 = smov 8  }
  0x5b   : > { %5389 = dma.hbm_to_vmem [thread:$0]  (!%p5787_p12), %s7421_s3, 16384, %s196_s11, [#allocation11], %s5689_s16, %s5689_s16, %s5690_s17  }
  0x5c   : > { %s4550_s15 = sshll.u32 %s212_s27, 10  ;;  %s4551_s19 = sshll.u32 %s5682_s23, 7 }
  0x5d   : > { %s5866_s26 = scalar_lea.hbm %s7418_s0, %s4551_s19  ;;  %s216_s28 = scalar_lea.vmem [#allocation4], %s4550_s15 }
  0x5e   : > { %s222_s8 = sshll.u32 %s216_s28, 4  ;;  %s5870_s10 = scalar_lea.sflag [#allocation5], %s212_s27  ;;  %s5868_s8 = int_to_ptr.vmem [resolvable:$true] %s222_s8 }
  0x5f   : > { %s5580_s12 = scalar_lea.hbm %s5866_s26, 16384  ;;  %p7435_p12 = scmp.ne.s32.totalorder %s7433_s9, 0 }
  0x60   : > { %p5581_p2 = scmp.ne.s32.totalorder %s5866_s26, %s5580_s12  ;;  %s5585_s13 = scalar_lea.hbm %s7418_s0, 32768 }
  0x61   : > { %p5582_p5 = pneg %p7435_p12  ;;  %p5586_p10 = scmp.lt.u32.totalorder %s5866_s26, %s7418_s0 }
  0x62   : > { %p5587_p0 = scmp.lt.u32.totalorder %s5585_s13, %s5580_s12  ;;  %p5589_p3 = scmp.lt.u32.totalorder %s5580_s12, %s5866_s26 }
  0x63   : > { %p5583_p8 = pnand %p5582_p5, %p5581_p2 }
  0x64   : > { %p5588_p1 = por %p5587_p0, %p5586_p10 }
  0x65   : > { %p5584_p9 = pneg %p5583_p8 }
  0x66   : > { %p5590_p4 = por %p5589_p3, %p5588_p1 }
  0x68   : > { %p5591_p6 = pnand %p5590_p4, %p5584_p9 }
  0x6a   : > { %5594 = shalt.err (!%p5591_p6)
}
  0x6b   : > { %s5595_s27 = scalar_lea.vmem %s5868_s8, 16384  ;;  %s5691_s18 = smov [#allocation4]  }
  0x6c   : > { %p5596_p7 = scmp.ne.s32.totalorder %s5868_s8, %s5595_s27  ;;  %s5600_s7 = sshll.u32 %s5691_s18, 4  ;;  %s5601_s7 = int_to_ptr.vmem [resolvable:$false] %s5600_s7 }
  0x6d   : > { %s5602_s15 = scalar_lea.vmem %s5601_s7, 32768  ;;  %p5603_p2 = scmp.lt.s32.totalorder %s5868_s8, %s5601_s7 }
  0x6e   : > { %p5598_p11 = pnand %p5596_p7, %p5582_p5  ;;  %p5604_p8 = scmp.lt.s32.totalorder %s5602_s15, %s5595_s27 }
  0x70   : > { %p5599_p13 = pneg %p5598_p11  ;;  %p5605_p10 = por %p5604_p8, %p5603_p2 }
  0x72   : > { %p5606_p0 = pnand %p5605_p10, %p5599_p13 }
  0x74   : > { %5609 = shalt.err (!%p5606_p0)
}
  0x75   : > { %s5692_s19 = smov 256   ;;  %p7436_p5 = scmp.ne.s32.totalorder %s7431_s30, 0 }
  0x76   : > { %5393 = dma.hbm_to_vmem [thread:$0]  (!%p7435_p12), %s5866_s26, 16384, %s5868_s8, %s5870_s10, %s5692_s19, %s5689_s16, %s5690_s17  }
  0x77   : > { %234 = sbr.rel (%p7436_p5) target bundleno = 1317 (0x525), region = 40  ;;  %s236_s20 = sand.u32 (!%p7436_p5), 1, %s5674_s21  }
  0x78   : > { %s4553_s25 = sshll.u32 (!%p7436_p5), %s236_s20, 10  ;;  %s237_s28 = scalar_lea.sflag (!%p7436_p5), [#allocation5], %s236_s20 }
  0x79   : > { %s5903_s12 = scalar_lea.vmem (!%p7436_p5), [#allocation4], %s4553_s25  ;;  %p7437_p9 = scmp.ne.s32.totalorder (!%p7436_p5), %s7430_s29, 0 }
  0x7e   : > { %5653 = dma.done.wait (%p7437_p9), %s237_s28, 16384  }
  0x7f   : > { %5655 = vsyncadd (%p7437_p9), %s237_s28, 4294950912  ;;  %p7438_p1 = scmp.eq.s32.totalorder %s5750_s4, 0 }
  0x81   : > { %5657 = dma.done.wait (%p7438_p1), [#allocation8], 65664   ;;  %p7439_p12 = pmov %p7438_p1 }
  0x82   : > { %p7440_p3 = pmov %p7438_p1 }
  0x83   : > { %5659 = vsyncadd (%p7439_p12), [#allocation8], 4294901632 }
  0x84   : > { %5661 = dma.done.wait (%p7440_p3), [#allocation11], 16384   ;;  %p7441_p4 = pmov %p7438_p1 }
  0x85   : > { %p7442_p6 = scmp.ne.s32.totalorder %s5750_s4, 0 }
  0x86   : > { %5663 = vsyncadd (%p7441_p4), [#allocation11], 4294950912  ;;  %v5693_v1 = vmov (!%p7442_p6), 0.0  }
  0x87   : > { %277 = sbr.rel (%p7442_p6) target bundleno = 199 (0xc7), region = 60  ;;  %278 = vst [vmem:[#allocation2] sm:$0xff] (!%p7442_p6), %v5693_v1  ;;  %279 = vst [vmem:[#allocation2 + $0x8] sm:$0xff] (!%p7442_p6), %v5693_v1 }
  0x88   : > { %280 = vst [vmem:[#allocation2 + $0x10] sm:$0xff] (!%p7442_p6), %v5693_v1  ;;  %281 = vst [vmem:[#allocation2 + $0x18] sm:$0xff] (!%p7442_p6), %v5693_v1 }
  0x89   : > { %282 = vst [vmem:[#allocation2 + $0x20] sm:$0xff] (!%p7442_p6), %v5693_v1  ;;  %283 = vst [vmem:[#allocation2 + $0x28] sm:$0xff] (!%p7442_p6), %v5693_v1 }
  0x8a   : > { %284 = vst [vmem:[#allocation2 + $0x30] sm:$0xff] (!%p7442_p6), %v5693_v1  ;;  %285 = vst [vmem:[#allocation2 + $0x38] sm:$0xff] (!%p7442_p6), %v5693_v1 }
  0x8b   : > { %286 = vst [vmem:[#allocation2 + $0x40] sm:$0xff] (!%p7442_p6), %v5693_v1  ;;  %287 = vst [vmem:[#allocation2 + $0x48] sm:$0xff] (!%p7442_p6), %v5693_v1 }
  0x8c   : > { %288 = vst [vmem:[#allocation2 + $0x50] sm:$0xff] (!%p7442_p6), %v5693_v1  ;;  %289 = vst [vmem:[#allocation2 + $0x58] sm:$0xff] (!%p7442_p6), %v5693_v1 }
  0x8d   : > { %290 = vst [vmem:[#allocation2 + $0x60] sm:$0xff] (!%p7442_p6), %v5693_v1  ;;  %291 = vst [vmem:[#allocation2 + $0x68] sm:$0xff] (!%p7442_p6), %v5693_v1 }
  0x8e   : > { %292 = vst [vmem:[#allocation2 + $0x70] sm:$0xff] %v5693_v1  ;;  %293 = vst [vmem:[#allocation2 + $0x78] sm:$0xff] %v5693_v1 }
  0x8f   : > { %294 = vst [vmem:[#allocation2 + $0x80] sm:$0xff] %v5693_v1  ;;  %295 = vst [vmem:[#allocation2 + $0x88] sm:$0xff] %v5693_v1 }
  0x90   : > { %296 = vst [vmem:[#allocation2 + $0x90] sm:$0xff] %v5693_v1  ;;  %297 = vst [vmem:[#allocation2 + $0x98] sm:$0xff] %v5693_v1 }
  0x91   : > { %298 = vst [vmem:[#allocation2 + $0xa0] sm:$0xff] %v5693_v1  ;;  %299 = vst [vmem:[#allocation2 + $0xa8] sm:$0xff] %v5693_v1 }
  0x92   : > { %300 = vst [vmem:[#allocation2 + $0xb0] sm:$0xff] %v5693_v1  ;;  %301 = vst [vmem:[#allocation2 + $0xb8] sm:$0xff] %v5693_v1 }
  0x93   : > { %302 = vst [vmem:[#allocation2 + $0xc0] sm:$0xff] %v5693_v1  ;;  %303 = vst [vmem:[#allocation2 + $0xc8] sm:$0xff] %v5693_v1 }
  0x94   : > { %304 = vst [vmem:[#allocation2 + $0xd0] sm:$0xff] %v5693_v1  ;;  %305 = vst [vmem:[#allocation2 + $0xd8] sm:$0xff] %v5693_v1 }
  0x95   : > { %306 = vst [vmem:[#allocation2 + $0xe0] sm:$0xff] %v5693_v1  ;;  %307 = vst [vmem:[#allocation2 + $0xe8] sm:$0xff] %v5693_v1 }
  0x96   : > { %308 = vst [vmem:[#allocation2 + $0xf0] sm:$0xff] %v5693_v1  ;;  %309 = vst [vmem:[#allocation2 + $0xf8] sm:$0xff] %v5693_v1 }
  0x97   : > { %310 = vst [vmem:[#allocation2 + $0x100] sm:$0xff] %v5693_v1  ;;  %311 = vst [vmem:[#allocation2 + $0x108] sm:$0xff] %v5693_v1 }
  0x98   : > { %312 = vst [vmem:[#allocation2 + $0x110] sm:$0xff] %v5693_v1  ;;  %313 = vst [vmem:[#allocation2 + $0x118] sm:$0xff] %v5693_v1 }
  0x99   : > { %314 = vst [vmem:[#allocation2 + $0x120] sm:$0xff] %v5693_v1  ;;  %315 = vst [vmem:[#allocation2 + $0x128] sm:$0xff] %v5693_v1 }
  0x9a   : > { %316 = vst [vmem:[#allocation2 + $0x130] sm:$0xff] %v5693_v1  ;;  %317 = vst [vmem:[#allocation2 + $0x138] sm:$0xff] %v5693_v1 }
  0x9b   : > { %318 = vst [vmem:[#allocation2 + $0x140] sm:$0xff] %v5693_v1  ;;  %319 = vst [vmem:[#allocation2 + $0x148] sm:$0xff] %v5693_v1 }
  0x9c   : > { %320 = vst [vmem:[#allocation2 + $0x150] sm:$0xff] %v5693_v1  ;;  %321 = vst [vmem:[#allocation2 + $0x158] sm:$0xff] %v5693_v1 }
  0x9d   : > { %322 = vst [vmem:[#allocation2 + $0x160] sm:$0xff] %v5693_v1  ;;  %323 = vst [vmem:[#allocation2 + $0x168] sm:$0xff] %v5693_v1 }
  0x9e   : > { %324 = vst [vmem:[#allocation2 + $0x170] sm:$0xff] %v5693_v1  ;;  %325 = vst [vmem:[#allocation2 + $0x178] sm:$0xff] %v5693_v1 }
  0x9f   : > { %326 = vst [vmem:[#allocation2 + $0x180] sm:$0xff] %v5693_v1  ;;  %327 = vst [vmem:[#allocation2 + $0x188] sm:$0xff] %v5693_v1 }
  0xa0   : > { %328 = vst [vmem:[#allocation2 + $0x190] sm:$0xff] %v5693_v1  ;;  %329 = vst [vmem:[#allocation2 + $0x198] sm:$0xff] %v5693_v1 }
  0xa1   : > { %330 = vst [vmem:[#allocation2 + $0x1a0] sm:$0xff] %v5693_v1  ;;  %331 = vst [vmem:[#allocation2 + $0x1a8] sm:$0xff] %v5693_v1 }
  0xa2   : > { %332 = vst [vmem:[#allocation2 + $0x1b0] sm:$0xff] %v5693_v1  ;;  %333 = vst [vmem:[#allocation2 + $0x1b8] sm:$0xff] %v5693_v1 }
  0xa3   : > { %334 = vst [vmem:[#allocation2 + $0x1c0] sm:$0xff] %v5693_v1  ;;  %335 = vst [vmem:[#allocation2 + $0x1c8] sm:$0xff] %v5693_v1 }
  0xa4   : > { %336 = vst [vmem:[#allocation2 + $0x1d0] sm:$0xff] %v5693_v1  ;;  %337 = vst [vmem:[#allocation2 + $0x1d8] sm:$0xff] %v5693_v1 }
  0xa5   : > { %338 = vst [vmem:[#allocation2 + $0x1e0] sm:$0xff] %v5693_v1  ;;  %339 = vst [vmem:[#allocation2 + $0x1e8] sm:$0xff] %v5693_v1 }
  0xa6   : > { %340 = vst [vmem:[#allocation2 + $0x1f0] sm:$0xff] %v5693_v1  ;;  %341 = vst [vmem:[#allocation2 + $0x1f8] sm:$0xff] %v5693_v1 }
  0xa7   : > { %342 = vst [vmem:[#allocation2 + $0x200] sm:$0xff] %v5693_v1  ;;  %343 = vst [vmem:[#allocation2 + $0x208] sm:$0xff] %v5693_v1 }
  0xa8   : > { %344 = vst [vmem:[#allocation2 + $0x210] sm:$0xff] %v5693_v1  ;;  %345 = vst [vmem:[#allocation2 + $0x218] sm:$0xff] %v5693_v1 }
  0xa9   : > { %346 = vst [vmem:[#allocation2 + $0x220] sm:$0xff] %v5693_v1  ;;  %347 = vst [vmem:[#allocation2 + $0x228] sm:$0xff] %v5693_v1 }
  0xaa   : > { %348 = vst [vmem:[#allocation2 + $0x230] sm:$0xff] %v5693_v1  ;;  %349 = vst [vmem:[#allocation2 + $0x238] sm:$0xff] %v5693_v1 }
  0xab   : > { %350 = vst [vmem:[#allocation2 + $0x240] sm:$0xff] %v5693_v1  ;;  %351 = vst [vmem:[#allocation2 + $0x248] sm:$0xff] %v5693_v1 }
  0xac   : > { %352 = vst [vmem:[#allocation2 + $0x250] sm:$0xff] %v5693_v1  ;;  %353 = vst [vmem:[#allocation2 + $0x258] sm:$0xff] %v5693_v1 }
  0xad   : > { %354 = vst [vmem:[#allocation2 + $0x260] sm:$0xff] %v5693_v1  ;;  %355 = vst [vmem:[#allocation2 + $0x268] sm:$0xff] %v5693_v1 }
  0xae   : > { %356 = vst [vmem:[#allocation2 + $0x270] sm:$0xff] %v5693_v1  ;;  %357 = vst [vmem:[#allocation2 + $0x278] sm:$0xff] %v5693_v1 }
  0xaf   : > { %358 = vst [vmem:[#allocation2 + $0x280] sm:$0xff] %v5693_v1  ;;  %359 = vst [vmem:[#allocation2 + $0x288] sm:$0xff] %v5693_v1 }
  0xb0   : > { %360 = vst [vmem:[#allocation2 + $0x290] sm:$0xff] %v5693_v1  ;;  %361 = vst [vmem:[#allocation2 + $0x298] sm:$0xff] %v5693_v1 }
  0xb1   : > { %362 = vst [vmem:[#allocation2 + $0x2a0] sm:$0xff] %v5693_v1  ;;  %363 = vst [vmem:[#allocation2 + $0x2a8] sm:$0xff] %v5693_v1 }
  0xb2   : > { %364 = vst [vmem:[#allocation2 + $0x2b0] sm:$0xff] %v5693_v1  ;;  %365 = vst [vmem:[#allocation2 + $0x2b8] sm:$0xff] %v5693_v1 }
  0xb3   : > { %366 = vst [vmem:[#allocation2 + $0x2c0] sm:$0xff] %v5693_v1  ;;  %367 = vst [vmem:[#allocation2 + $0x2c8] sm:$0xff] %v5693_v1 }
  0xb4   : > { %368 = vst [vmem:[#allocation2 + $0x2d0] sm:$0xff] %v5693_v1  ;;  %369 = vst [vmem:[#allocation2 + $0x2d8] sm:$0xff] %v5693_v1 }
  0xb5   : > { %370 = vst [vmem:[#allocation2 + $0x2e0] sm:$0xff] %v5693_v1  ;;  %371 = vst [vmem:[#allocation2 + $0x2e8] sm:$0xff] %v5693_v1 }
  0xb6   : > { %372 = vst [vmem:[#allocation2 + $0x2f0] sm:$0xff] %v5693_v1  ;;  %373 = vst [vmem:[#allocation2 + $0x2f8] sm:$0xff] %v5693_v1 }
  0xb7   : > { %374 = vst [vmem:[#allocation2 + $0x300] sm:$0xff] %v5693_v1  ;;  %375 = vst [vmem:[#allocation2 + $0x308] sm:$0xff] %v5693_v1 }
  0xb8   : > { %376 = vst [vmem:[#allocation2 + $0x310] sm:$0xff] %v5693_v1  ;;  %377 = vst [vmem:[#allocation2 + $0x318] sm:$0xff] %v5693_v1 }
  0xb9   : > { %378 = vst [vmem:[#allocation2 + $0x320] sm:$0xff] %v5693_v1  ;;  %379 = vst [vmem:[#allocation2 + $0x328] sm:$0xff] %v5693_v1 }
  0xba   : > { %380 = vst [vmem:[#allocation2 + $0x330] sm:$0xff] %v5693_v1  ;;  %381 = vst [vmem:[#allocation2 + $0x338] sm:$0xff] %v5693_v1 }
  0xbb   : > { %382 = vst [vmem:[#allocation2 + $0x340] sm:$0xff] %v5693_v1  ;;  %383 = vst [vmem:[#allocation2 + $0x348] sm:$0xff] %v5693_v1 }
  0xbc   : > { %384 = vst [vmem:[#allocation2 + $0x350] sm:$0xff] %v5693_v1  ;;  %385 = vst [vmem:[#allocation2 + $0x358] sm:$0xff] %v5693_v1 }
  0xbd   : > { %386 = vst [vmem:[#allocation2 + $0x360] sm:$0xff] %v5693_v1  ;;  %387 = vst [vmem:[#allocation2 + $0x368] sm:$0xff] %v5693_v1 }
  0xbe   : > { %388 = vst [vmem:[#allocation2 + $0x370] sm:$0xff] %v5693_v1  ;;  %389 = vst [vmem:[#allocation2 + $0x378] sm:$0xff] %v5693_v1 }
  0xbf   : > { %390 = vst [vmem:[#allocation2 + $0x380] sm:$0xff] %v5693_v1  ;;  %391 = vst [vmem:[#allocation2 + $0x388] sm:$0xff] %v5693_v1 }
  0xc0   : > { %392 = vst [vmem:[#allocation2 + $0x390] sm:$0xff] %v5693_v1  ;;  %393 = vst [vmem:[#allocation2 + $0x398] sm:$0xff] %v5693_v1 }
  0xc1   : > { %394 = vst [vmem:[#allocation2 + $0x3a0] sm:$0xff] %v5693_v1  ;;  %395 = vst [vmem:[#allocation2 + $0x3a8] sm:$0xff] %v5693_v1 }
  0xc2   : > { %396 = vst [vmem:[#allocation2 + $0x3b0] sm:$0xff] %v5693_v1  ;;  %397 = vst [vmem:[#allocation2 + $0x3b8] sm:$0xff] %v5693_v1 }
  0xc3   : > { %398 = vst [vmem:[#allocation2 + $0x3c0] sm:$0xff] %v5693_v1  ;;  %399 = vst [vmem:[#allocation2 + $0x3c8] sm:$0xff] %v5693_v1 }
  0xc4   : > { %400 = vst [vmem:[#allocation2 + $0x3d0] sm:$0xff] %v5693_v1  ;;  %401 = vst [vmem:[#allocation2 + $0x3d8] sm:$0xff] %v5693_v1 }
  0xc5   : > { %402 = vst [vmem:[#allocation2 + $0x3e0] sm:$0xff] %v5693_v1  ;;  %403 = vst [vmem:[#allocation2 + $0x3e8] sm:$0xff] %v5693_v1 }
  0xc6   : > { %404 = vst [vmem:[#allocation2 + $0x3f0] sm:$0xff] %v5693_v1  ;;  %405 = vst [vmem:[#allocation2 + $0x3f8] sm:$0xff] %v5693_v1 }
  0xc7 PF: > { %p4558_p7 = scmp.ge.s32.totalorder %s5750_s4, 1 }
  0xc8   : > { %v410_v2 = vld [vmem:[#allocation2] sm:$0xff] (!%p4558_p7)  ;;  %v411_v4 = vld [vmem:[#allocation2 + $0x8] sm:$0xff] (!%p4558_p7)  ;;  %v412_v7 = vld [vmem:[#allocation2 + $0x10] sm:$0xff] (!%p4558_p7) }
  0xc9   : > { %409 = sbr.rel (%p4558_p7) target bundleno = 303 (0x12f), region = 64  ;;  %v538_v3 = vld [vmem:[%s5903_s12] sm:$0xff] (!%p4558_p7)  ;;  %v539_v6 = vld [vmem:[%s5903_s12 + $0x8] sm:$0xff] (!%p4558_p7)  ;;  %v540_v8 = vld [vmem:[%s5903_s12 + $0x10] sm:$0xff] (!%p4558_p7) }
  0xca   : > { %v666_v5 = vadd.f32 (!%p4558_p7), %v538_v3, %v410_v2  ;;  %v667_v9 = vadd.f32 (!%p4558_p7), %v539_v6, %v411_v4  ;;  %v668_v10 = vadd.f32 (!%p4558_p7), %v540_v8, %v412_v7  ;;  %v413_v11 = vld [vmem:[#allocation2 + $0x18] sm:$0xff] (!%p4558_p7)  ;;  %v414_v13 = vld [vmem:[#allocation2 + $0x20] sm:$0xff] (!%p4558_p7)  ;;  %v415_v16 = vld [vmem:[#allocation2 + $0x28] sm:$0xff] (!%p4558_p7) }
  0xcb   : > { %v541_v12 = vld [vmem:[%s5903_s12 + $0x18] sm:$0xff] (!%p4558_p7)  ;;  %v542_v15 = vld [vmem:[%s5903_s12 + $0x20] sm:$0xff] (!%p4558_p7)  ;;  %v543_v17 = vld [vmem:[%s5903_s12 + $0x28] sm:$0xff] (!%p4558_p7) }
  0xcc   : > { %794 = vst [vmem:[#allocation2] sm:$0xff] (!%p4558_p7), %v666_v5  ;;  %v669_v14 = vadd.f32 (!%p4558_p7), %v541_v12, %v413_v11  ;;  %795 = vst [vmem:[#allocation2 + $0x8] sm:$0xff] (!%p4558_p7), %v667_v9  ;;  %v670_v18 = vadd.f32 (!%p4558_p7), %v542_v15, %v414_v13  ;;  %v671_v19 = vadd.f32 (!%p4558_p7), %v543_v17, %v415_v16  ;;  %v416_v20 = vld [vmem:[#allocation2 + $0x30] sm:$0xff] (!%p4558_p7)  ;;  %v417_v22 = vld [vmem:[#allocation2 + $0x38] sm:$0xff] (!%p4558_p7) }
  0xcd   : > { %796 = vst [vmem:[#allocation2 + $0x10] sm:$0xff] (!%p4558_p7), %v668_v10  ;;  %v544_v21 = vld [vmem:[%s5903_s12 + $0x30] sm:$0xff] (!%p4558_p7)  ;;  %v545_v24 = vld [vmem:[%s5903_s12 + $0x38] sm:$0xff] (!%p4558_p7)  ;;  %v546_v26 = vld [vmem:[%s5903_s12 + $0x40] sm:$0xff] (!%p4558_p7) }
  0xce   : > { %797 = vst [vmem:[#allocation2 + $0x18] sm:$0xff] (!%p4558_p7), %v669_v14  ;;  %v672_v23 = vadd.f32 (!%p4558_p7), %v544_v21, %v416_v20  ;;  %v418_v25 = vld [vmem:[#allocation2 + $0x40] sm:$0xff] (!%p4558_p7)  ;;  %798 = vst [vmem:[#allocation2 + $0x20] sm:$0xff] (!%p4558_p7), %v670_v18  ;;  %v673_v27 = vadd.f32 (!%p4558_p7), %v545_v24, %v417_v22  ;;  %v419_v29 = vld [vmem:[#allocation2 + $0x48] sm:$0xff] (!%p4558_p7) }
  0xcf   : > { %799 = vst [vmem:[#allocation2 + $0x28] sm:$0xff] (!%p4558_p7), %v671_v19  ;;  %v674_v28 = vadd.f32 (!%p4558_p7), %v546_v26, %v418_v25  ;;  %v547_v30 = vld [vmem:[%s5903_s12 + $0x48] sm:$0xff] (!%p4558_p7)  ;;  %v548_v33 = vld [vmem:[%s5903_s12 + $0x50] sm:$0xff] (!%p4558_p7)  ;;  %v549_v35 = vld [vmem:[%s5903_s12 + $0x58] sm:$0xff] (!%p4558_p7) }
  0xd0   : > { %v420_v31 = vld [vmem:[#allocation2 + $0x50] sm:$0xff]  ;;  %800 = vst [vmem:[#allocation2 + $0x30] sm:$0xff] %v672_v23  ;;  %v675_v32 = vadd.f32 %v547_v30, %v419_v29  ;;  %v421_v34 = vld [vmem:[#allocation2 + $0x58] sm:$0xff]  ;;  %801 = vst [vmem:[#allocation2 + $0x38] sm:$0xff] %v673_v27 }
  0xd1   : > { %802 = vst [vmem:[#allocation2 + $0x40] sm:$0xff] %v674_v28  ;;  %v676_v36 = vadd.f32 %v548_v33, %v420_v31  ;;  %v677_v37 = vadd.f32 %v549_v35, %v421_v34  ;;  %v422_v38 = vld [vmem:[#allocation2 + $0x60] sm:$0xff]  ;;  %v423_v40 = vld [vmem:[#allocation2 + $0x68] sm:$0xff]  ;;  %v424_v43 = vld [vmem:[#allocation2 + $0x70] sm:$0xff] }
  0xd2   : > { %v550_v39 = vld [vmem:[%s5903_s12 + $0x60] sm:$0xff]  ;;  %803 = vst [vmem:[#allocation2 + $0x48] sm:$0xff] %v675_v32  ;;  %v551_v42 = vld [vmem:[%s5903_s12 + $0x68] sm:$0xff]  ;;  %v552_v44 = vld [vmem:[%s5903_s12 + $0x70] sm:$0xff] }
  0xd3   : > { %v678_v41 = vadd.f32 %v550_v39, %v422_v38  ;;  %804 = vst [vmem:[#allocation2 + $0x50] sm:$0xff] %v676_v36  ;;  %805 = vst [vmem:[#allocation2 + $0x58] sm:$0xff] %v677_v37  ;;  %v679_v45 = vadd.f32 %v551_v42, %v423_v40  ;;  %v680_v46 = vadd.f32 %v552_v44, %v424_v43  ;;  %v425_v47 = vld [vmem:[#allocation2 + $0x78] sm:$0xff]  ;;  %v426_v49 = vld [vmem:[#allocation2 + $0x80] sm:$0xff] }
  0xd4   : > { %v553_v48 = vld [vmem:[%s5903_s12 + $0x78] sm:$0xff]  ;;  %v554_v51 = vld [vmem:[%s5903_s12 + $0x80] sm:$0xff]  ;;  %v555_v53 = vld [vmem:[%s5903_s12 + $0x88] sm:$0xff] }
  0xd5   : > { %806 = vst [vmem:[#allocation2 + $0x60] sm:$0xff] %v678_v41  ;;  %v681_v50 = vadd.f32 %v553_v48, %v425_v47  ;;  %v427_v52 = vld [vmem:[#allocation2 + $0x88] sm:$0xff]  ;;  %807 = vst [vmem:[#allocation2 + $0x68] sm:$0xff] %v679_v45  ;;  %v682_v54 = vadd.f32 %v554_v51, %v426_v49  ;;  %v428_v56 = vld [vmem:[#allocation2 + $0x90] sm:$0xff] }
  0xd6   : > { %808 = vst [vmem:[#allocation2 + $0x70] sm:$0xff] %v680_v46  ;;  %v683_v55 = vadd.f32 %v555_v53, %v427_v52  ;;  %v556_v57 = vld [vmem:[%s5903_s12 + $0x90] sm:$0xff]  ;;  %v557_v60 = vld [vmem:[%s5903_s12 + $0x98] sm:$0xff]  ;;  %v558_v62 = vld [vmem:[%s5903_s12 + $0xa0] sm:$0xff] }
  0xd7   : > { %v429_v58 = vld [vmem:[#allocation2 + $0x98] sm:$0xff]  ;;  %809 = vst [vmem:[#allocation2 + $0x78] sm:$0xff] %v681_v50  ;;  %v684_v59 = vadd.f32 %v556_v57, %v428_v56  ;;  %v430_v61 = vld [vmem:[#allocation2 + $0xa0] sm:$0xff]  ;;  %810 = vst [vmem:[#allocation2 + $0x80] sm:$0xff] %v682_v54 }
  0xd8   : > { %811 = vst [vmem:[#allocation2 + $0x88] sm:$0xff] %v683_v55  ;;  %v685_v63 = vadd.f32 %v557_v60, %v429_v58  ;;  %v686_v0 = vadd.f32 %v558_v62, %v430_v61  ;;  %v431_v1 = vld [vmem:[#allocation2 + $0xa8] sm:$0xff]  ;;  %v432_v3 = vld [vmem:[#allocation2 + $0xb0] sm:$0xff]  ;;  %v433_v6 = vld [vmem:[#allocation2 + $0xb8] sm:$0xff] }
  0xd9   : > { %v559_v2 = vld [vmem:[%s5903_s12 + $0xa8] sm:$0xff]  ;;  %812 = vst [vmem:[#allocation2 + $0x90] sm:$0xff] %v684_v59  ;;  %v560_v5 = vld [vmem:[%s5903_s12 + $0xb0] sm:$0xff]  ;;  %v561_v7 = vld [vmem:[%s5903_s12 + $0xb8] sm:$0xff] }
  0xda   : > { %v687_v4 = vadd.f32 %v559_v2, %v431_v1  ;;  %813 = vst [vmem:[#allocation2 + $0x98] sm:$0xff] %v685_v63  ;;  %814 = vst [vmem:[#allocation2 + $0xa0] sm:$0xff] %v686_v0  ;;  %v688_v8 = vadd.f32 %v560_v5, %v432_v3  ;;  %v689_v9 = vadd.f32 %v561_v7, %v433_v6  ;;  %v434_v10 = vld [vmem:[#allocation2 + $0xc0] sm:$0xff]  ;;  %v435_v12 = vld [vmem:[#allocation2 + $0xc8] sm:$0xff] }
  0xdb   : > { %v562_v11 = vld [vmem:[%s5903_s12 + $0xc0] sm:$0xff]  ;;  %v563_v14 = vld [vmem:[%s5903_s12 + $0xc8] sm:$0xff]  ;;  %v564_v16 = vld [vmem:[%s5903_s12 + $0xd0] sm:$0xff] }
  0xdc   : > { %815 = vst [vmem:[#allocation2 + $0xa8] sm:$0xff] %v687_v4  ;;  %v690_v13 = vadd.f32 %v562_v11, %v434_v10  ;;  %v436_v15 = vld [vmem:[#allocation2 + $0xd0] sm:$0xff]  ;;  %816 = vst [vmem:[#allocation2 + $0xb0] sm:$0xff] %v688_v8  ;;  %v691_v17 = vadd.f32 %v563_v14, %v435_v12  ;;  %v437_v19 = vld [vmem:[#allocation2 + $0xd8] sm:$0xff] }
  0xdd   : > { %817 = vst [vmem:[#allocation2 + $0xb8] sm:$0xff] %v689_v9  ;;  %v692_v18 = vadd.f32 %v564_v16, %v436_v15  ;;  %v565_v20 = vld [vmem:[%s5903_s12 + $0xd8] sm:$0xff]  ;;  %v566_v23 = vld [vmem:[%s5903_s12 + $0xe0] sm:$0xff]  ;;  %v567_v25 = vld [vmem:[%s5903_s12 + $0xe8] sm:$0xff] }
  0xde   : > { %v438_v21 = vld [vmem:[#allocation2 + $0xe0] sm:$0xff]  ;;  %818 = vst [vmem:[#allocation2 + $0xc0] sm:$0xff] %v690_v13  ;;  %v693_v22 = vadd.f32 %v565_v20, %v437_v19  ;;  %v439_v24 = vld [vmem:[#allocation2 + $0xe8] sm:$0xff]  ;;  %819 = vst [vmem:[#allocation2 + $0xc8] sm:$0xff] %v691_v17 }
  0xdf   : > { %820 = vst [vmem:[#allocation2 + $0xd0] sm:$0xff] %v692_v18  ;;  %v694_v26 = vadd.f32 %v566_v23, %v438_v21  ;;  %v695_v27 = vadd.f32 %v567_v25, %v439_v24  ;;  %v440_v28 = vld [vmem:[#allocation2 + $0xf0] sm:$0xff]  ;;  %v441_v30 = vld [vmem:[#allocation2 + $0xf8] sm:$0xff]  ;;  %v442_v33 = vld [vmem:[#allocation2 + $0x100] sm:$0xff] }
  0xe0   : > { %v568_v29 = vld [vmem:[%s5903_s12 + $0xf0] sm:$0xff]  ;;  %821 = vst [vmem:[#allocation2 + $0xd8] sm:$0xff] %v693_v22  ;;  %v569_v32 = vld [vmem:[%s5903_s12 + $0xf8] sm:$0xff]  ;;  %v570_v34 = vld [vmem:[%s5903_s12 + $0x100] sm:$0xff] }
  0xe1   : > { %v696_v31 = vadd.f32 %v568_v29, %v440_v28  ;;  %822 = vst [vmem:[#allocation2 + $0xe0] sm:$0xff] %v694_v26  ;;  %823 = vst [vmem:[#allocation2 + $0xe8] sm:$0xff] %v695_v27  ;;  %v697_v35 = vadd.f32 %v569_v32, %v441_v30  ;;  %v698_v36 = vadd.f32 %v570_v34, %v442_v33  ;;  %v443_v37 = vld [vmem:[#allocation2 + $0x108] sm:$0xff]  ;;  %v444_v39 = vld [vmem:[#allocation2 + $0x110] sm:$0xff] }
  0xe2   : > { %v571_v38 = vld [vmem:[%s5903_s12 + $0x108] sm:$0xff]  ;;  %v572_v41 = vld [vmem:[%s5903_s12 + $0x110] sm:$0xff]  ;;  %v573_v43 = vld [vmem:[%s5903_s12 + $0x118] sm:$0xff] }
  0xe3   : > { %824 = vst [vmem:[#allocation2 + $0xf0] sm:$0xff] %v696_v31  ;;  %v699_v40 = vadd.f32 %v571_v38, %v443_v37  ;;  %v445_v42 = vld [vmem:[#allocation2 + $0x118] sm:$0xff]  ;;  %825 = vst [vmem:[#allocation2 + $0xf8] sm:$0xff] %v697_v35  ;;  %v700_v44 = vadd.f32 %v572_v41, %v444_v39  ;;  %v446_v46 = vld [vmem:[#allocation2 + $0x120] sm:$0xff] }
  0xe4   : > { %826 = vst [vmem:[#allocation2 + $0x100] sm:$0xff] %v698_v36  ;;  %v701_v45 = vadd.f32 %v573_v43, %v445_v42  ;;  %v574_v47 = vld [vmem:[%s5903_s12 + $0x120] sm:$0xff]  ;;  %v575_v50 = vld [vmem:[%s5903_s12 + $0x128] sm:$0xff]  ;;  %v576_v52 = vld [vmem:[%s5903_s12 + $0x130] sm:$0xff] }
  0xe5   : > { %v447_v48 = vld [vmem:[#allocation2 + $0x128] sm:$0xff]  ;;  %827 = vst [vmem:[#allocation2 + $0x108] sm:$0xff] %v699_v40  ;;  %v702_v49 = vadd.f32 %v574_v47, %v446_v46  ;;  %v448_v51 = vld [vmem:[#allocation2 + $0x130] sm:$0xff]  ;;  %828 = vst [vmem:[#allocation2 + $0x110] sm:$0xff] %v700_v44 }
  0xe6   : > { %829 = vst [vmem:[#allocation2 + $0x118] sm:$0xff] %v701_v45  ;;  %v703_v53 = vadd.f32 %v575_v50, %v447_v48  ;;  %v704_v54 = vadd.f32 %v576_v52, %v448_v51  ;;  %v449_v55 = vld [vmem:[#allocation2 + $0x138] sm:$0xff]  ;;  %v450_v57 = vld [vmem:[#allocation2 + $0x140] sm:$0xff]  ;;  %v451_v60 = vld [vmem:[#allocation2 + $0x148] sm:$0xff] }
  0xe7   : > { %v577_v56 = vld [vmem:[%s5903_s12 + $0x138] sm:$0xff]  ;;  %830 = vst [vmem:[#allocation2 + $0x120] sm:$0xff] %v702_v49  ;;  %v578_v59 = vld [vmem:[%s5903_s12 + $0x140] sm:$0xff]  ;;  %v579_v61 = vld [vmem:[%s5903_s12 + $0x148] sm:$0xff] }
  0xe8   : > { %v705_v58 = vadd.f32 %v577_v56, %v449_v55  ;;  %831 = vst [vmem:[#allocation2 + $0x128] sm:$0xff] %v703_v53  ;;  %832 = vst [vmem:[#allocation2 + $0x130] sm:$0xff] %v704_v54  ;;  %v706_v62 = vadd.f32 %v578_v59, %v450_v57  ;;  %v707_v63 = vadd.f32 %v579_v61, %v451_v60  ;;  %v452_v0 = vld [vmem:[#allocation2 + $0x150] sm:$0xff]  ;;  %v453_v2 = vld [vmem:[#allocation2 + $0x158] sm:$0xff] }
  0xe9   : > { %v580_v1 = vld [vmem:[%s5903_s12 + $0x150] sm:$0xff]  ;;  %v581_v4 = vld [vmem:[%s5903_s12 + $0x158] sm:$0xff]  ;;  %v582_v6 = vld [vmem:[%s5903_s12 + $0x160] sm:$0xff] }
  0xea   : > { %833 = vst [vmem:[#allocation2 + $0x138] sm:$0xff] %v705_v58  ;;  %v708_v3 = vadd.f32 %v580_v1, %v452_v0  ;;  %v454_v5 = vld [vmem:[#allocation2 + $0x160] sm:$0xff]  ;;  %834 = vst [vmem:[#allocation2 + $0x140] sm:$0xff] %v706_v62  ;;  %v709_v7 = vadd.f32 %v581_v4, %v453_v2  ;;  %v455_v9 = vld [vmem:[#allocation2 + $0x168] sm:$0xff] }
  0xeb   : > { %835 = vst [vmem:[#allocation2 + $0x148] sm:$0xff] %v707_v63  ;;  %v710_v8 = vadd.f32 %v582_v6, %v454_v5  ;;  %v583_v10 = vld [vmem:[%s5903_s12 + $0x168] sm:$0xff]  ;;  %v584_v13 = vld [vmem:[%s5903_s12 + $0x170] sm:$0xff]  ;;  %v585_v15 = vld [vmem:[%s5903_s12 + $0x178] sm:$0xff] }
  0xec   : > { %v456_v11 = vld [vmem:[#allocation2 + $0x170] sm:$0xff]  ;;  %836 = vst [vmem:[#allocation2 + $0x150] sm:$0xff] %v708_v3  ;;  %v711_v12 = vadd.f32 %v583_v10, %v455_v9  ;;  %v457_v14 = vld [vmem:[#allocation2 + $0x178] sm:$0xff]  ;;  %837 = vst [vmem:[#allocation2 + $0x158] sm:$0xff] %v709_v7 }
  0xed   : > { %838 = vst [vmem:[#allocation2 + $0x160] sm:$0xff] %v710_v8  ;;  %v712_v16 = vadd.f32 %v584_v13, %v456_v11  ;;  %v713_v17 = vadd.f32 %v585_v15, %v457_v14  ;;  %v458_v18 = vld [vmem:[#allocation2 + $0x180] sm:$0xff]  ;;  %v459_v20 = vld [vmem:[#allocation2 + $0x188] sm:$0xff]  ;;  %v460_v23 = vld [vmem:[#allocation2 + $0x190] sm:$0xff] }
  0xee   : > { %v586_v19 = vld [vmem:[%s5903_s12 + $0x180] sm:$0xff]  ;;  %839 = vst [vmem:[#allocation2 + $0x168] sm:$0xff] %v711_v12  ;;  %v587_v22 = vld [vmem:[%s5903_s12 + $0x188] sm:$0xff]  ;;  %v588_v24 = vld [vmem:[%s5903_s12 + $0x190] sm:$0xff] }
  0xef   : > { %v714_v21 = vadd.f32 %v586_v19, %v458_v18  ;;  %840 = vst [vmem:[#allocation2 + $0x170] sm:$0xff] %v712_v16  ;;  %841 = vst [vmem:[#allocation2 + $0x178] sm:$0xff] %v713_v17  ;;  %v715_v25 = vadd.f32 %v587_v22, %v459_v20  ;;  %v716_v26 = vadd.f32 %v588_v24, %v460_v23  ;;  %v461_v27 = vld [vmem:[#allocation2 + $0x198] sm:$0xff]  ;;  %v462_v29 = vld [vmem:[#allocation2 + $0x1a0] sm:$0xff] }
  0xf0   : > { %v589_v28 = vld [vmem:[%s5903_s12 + $0x198] sm:$0xff]  ;;  %v590_v31 = vld [vmem:[%s5903_s12 + $0x1a0] sm:$0xff]  ;;  %v591_v33 = vld [vmem:[%s5903_s12 + $0x1a8] sm:$0xff] }
  0xf1   : > { %842 = vst [vmem:[#allocation2 + $0x180] sm:$0xff] %v714_v21  ;;  %v717_v30 = vadd.f32 %v589_v28, %v461_v27  ;;  %v463_v32 = vld [vmem:[#allocation2 + $0x1a8] sm:$0xff]  ;;  %843 = vst [vmem:[#allocation2 + $0x188] sm:$0xff] %v715_v25  ;;  %v718_v34 = vadd.f32 %v590_v31, %v462_v29  ;;  %v464_v36 = vld [vmem:[#allocation2 + $0x1b0] sm:$0xff] }
  0xf2   : > { %844 = vst [vmem:[#allocation2 + $0x190] sm:$0xff] %v716_v26  ;;  %v719_v35 = vadd.f32 %v591_v33, %v463_v32  ;;  %v592_v37 = vld [vmem:[%s5903_s12 + $0x1b0] sm:$0xff]  ;;  %v593_v40 = vld [vmem:[%s5903_s12 + $0x1b8] sm:$0xff]  ;;  %v594_v42 = vld [vmem:[%s5903_s12 + $0x1c0] sm:$0xff] }
  0xf3   : > { %v465_v38 = vld [vmem:[#allocation2 + $0x1b8] sm:$0xff]  ;;  %845 = vst [vmem:[#allocation2 + $0x198] sm:$0xff] %v717_v30  ;;  %v720_v39 = vadd.f32 %v592_v37, %v464_v36  ;;  %v466_v41 = vld [vmem:[#allocation2 + $0x1c0] sm:$0xff]  ;;  %846 = vst [vmem:[#allocation2 + $0x1a0] sm:$0xff] %v718_v34 }
  0xf4   : > { %847 = vst [vmem:[#allocation2 + $0x1a8] sm:$0xff] %v719_v35  ;;  %v721_v43 = vadd.f32 %v593_v40, %v465_v38  ;;  %v722_v44 = vadd.f32 %v594_v42, %v466_v41  ;;  %v467_v45 = vld [vmem:[#allocation2 + $0x1c8] sm:$0xff]  ;;  %v468_v47 = vld [vmem:[#allocation2 + $0x1d0] sm:$0xff]  ;;  %v469_v50 = vld [vmem:[#allocation2 + $0x1d8] sm:$0xff] }
  0xf5   : > { %v595_v46 = vld [vmem:[%s5903_s12 + $0x1c8] sm:$0xff]  ;;  %848 = vst [vmem:[#allocation2 + $0x1b0] sm:$0xff] %v720_v39  ;;  %v596_v49 = vld [vmem:[%s5903_s12 + $0x1d0] sm:$0xff]  ;;  %v597_v51 = vld [vmem:[%s5903_s12 + $0x1d8] sm:$0xff] }
  0xf6   : > { %v723_v48 = vadd.f32 %v595_v46, %v467_v45  ;;  %849 = vst [vmem:[#allocation2 + $0x1b8] sm:$0xff] %v721_v43  ;;  %850 = vst [vmem:[#allocation2 + $0x1c0] sm:$0xff] %v722_v44  ;;  %v724_v52 = vadd.f32 %v596_v49, %v468_v47  ;;  %v725_v53 = vadd.f32 %v597_v51, %v469_v50  ;;  %v470_v54 = vld [vmem:[#allocation2 + $0x1e0] sm:$0xff]  ;;  %v471_v56 = vld [vmem:[#allocation2 + $0x1e8] sm:$0xff] }
  0xf7   : > { %v598_v55 = vld [vmem:[%s5903_s12 + $0x1e0] sm:$0xff]  ;;  %v599_v58 = vld [vmem:[%s5903_s12 + $0x1e8] sm:$0xff]  ;;  %v600_v60 = vld [vmem:[%s5903_s12 + $0x1f0] sm:$0xff] }
  0xf8   : > { %851 = vst [vmem:[#allocation2 + $0x1c8] sm:$0xff] %v723_v48  ;;  %v726_v57 = vadd.f32 %v598_v55, %v470_v54  ;;  %v472_v59 = vld [vmem:[#allocation2 + $0x1f0] sm:$0xff]  ;;  %852 = vst [vmem:[#allocation2 + $0x1d0] sm:$0xff] %v724_v52  ;;  %v727_v61 = vadd.f32 %v599_v58, %v471_v56  ;;  %v473_v63 = vld [vmem:[#allocation2 + $0x1f8] sm:$0xff] }
  0xf9   : > { %853 = vst [vmem:[#allocation2 + $0x1d8] sm:$0xff] %v725_v53  ;;  %v728_v62 = vadd.f32 %v600_v60, %v472_v59  ;;  %v601_v0 = vld [vmem:[%s5903_s12 + $0x1f8] sm:$0xff]  ;;  %v602_v3 = vld [vmem:[%s5903_s12 + $0x200] sm:$0xff]  ;;  %v603_v5 = vld [vmem:[%s5903_s12 + $0x208] sm:$0xff] }
  0xfa   : > { %v474_v1 = vld [vmem:[#allocation2 + $0x200] sm:$0xff]  ;;  %854 = vst [vmem:[#allocation2 + $0x1e0] sm:$0xff] %v726_v57  ;;  %v729_v2 = vadd.f32 %v601_v0, %v473_v63  ;;  %v475_v4 = vld [vmem:[#allocation2 + $0x208] sm:$0xff]  ;;  %855 = vst [vmem:[#allocation2 + $0x1e8] sm:$0xff] %v727_v61 }
  0xfb   : > { %856 = vst [vmem:[#allocation2 + $0x1f0] sm:$0xff] %v728_v62  ;;  %v730_v6 = vadd.f32 %v602_v3, %v474_v1  ;;  %v731_v7 = vadd.f32 %v603_v5, %v475_v4  ;;  %v476_v8 = vld [vmem:[#allocation2 + $0x210] sm:$0xff]  ;;  %v477_v10 = vld [vmem:[#allocation2 + $0x218] sm:$0xff]  ;;  %v478_v13 = vld [vmem:[#allocation2 + $0x220] sm:$0xff] }
  0xfc   : > { %v604_v9 = vld [vmem:[%s5903_s12 + $0x210] sm:$0xff]  ;;  %857 = vst [vmem:[#allocation2 + $0x1f8] sm:$0xff] %v729_v2  ;;  %v605_v12 = vld [vmem:[%s5903_s12 + $0x218] sm:$0xff]  ;;  %v606_v14 = vld [vmem:[%s5903_s12 + $0x220] sm:$0xff] }
  0xfd   : > { %v732_v11 = vadd.f32 %v604_v9, %v476_v8  ;;  %858 = vst [vmem:[#allocation2 + $0x200] sm:$0xff] %v730_v6  ;;  %859 = vst [vmem:[#allocation2 + $0x208] sm:$0xff] %v731_v7  ;;  %v733_v15 = vadd.f32 %v605_v12, %v477_v10  ;;  %v734_v16 = vadd.f32 %v606_v14, %v478_v13  ;;  %v479_v17 = vld [vmem:[#allocation2 + $0x228] sm:$0xff]  ;;  %v480_v19 = vld [vmem:[#allocation2 + $0x230] sm:$0xff] }
  0xfe   : > { %v607_v18 = vld [vmem:[%s5903_s12 + $0x228] sm:$0xff]  ;;  %v608_v21 = vld [vmem:[%s5903_s12 + $0x230] sm:$0xff]  ;;  %v609_v23 = vld [vmem:[%s5903_s12 + $0x238] sm:$0xff] }
  0xff   : > { %860 = vst [vmem:[#allocation2 + $0x210] sm:$0xff] %v732_v11  ;;  %v735_v20 = vadd.f32 %v607_v18, %v479_v17  ;;  %v481_v22 = vld [vmem:[#allocation2 + $0x238] sm:$0xff]  ;;  %861 = vst [vmem:[#allocation2 + $0x218] sm:$0xff] %v733_v15  ;;  %v736_v24 = vadd.f32 %v608_v21, %v480_v19  ;;  %v482_v26 = vld [vmem:[#allocation2 + $0x240] sm:$0xff] }
 0x100   : > { %862 = vst [vmem:[#allocation2 + $0x220] sm:$0xff] %v734_v16  ;;  %v737_v25 = vadd.f32 %v609_v23, %v481_v22  ;;  %v610_v27 = vld [vmem:[%s5903_s12 + $0x240] sm:$0xff]  ;;  %v611_v30 = vld [vmem:[%s5903_s12 + $0x248] sm:$0xff]  ;;  %v612_v32 = vld [vmem:[%s5903_s12 + $0x250] sm:$0xff] }
 0x101   : > { %v483_v28 = vld [vmem:[#allocation2 + $0x248] sm:$0xff]  ;;  %863 = vst [vmem:[#allocation2 + $0x228] sm:$0xff] %v735_v20  ;;  %v738_v29 = vadd.f32 %v610_v27, %v482_v26  ;;  %v484_v31 = vld [vmem:[#allocation2 + $0x250] sm:$0xff]  ;;  %864 = vst [vmem:[#allocation2 + $0x230] sm:$0xff] %v736_v24 }
 0x102   : > { %865 = vst [vmem:[#allocation2 + $0x238] sm:$0xff] %v737_v25  ;;  %v739_v33 = vadd.f32 %v611_v30, %v483_v28  ;;  %v740_v34 = vadd.f32 %v612_v32, %v484_v31  ;;  %v485_v35 = vld [vmem:[#allocation2 + $0x258] sm:$0xff]  ;;  %v486_v37 = vld [vmem:[#allocation2 + $0x260] sm:$0xff]  ;;  %v487_v40 = vld [vmem:[#allocation2 + $0x268] sm:$0xff] }
 0x103   : > { %v613_v36 = vld [vmem:[%s5903_s12 + $0x258] sm:$0xff]  ;;  %866 = vst [vmem:[#allocation2 + $0x240] sm:$0xff] %v738_v29  ;;  %v614_v39 = vld [vmem:[%s5903_s12 + $0x260] sm:$0xff]  ;;  %v615_v41 = vld [vmem:[%s5903_s12 + $0x268] sm:$0xff] }
 0x104   : > { %v741_v38 = vadd.f32 %v613_v36, %v485_v35  ;;  %867 = vst [vmem:[#allocation2 + $0x248] sm:$0xff] %v739_v33  ;;  %868 = vst [vmem:[#allocation2 + $0x250] sm:$0xff] %v740_v34  ;;  %v742_v42 = vadd.f32 %v614_v39, %v486_v37  ;;  %v743_v43 = vadd.f32 %v615_v41, %v487_v40  ;;  %v488_v44 = vld [vmem:[#allocation2 + $0x270] sm:$0xff]  ;;  %v489_v46 = vld [vmem:[#allocation2 + $0x278] sm:$0xff] }
 0x105   : > { %v616_v45 = vld [vmem:[%s5903_s12 + $0x270] sm:$0xff]  ;;  %v617_v48 = vld [vmem:[%s5903_s12 + $0x278] sm:$0xff]  ;;  %v618_v50 = vld [vmem:[%s5903_s12 + $0x280] sm:$0xff] }
 0x106   : > { %869 = vst [vmem:[#allocation2 + $0x258] sm:$0xff] %v741_v38  ;;  %v744_v47 = vadd.f32 %v616_v45, %v488_v44  ;;  %v490_v49 = vld [vmem:[#allocation2 + $0x280] sm:$0xff]  ;;  %870 = vst [vmem:[#allocation2 + $0x260] sm:$0xff] %v742_v42  ;;  %v745_v51 = vadd.f32 %v617_v48, %v489_v46  ;;  %v491_v53 = vld [vmem:[#allocation2 + $0x288] sm:$0xff] }
 0x107   : > { %871 = vst [vmem:[#allocation2 + $0x268] sm:$0xff] %v743_v43  ;;  %v746_v52 = vadd.f32 %v618_v50, %v490_v49  ;;  %v619_v54 = vld [vmem:[%s5903_s12 + $0x288] sm:$0xff]  ;;  %v620_v57 = vld [vmem:[%s5903_s12 + $0x290] sm:$0xff]  ;;  %v621_v59 = vld [vmem:[%s5903_s12 + $0x298] sm:$0xff] }
 0x108   : > { %v492_v55 = vld [vmem:[#allocation2 + $0x290] sm:$0xff]  ;;  %872 = vst [vmem:[#allocation2 + $0x270] sm:$0xff] %v744_v47  ;;  %v747_v56 = vadd.f32 %v619_v54, %v491_v53  ;;  %v493_v58 = vld [vmem:[#allocation2 + $0x298] sm:$0xff]  ;;  %873 = vst [vmem:[#allocation2 + $0x278] sm:$0xff] %v745_v51 }
 0x109   : > { %874 = vst [vmem:[#allocation2 + $0x280] sm:$0xff] %v746_v52  ;;  %v748_v60 = vadd.f32 %v620_v57, %v492_v55  ;;  %v749_v61 = vadd.f32 %v621_v59, %v493_v58  ;;  %v494_v62 = vld [vmem:[#allocation2 + $0x2a0] sm:$0xff]  ;;  %v495_v0 = vld [vmem:[#allocation2 + $0x2a8] sm:$0xff]  ;;  %v496_v3 = vld [vmem:[#allocation2 + $0x2b0] sm:$0xff] }
 0x10a   : > { %v622_v63 = vld [vmem:[%s5903_s12 + $0x2a0] sm:$0xff]  ;;  %875 = vst [vmem:[#allocation2 + $0x288] sm:$0xff] %v747_v56  ;;  %v623_v2 = vld [vmem:[%s5903_s12 + $0x2a8] sm:$0xff]  ;;  %v624_v4 = vld [vmem:[%s5903_s12 + $0x2b0] sm:$0xff] }
 0x10b   : > { %v750_v1 = vadd.f32 %v622_v63, %v494_v62  ;;  %876 = vst [vmem:[#allocation2 + $0x290] sm:$0xff] %v748_v60  ;;  %877 = vst [vmem:[#allocation2 + $0x298] sm:$0xff] %v749_v61  ;;  %v751_v5 = vadd.f32 %v623_v2, %v495_v0  ;;  %v752_v6 = vadd.f32 %v624_v4, %v496_v3  ;;  %v497_v7 = vld [vmem:[#allocation2 + $0x2b8] sm:$0xff]  ;;  %v498_v9 = vld [vmem:[#allocation2 + $0x2c0] sm:$0xff] }
 0x10c   : > { %v625_v8 = vld [vmem:[%s5903_s12 + $0x2b8] sm:$0xff]  ;;  %v626_v11 = vld [vmem:[%s5903_s12 + $0x2c0] sm:$0xff]  ;;  %v627_v13 = vld [vmem:[%s5903_s12 + $0x2c8] sm:$0xff] }
 0x10d   : > { %878 = vst [vmem:[#allocation2 + $0x2a0] sm:$0xff] %v750_v1  ;;  %v753_v10 = vadd.f32 %v625_v8, %v497_v7  ;;  %v499_v12 = vld [vmem:[#allocation2 + $0x2c8] sm:$0xff]  ;;  %879 = vst [vmem:[#allocation2 + $0x2a8] sm:$0xff] %v751_v5  ;;  %v754_v14 = vadd.f32 %v626_v11, %v498_v9  ;;  %v500_v16 = vld [vmem:[#allocation2 + $0x2d0] sm:$0xff] }
 0x10e   : > { %880 = vst [vmem:[#allocation2 + $0x2b0] sm:$0xff] %v752_v6  ;;  %v755_v15 = vadd.f32 %v627_v13, %v499_v12  ;;  %v628_v17 = vld [vmem:[%s5903_s12 + $0x2d0] sm:$0xff]  ;;  %v629_v20 = vld [vmem:[%s5903_s12 + $0x2d8] sm:$0xff]  ;;  %v630_v22 = vld [vmem:[%s5903_s12 + $0x2e0] sm:$0xff] }
 0x10f   : > { %v501_v18 = vld [vmem:[#allocation2 + $0x2d8] sm:$0xff]  ;;  %881 = vst [vmem:[#allocation2 + $0x2b8] sm:$0xff] %v753_v10  ;;  %v756_v19 = vadd.f32 %v628_v17, %v500_v16  ;;  %v502_v21 = vld [vmem:[#allocation2 + $0x2e0] sm:$0xff]  ;;  %882 = vst [vmem:[#allocation2 + $0x2c0] sm:$0xff] %v754_v14 }
 0x110   : > { %883 = vst [vmem:[#allocation2 + $0x2c8] sm:$0xff] %v755_v15  ;;  %v757_v23 = vadd.f32 %v629_v20, %v501_v18  ;;  %v758_v24 = vadd.f32 %v630_v22, %v502_v21  ;;  %v503_v25 = vld [vmem:[#allocation2 + $0x2e8] sm:$0xff]  ;;  %v504_v27 = vld [vmem:[#allocation2 + $0x2f0] sm:$0xff]  ;;  %v505_v30 = vld [vmem:[#allocation2 + $0x2f8] sm:$0xff] }
 0x111   : > { %v631_v26 = vld [vmem:[%s5903_s12 + $0x2e8] sm:$0xff]  ;;  %884 = vst [vmem:[#allocation2 + $0x2d0] sm:$0xff] %v756_v19  ;;  %v632_v29 = vld [vmem:[%s5903_s12 + $0x2f0] sm:$0xff]  ;;  %v633_v31 = vld [vmem:[%s5903_s12 + $0x2f8] sm:$0xff] }
 0x112   : > { %v759_v28 = vadd.f32 %v631_v26, %v503_v25  ;;  %885 = vst [vmem:[#allocation2 + $0x2d8] sm:$0xff] %v757_v23  ;;  %886 = vst [vmem:[#allocation2 + $0x2e0] sm:$0xff] %v758_v24  ;;  %v760_v32 = vadd.f32 %v632_v29, %v504_v27  ;;  %v761_v33 = vadd.f32 %v633_v31, %v505_v30  ;;  %v506_v34 = vld [vmem:[#allocation2 + $0x300] sm:$0xff]  ;;  %v507_v36 = vld [vmem:[#allocation2 + $0x308] sm:$0xff] }
 0x113   : > { %v634_v35 = vld [vmem:[%s5903_s12 + $0x300] sm:$0xff]  ;;  %v635_v38 = vld [vmem:[%s5903_s12 + $0x308] sm:$0xff]  ;;  %v636_v40 = vld [vmem:[%s5903_s12 + $0x310] sm:$0xff] }
 0x114   : > { %887 = vst [vmem:[#allocation2 + $0x2e8] sm:$0xff] %v759_v28  ;;  %v762_v37 = vadd.f32 %v634_v35, %v506_v34  ;;  %v508_v39 = vld [vmem:[#allocation2 + $0x310] sm:$0xff]  ;;  %888 = vst [vmem:[#allocation2 + $0x2f0] sm:$0xff] %v760_v32  ;;  %v763_v41 = vadd.f32 %v635_v38, %v507_v36  ;;  %v509_v43 = vld [vmem:[#allocation2 + $0x318] sm:$0xff] }
 0x115   : > { %889 = vst [vmem:[#allocation2 + $0x2f8] sm:$0xff] %v761_v33  ;;  %v764_v42 = vadd.f32 %v636_v40, %v508_v39  ;;  %v637_v44 = vld [vmem:[%s5903_s12 + $0x318] sm:$0xff]  ;;  %v638_v47 = vld [vmem:[%s5903_s12 + $0x320] sm:$0xff]  ;;  %v639_v49 = vld [vmem:[%s5903_s12 + $0x328] sm:$0xff] }
 0x116   : > { %v510_v45 = vld [vmem:[#allocation2 + $0x320] sm:$0xff]  ;;  %890 = vst [vmem:[#allocation2 + $0x300] sm:$0xff] %v762_v37  ;;  %v765_v46 = vadd.f32 %v637_v44, %v509_v43  ;;  %v511_v48 = vld [vmem:[#allocation2 + $0x328] sm:$0xff]  ;;  %891 = vst [vmem:[#allocation2 + $0x308] sm:$0xff] %v763_v41 }
 0x117   : > { %892 = vst [vmem:[#allocation2 + $0x310] sm:$0xff] %v764_v42  ;;  %v766_v50 = vadd.f32 %v638_v47, %v510_v45  ;;  %v767_v51 = vadd.f32 %v639_v49, %v511_v48  ;;  %v512_v52 = vld [vmem:[#allocation2 + $0x330] sm:$0xff]  ;;  %v513_v54 = vld [vmem:[#allocation2 + $0x338] sm:$0xff]  ;;  %v514_v57 = vld [vmem:[#allocation2 + $0x340] sm:$0xff] }
 0x118   : > { %v640_v53 = vld [vmem:[%s5903_s12 + $0x330] sm:$0xff]  ;;  %893 = vst [vmem:[#allocation2 + $0x318] sm:$0xff] %v765_v46  ;;  %v641_v56 = vld [vmem:[%s5903_s12 + $0x338] sm:$0xff]  ;;  %v642_v58 = vld [vmem:[%s5903_s12 + $0x340] sm:$0xff] }
 0x119   : > { %v768_v55 = vadd.f32 %v640_v53, %v512_v52  ;;  %894 = vst [vmem:[#allocation2 + $0x320] sm:$0xff] %v766_v50  ;;  %895 = vst [vmem:[#allocation2 + $0x328] sm:$0xff] %v767_v51  ;;  %v769_v59 = vadd.f32 %v641_v56, %v513_v54  ;;  %v770_v60 = vadd.f32 %v642_v58, %v514_v57  ;;  %v515_v61 = vld [vmem:[#allocation2 + $0x348] sm:$0xff]  ;;  %v516_v63 = vld [vmem:[#allocation2 + $0x350] sm:$0xff] }
 0x11a   : > { %v643_v62 = vld [vmem:[%s5903_s12 + $0x348] sm:$0xff]  ;;  %v644_v1 = vld [vmem:[%s5903_s12 + $0x350] sm:$0xff]  ;;  %v645_v3 = vld [vmem:[%s5903_s12 + $0x358] sm:$0xff] }
 0x11b   : > { %896 = vst [vmem:[#allocation2 + $0x330] sm:$0xff] %v768_v55  ;;  %v771_v0 = vadd.f32 %v643_v62, %v515_v61  ;;  %v517_v2 = vld [vmem:[#allocation2 + $0x358] sm:$0xff]  ;;  %897 = vst [vmem:[#allocation2 + $0x338] sm:$0xff] %v769_v59  ;;  %v772_v4 = vadd.f32 %v644_v1, %v516_v63  ;;  %v518_v6 = vld [vmem:[#allocation2 + $0x360] sm:$0xff] }
 0x11c   : > { %898 = vst [vmem:[#allocation2 + $0x340] sm:$0xff] %v770_v60  ;;  %v773_v5 = vadd.f32 %v645_v3, %v517_v2  ;;  %v646_v7 = vld [vmem:[%s5903_s12 + $0x360] sm:$0xff]  ;;  %v647_v10 = vld [vmem:[%s5903_s12 + $0x368] sm:$0xff]  ;;  %v648_v12 = vld [vmem:[%s5903_s12 + $0x370] sm:$0xff] }
 0x11d   : > { %v519_v8 = vld [vmem:[#allocation2 + $0x368] sm:$0xff]  ;;  %899 = vst [vmem:[#allocation2 + $0x348] sm:$0xff] %v771_v0  ;;  %v774_v9 = vadd.f32 %v646_v7, %v518_v6  ;;  %v520_v11 = vld [vmem:[#allocation2 + $0x370] sm:$0xff]  ;;  %900 = vst [vmem:[#allocation2 + $0x350] sm:$0xff] %v772_v4 }
 0x11e   : > { %901 = vst [vmem:[#allocation2 + $0x358] sm:$0xff] %v773_v5  ;;  %v775_v13 = vadd.f32 %v647_v10, %v519_v8  ;;  %v776_v14 = vadd.f32 %v648_v12, %v520_v11  ;;  %v521_v15 = vld [vmem:[#allocation2 + $0x378] sm:$0xff]  ;;  %v522_v17 = vld [vmem:[#allocation2 + $0x380] sm:$0xff]  ;;  %v523_v20 = vld [vmem:[#allocation2 + $0x388] sm:$0xff] }
 0x11f   : > { %v649_v16 = vld [vmem:[%s5903_s12 + $0x378] sm:$0xff]  ;;  %902 = vst [vmem:[#allocation2 + $0x360] sm:$0xff] %v774_v9  ;;  %v650_v19 = vld [vmem:[%s5903_s12 + $0x380] sm:$0xff]  ;;  %v651_v21 = vld [vmem:[%s5903_s12 + $0x388] sm:$0xff] }
 0x120   : > { %v777_v18 = vadd.f32 %v649_v16, %v521_v15  ;;  %903 = vst [vmem:[#allocation2 + $0x368] sm:$0xff] %v775_v13  ;;  %904 = vst [vmem:[#allocation2 + $0x370] sm:$0xff] %v776_v14  ;;  %v778_v22 = vadd.f32 %v650_v19, %v522_v17  ;;  %v779_v23 = vadd.f32 %v651_v21, %v523_v20  ;;  %v524_v24 = vld [vmem:[#allocation2 + $0x390] sm:$0xff]  ;;  %v525_v26 = vld [vmem:[#allocation2 + $0x398] sm:$0xff] }
 0x121   : > { %v652_v25 = vld [vmem:[%s5903_s12 + $0x390] sm:$0xff]  ;;  %v653_v28 = vld [vmem:[%s5903_s12 + $0x398] sm:$0xff]  ;;  %v654_v30 = vld [vmem:[%s5903_s12 + $0x3a0] sm:$0xff] }
 0x122   : > { %905 = vst [vmem:[#allocation2 + $0x378] sm:$0xff] %v777_v18  ;;  %v780_v27 = vadd.f32 %v652_v25, %v524_v24  ;;  %v526_v29 = vld [vmem:[#allocation2 + $0x3a0] sm:$0xff]  ;;  %906 = vst [vmem:[#allocation2 + $0x380] sm:$0xff] %v778_v22  ;;  %v781_v31 = vadd.f32 %v653_v28, %v525_v26  ;;  %v527_v33 = vld [vmem:[#allocation2 + $0x3a8] sm:$0xff] }
 0x123   : > { %907 = vst [vmem:[#allocation2 + $0x388] sm:$0xff] %v779_v23  ;;  %v782_v32 = vadd.f32 %v654_v30, %v526_v29  ;;  %v655_v34 = vld [vmem:[%s5903_s12 + $0x3a8] sm:$0xff]  ;;  %v656_v37 = vld [vmem:[%s5903_s12 + $0x3b0] sm:$0xff]  ;;  %v657_v39 = vld [vmem:[%s5903_s12 + $0x3b8] sm:$0xff] }
 0x124   : > { %v528_v35 = vld [vmem:[#allocation2 + $0x3b0] sm:$0xff]  ;;  %908 = vst [vmem:[#allocation2 + $0x390] sm:$0xff] %v780_v27  ;;  %v783_v36 = vadd.f32 %v655_v34, %v527_v33  ;;  %v529_v38 = vld [vmem:[#allocation2 + $0x3b8] sm:$0xff]  ;;  %909 = vst [vmem:[#allocation2 + $0x398] sm:$0xff] %v781_v31 }
 0x125   : > { %910 = vst [vmem:[#allocation2 + $0x3a0] sm:$0xff] %v782_v32  ;;  %v784_v40 = vadd.f32 %v656_v37, %v528_v35  ;;  %v785_v41 = vadd.f32 %v657_v39, %v529_v38  ;;  %v530_v42 = vld [vmem:[#allocation2 + $0x3c0] sm:$0xff]  ;;  %v531_v44 = vld [vmem:[#allocation2 + $0x3c8] sm:$0xff]  ;;  %v532_v47 = vld [vmem:[#allocation2 + $0x3d0] sm:$0xff] }
 0x126   : > { %v658_v43 = vld [vmem:[%s5903_s12 + $0x3c0] sm:$0xff]  ;;  %911 = vst [vmem:[#allocation2 + $0x3a8] sm:$0xff] %v783_v36  ;;  %v659_v46 = vld [vmem:[%s5903_s12 + $0x3c8] sm:$0xff]  ;;  %v660_v48 = vld [vmem:[%s5903_s12 + $0x3d0] sm:$0xff] }
 0x127   : > { %v786_v45 = vadd.f32 %v658_v43, %v530_v42  ;;  %912 = vst [vmem:[#allocation2 + $0x3b0] sm:$0xff] %v784_v40  ;;  %913 = vst [vmem:[#allocation2 + $0x3b8] sm:$0xff] %v785_v41  ;;  %v787_v49 = vadd.f32 %v659_v46, %v531_v44  ;;  %v788_v50 = vadd.f32 %v660_v48, %v532_v47  ;;  %v533_v51 = vld [vmem:[#allocation2 + $0x3d8] sm:$0xff]  ;;  %v534_v53 = vld [vmem:[#allocation2 + $0x3e0] sm:$0xff] }
 0x128   : > { %v661_v52 = vld [vmem:[%s5903_s12 + $0x3d8] sm:$0xff]  ;;  %v662_v55 = vld [vmem:[%s5903_s12 + $0x3e0] sm:$0xff]  ;;  %v663_v57 = vld [vmem:[%s5903_s12 + $0x3e8] sm:$0xff] }
 0x129   : > { %914 = vst [vmem:[#allocation2 + $0x3c0] sm:$0xff] %v786_v45  ;;  %v789_v54 = vadd.f32 %v661_v52, %v533_v51  ;;  %v535_v56 = vld [vmem:[#allocation2 + $0x3e8] sm:$0xff]  ;;  %915 = vst [vmem:[#allocation2 + $0x3c8] sm:$0xff] %v787_v49  ;;  %v790_v58 = vadd.f32 %v662_v55, %v534_v53  ;;  %v536_v60 = vld [vmem:[#allocation2 + $0x3f0] sm:$0xff] }
 0x12a   : > { %916 = vst [vmem:[#allocation2 + $0x3d0] sm:$0xff] %v788_v50  ;;  %v791_v59 = vadd.f32 %v663_v57, %v535_v56  ;;  %v664_v61 = vld [vmem:[%s5903_s12 + $0x3f0] sm:$0xff]  ;;  %v665_v0 = vld [vmem:[%s5903_s12 + $0x3f8] sm:$0xff] }
 0x12b   : > { %v537_v62 = vld [vmem:[#allocation2 + $0x3f8] sm:$0xff]  ;;  %917 = vst [vmem:[#allocation2 + $0x3d8] sm:$0xff] %v789_v54  ;;  %v792_v63 = vadd.f32 %v664_v61, %v536_v60  ;;  %918 = vst [vmem:[#allocation2 + $0x3e0] sm:$0xff] %v790_v58 }
 0x12c   : > { %919 = vst [vmem:[#allocation2 + $0x3e8] sm:$0xff] %v791_v59  ;;  %v793_v1 = vadd.f32 %v665_v0, %v537_v62 }
 0x12d   : > { %920 = vst [vmem:[#allocation2 + $0x3f0] sm:$0xff] %v792_v63 }
 0x12e   : > { %921 = vst [vmem:[#allocation2 + $0x3f8] sm:$0xff] %v793_v1 }
 0x12f PF: > { %p4559_p11 = scmp.ne.s32.totalorder %s5750_s4, 1 }
 0x130   : > { %v1182_v2 = vlaneseq (!%p4559_p11)  ;;  %s4560_s29 = sshll.u32 (!%p4559_p11), %s5750_s4, 7  ;;  %v1134_v4 = vld [vmem:[%s5903_s12 + $0x280] sm:$0xff] (!%p4559_p11)  ;;  %v1135_v10 = vld [vmem:[%s5903_s12 + $0x288] sm:$0xff] (!%p4559_p11)  ;;  %v1072_v20 = vld [vmem:[%s5903_s12 + $0x90] sm:$0xff] (!%p4559_p11)  ;;  %vm2775_vm1 = vcmask (!%p4559_p11), 130112   ;;  %vm2782_vm2 = vcmask (!%p4559_p11), 195712  }
 0x131   : > { %925 = sbr.rel (%p4559_p11) target bundleno = 1291 (0x50b), region = 68  ;;  %v1185_v3 = vstv (!%p4559_p11), %s4560_s29  ;;  %v1070_v6 = vld [vmem:[%s5903_s12 + $0x80] sm:$0xff] (!%p4559_p11)  ;;  %v1071_v13 = vld [vmem:[%s5903_s12 + $0x88] sm:$0xff] (!%p4559_p11)  ;;  %v1136_v23 = vld [vmem:[%s5903_s12 + $0x290] sm:$0xff] (!%p4559_p11)  ;;  %vm2789_vm3 = vcmask (!%p4559_p11), 261312   ;;  %vm2796_vm4 = vcmask (!%p4559_p11), 326912  }
 0x132   : > { %v6180_v5 = vand.u32 (!%p4559_p11), 127, %v1182_v2  ;;  %v1006_v7 = vld [vmem:[#allocation2 + $0x280] sm:$0xff] (!%p4559_p11)  ;;  %v1007_v9 = vld [vmem:[#allocation2 + $0x288] sm:$0xff] (!%p4559_p11)  ;;  %v944_v21 = vld [vmem:[#allocation2 + $0x90] sm:$0xff] (!%p4559_p11)  ;;  %vm2803_vm5 = vcmask (!%p4559_p11), 392512   ;;  %vm2810_vm6 = vcmask (!%p4559_p11), 458112  }
 0x133   : > { %v942_v8 = vld [vmem:[#allocation2 + $0x80] sm:$0xff] (!%p4559_p11)  ;;  %v943_v11 = vld [vmem:[#allocation2 + $0x88] sm:$0xff] (!%p4559_p11)  ;;  %v1008_v22 = vld [vmem:[#allocation2 + $0x290] sm:$0xff] (!%p4559_p11)  ;;  %vm2817_vm7 = vcmask (!%p4559_p11), 523712   ;;  %vm2824_vm8 = vcmask (!%p4559_p11), 589312   ;;  %vm2831_vm9 = vcmask (!%p4559_p11), 654912  }
 0x134   : > { %v6185_v12 = vadd.s32 (!%p4559_p11), %v1185_v3, %v6180_v5  ;;  %v1055_v14 = vld [vmem:[%s5903_s12 + $0x8] sm:$0xff] (!%p4559_p11)  ;;  %v1054_v15 = vld [vmem:[%s5903_s12] sm:$0xff] (!%p4559_p11)  ;;  %v945_v30 = vld [vmem:[#allocation2 + $0x98] sm:$0xff] (!%p4559_p11)  ;;  %vm2838_vm10 = vcmask (!%p4559_p11), 720512   ;;  %vm2845_vm11 = vcmask (!%p4559_p11), 786112   ;;  %vm2852_vm12 = vcmask (!%p4559_p11), 851712  }
 0x135   : > { %v927_v16 = vld [vmem:[#allocation2 + $0x8] sm:$0xff] (!%p4559_p11)  ;;  %v926_v17 = vld [vmem:[#allocation2] sm:$0xff] (!%p4559_p11)  ;;  %v928_v36 = vld [vmem:[#allocation2 + $0x10] sm:$0xff] (!%p4559_p11)  ;;  %vm2859_vm13 = vcmask (!%p4559_p11), 917312   ;;  %vm2866_vm14 = vcmask (!%p4559_p11), 982912   ;;  %vm2873_vm15 = vcmask (!%p4559_p11), 1048512  }
 0x136   : > { %v990_v18 = vld [vmem:[#allocation2 + $0x200] sm:$0xff] (!%p4559_p11)  ;;  %vm1187_vm0 = vcmp.lt.s32.totalorder (!%p4559_p11), %v6185_v12, 192  ;;  %v1119_v24 = vld [vmem:[%s5903_s12 + $0x208] sm:$0xff] (!%p4559_p11)  ;;  %v1056_v37 = vld [vmem:[%s5903_s12 + $0x10] sm:$0xff] (!%p4559_p11) }
 0x137   : > { %v1118_v19 = vld [vmem:[%s5903_s12 + $0x200] sm:$0xff] (!%p4559_p11)  ;;  %v1268_v25 = vsel (!%p4559_p11), %vm1187_vm0, %v1134_v4, 0.0  ;;  %v1204_v26 = vsel (!%p4559_p11), %vm1187_vm0, %v1070_v6, 0.0  ;;  %v1269_v27 = vsel (!%p4559_p11), %vm1187_vm0, %v1135_v10, 0.0  ;;  %v1205_v28 = vsel (!%p4559_p11), %vm1187_vm0, %v1071_v13, 0.0  ;;  %v1073_v31 = vld [vmem:[%s5903_s12 + $0x98] sm:$0xff] (!%p4559_p11) }
 0x138   : > { %v991_v29 = vld [vmem:[#allocation2 + $0x208] sm:$0xff]  ;;  %v1396_v32 = vadd.f32 %v1268_v25, %v1006_v7  ;;  %v1332_v33 = vadd.f32 %v1204_v26, %v942_v8  ;;  %v1397_v34 = vadd.f32 %v1269_v27, %v1007_v9  ;;  %v1333_v35 = vadd.f32 %v1205_v28, %v943_v11  ;;  %v1009_v38 = vld [vmem:[#allocation2 + $0x298] sm:$0xff]  ;;  %v992_v44 = vld [vmem:[#allocation2 + $0x210] sm:$0xff] }
 0x139   : > { %v1137_v39 = vld [vmem:[%s5903_s12 + $0x298] sm:$0xff]  ;;  %v1189_v40 = vsel %vm1187_vm0, %v1055_v14, 0.0  ;;  %v1188_v41 = vsel %vm1187_vm0, %v1054_v15, 0.0  ;;  %v1252_v42 = vsel %vm1187_vm0, %v1118_v19, 0.0  ;;  %v1206_v43 = vsel %vm1187_vm0, %v1072_v20, 0.0  ;;  %v1120_v45 = vld [vmem:[%s5903_s12 + $0x210] sm:$0xff] }
 0x13a   : > { %1524 = vst [vmem:[#allocation2 + $0x280] sm:$0xff] %v1396_v32  ;;  %1860 = vadd.xlane.f32.xlu1 %v1396_v32  ;;  %1460 = vst [vmem:[#allocation2 + $0x80] sm:$0xff] %v1332_v33  ;;  %1732 = vadd.xlane.f32.xlu0 %v1332_v33  ;;  %v6215_v46 = vadd.f32 %v1189_v40, %v927_v16  ;;  %v6217_v47 = vadd.f32 %v1188_v41, %v926_v17  ;;  %v1270_v49 = vsel %vm1187_vm0, %v1136_v23, 0.0  ;;  %v946_v50 = vld [vmem:[#allocation2 + $0xa0] sm:$0xff]  ;;  %v929_v52 = vld [vmem:[#allocation2 + $0x18] sm:$0xff] }
 0x13b   : > { %1525 = vst [vmem:[#allocation2 + $0x288] sm:$0xff] %v1397_v34  ;;  %1461 = vst [vmem:[#allocation2 + $0x88] sm:$0xff] %v1333_v35  ;;  %v6219_v48 = vadd.f32 %v1252_v42, %v990_v18  ;;  %v1074_v51 = vld [vmem:[%s5903_s12 + $0xa0] sm:$0xff]  ;;  %v6224_v53 = vadd.f32 %v1206_v43, %v944_v21  ;;  %v6226_v54 = vadd.f32 %v1270_v49, %v1008_v22  ;;  %v1253_v55 = vsel %vm1187_vm0, %v1119_v24, 0.0  ;;  %v1057_v57 = vld [vmem:[%s5903_s12 + $0x18] sm:$0xff] }
 0x13c   : > { %v1207_v56 = vsel %vm1187_vm0, %v1073_v31, 0.0  ;;  %v1010_v58 = vld [vmem:[#allocation2 + $0x2a0] sm:$0xff]  ;;  %1445 = vst [vmem:[#allocation2 + $0x8] sm:$0xff] %v6215_v46  ;;  %1444 = vst [vmem:[#allocation2] sm:$0xff] %v6217_v47  ;;  %v6237_v60 = vadd.f32 %v1253_v55, %v991_v29  ;;  %v1190_v62 = vsel %vm1187_vm0, %v1056_v37, 0.0  ;;  %v1271_v63 = vsel %vm1187_vm0, %v1137_v39, 0.0 }
 0x13d   : > { %v1138_v59 = vld [vmem:[%s5903_s12 + $0x2a0] sm:$0xff]  ;;  %1508 = vst [vmem:[#allocation2 + $0x200] sm:$0xff] %v6219_v48  ;;  %v6239_v61 = vadd.f32 %v1207_v56, %v945_v30  ;;  %v993_v0 = vld [vmem:[#allocation2 + $0x218] sm:$0xff]  ;;  %1462 = vst [vmem:[#allocation2 + $0x90] sm:$0xff] %v6224_v53  ;;  %v6248_v4 = vadd.f32 %v1190_v62, %v928_v36  ;;  %v6250_v6 = vadd.f32 %v1271_v63, %v1009_v38  ;;  %v1254_v7 = vsel %vm1187_vm0, %v1120_v45, 0.0 }
 0x13e   : > { %v1121_v1 = vld [vmem:[%s5903_s12 + $0x218] sm:$0xff]  ;;  %v947_v3 = vld [vmem:[#allocation2 + $0xa8] sm:$0xff]  ;;  %1526 = vst [vmem:[#allocation2 + $0x290] sm:$0xff] %v6226_v54  ;;  %v1208_v8 = vsel %vm1187_vm0, %v1074_v51, 0.0  ;;  %1862 = vadd.xlane.f32.xlu1 %v1397_v34  ;;  %1734 = vadd.xlane.f32.xlu0 %v1333_v35  ;;  %1509 = vst [vmem:[#allocation2 + $0x208] sm:$0xff] %v6237_v60  ;;  %v6260_v13 = vadd.f32 %v1254_v7, %v992_v44  ;;  %v1191_v15 = vsel %vm1187_vm0, %v1057_v57, 0.0 }
 0x13f   : > { %v1075_v9 = vld [vmem:[%s5903_s12 + $0xa8] sm:$0xff]  ;;  %v930_v10 = vld [vmem:[#allocation2 + $0x20] sm:$0xff]  ;;  %1463 = vst [vmem:[#allocation2 + $0x98] sm:$0xff] %v6239_v61  ;;  %v6262_v14 = vadd.f32 %v1208_v8, %v946_v50  ;;  %v1272_v16 = vsel %vm1187_vm0, %v1138_v59, 0.0  ;;  %1446 = vst [vmem:[#allocation2 + $0x10] sm:$0xff] %v6248_v4  ;;  %v6271_v20 = vadd.f32 %v1191_v15, %v929_v52  ;;  %v1255_v22 = vsel %vm1187_vm0, %v1121_v1, 0.0 }
 0x140   : > { %v1058_v11 = vld [vmem:[%s5903_s12 + $0x20] sm:$0xff]  ;;  %v1139_v18 = vld [vmem:[%s5903_s12 + $0x2a8] sm:$0xff]  ;;  %1527 = vst [vmem:[#allocation2 + $0x298] sm:$0xff] %v6250_v6  ;;  %v6273_v21 = vadd.f32 %v1272_v16, %v1010_v58  ;;  %v1209_v23 = vsel %vm1187_vm0, %v1075_v9, 0.0  ;;  %v1076_v26 = vld [vmem:[%s5903_s12 + $0xb0] sm:$0xff]  ;;  %v6283_v27 = vadd.f32 %v1255_v22, %v993_v0 }
 0x141   : > { %v1011_v17 = vld [vmem:[#allocation2 + $0x2a8] sm:$0xff]  ;;  %v994_v19 = vld [vmem:[#allocation2 + $0x220] sm:$0xff]  ;;  %v948_v25 = vld [vmem:[#allocation2 + $0xb0] sm:$0xff]  ;;  %1510 = vst [vmem:[#allocation2 + $0x210] sm:$0xff] %v6260_v13  ;;  %v6285_v28 = vadd.f32 %v1209_v23, %v947_v3  ;;  %v1192_v29 = vsel %vm1187_vm0, %v1058_v11, 0.0  ;;  %v1273_v30 = vsel %vm1187_vm0, %v1139_v18, 0.0 }
 0x142   : > { %v1122_v24 = vld [vmem:[%s5903_s12 + $0x220] sm:$0xff]  ;;  %1464 = vst [vmem:[#allocation2 + $0xa0] sm:$0xff] %v6262_v14  ;;  %v1059_v32 = vld [vmem:[%s5903_s12 + $0x28] sm:$0xff]  ;;  %1447 = vst [vmem:[#allocation2 + $0x18] sm:$0xff] %v6271_v20  ;;  %v6294_v34 = vadd.f32 %v1192_v29, %v930_v10  ;;  %v6296_v35 = vadd.f32 %v1273_v30, %v1011_v17  ;;  %v1210_v37 = vsel %vm1187_vm0, %v1076_v26, 0.0  ;;  %1702 = vadd.xlane.f32.xlu1 %v6215_v46  ;;  %1700 = vadd.xlane.f32.xlu0 %v6217_v47 }
 0x143   : > { %v931_v31 = vld [vmem:[#allocation2 + $0x28] sm:$0xff]  ;;  %v1012_v33 = vld [vmem:[#allocation2 + $0x2b0] sm:$0xff]  ;;  %1528 = vst [vmem:[#allocation2 + $0x2a0] sm:$0xff] %v6273_v21  ;;  %v1256_v36 = vsel %vm1187_vm0, %v1122_v24, 0.0  ;;  %1511 = vst [vmem:[#allocation2 + $0x218] sm:$0xff] %v6283_v27  ;;  %v6310_v42 = vadd.f32 %v1210_v37, %v948_v25  ;;  %v1193_v43 = vsel %vm1187_vm0, %v1059_v32, 0.0 }
 0x144   : > { %v1140_v38 = vld [vmem:[%s5903_s12 + $0x2b0] sm:$0xff]  ;;  %v995_v39 = vld [vmem:[#allocation2 + $0x228] sm:$0xff]  ;;  %1465 = vst [vmem:[#allocation2 + $0xa8] sm:$0xff] %v6285_v28  ;;  %v6308_v41 = vadd.f32 %v1256_v36, %v994_v19  ;;  %v1077_v46 = vld [vmem:[%s5903_s12 + $0xb8] sm:$0xff]  ;;  %v6319_v47 = vadd.f32 %v1193_v43, %v931_v31 }
 0x145   : > { %v1123_v40 = vld [vmem:[%s5903_s12 + $0x228] sm:$0xff]  ;;  %v1274_v44 = vsel %vm1187_vm0, %v1140_v38, 0.0  ;;  %v949_v45 = vld [vmem:[#allocation2 + $0xb8] sm:$0xff]  ;;  %1448 = vst [vmem:[#allocation2 + $0x20] sm:$0xff] %v6294_v34  ;;  %1529 = vst [vmem:[#allocation2 + $0x2a8] sm:$0xff] %v6296_v35  ;;  %v1211_v52 = vsel %vm1187_vm0, %v1077_v46, 0.0 }
 0x146   : > { %v932_v49 = vld [vmem:[#allocation2 + $0x30] sm:$0xff]  ;;  %v6321_v50 = vadd.f32 %v1274_v44, %v1012_v33  ;;  %v1257_v51 = vsel %vm1187_vm0, %v1123_v40, 0.0  ;;  %v1013_v56 = vld [vmem:[#allocation2 + $0x2b8] sm:$0xff]  ;;  %1512 = vst [vmem:[#allocation2 + $0x220] sm:$0xff] %v6308_v41  ;;  %1466 = vst [vmem:[#allocation2 + $0xb0] sm:$0xff] %v6310_v42  ;;  %v6333_v59 = vadd.f32 %v1211_v52, %v949_v45  ;;  %1828 = vadd.xlane.f32.xlu1 %v6219_v48  ;;  %1736 = vadd.xlane.f32.xlu0 %v6224_v53 }
 0x147   : > { %v1060_v55 = vld [vmem:[%s5903_s12 + $0x30] sm:$0xff]  ;;  %v1141_v57 = vld [vmem:[%s5903_s12 + $0x2b8] sm:$0xff]  ;;  %v6331_v58 = vadd.f32 %v1257_v51, %v995_v39  ;;  %1449 = vst [vmem:[#allocation2 + $0x28] sm:$0xff] %v6319_v47  ;;  %v1078_v10 = vld [vmem:[%s5903_s12 + $0xc0] sm:$0xff] }
 0x148   : > { %v1194_v62 = vsel %vm1187_vm0, %v1060_v55, 0.0  ;;  %v1275_v63 = vsel %vm1187_vm0, %v1141_v57, 0.0  ;;  %v996_v0 = vld [vmem:[#allocation2 + $0x230] sm:$0xff]  ;;  %v950_v3 = vld [vmem:[#allocation2 + $0xc0] sm:$0xff]  ;;  %1530 = vst [vmem:[#allocation2 + $0x2b0] sm:$0xff] %v6321_v50  ;;  %v933_v11 = vld [vmem:[#allocation2 + $0x38] sm:$0xff] }
 0x149   : > { %v1124_v1 = vld [vmem:[%s5903_s12 + $0x230] sm:$0xff]  ;;  %v6342_v7 = vadd.f32 %v1194_v62, %v932_v49  ;;  %v6344_v8 = vadd.f32 %v1275_v63, %v1013_v56  ;;  %v1061_v15 = vld [vmem:[%s5903_s12 + $0x38] sm:$0xff]  ;;  %1513 = vst [vmem:[#allocation2 + $0x228] sm:$0xff] %v6331_v58  ;;  %1467 = vst [vmem:[#allocation2 + $0xb8] sm:$0xff] %v6333_v59  ;;  %v1212_v17 = vsel %vm1187_vm0, %v1078_v10, 0.0 }
 0x14a   : > { %v1258_v9 = vsel %vm1187_vm0, %v1124_v1, 0.0  ;;  %v1195_v18 = vsel %vm1187_vm0, %v1061_v15, 0.0  ;;  %v1014_v19 = vld [vmem:[#allocation2 + $0x2c0] sm:$0xff]  ;;  %v997_v23 = vld [vmem:[#allocation2 + $0x238] sm:$0xff]  ;;  %v6363_v48 = vadd.f32 %v1212_v17, %v950_v3  ;;  %v951_v26 = vld [vmem:[#allocation2 + $0xc8] sm:$0xff]  ;;  %1864 = vadd.xlane.f32.xlu1 %v6226_v54  ;;  %1830 = vadd.xlane.f32.xlu0 %v6237_v60 }
 0x14b   : > { %v6354_v16 = vadd.f32 %v1258_v9, %v996_v0  ;;  %v1142_v22 = vld [vmem:[%s5903_s12 + $0x2c0] sm:$0xff]  ;;  %1450 = vst [vmem:[#allocation2 + $0x30] sm:$0xff] %v6342_v7  ;;  %1531 = vst [vmem:[#allocation2 + $0x2b8] sm:$0xff] %v6344_v8  ;;  %v6365_v53 = vadd.f32 %v1195_v18, %v933_v11  ;;  %v1125_v25 = vld [vmem:[%s5903_s12 + $0x238] sm:$0xff] }
 0x14c   : > { %v1276_v24 = vsel %vm1187_vm0, %v1142_v22, 0.0  ;;  %v1079_v29 = vld [vmem:[%s5903_s12 + $0xc8] sm:$0xff]  ;;  %v1259_v31 = vsel %vm1187_vm0, %v1125_v25, 0.0  ;;  %v934_v33 = vld [vmem:[#allocation2 + $0x40] sm:$0xff]  ;;  %1468 = vst [vmem:[#allocation2 + $0xc0] sm:$0xff] %v6363_v48  ;;  %v1080_v55 = vld [vmem:[%s5903_s12 + $0xd0] sm:$0xff] }
 0x14d   : > { %1514 = vst [vmem:[#allocation2 + $0x230] sm:$0xff] %v6354_v16  ;;  %v6372_v30 = vadd.f32 %v1276_v24, %v1014_v19  ;;  %v1213_v32 = vsel %vm1187_vm0, %v1079_v29, 0.0  ;;  %v1062_v36 = vld [vmem:[%s5903_s12 + $0x40] sm:$0xff]  ;;  %1451 = vst [vmem:[#allocation2 + $0x38] sm:$0xff] %v6365_v53  ;;  %v6381_v38 = vadd.f32 %v1259_v31, %v997_v23  ;;  %v1143_v43 = vld [vmem:[%s5903_s12 + $0x2c8] sm:$0xff]  ;;  %v1214_v57 = vsel %vm1187_vm0, %v1080_v55, 0.0 }
 0x14e   : > { %v1015_v37 = vld [vmem:[#allocation2 + $0x2c8] sm:$0xff]  ;;  %v6383_v39 = vadd.f32 %v1213_v32, %v951_v26  ;;  %v1196_v40 = vsel %vm1187_vm0, %v1062_v36, 0.0  ;;  %v998_v44 = vld [vmem:[#allocation2 + $0x240] sm:$0xff]  ;;  %v1277_v49 = vsel %vm1187_vm0, %v1143_v43, 0.0  ;;  %v952_v52 = vld [vmem:[#allocation2 + $0xd0] sm:$0xff]  ;;  %1738 = vadd.xlane.f32.xlu1 %v6239_v61  ;;  %1704 = vadd.xlane.f32.xlu0 %v6248_v4 }
 0x14f   : > { %v1126_v45 = vld [vmem:[%s5903_s12 + $0x240] sm:$0xff]  ;;  %1532 = vst [vmem:[#allocation2 + $0x2c0] sm:$0xff] %v6372_v30  ;;  %v6392_v46 = vadd.f32 %v1196_v40, %v934_v33  ;;  %1515 = vst [vmem:[#allocation2 + $0x238] sm:$0xff] %v6381_v38  ;;  %v6401_v54 = vadd.f32 %v1277_v49, %v1015_v37  ;;  %v1063_v62 = vld [vmem:[%s5903_s12 + $0x48] sm:$0xff]  ;;  %v6410_v1 = vadd.f32 %v1214_v57, %v952_v52 }
 0x150   : > { %v1260_v51 = vsel %vm1187_vm0, %v1126_v45, 0.0  ;;  %v935_v56 = vld [vmem:[#allocation2 + $0x48] sm:$0xff]  ;;  %1469 = vst [vmem:[#allocation2 + $0xc8] sm:$0xff] %v6383_v39  ;;  %v1016_v63 = vld [vmem:[#allocation2 + $0x2d0] sm:$0xff]  ;;  %v1197_v3 = vsel %vm1187_vm0, %v1063_v62, 0.0  ;;  %v953_v15 = vld [vmem:[#allocation2 + $0xd8] sm:$0xff] }
 0x151   : > { %v6403_v60 = vadd.f32 %v1260_v51, %v998_v44  ;;  %v1144_v0 = vld [vmem:[%s5903_s12 + $0x2d0] sm:$0xff]  ;;  %1452 = vst [vmem:[#allocation2 + $0x40] sm:$0xff] %v6392_v46  ;;  %v999_v10 = vld [vmem:[#allocation2 + $0x248] sm:$0xff]  ;;  %1533 = vst [vmem:[#allocation2 + $0x2c8] sm:$0xff] %v6401_v54  ;;  %v6419_v17 = vadd.f32 %v1197_v3, %v935_v56 }
 0x152   : > { %v1278_v9 = vsel %vm1187_vm0, %v1144_v0, 0.0  ;;  %v1127_v11 = vld [vmem:[%s5903_s12 + $0x248] sm:$0xff]  ;;  %v1081_v22 = vld [vmem:[%s5903_s12 + $0xd8] sm:$0xff]  ;;  %v1064_v24 = vld [vmem:[%s5903_s12 + $0x50] sm:$0xff]  ;;  %1470 = vst [vmem:[#allocation2 + $0xd0] sm:$0xff] %v6410_v1  ;;  %1866 = vadd.xlane.f32.xlu1 %v6250_v6  ;;  %1832 = vadd.xlane.f32.xlu0 %v6260_v13 }
 0x153   : > { %1516 = vst [vmem:[#allocation2 + $0x240] sm:$0xff] %v6403_v60  ;;  %v6421_v18 = vadd.f32 %v1278_v9, %v1016_v63  ;;  %v1261_v19 = vsel %vm1187_vm0, %v1127_v11, 0.0  ;;  %v936_v23 = vld [vmem:[#allocation2 + $0x50] sm:$0xff]  ;;  %v1215_v26 = vsel %vm1187_vm0, %v1081_v22, 0.0  ;;  %v1198_v29 = vsel %vm1187_vm0, %v1064_v24, 0.0  ;;  %v1017_v31 = vld [vmem:[#allocation2 + $0x2d8] sm:$0xff] }
 0x154   : > { %v6430_v25 = vadd.f32 %v1261_v19, %v999_v10  ;;  %v1145_v32 = vld [vmem:[%s5903_s12 + $0x2d8] sm:$0xff]  ;;  %v1000_v33 = vld [vmem:[#allocation2 + $0x250] sm:$0xff]  ;;  %1453 = vst [vmem:[#allocation2 + $0x48] sm:$0xff] %v6419_v17  ;;  %v6439_v61 = vadd.f32 %v1215_v26, %v953_v15  ;;  %v6441_v4 = vadd.f32 %v1198_v29, %v936_v23  ;;  %v1082_v43 = vld [vmem:[%s5903_s12 + $0xe0] sm:$0xff] }
 0x155   : > { %1534 = vst [vmem:[#allocation2 + $0x2d0] sm:$0xff] %v6421_v18  ;;  %v1279_v36 = vsel %vm1187_vm0, %v1145_v32, 0.0  ;;  %v1128_v37 = vld [vmem:[%s5903_s12 + $0x250] sm:$0xff]  ;;  %v954_v40 = vld [vmem:[#allocation2 + $0xe0] sm:$0xff]  ;;  %v1216_v49 = vsel %vm1187_vm0, %v1082_v43, 0.0  ;;  %v955_v15 = vld [vmem:[#allocation2 + $0xe8] sm:$0xff] }
 0x156   : > { %1517 = vst [vmem:[#allocation2 + $0x248] sm:$0xff] %v6430_v25  ;;  %v6448_v44 = vadd.f32 %v1279_v36, %v1017_v31  ;;  %v1262_v45 = vsel %vm1187_vm0, %v1128_v37, 0.0  ;;  %v937_v51 = vld [vmem:[#allocation2 + $0x58] sm:$0xff]  ;;  %v1018_v55 = vld [vmem:[#allocation2 + $0x2e0] sm:$0xff]  ;;  %1471 = vst [vmem:[#allocation2 + $0xd8] sm:$0xff] %v6439_v61  ;;  %v6459_v57 = vadd.f32 %v1216_v49, %v954_v40  ;;  %1740 = vadd.xlane.f32.xlu1 %v6262_v14  ;;  %1706 = vadd.xlane.f32.xlu0 %v6271_v20 }
 0x157   : > { %v1065_v52 = vld [vmem:[%s5903_s12 + $0x58] sm:$0xff]  ;;  %1454 = vst [vmem:[#allocation2 + $0x50] sm:$0xff] %v6441_v4  ;;  %v6457_v56 = vadd.f32 %v1262_v45, %v1000_v33  ;;  %v1146_v63 = vld [vmem:[%s5903_s12 + $0x2e0] sm:$0xff]  ;;  %v1083_v19 = vld [vmem:[%s5903_s12 + $0xe8] sm:$0xff] }
 0x158   : > { %v1199_v62 = vsel %vm1187_vm0, %v1065_v52, 0.0  ;;  %v1001_v0 = vld [vmem:[#allocation2 + $0x258] sm:$0xff]  ;;  %1535 = vst [vmem:[#allocation2 + $0x2d8] sm:$0xff] %v6448_v44  ;;  %v1280_v10 = vsel %vm1187_vm0, %v1146_v63, 0.0  ;;  %v938_v22 = vld [vmem:[#allocation2 + $0x60] sm:$0xff]  ;;  %1472 = vst [vmem:[#allocation2 + $0xe0] sm:$0xff] %v6459_v57 }
 0x159   : > { %v1129_v3 = vld [vmem:[%s5903_s12 + $0x258] sm:$0xff]  ;;  %v6468_v9 = vadd.f32 %v1199_v62, %v937_v51  ;;  %1518 = vst [vmem:[#allocation2 + $0x250] sm:$0xff] %v6457_v56  ;;  %v6477_v6 = vadd.f32 %v1280_v10, %v1018_v55  ;;  %v1217_v23 = vsel %vm1187_vm0, %v1083_v19, 0.0  ;;  %v1066_v24 = vld [vmem:[%s5903_s12 + $0x60] sm:$0xff]  ;;  %v1147_v29 = vld [vmem:[%s5903_s12 + $0x2e8] sm:$0xff] }
 0x15a   : > { %v1263_v11 = vsel %vm1187_vm0, %v1129_v3, 0.0  ;;  %v1019_v26 = vld [vmem:[#allocation2 + $0x2e8] sm:$0xff]  ;;  %v6486_v31 = vadd.f32 %v1217_v23, %v955_v15  ;;  %v1200_v32 = vsel %vm1187_vm0, %v1066_v24, 0.0  ;;  %v1281_v33 = vsel %vm1187_vm0, %v1147_v29, 0.0  ;;  %v1002_v36 = vld [vmem:[#allocation2 + $0x260] sm:$0xff]  ;;  %v956_v40 = vld [vmem:[#allocation2 + $0xf0] sm:$0xff]  ;;  %1868 = vadd.xlane.f32.xlu1 %v6273_v21  ;;  %1834 = vadd.xlane.f32.xlu0 %v6283_v27 }
 0x15b   : > { %v6479_v13 = vadd.f32 %v1263_v11, %v1001_v0  ;;  %1455 = vst [vmem:[#allocation2 + $0x58] sm:$0xff] %v6468_v9  ;;  %v1130_v37 = vld [vmem:[%s5903_s12 + $0x260] sm:$0xff]  ;;  %1536 = vst [vmem:[#allocation2 + $0x2e0] sm:$0xff] %v6477_v6  ;;  %v6495_v43 = vadd.f32 %v1200_v32, %v938_v22  ;;  %v6497_v45 = vadd.f32 %v1281_v33, %v1019_v26  ;;  %v1084_v51 = vld [vmem:[%s5903_s12 + $0xf0] sm:$0xff] }
 0x15c   : > { %v1264_v49 = vsel %vm1187_vm0, %v1130_v37, 0.0  ;;  %v939_v52 = vld [vmem:[#allocation2 + $0x68] sm:$0xff]  ;;  %1473 = vst [vmem:[#allocation2 + $0xe8] sm:$0xff] %v6486_v31  ;;  %v1218_v63 = vsel %vm1187_vm0, %v1084_v51, 0.0  ;;  %v1020_v3 = vld [vmem:[#allocation2 + $0x2f0] sm:$0xff]  ;;  %v957_v22 = vld [vmem:[#allocation2 + $0xf8] sm:$0xff] }
 0x15d   : > { %1519 = vst [vmem:[#allocation2 + $0x258] sm:$0xff] %v6479_v13  ;;  %v1067_v55 = vld [vmem:[%s5903_s12 + $0x68] sm:$0xff]  ;;  %v6506_v62 = vadd.f32 %v1264_v49, %v1002_v36  ;;  %v1148_v10 = vld [vmem:[%s5903_s12 + $0x2f0] sm:$0xff]  ;;  %1456 = vst [vmem:[#allocation2 + $0x60] sm:$0xff] %v6495_v43  ;;  %v6515_v14 = vadd.f32 %v1218_v63, %v956_v40 }
 0x15e   : > { %v1201_v0 = vsel %vm1187_vm0, %v1067_v55, 0.0  ;;  %v1003_v11 = vld [vmem:[#allocation2 + $0x268] sm:$0xff]  ;;  %1537 = vst [vmem:[#allocation2 + $0x2e8] sm:$0xff] %v6497_v45  ;;  %v1282_v15 = vsel %vm1187_vm0, %v1148_v10, 0.0  ;;  %v1085_v23 = vld [vmem:[%s5903_s12 + $0xf8] sm:$0xff]  ;;  %v940_v32 = vld [vmem:[#allocation2 + $0x70] sm:$0xff]  ;;  %1742 = vadd.xlane.f32.xlu1 %v6285_v28  ;;  %1708 = vadd.xlane.f32.xlu0 %v6294_v34 }
 0x15f   : > { %v6517_v20 = vadd.f32 %v1201_v0, %v939_v52  ;;  %v1131_v19 = vld [vmem:[%s5903_s12 + $0x268] sm:$0xff]  ;;  %1520 = vst [vmem:[#allocation2 + $0x260] sm:$0xff] %v6506_v62  ;;  %v6524_v24 = vadd.f32 %v1282_v15, %v1020_v3  ;;  %v1219_v29 = vsel %vm1187_vm0, %v1085_v23, 0.0  ;;  %v1068_v33 = vld [vmem:[%s5903_s12 + $0x70] sm:$0xff]  ;;  %1474 = vst [vmem:[#allocation2 + $0xf0] sm:$0xff] %v6515_v14 }
 0x160   : > { %v1265_v26 = vsel %vm1187_vm0, %v1131_v19, 0.0  ;;  %v1021_v36 = vld [vmem:[#allocation2 + $0x2f8] sm:$0xff]  ;;  %v6535_v40 = vadd.f32 %v1219_v29, %v957_v22  ;;  %v1202_v49 = vsel %vm1187_vm0, %v1068_v33, 0.0  ;;  %v1004_v52 = vld [vmem:[#allocation2 + $0x270] sm:$0xff]  ;;  %v975_v23 = vld [vmem:[#allocation2 + $0x188] sm:$0xff] }
 0x161   : > { %1457 = vst [vmem:[#allocation2 + $0x68] sm:$0xff] %v6517_v20  ;;  %v6533_v37 = vadd.f32 %v1265_v26, %v1003_v11  ;;  %v1149_v51 = vld [vmem:[%s5903_s12 + $0x2f8] sm:$0xff]  ;;  %v1132_v55 = vld [vmem:[%s5903_s12 + $0x270] sm:$0xff]  ;;  %1538 = vst [vmem:[#allocation2 + $0x2f0] sm:$0xff] %v6524_v24  ;;  %v6544_v63 = vadd.f32 %v1202_v49, %v940_v32 }
 0x162   : > { %v1283_v0 = vsel %vm1187_vm0, %v1149_v51, 0.0  ;;  %v1266_v3 = vsel %vm1187_vm0, %v1132_v55, 0.0  ;;  %v1005_v10 = vld [vmem:[#allocation2 + $0x278] sm:$0xff]  ;;  %1475 = vst [vmem:[#allocation2 + $0xf8] sm:$0xff] %v6535_v40  ;;  %v1103_v26 = vld [vmem:[%s5903_s12 + $0x188] sm:$0xff]  ;;  %v974_v49 = vld [vmem:[#allocation2 + $0x180] sm:$0xff]  ;;  %1870 = vadd.xlane.f32.xlu1 %v6296_v35  ;;  %1836 = vadd.xlane.f32.xlu0 %v6308_v41 }
 0x163   : > { %v1133_v11 = vld [vmem:[%s5903_s12 + $0x278] sm:$0xff]  ;;  %1521 = vst [vmem:[#allocation2 + $0x268] sm:$0xff] %v6533_v37  ;;  %v1411_v21 = vadd.f32 %v1283_v0, %v1021_v36  ;;  %v1394_v27 = vadd.f32 %v1266_v3, %v1004_v52  ;;  %1458 = vst [vmem:[#allocation2 + $0x70] sm:$0xff] %v6544_v63  ;;  %v1237_v33 = vsel %vm1187_vm0, %v1103_v26, 0.0  ;;  %v1102_v36 = vld [vmem:[%s5903_s12 + $0x180] sm:$0xff] }
 0x164   : > { %v941_v15 = vld [vmem:[#allocation2 + $0x78] sm:$0xff]  ;;  %v1267_v19 = vsel %vm1187_vm0, %v1133_v11, 0.0  ;;  %v1039_v51 = vld [vmem:[#allocation2 + $0x388] sm:$0xff]  ;;  %v1365_v55 = vadd.f32 %v1237_v33, %v975_v23  ;;  %v1236_v0 = vsel %vm1187_vm0, %v1102_v36, 0.0  ;;  %v1038_v11 = vld [vmem:[#allocation2 + $0x380] sm:$0xff] }
 0x165   : > { %v1069_v22 = vld [vmem:[%s5903_s12 + $0x78] sm:$0xff]  ;;  %v1395_v29 = vadd.f32 %v1267_v19, %v1005_v10  ;;  %1539 = vst [vmem:[#allocation2 + $0x2f8] sm:$0xff] %v1411_v21  ;;  %1522 = vst [vmem:[#allocation2 + $0x270] sm:$0xff] %v1394_v27  ;;  %v1167_v3 = vld [vmem:[%s5903_s12 + $0x388] sm:$0xff]  ;;  %v1364_v19 = vadd.f32 %v1236_v0, %v974_v49 }
 0x166   : > { %v1203_v32 = vsel %vm1187_vm0, %v1069_v22, 0.0  ;;  %v1166_v10 = vld [vmem:[%s5903_s12 + $0x380] sm:$0xff]  ;;  %v1301_v21 = vsel %vm1187_vm0, %v1167_v3, 0.0  ;;  %v1087_v22 = vld [vmem:[%s5903_s12 + $0x108] sm:$0xff]  ;;  %1493 = vst [vmem:[#allocation2 + $0x188] sm:$0xff] %v1365_v55  ;;  %v1104_v55 = vld [vmem:[%s5903_s12 + $0x190] sm:$0xff]  ;;  %1744 = vadd.xlane.f32.xlu1 %v6310_v42  ;;  %1710 = vadd.xlane.f32.xlu0 %v6319_v47 }
 0x167   : > { %v1331_v52 = vadd.f32 %v1203_v32, %v941_v15  ;;  %1523 = vst [vmem:[#allocation2 + $0x278] sm:$0xff] %v1395_v29  ;;  %v1300_v15 = vsel %vm1187_vm0, %v1166_v10, 0.0  ;;  %v959_v27 = vld [vmem:[#allocation2 + $0x108] sm:$0xff]  ;;  %v958_v23 = vld [vmem:[#allocation2 + $0x100] sm:$0xff]  ;;  %v1429_v26 = vadd.f32 %v1301_v21, %v1039_v51  ;;  %v1221_v28 = vsel %vm1187_vm0, %v1087_v22, 0.0  ;;  %1492 = vst [vmem:[#allocation2 + $0x180] sm:$0xff] %v1364_v19 }
 0x168   : > { %v1428_v32 = vadd.f32 %v1300_v15, %v1038_v11  ;;  %v1086_v34 = vld [vmem:[%s5903_s12 + $0x100] sm:$0xff]  ;;  %v1349_v49 = vadd.f32 %v1221_v28, %v959_v27  ;;  %v1040_v51 = vld [vmem:[#allocation2 + $0x390] sm:$0xff]  ;;  %v1238_v10 = vsel %vm1187_vm0, %v1104_v55, 0.0  ;;  %v1153_v47 = vld [vmem:[%s5903_s12 + $0x318] sm:$0xff] }
 0x169   : > { %1459 = vst [vmem:[#allocation2 + $0x78] sm:$0xff] %v1331_v52  ;;  %v1022_v29 = vld [vmem:[#allocation2 + $0x300] sm:$0xff]  ;;  %v1220_v36 = vsel %vm1187_vm0, %v1086_v34, 0.0  ;;  %v976_v52 = vld [vmem:[#allocation2 + $0x190] sm:$0xff]  ;;  %1557 = vst [vmem:[#allocation2 + $0x388] sm:$0xff] %v1429_v26 }
 0x16a   : > { %v1150_v33 = vld [vmem:[%s5903_s12 + $0x300] sm:$0xff]  ;;  %1556 = vst [vmem:[#allocation2 + $0x380] sm:$0xff] %v1428_v32  ;;  %v1348_v3 = vadd.f32 %v1220_v36, %v958_v23  ;;  %v1168_v21 = vld [vmem:[%s5903_s12 + $0x390] sm:$0xff]  ;;  %v1151_v15 = vld [vmem:[%s5903_s12 + $0x308] sm:$0xff]  ;;  %v1366_v27 = vadd.f32 %v1238_v10, %v976_v52  ;;  %1872 = vadd.xlane.f32.xlu1 %v6321_v50  ;;  %1838 = vadd.xlane.f32.xlu0 %v6331_v58 }
 0x16b   : > { %v1284_v0 = vsel %vm1187_vm0, %v1150_v33, 0.0  ;;  %v1023_v19 = vld [vmem:[#allocation2 + $0x308] sm:$0xff]  ;;  %1477 = vst [vmem:[#allocation2 + $0x108] sm:$0xff] %v1349_v49  ;;  %v1302_v22 = vsel %vm1187_vm0, %v1168_v21, 0.0  ;;  %v1285_v23 = vsel %vm1187_vm0, %v1151_v15, 0.0  ;;  %v977_v26 = vld [vmem:[#allocation2 + $0x198] sm:$0xff] }
 0x16c   : > { %v1412_v11 = vadd.f32 %v1284_v0, %v1022_v29  ;;  %v1105_v32 = vld [vmem:[%s5903_s12 + $0x198] sm:$0xff]  ;;  %v960_v28 = vld [vmem:[#allocation2 + $0x110] sm:$0xff]  ;;  %1476 = vst [vmem:[#allocation2 + $0x100] sm:$0xff] %v1348_v3  ;;  %v1430_v34 = vadd.f32 %v1302_v22, %v1040_v51  ;;  %v1413_v29 = vadd.f32 %v1285_v23, %v1023_v19  ;;  %1494 = vst [vmem:[#allocation2 + $0x190] sm:$0xff] %v1366_v27 }
 0x16d   : > { %v1239_v35 = vsel %vm1187_vm0, %v1105_v32, 0.0  ;;  %v1088_v41 = vld [vmem:[%s5903_s12 + $0x110] sm:$0xff]  ;;  %v1169_v49 = vld [vmem:[%s5903_s12 + $0x398] sm:$0xff]  ;;  %v1106_v19 = vld [vmem:[%s5903_s12 + $0x1a0] sm:$0xff] }
 0x16e   : > { %1540 = vst [vmem:[#allocation2 + $0x300] sm:$0xff] %v1412_v11  ;;  %v1041_v33 = vld [vmem:[#allocation2 + $0x398] sm:$0xff]  ;;  %v1367_v36 = vadd.f32 %v1239_v35, %v977_v26  ;;  %v1222_v0 = vsel %vm1187_vm0, %v1088_v41, 0.0  ;;  %v1303_v52 = vsel %vm1187_vm0, %v1169_v49, 0.0  ;;  %v1024_v55 = vld [vmem:[#allocation2 + $0x310] sm:$0xff]  ;;  %v978_v51 = vld [vmem:[#allocation2 + $0x1a0] sm:$0xff]  ;;  %1746 = vadd.xlane.f32.xlu1 %v6333_v59  ;;  %1712 = vadd.xlane.f32.xlu0 %v6342_v7 }
 0x16f   : > { %v1152_v3 = vld [vmem:[%s5903_s12 + $0x310] sm:$0xff]  ;;  %1558 = vst [vmem:[#allocation2 + $0x390] sm:$0xff] %v1430_v34  ;;  %1541 = vst [vmem:[#allocation2 + $0x308] sm:$0xff] %v1413_v29  ;;  %v1350_v11 = vadd.f32 %v1222_v0, %v960_v28  ;;  %v1431_v10 = vadd.f32 %v1303_v52, %v1041_v33  ;;  %v1089_v27 = vld [vmem:[%s5903_s12 + $0x118] sm:$0xff]  ;;  %v1240_v23 = vsel %vm1187_vm0, %v1106_v19, 0.0 }
 0x170   : > { %v1286_v21 = vsel %vm1187_vm0, %v1152_v3, 0.0  ;;  %v961_v15 = vld [vmem:[#allocation2 + $0x118] sm:$0xff]  ;;  %1495 = vst [vmem:[#allocation2 + $0x198] sm:$0xff] %v1367_v36  ;;  %v1223_v26 = vsel %vm1187_vm0, %v1089_v27, 0.0  ;;  %v1042_v32 = vld [vmem:[#allocation2 + $0x3a0] sm:$0xff]  ;;  %v1368_v29 = vadd.f32 %v1240_v23, %v978_v51  ;;  %v979_v41 = vld [vmem:[#allocation2 + $0x1a8] sm:$0xff] }
 0x171   : > { %v1414_v22 = vadd.f32 %v1286_v21, %v1024_v55  ;;  %v1170_v28 = vld [vmem:[%s5903_s12 + $0x3a0] sm:$0xff]  ;;  %v1025_v34 = vld [vmem:[#allocation2 + $0x318] sm:$0xff]  ;;  %1478 = vst [vmem:[#allocation2 + $0x110] sm:$0xff] %v1350_v11  ;;  %1559 = vst [vmem:[#allocation2 + $0x398] sm:$0xff] %v1431_v10  ;;  %v1351_v35 = vadd.f32 %v1223_v26, %v961_v15  ;;  %v1287_v36 = vsel %vm1187_vm0, %v1153_v47, 0.0 }
 0x172   : > { %v1304_v42 = vsel %vm1187_vm0, %v1170_v28, 0.0  ;;  %v1107_v33 = vld [vmem:[%s5903_s12 + $0x1a8] sm:$0xff]  ;;  %v962_v52 = vld [vmem:[#allocation2 + $0x120] sm:$0xff]  ;;  %1496 = vst [vmem:[#allocation2 + $0x1a0] sm:$0xff] %v1368_v29  ;;  %v1415_v51 = vadd.f32 %v1287_v36, %v1025_v34  ;;  %1874 = vadd.xlane.f32.xlu1 %v6344_v8  ;;  %1840 = vadd.xlane.f32.xlu0 %v6354_v16 }
 0x173   : > { %1542 = vst [vmem:[#allocation2 + $0x310] sm:$0xff] %v1414_v22  ;;  %v1432_v49 = vadd.f32 %v1304_v42, %v1042_v32  ;;  %v1241_v0 = vsel %vm1187_vm0, %v1107_v33, 0.0  ;;  %v1090_v55 = vld [vmem:[%s5903_s12 + $0x120] sm:$0xff]  ;;  %1479 = vst [vmem:[#allocation2 + $0x118] sm:$0xff] %v1351_v35  ;;  %v1171_v21 = vld [vmem:[%s5903_s12 + $0x3a8] sm:$0xff] }
 0x174   : > { %v1043_v3 = vld [vmem:[#allocation2 + $0x3a8] sm:$0xff]  ;;  %v1369_v11 = vadd.f32 %v1241_v0, %v979_v41  ;;  %v1224_v10 = vsel %vm1187_vm0, %v1090_v55, 0.0  ;;  %v1026_v19 = vld [vmem:[#allocation2 + $0x320] sm:$0xff]  ;;  %v1305_v22 = vsel %vm1187_vm0, %v1171_v21, 0.0  ;;  %v980_v26 = vld [vmem:[#allocation2 + $0x1b0] sm:$0xff]  ;;  %1543 = vst [vmem:[#allocation2 + $0x318] sm:$0xff] %v1415_v51 }
 0x175   : > { %v1154_v15 = vld [vmem:[%s5903_s12 + $0x320] sm:$0xff]  ;;  %1560 = vst [vmem:[#allocation2 + $0x3a0] sm:$0xff] %v1432_v49  ;;  %v1352_v27 = vadd.f32 %v1224_v10, %v962_v52  ;;  %v1108_v32 = vld [vmem:[%s5903_s12 + $0x1b0] sm:$0xff]  ;;  %v1433_v34 = vadd.f32 %v1305_v22, %v1043_v3  ;;  %v1091_v58 = vld [vmem:[%s5903_s12 + $0x128] sm:$0xff] }
 0x176   : > { %v1288_v23 = vsel %vm1187_vm0, %v1154_v15, 0.0  ;;  %v963_v28 = vld [vmem:[#allocation2 + $0x128] sm:$0xff]  ;;  %1497 = vst [vmem:[#allocation2 + $0x1a8] sm:$0xff] %v1369_v11  ;;  %v1242_v50 = vsel %vm1187_vm0, %v1108_v32, 0.0  ;;  %v1044_v35 = vld [vmem:[#allocation2 + $0x3b0] sm:$0xff]  ;;  %v1225_v41 = vsel %vm1187_vm0, %v1091_v58, 0.0  ;;  %1748 = vadd.xlane.f32.xlu1 %v6363_v48  ;;  %1714 = vadd.xlane.f32.xlu0 %v6365_v53 }
 0x177   : > { %v1416_v29 = vadd.f32 %v1288_v23, %v1026_v19  ;;  %v1172_v42 = vld [vmem:[%s5903_s12 + $0x3b0] sm:$0xff]  ;;  %1480 = vst [vmem:[#allocation2 + $0x120] sm:$0xff] %v1352_v27  ;;  %v1370_v47 = vadd.f32 %v1242_v50, %v980_v26  ;;  %v1027_v49 = vld [vmem:[#allocation2 + $0x328] sm:$0xff]  ;;  %1561 = vst [vmem:[#allocation2 + $0x3a8] sm:$0xff] %v1433_v34  ;;  %v1353_v52 = vadd.f32 %v1225_v41, %v963_v28 }
 0x178   : > { %v1306_v33 = vsel %vm1187_vm0, %v1172_v42, 0.0  ;;  %v1155_v36 = vld [vmem:[%s5903_s12 + $0x328] sm:$0xff]  ;;  %v981_v0 = vld [vmem:[#allocation2 + $0x1b8] sm:$0xff]  ;;  %v1110_v50 = vld [vmem:[%s5903_s12 + $0x1c0] sm:$0xff] }
 0x179   : > { %1544 = vst [vmem:[#allocation2 + $0x320] sm:$0xff] %v1416_v29  ;;  %v1434_v55 = vadd.f32 %v1306_v33, %v1044_v35  ;;  %v1289_v3 = vsel %vm1187_vm0, %v1155_v36, 0.0  ;;  %v1109_v51 = vld [vmem:[%s5903_s12 + $0x1b8] sm:$0xff]  ;;  %v964_v11 = vld [vmem:[#allocation2 + $0x130] sm:$0xff]  ;;  %1498 = vst [vmem:[#allocation2 + $0x1b0] sm:$0xff] %v1370_v47  ;;  %v1244_v42 = vsel %vm1187_vm0, %v1110_v50, 0.0 }
 0x17a   : > { %v1092_v10 = vld [vmem:[%s5903_s12 + $0x130] sm:$0xff]  ;;  %v1417_v21 = vadd.f32 %v1289_v3, %v1027_v49  ;;  %v1243_v19 = vsel %vm1187_vm0, %v1109_v51, 0.0  ;;  %v1173_v27 = vld [vmem:[%s5903_s12 + $0x3b8] sm:$0xff]  ;;  %1481 = vst [vmem:[#allocation2 + $0x128] sm:$0xff] %v1353_v52  ;;  %v1174_v8 = vld [vmem:[%s5903_s12 + $0x3c0] sm:$0xff]  ;;  %1876 = vadd.xlane.f32.xlu1 %v6372_v30  ;;  %1842 = vadd.xlane.f32.xlu0 %v6381_v38 }
 0x17b   : > { %v1226_v15 = vsel %vm1187_vm0, %v1092_v10, 0.0  ;;  %v1156_v22 = vld [vmem:[%s5903_s12 + $0x330] sm:$0xff]  ;;  %1562 = vst [vmem:[#allocation2 + $0x3b0] sm:$0xff] %v1434_v55  ;;  %v1371_v23 = vadd.f32 %v1243_v19, %v981_v0  ;;  %v1307_v59 = vsel %vm1187_vm0, %v1173_v27, 0.0  ;;  %v1093_v58 = vld [vmem:[%s5903_s12 + $0x138] sm:$0xff]  ;;  %v1308_v0 = vsel %vm1187_vm0, %v1174_v8, 0.0 }
 0x17c   : > { %v1354_v26 = vadd.f32 %v1226_v15, %v964_v11  ;;  %v1045_v32 = vld [vmem:[#allocation2 + $0x3b8] sm:$0xff]  ;;  %v1028_v7 = vld [vmem:[#allocation2 + $0x330] sm:$0xff]  ;;  %v1290_v28 = vsel %vm1187_vm0, %v1156_v22, 0.0  ;;  %1545 = vst [vmem:[#allocation2 + $0x328] sm:$0xff] %v1417_v21  ;;  %v982_v35 = vld [vmem:[#allocation2 + $0x1c0] sm:$0xff]  ;;  %v1227_v41 = vsel %vm1187_vm0, %v1093_v58, 0.0 }
 0x17d   : > { %v1435_v34 = vadd.f32 %v1307_v59, %v1045_v32  ;;  %v1418_v29 = vadd.f32 %v1290_v28, %v1028_v7  ;;  %1499 = vst [vmem:[#allocation2 + $0x1b8] sm:$0xff] %v1371_v23  ;;  %v965_v47 = vld [vmem:[#allocation2 + $0x138] sm:$0xff]  ;;  %v1372_v33 = vadd.f32 %v1244_v42, %v982_v35  ;;  %v1046_v36 = vld [vmem:[#allocation2 + $0x3c0] sm:$0xff]  ;;  %v1111_v48 = vld [vmem:[%s5903_s12 + $0x1c8] sm:$0xff] }
 0x17e   : > { %1482 = vst [vmem:[#allocation2 + $0x130] sm:$0xff] %v1354_v26  ;;  %v1355_v49 = vadd.f32 %v1227_v41, %v965_v47  ;;  %v1157_v16 = vld [vmem:[%s5903_s12 + $0x338] sm:$0xff]  ;;  %v1436_v3 = vadd.f32 %v1308_v0, %v1046_v36  ;;  %v1094_v53 = vld [vmem:[%s5903_s12 + $0x140] sm:$0xff]  ;;  %v1245_v10 = vsel %vm1187_vm0, %v1111_v48, 0.0  ;;  %1750 = vadd.xlane.f32.xlu1 %v6383_v39  ;;  %1716 = vadd.xlane.f32.xlu0 %v6392_v46  ;;  %v1175_v30 = vld [vmem:[%s5903_s12 + $0x3c8] sm:$0xff] }
 0x17f   : > { %1563 = vst [vmem:[#allocation2 + $0x3b8] sm:$0xff] %v1435_v34  ;;  %1546 = vst [vmem:[#allocation2 + $0x330] sm:$0xff] %v1418_v29  ;;  %v1029_v52 = vld [vmem:[#allocation2 + $0x338] sm:$0xff]  ;;  %v1291_v55 = vsel %vm1187_vm0, %v1157_v16, 0.0  ;;  %v983_v11 = vld [vmem:[#allocation2 + $0x1c8] sm:$0xff]  ;;  %v1228_v19 = vsel %vm1187_vm0, %v1094_v53, 0.0 }
 0x180   : > { %1500 = vst [vmem:[#allocation2 + $0x1c0] sm:$0xff] %v1372_v33  ;;  %1483 = vst [vmem:[#allocation2 + $0x138] sm:$0xff] %v1355_v49  ;;  %v1419_v51 = vadd.f32 %v1291_v55, %v1029_v52  ;;  %v966_v21 = vld [vmem:[#allocation2 + $0x140] sm:$0xff]  ;;  %v1373_v15 = vadd.f32 %v1245_v10, %v983_v11  ;;  %v1047_v22 = vld [vmem:[#allocation2 + $0x3c8] sm:$0xff]  ;;  %v1309_v23 = vsel %vm1187_vm0, %v1175_v30, 0.0 }
 0x181   : > { %1564 = vst [vmem:[#allocation2 + $0x3c0] sm:$0xff] %v1436_v3  ;;  %v1356_v27 = vadd.f32 %v1228_v19, %v966_v21  ;;  %v1158_v38 = vld [vmem:[%s5903_s12 + $0x340] sm:$0xff]  ;;  %v1437_v59 = vadd.f32 %v1309_v23, %v1047_v22  ;;  %v1112_v39 = vld [vmem:[%s5903_s12 + $0x1d0] sm:$0xff]  ;;  %v1095_v46 = vld [vmem:[%s5903_s12 + $0x148] sm:$0xff] }
 0x182   : > { %1547 = vst [vmem:[#allocation2 + $0x338] sm:$0xff] %v1419_v51  ;;  %1501 = vst [vmem:[#allocation2 + $0x1c8] sm:$0xff] %v1373_v15  ;;  %v1030_v26 = vld [vmem:[#allocation2 + $0x340] sm:$0xff]  ;;  %v1292_v32 = vsel %vm1187_vm0, %v1158_v38, 0.0  ;;  %1878 = vadd.xlane.f32.xlu1 %v6401_v54  ;;  %1844 = vadd.xlane.f32.xlu0 %v6403_v60  ;;  %v984_v28 = vld [vmem:[#allocation2 + $0x1d0] sm:$0xff]  ;;  %v1246_v34 = vsel %vm1187_vm0, %v1112_v39, 0.0 }
 0x183   : > { %1484 = vst [vmem:[#allocation2 + $0x140] sm:$0xff] %v1356_v27  ;;  %v1420_v7 = vadd.f32 %v1292_v32, %v1030_v26  ;;  %1565 = vst [vmem:[#allocation2 + $0x3c8] sm:$0xff] %v1437_v59  ;;  %v967_v29 = vld [vmem:[#allocation2 + $0x148] sm:$0xff]  ;;  %v1229_v50 = vsel %vm1187_vm0, %v1095_v46, 0.0  ;;  %v1374_v58 = vadd.f32 %v1246_v34, %v984_v28  ;;  %v1176_v54 = vld [vmem:[%s5903_s12 + $0x3d0] sm:$0xff] }
 0x184   : > { %v1357_v35 = vadd.f32 %v1229_v50, %v967_v29  ;;  %v1159_v60 = vld [vmem:[%s5903_s12 + $0x348] sm:$0xff]  ;;  %v2087_v41 = vld [vmem:[#allocation7 + $0x18] sm:$0xff]  ;;  %v1310_v33 = vsel %vm1187_vm0, %v1176_v54, 0.0  ;;  %v2084_v55 = vld [vmem:[#allocation7] sm:$0xff] }
 0x185   : > { %1548 = vst [vmem:[#allocation2 + $0x340] sm:$0xff] %v1420_v7  ;;  %1502 = vst [vmem:[#allocation2 + $0x1d0] sm:$0xff] %v1374_v58  ;;  %v2085_v42 = vld [vmem:[#allocation7 + $0x8] sm:$0xff]  ;;  %v1293_v49 = vsel %vm1187_vm0, %v1159_v60, 0.0  ;;  %v2095_v16 = vld [vmem:[#allocation7 + $0x58] sm:$0xff] }
 0x186   : > { %1752 = vadd.xlane.f32.xlu1 %v6410_v1  ;;  %1718 = vadd.xlane.f32.xlu0 %v6419_v17  ;;  %1485 = vst [vmem:[#allocation2 + $0x148] sm:$0xff] %v1357_v35  ;;  %v2093_v47 = vld [vmem:[#allocation7 + $0x48] sm:$0xff]  ;;  %v4834_v17 = vpack.c.bf16 %v2095_v16, %v2087_v41  ;;  %v2092_v3 = vld [vmem:[#allocation7 + $0x40] sm:$0xff]  ;;  %v2086_v51 = vld [vmem:[#allocation7 + $0x10] sm:$0xff] }
 0x187   : > { %v4706_v8 = vpack.c.bf16 %v2093_v47, %v2085_v42  ;;  %v1048_v1 = vld [vmem:[#allocation2 + $0x3d0] sm:$0xff]  ;;  %v1031_v36 = vld [vmem:[#allocation2 + $0x348] sm:$0xff]  ;;  %v4708_v48 = vpack.c.bf16 %v2092_v3, %v2084_v55  ;;  %v1113_v11 = vld [vmem:[%s5903_s12 + $0x1d8] sm:$0xff] }
 0x188   : > { %v1438_v0 = vadd.f32 %v1310_v33, %v1048_v1  ;;  %v1421_v52 = vadd.f32 %v1293_v49, %v1031_v36  ;;  %v2094_v53 = vld [vmem:[#allocation7 + $0x50] sm:$0xff]  ;;  %4835 = vmatprep.subr.bf16.mxu1 %v4834_v17  ;;  %v2101_v19 = vld [vmem:[#allocation7 + $0x88] sm:$0xff]  ;;  %v2103_v27 = vld [vmem:[#allocation7 + $0x98] sm:$0xff]  ;;  %v1247_v30 = vsel %vm1187_vm0, %v1113_v11, 0.0 }
 0x189   : > { %v1096_v10 = vld [vmem:[%s5903_s12 + $0x150] sm:$0xff]  ;;  %4707 = vmatprep.subr.bf16.mxu0 %v4706_v8  ;;  %v4836_v21 = vpack.c.bf16 %v2094_v53, %v2086_v51  ;;  %v2109_v15 = vld [vmem:[#allocation7 + $0xc8] sm:$0xff]  ;;  %v2111_v38 = vld [vmem:[#allocation7 + $0xd8] sm:$0xff] }
 0x18a   : > { %1880 = vadd.xlane.f32.xlu1 %v6421_v18  ;;  %1846 = vadd.xlane.f32.xlu0 %v6430_v25  ;;  %1566 = vst [vmem:[#allocation2 + $0x3d0] sm:$0xff] %v1438_v0  ;;  %1549 = vst [vmem:[#allocation2 + $0x348] sm:$0xff] %v1421_v52  ;;  %v1230_v18 = vsel %vm1187_vm0, %v1096_v10, 0.0  ;;  %v4710_v25 = vpack.c.bf16 %v2109_v15, %v2101_v19  ;;  %v985_v22 = vld [vmem:[#allocation2 + $0x1d8] sm:$0xff]  ;;  %v968_v23 = vld [vmem:[#allocation2 + $0x150] sm:$0xff]  ;;  %v4838_v26 = vpack.c.bf16 %v2111_v38, %v2103_v27 }
 0x18b   : > { %4709 = vmatpush1.bf16.msra.mxu0 %v4708_v48  ;;  %4837 = vmatpush1.bf16.msra.mxu1 %v4836_v21  ;;  %v1375_v32 = vadd.f32 %v1247_v30, %v985_v22  ;;  %v1358_v59 = vadd.f32 %v1230_v18, %v968_v23  ;;  %v2100_v7 = vld [vmem:[#allocation7 + $0x80] sm:$0xff]  ;;  %v2102_v46 = vld [vmem:[#allocation7 + $0x90] sm:$0xff]  ;;  %v1177_v29 = vld [vmem:[%s5903_s12 + $0x3d8] sm:$0xff] }
 0x18c   : > { %v2108_v39 = vld [vmem:[#allocation7 + $0xc0] sm:$0xff]  ;;  %v2110_v34 = vld [vmem:[#allocation7 + $0xd0] sm:$0xff]  ;;  %4711 = vmatprep.subr.bf16.mxu0 %v4710_v25  ;;  %4839 = vmatprep.subr.bf16.mxu1 %v4838_v26  ;;  %v2117_v35 = vld [vmem:[#allocation7 + $0x108] sm:$0xff]  ;;  %v1311_v42 = vsel %vm1187_vm0, %v1177_v29, 0.0 }
 0x18d   : > { %v4712_v28 = vpack.c.bf16 %v2108_v39, %v2100_v7  ;;  %v1160_v50 = vld [vmem:[%s5903_s12 + $0x350] sm:$0xff]  ;;  %1503 = vst [vmem:[#allocation2 + $0x1d8] sm:$0xff] %v1375_v32  ;;  %1486 = vst [vmem:[#allocation2 + $0x150] sm:$0xff] %v1358_v59  ;;  %v4840_v58 = vpack.c.bf16 %v2110_v34, %v2102_v46  ;;  %v2125_v54 = vld [vmem:[#allocation7 + $0x148] sm:$0xff] }
 0x18e   : > { %1754 = vadd.xlane.f32.xlu1 %v6439_v61  ;;  %1720 = vadd.xlane.f32.xlu0 %v6441_v4  ;;  %v2119_v60 = vld [vmem:[#allocation7 + $0x118] sm:$0xff]  ;;  %v1294_v61 = vsel %vm1187_vm0, %v1160_v50, 0.0  ;;  %v4714_v4 = vpack.c.bf16 %v2125_v54, %v2117_v35  ;;  %v1032_v33 = vld [vmem:[#allocation2 + $0x350] sm:$0xff]  ;;  %v2116_v1 = vld [vmem:[#allocation7 + $0x100] sm:$0xff] }
 0x18f   : > { %4713 = vmatpush1.bf16.msra.mxu0 %v4712_v28  ;;  %v2127_v47 = vld [vmem:[#allocation7 + $0x158] sm:$0xff]  ;;  %4841 = vmatpush1.bf16.msra.mxu1 %v4840_v58  ;;  %v6725_v16 = vadd.f32 %v1294_v61, %v1032_v33  ;;  %v2124_v36 = vld [vmem:[#allocation7 + $0x140] sm:$0xff]  ;;  %v2118_v17 = vld [vmem:[#allocation7 + $0x110] sm:$0xff] }
 0x190   : > { %v1049_v41 = vld [vmem:[#allocation2 + $0x3d8] sm:$0xff]  ;;  %v4842_v49 = vpack.c.bf16 %v2127_v47, %v2119_v60  ;;  %v4716_v0 = vpack.c.bf16 %v2124_v36, %v2116_v1  ;;  %v1114_v55 = vld [vmem:[%s5903_s12 + $0x1e0] sm:$0xff]  ;;  %4715 = vmatprep.subr.bf16.mxu0 %v4714_v4  ;;  %v2133_v48 = vld [vmem:[#allocation7 + $0x188] sm:$0xff] }
 0x191   : > { %v6723_v8 = vadd.f32 %v1311_v42, %v1049_v41  ;;  %v2126_v52 = vld [vmem:[#allocation7 + $0x150] sm:$0xff]  ;;  %v1097_v3 = vld [vmem:[%s5903_s12 + $0x158] sm:$0xff]  ;;  %1550 = vst [vmem:[#allocation2 + $0x350] sm:$0xff] %v6725_v16  ;;  %v2141_v53 = vld [vmem:[#allocation7 + $0x1c8] sm:$0xff]  ;;  %v1248_v10 = vsel %vm1187_vm0, %v1114_v55, 0.0 }
 0x192   : > { %1882 = vadd.xlane.f32.xlu1 %v6448_v44  ;;  %1848 = vadd.xlane.f32.xlu0 %v6457_v56  ;;  %v4844_v51 = vpack.c.bf16 %v2126_v52, %v2118_v17  ;;  %v2135_v11 = vld [vmem:[#allocation7 + $0x198] sm:$0xff]  ;;  %v1231_v44 = vsel %vm1187_vm0, %v1097_v3, 0.0  ;;  %v4718_v56 = vpack.c.bf16 %v2141_v53, %v2133_v48  ;;  %v2132_v25 = vld [vmem:[#allocation7 + $0x180] sm:$0xff]  ;;  %v2134_v22 = vld [vmem:[#allocation7 + $0x190] sm:$0xff] }
 0x193   : > { %4843 = vmatprep.subr.bf16.mxu1 %v4842_v49  ;;  %1567 = vst [vmem:[#allocation2 + $0x3d8] sm:$0xff] %v6723_v8  ;;  %4717 = vmatpush1.bf16.msra.mxu0 %v4716_v0  ;;  %v2143_v21 = vld [vmem:[#allocation7 + $0x1d8] sm:$0xff]  ;;  %v2140_v38 = vld [vmem:[#allocation7 + $0x1c0] sm:$0xff]  ;;  %v2142_v26 = vld [vmem:[#allocation7 + $0x1d0] sm:$0xff] }
 0x194   : > { %v986_v19 = vld [vmem:[#allocation2 + $0x1e0] sm:$0xff]  ;;  %v969_v15 = vld [vmem:[#allocation2 + $0x158] sm:$0xff]  ;;  %4845 = vmatpush1.bf16.msra.mxu1 %v4844_v51  ;;  %v4846_v27 = vpack.c.bf16 %v2143_v21, %v2135_v11  ;;  %v4720_v23 = vpack.c.bf16 %v2140_v38, %v2132_v25  ;;  %4719 = vmatprep.subr.bf16.mxu0 %v4718_v56  ;;  %v4848_v7 = vpack.c.bf16 %v2142_v26, %v2134_v22  ;;  %v2149_v39 = vld [vmem:[#allocation7 + $0x208] sm:$0xff] }
 0x195   : > { %v6737_v30 = vadd.f32 %v1248_v10, %v986_v19  ;;  %v6739_v18 = vadd.f32 %v1231_v44, %v969_v15  ;;  %v1178_v32 = vld [vmem:[%s5903_s12 + $0x3e0] sm:$0xff]  ;;  %v1161_v59 = vld [vmem:[%s5903_s12 + $0x358] sm:$0xff]  ;;  %v2157_v46 = vld [vmem:[#allocation7 + $0x248] sm:$0xff] }
 0x196   : > { %1756 = vadd.xlane.f32.xlu1 %v6459_v57  ;;  %1722 = vadd.xlane.f32.xlu0 %v6468_v9  ;;  %v2151_v28 = vld [vmem:[#allocation7 + $0x218] sm:$0xff]  ;;  %v1312_v34 = vsel %vm1187_vm0, %v1178_v32, 0.0  ;;  %v1295_v57 = vsel %vm1187_vm0, %v1161_v59, 0.0  ;;  %v4722_v9 = vpack.c.bf16 %v2157_v46, %v2149_v39  ;;  %v2148_v42 = vld [vmem:[#allocation7 + $0x200] sm:$0xff]  ;;  %v2150_v4 = vld [vmem:[#allocation7 + $0x210] sm:$0xff] }
 0x197   : > { %4847 = vmatprep.subr.bf16.mxu1 %v4846_v27  ;;  %1504 = vst [vmem:[#allocation2 + $0x1e0] sm:$0xff] %v6737_v30  ;;  %1487 = vst [vmem:[#allocation2 + $0x158] sm:$0xff] %v6739_v18  ;;  %4721 = vmatpush1.bf16.msra.mxu0 %v4720_v23  ;;  %v2159_v29 = vld [vmem:[#allocation7 + $0x258] sm:$0xff]  ;;  %v2156_v61 = vld [vmem:[#allocation7 + $0x240] sm:$0xff] }
 0x198   : > { %v1050_v50 = vld [vmem:[#allocation2 + $0x3e0] sm:$0xff]  ;;  %v1033_v58 = vld [vmem:[#allocation2 + $0x358] sm:$0xff]  ;;  %4849 = vmatpush1.bf16.msra.mxu1 %v4848_v7  ;;  %v4850_v35 = vpack.c.bf16 %v2159_v29, %v2151_v28  ;;  %v4724_v47 = vpack.c.bf16 %v2156_v61, %v2148_v42  ;;  %v1115_v33 = vld [vmem:[%s5903_s12 + $0x1e8] sm:$0xff]  ;;  %4723 = vmatprep.subr.bf16.mxu0 %v4722_v9 }
 0x199   : > { %v6751_v54 = vadd.f32 %v1312_v34, %v1050_v50  ;;  %v6753_v60 = vadd.f32 %v1295_v57, %v1033_v58  ;;  %v2158_v41 = vld [vmem:[#allocation7 + $0x250] sm:$0xff]  ;;  %v1098_v49 = vld [vmem:[%s5903_s12 + $0x160] sm:$0xff]  ;;  %v2165_v36 = vld [vmem:[#allocation7 + $0x288] sm:$0xff]  ;;  %v1249_v52 = vsel %vm1187_vm0, %v1115_v33, 0.0 }
 0x19a   : > { %1884 = vadd.xlane.f32.xlu1 %v6477_v6  ;;  %1850 = vadd.xlane.f32.xlu0 %v6479_v13  ;;  %v4852_v1 = vpack.c.bf16 %v2158_v41, %v2150_v4  ;;  %v2173_v17 = vld [vmem:[#allocation7 + $0x2c8] sm:$0xff]  ;;  %v2167_v0 = vld [vmem:[#allocation7 + $0x298] sm:$0xff]  ;;  %v1232_v6 = vsel %vm1187_vm0, %v1098_v49, 0.0  ;;  %v2164_v10 = vld [vmem:[#allocation7 + $0x280] sm:$0xff] }
 0x19b   : > { %4851 = vmatprep.subr.bf16.mxu1 %v4850_v35  ;;  %1568 = vst [vmem:[#allocation2 + $0x3e0] sm:$0xff] %v6751_v54  ;;  %1551 = vst [vmem:[#allocation2 + $0x358] sm:$0xff] %v6753_v60  ;;  %4725 = vmatpush1.bf16.msra.mxu0 %v4724_v47  ;;  %v4726_v13 = vpack.c.bf16 %v2173_v17, %v2165_v36  ;;  %v2175_v55 = vld [vmem:[#allocation7 + $0x2d8] sm:$0xff]  ;;  %v987_v3 = vld [vmem:[#allocation2 + $0x1e8] sm:$0xff] }
 0x19c   : > { %v970_v51 = vld [vmem:[#allocation2 + $0x160] sm:$0xff]  ;;  %4853 = vmatpush1.bf16.msra.mxu1 %v4852_v1  ;;  %v4854_v48 = vpack.c.bf16 %v2175_v55, %v2167_v0  ;;  %v6765_v53 = vadd.f32 %v1249_v52, %v987_v3  ;;  %v2166_v56 = vld [vmem:[#allocation7 + $0x290] sm:$0xff]  ;;  %v1179_v15 = vld [vmem:[%s5903_s12 + $0x3e8] sm:$0xff] }
 0x19d   : > { %v6767_v11 = vadd.f32 %v1232_v6, %v970_v51  ;;  %v2172_v44 = vld [vmem:[#allocation7 + $0x2c0] sm:$0xff]  ;;  %v2174_v19 = vld [vmem:[#allocation7 + $0x2d0] sm:$0xff]  ;;  %4727 = vmatprep.subr.bf16.mxu0 %v4726_v13  ;;  %v2181_v38 = vld [vmem:[#allocation7 + $0x308] sm:$0xff]  ;;  %v1313_v26 = vsel %vm1187_vm0, %v1179_v15, 0.0 }
 0x19e   : > { %1758 = vadd.xlane.f32.xlu1 %v6486_v31  ;;  %1724 = vadd.xlane.f32.xlu0 %v6495_v43  ;;  %v4728_v21 = vpack.c.bf16 %v2172_v44, %v2164_v10  ;;  %v1162_v27 = vld [vmem:[%s5903_s12 + $0x360] sm:$0xff]  ;;  %1505 = vst [vmem:[#allocation2 + $0x1e8] sm:$0xff] %v6765_v53  ;;  %v4856_v25 = vpack.c.bf16 %v2174_v19, %v2166_v56  ;;  %v2189_v22 = vld [vmem:[#allocation7 + $0x348] sm:$0xff]  ;;  %v2183_v23 = vld [vmem:[#allocation7 + $0x318] sm:$0xff] }
 0x19f   : > { %4855 = vmatprep.subr.bf16.mxu1 %v4854_v48  ;;  %1488 = vst [vmem:[#allocation2 + $0x160] sm:$0xff] %v6767_v11  ;;  %v1296_v31 = vsel %vm1187_vm0, %v1162_v27, 0.0  ;;  %v4730_v43 = vpack.c.bf16 %v2189_v22, %v2181_v38  ;;  %v2191_v32 = vld [vmem:[#allocation7 + $0x358] sm:$0xff]  ;;  %v1051_v59 = vld [vmem:[#allocation2 + $0x3e8] sm:$0xff]  ;;  %v2182_v9 = vld [vmem:[#allocation7 + $0x310] sm:$0xff] }
 0x1a0   : > { %4729 = vmatpush1.bf16.msra.mxu0 %v4728_v21  ;;  %v1034_v7 = vld [vmem:[#allocation2 + $0x360] sm:$0xff]  ;;  %4857 = vmatpush1.bf16.msra.mxu1 %v4856_v25  ;;  %v4858_v39 = vpack.c.bf16 %v2191_v32, %v2183_v23  ;;  %v6779_v46 = vadd.f32 %v1313_v26, %v1051_v59  ;;  %v2190_v50 = vld [vmem:[#allocation7 + $0x350] sm:$0xff]  ;;  %v1099_v35 = vld [vmem:[%s5903_s12 + $0x168] sm:$0xff] }
 0x1a1   : > { %v6781_v28 = vadd.f32 %v1296_v31, %v1034_v7  ;;  %v2180_v34 = vld [vmem:[#allocation7 + $0x300] sm:$0xff]  ;;  %v1116_v58 = vld [vmem:[%s5903_s12 + $0x1f0] sm:$0xff]  ;;  %4731 = vmatprep.subr.bf16.mxu0 %v4730_v43  ;;  %v4860_v42 = vpack.c.bf16 %v2190_v50, %v2182_v9  ;;  %v2197_v61 = vld [vmem:[#allocation7 + $0x388] sm:$0xff] }
 0x1a2   : > { %v2188_v57 = vld [vmem:[#allocation7 + $0x340] sm:$0xff]  ;;  %1886 = vadd.xlane.f32.xlu1 %v6497_v45  ;;  %1852 = vadd.xlane.f32.xlu0 %v6506_v62  ;;  %1569 = vst [vmem:[#allocation2 + $0x3e8] sm:$0xff] %v6779_v46  ;;  %v2205_v4 = vld [vmem:[#allocation7 + $0x3c8] sm:$0xff]  ;;  %v2199_v47 = vld [vmem:[#allocation7 + $0x398] sm:$0xff]  ;;  %v1250_v41 = vsel %vm1187_vm0, %v1116_v58, 0.0  ;;  %v1233_v45 = vsel %vm1187_vm0, %v1099_v35, 0.0 }
 0x1a3   : > { %v4732_v29 = vpack.c.bf16 %v2188_v57, %v2180_v34  ;;  %4859 = vmatprep.subr.bf16.mxu1 %v4858_v39  ;;  %1552 = vst [vmem:[#allocation2 + $0x360] sm:$0xff] %v6781_v28  ;;  %v4734_v62 = vpack.c.bf16 %v2205_v4, %v2197_v61  ;;  %v2207_v33 = vld [vmem:[#allocation7 + $0x3d8] sm:$0xff]  ;;  %v988_v49 = vld [vmem:[#allocation2 + $0x1f0] sm:$0xff]  ;;  %v971_v1 = vld [vmem:[#allocation2 + $0x168] sm:$0xff] }
 0x1a4   : > { %4861 = vmatpush1.bf16.msra.mxu1 %v4860_v42  ;;  %v4862_v36 = vpack.c.bf16 %v2207_v33, %v2199_v47  ;;  %v6793_v17 = vadd.f32 %v1250_v41, %v988_v49  ;;  %v6795_v0 = vadd.f32 %v1233_v45, %v971_v1  ;;  %v2196_v52 = vld [vmem:[#allocation7 + $0x380] sm:$0xff]  ;;  %v2198_v13 = vld [vmem:[#allocation7 + $0x390] sm:$0xff]  ;;  %v1163_v48 = vld [vmem:[%s5903_s12 + $0x368] sm:$0xff] }
 0x1a5   : > { %4733 = vmatpush1.bf16.msra.mxu0 %v4732_v29  ;;  %v2204_v6 = vld [vmem:[#allocation7 + $0x3c0] sm:$0xff]  ;;  %v2206_v3 = vld [vmem:[#allocation7 + $0x3d0] sm:$0xff]  ;;  %v2213_v44 = vld [vmem:[#allocation7 + $0x408] sm:$0xff] }
 0x1a6   : > { %1760 = vadd.xlane.f32.xlu1 %v6515_v14  ;;  %1726 = vadd.xlane.f32.xlu0 %v6517_v20  ;;  %v4736_v55 = vpack.c.bf16 %v2204_v6, %v2196_v52  ;;  %v1180_v51 = vld [vmem:[%s5903_s12 + $0x3f0] sm:$0xff]  ;;  %1506 = vst [vmem:[#allocation2 + $0x1f0] sm:$0xff] %v6793_v17  ;;  %1489 = vst [vmem:[#allocation2 + $0x168] sm:$0xff] %v6795_v0  ;;  %v4864_v10 = vpack.c.bf16 %v2206_v3, %v2198_v13  ;;  %v2221_v56 = vld [vmem:[#allocation7 + $0x448] sm:$0xff]  ;;  %v1297_v14 = vsel %vm1187_vm0, %v1163_v48, 0.0 }
 0x1a7   : > { %4735 = vmatprep.subr.bf16.mxu0 %v4734_v62  ;;  %4863 = vmatprep.subr.bf16.mxu1 %v4862_v36  ;;  %v2215_v21 = vld [vmem:[#allocation7 + $0x418] sm:$0xff]  ;;  %v1314_v19 = vsel %vm1187_vm0, %v1180_v51, 0.0  ;;  %v4738_v20 = vpack.c.bf16 %v2221_v56, %v2213_v44  ;;  %v1052_v27 = vld [vmem:[#allocation2 + $0x3f0] sm:$0xff]  ;;  %v1035_v25 = vld [vmem:[#allocation2 + $0x368] sm:$0xff] }
 0x1a8   : > { %v2223_v15 = vld [vmem:[#allocation7 + $0x458] sm:$0xff]  ;;  %4865 = vmatpush1.bf16.msra.mxu1 %v4864_v10  ;;  %v6807_v22 = vadd.f32 %v1314_v19, %v1052_v27  ;;  %v6809_v23 = vadd.f32 %v1297_v14, %v1035_v25  ;;  %v2212_v26 = vld [vmem:[#allocation7 + $0x400] sm:$0xff]  ;;  %v2214_v43 = vld [vmem:[#allocation7 + $0x410] sm:$0xff] }
 0x1a9   : > { %4737 = vmatpush1.bf16.msra.mxu0 %v4736_v55  ;;  %v4866_v38 = vpack.c.bf16 %v2223_v15, %v2215_v21  ;;  %v2220_v31 = vld [vmem:[#allocation7 + $0x440] sm:$0xff]  ;;  %v2222_v59 = vld [vmem:[#allocation7 + $0x450] sm:$0xff]  ;;  %v1117_v7 = vld [vmem:[%s5903_s12 + $0x1f8] sm:$0xff] }
 0x1aa   : > { %1888 = vadd.xlane.f32.xlu1 %v6524_v24  ;;  %1854 = vadd.xlane.f32.xlu0 %v6533_v37  ;;  %v4740_v32 = vpack.c.bf16 %v2220_v31, %v2212_v26  ;;  %v1100_v39 = vld [vmem:[%s5903_s12 + $0x170] sm:$0xff]  ;;  %1570 = vst [vmem:[#allocation2 + $0x3f0] sm:$0xff] %v6807_v22  ;;  %1553 = vst [vmem:[#allocation2 + $0x368] sm:$0xff] %v6809_v23  ;;  %v4868_v34 = vpack.c.bf16 %v2222_v59, %v2214_v43  ;;  %v2229_v57 = vld [vmem:[#allocation7 + $0x488] sm:$0xff]  ;;  %v1251_v50 = vsel %vm1187_vm0, %v1117_v7, 0.0 }
 0x1ab   : > { %4739 = vmatprep.subr.bf16.mxu0 %v4738_v20  ;;  %4867 = vmatprep.subr.bf16.mxu1 %v4866_v38  ;;  %v2237_v9 = vld [vmem:[#allocation7 + $0x4c8] sm:$0xff]  ;;  %v2231_v29 = vld [vmem:[#allocation7 + $0x498] sm:$0xff]  ;;  %v1234_v24 = vsel %vm1187_vm0, %v1100_v39, 0.0  ;;  %v2228_v41 = vld [vmem:[#allocation7 + $0x480] sm:$0xff] }
 0x1ac   : > { %v4742_v37 = vpack.c.bf16 %v2237_v9, %v2229_v57  ;;  %v2239_v58 = vld [vmem:[#allocation7 + $0x4d8] sm:$0xff]  ;;  %v972_v42 = vld [vmem:[#allocation2 + $0x170] sm:$0xff]  ;;  %4869 = vmatpush1.bf16.msra.mxu1 %v4868_v34  ;;  %v2236_v45 = vld [vmem:[#allocation7 + $0x4c0] sm:$0xff] }
 0x1ad   : > { %4741 = vmatpush1.bf16.msra.mxu0 %v4740_v32  ;;  %v989_v35 = vld [vmem:[#allocation2 + $0x1f8] sm:$0xff]  ;;  %v4870_v61 = vpack.c.bf16 %v2239_v58, %v2231_v29  ;;  %v6823_v47 = vadd.f32 %v1234_v24, %v972_v42  ;;  %v4744_v33 = vpack.c.bf16 %v2236_v45, %v2228_v41  ;;  %v2245_v6 = vld [vmem:[#allocation7 + $0x508] sm:$0xff]  ;;  %v2244_v19 = vld [vmem:[#allocation7 + $0x500] sm:$0xff] }
 0x1ae   : > { %v6821_v4 = vadd.f32 %v1251_v50, %v989_v35  ;;  %v2230_v62 = vld [vmem:[#allocation7 + $0x490] sm:$0xff]  ;;  %1762 = vadd.xlane.f32.xlu1 %v6535_v40  ;;  %1728 = vadd.xlane.f32.xlu0 %v6544_v63  ;;  %v1181_v1 = vld [vmem:[%s5903_s12 + $0x3f8] sm:$0xff]  ;;  %v2253_v13 = vld [vmem:[#allocation7 + $0x548] sm:$0xff] }
 0x1af   : > { %v2238_v49 = vld [vmem:[#allocation7 + $0x4d0] sm:$0xff]  ;;  %4743 = vmatprep.subr.bf16.mxu0 %v4742_v37  ;;  %4871 = vmatprep.subr.bf16.mxu1 %v4870_v61  ;;  %1490 = vst [vmem:[#allocation2 + $0x170] sm:$0xff] %v6823_v47  ;;  %v2247_v55 = vld [vmem:[#allocation7 + $0x518] sm:$0xff]  ;;  %v1315_v3 = vsel %vm1187_vm0, %v1181_v1, 0.0  ;;  %v4746_v63 = vpack.c.bf16 %v2253_v13, %v2245_v6  ;;  %v2252_v14 = vld [vmem:[#allocation7 + $0x540] sm:$0xff] }
 0x1b0   : > { %v1164_v36 = vld [vmem:[%s5903_s12 + $0x370] sm:$0xff]  ;;  %1507 = vst [vmem:[#allocation2 + $0x1f8] sm:$0xff] %v6821_v4  ;;  %v4872_v52 = vpack.c.bf16 %v2238_v49, %v2230_v62  ;;  %v2255_v51 = vld [vmem:[#allocation7 + $0x558] sm:$0xff]  ;;  %v4748_v25 = vpack.c.bf16 %v2252_v14, %v2244_v19  ;;  %v2261_v32 = vld [vmem:[#allocation7 + $0x588] sm:$0xff] }
 0x1b1   : > { %v1298_v40 = vsel %vm1187_vm0, %v1164_v36, 0.0  ;;  %4745 = vmatpush1.bf16.msra.mxu0 %v4744_v33  ;;  %v1053_v48 = vld [vmem:[#allocation2 + $0x3f8] sm:$0xff]  ;;  %v1036_v10 = vld [vmem:[#allocation2 + $0x370] sm:$0xff]  ;;  %v4874_v44 = vpack.c.bf16 %v2255_v51, %v2247_v55  ;;  %v2260_v35 = vld [vmem:[#allocation7 + $0x580] sm:$0xff] }
 0x1b2   : > { %4873 = vmatpush1.bf16.msra.mxu1 %v4872_v52  ;;  %v6835_v56 = vadd.f32 %v1315_v3, %v1053_v48  ;;  %v6837_v21 = vadd.f32 %v1298_v40, %v1036_v10  ;;  %v2246_v20 = vld [vmem:[#allocation7 + $0x510] sm:$0xff]  ;;  %v1165_v26 = vld [vmem:[%s5903_s12 + $0x378] sm:$0xff]  ;;  %4747 = vmatprep.subr.bf16.mxu0 %v4746_v63  ;;  %v2269_v59 = vld [vmem:[#allocation7 + $0x5c8] sm:$0xff] }
 0x1b3   : > { %v5448_v15 = vld [vmem:[#allocation2 + $0x2f8] sm:$0xff]  ;;  %v5449_v27 = vld [vmem:[#allocation2 + $0x270] sm:$0xff]  ;;  %4875 = vmatprep.subr.bf16.mxu1 %v4874_v44  ;;  %v1299_v39 = vsel %vm1187_vm0, %v1165_v26, 0.0  ;;  %v4750_v57 = vpack.c.bf16 %v2269_v59, %v2261_v32  ;;  %v2268_v42 = vld [vmem:[#allocation7 + $0x5c0] sm:$0xff] }
 0x1b4   : > { %1890 = vadd.xlane.f32.xlu1 %v5448_v15  ;;  %1856 = vadd.xlane.f32.xlu0 %v5449_v27  ;;  %v2254_v38 = vld [vmem:[#allocation7 + $0x550] sm:$0xff]  ;;  %v1101_v31 = vld [vmem:[%s5903_s12 + $0x178] sm:$0xff]  ;;  %1571 = vst [vmem:[#allocation2 + $0x3f8] sm:$0xff] %v6835_v56  ;;  %1554 = vst [vmem:[#allocation2 + $0x370] sm:$0xff] %v6837_v21  ;;  %v4752_v12 = vpack.c.bf16 %v2268_v42, %v2260_v35 }
 0x1b5   : > { %v4876_v43 = vpack.c.bf16 %v2254_v38, %v2246_v20  ;;  %v2263_v7 = vld [vmem:[#allocation7 + $0x598] sm:$0xff]  ;;  %v1235_v34 = vsel %vm1187_vm0, %v1101_v31, 0.0  ;;  %4749 = vmatpush1.bf16.msra.mxu0 %v4748_v25  ;;  %v2262_v61 = vld [vmem:[#allocation7 + $0x590] sm:$0xff]  ;;  %v2277_v49 = vld [vmem:[#allocation7 + $0x608] sm:$0xff]  ;;  %vm3428_vm0 = vcmask 1041409  }
 0x1b6   : > { %v2271_v9 = vld [vmem:[#allocation7 + $0x5d8] sm:$0xff]  ;;  %v2270_v62 = vld [vmem:[#allocation7 + $0x5d0] sm:$0xff]  ;;  %4751 = vmatprep.subr.bf16.mxu0 %v4750_v57  ;;  %v2285_v1 = vld [vmem:[#allocation7 + $0x648] sm:$0xff] }
 0x1b7   : > { %v1037_v29 = vld [vmem:[#allocation2 + $0x378] sm:$0xff]  ;;  %4877 = vmatpush1.bf16.msra.mxu1 %v4876_v43  ;;  %v4878_v24 = vpack.c.bf16 %v2271_v9, %v2263_v7  ;;  %v4880_v33 = vpack.c.bf16 %v2270_v62, %v2262_v61  ;;  %v4754_v52 = vpack.c.bf16 %v2285_v1, %v2277_v49  ;;  %v2276_v13 = vld [vmem:[#allocation7 + $0x600] sm:$0xff]  ;;  %v2293_v19 = vld [vmem:[#allocation7 + $0x688] sm:$0xff] }
 0x1b8   : > { %v973_v50 = vld [vmem:[#allocation2 + $0x178] sm:$0xff]  ;;  %v6847_v37 = vadd.f32 %v1299_v39, %v1037_v29  ;;  %v2284_v55 = vld [vmem:[#allocation7 + $0x640] sm:$0xff]  ;;  %v2301_v14 = vld [vmem:[#allocation7 + $0x6c8] sm:$0xff] }
 0x1b9   : > { %v6849_v58 = vadd.f32 %v1235_v34, %v973_v50  ;;  %v5450_v41 = vld [vmem:[#allocation2 + $0x278] sm:$0xff]  ;;  %4879 = vmatprep.subr.bf16.mxu1 %v4878_v24  ;;  %4753 = vmatpush1.bf16.msra.mxu0 %v4752_v12  ;;  %v4756_v40 = vpack.c.bf16 %v2284_v55, %v2276_v13  ;;  %v5452_v48 = vld [vmem:[#allocation2 + $0x188] sm:$0xff]  ;;  %v5453_v10 = vld [vmem:[#allocation2 + $0x180] sm:$0xff]  ;;  %v4758_v15 = vpack.c.bf16 %v2301_v14, %v2293_v19  ;;  %v2770_v19 = vadd.s32 4294967288, %v6180_v5 }
 0x1ba   : > { %1858 = vadd.xlane.f32.xlu1 %v5450_v41  ;;  %v5451_v45 = vld [vmem:[#allocation2 + $0x78] sm:$0xff]  ;;  %1555 = vst [vmem:[#allocation2 + $0x378] sm:$0xff] %v6847_v37  ;;  %4755 = vmatprep.subr.bf16.mxu0 %v4754_v52  ;;  %v2292_v25 = vld [vmem:[#allocation7 + $0x680] sm:$0xff]  ;;  %v2309_v34 = vld [vmem:[#allocation7 + $0x708] sm:$0xff] }
 0x1bb   : > { %1730 = vadd.xlane.f32.xlu0 %v5451_v45  ;;  %1491 = vst [vmem:[#allocation2 + $0x178] sm:$0xff] %v6849_v58  ;;  %v2279_v36 = vld [vmem:[#allocation7 + $0x618] sm:$0xff]  ;;  %4881 = vmatpush1.bf16.msra.mxu1 %v4880_v33  ;;  %v2278_v63 = vld [vmem:[#allocation7 + $0x610] sm:$0xff]  ;;  %v2300_v38 = vld [vmem:[#allocation7 + $0x6c0] sm:$0xff] }
 0x1bc   : > { %v2287_v6 = vld [vmem:[#allocation7 + $0x658] sm:$0xff]  ;;  %v2286_v51 = vld [vmem:[#allocation7 + $0x650] sm:$0xff]  ;;  %v4760_v31 = vpack.c.bf16 %v2300_v38, %v2292_v25  ;;  %v5454_v59 = vld [vmem:[#allocation2 + $0x388] sm:$0xff] }
 0x1bd   : > { %v4882_v3 = vpack.c.bf16 %v2287_v6, %v2279_v36  ;;  %v4884_v44 = vpack.c.bf16 %v2286_v51, %v2278_v63  ;;  %v2295_v20 = vld [vmem:[#allocation7 + $0x698] sm:$0xff]  ;;  %4757 = vmatpush1.bf16.msra.mxu0 %v4756_v40  ;;  %v2294_v43 = vld [vmem:[#allocation7 + $0x690] sm:$0xff]  ;;  %v2317_v57 = vld [vmem:[#allocation7 + $0x748] sm:$0xff] }
 0x1be   : > { %1798 = vadd.xlane.f32.xlu1 %v5452_v48  ;;  %v2303_v27 = vld [vmem:[#allocation7 + $0x6d8] sm:$0xff]  ;;  %v2302_v32 = vld [vmem:[#allocation7 + $0x6d0] sm:$0xff]  ;;  %4759 = vmatprep.subr.bf16.mxu0 %v4758_v15  ;;  %v4762_v29 = vpack.c.bf16 %v2317_v57, %v2309_v34  ;;  %v2308_v24 = vld [vmem:[#allocation7 + $0x700] sm:$0xff] }
 0x1bf   : > { %1796 = vadd.xlane.f32.xlu0 %v5453_v10  ;;  %4883 = vmatprep.subr.bf16.mxu1 %v4882_v3  ;;  %v4886_v26 = vpack.c.bf16 %v2303_v27, %v2295_v20  ;;  %v5455_v7 = vld [vmem:[#allocation2 + $0x380] sm:$0xff]  ;;  %v4888_v39 = vpack.c.bf16 %v2302_v32, %v2294_v43  ;;  %v2310_v41 = vld [vmem:[#allocation7 + $0x710] sm:$0xff]  ;;  %v5456_v12 = vld [vmem:[#allocation2 + $0x108] sm:$0xff]  ;;  %v6854_v3 = vshrl.u32 %v1182_v2, 7 }
 0x1c0   : > { %4885 = vmatpush1.bf16.msra.mxu1 %v4884_v44  ;;  %v2311_v9 = vld [vmem:[#allocation7 + $0x718] sm:$0xff]  ;;  %v2316_v35 = vld [vmem:[#allocation7 + $0x740] sm:$0xff]  ;;  %v2318_v45 = vld [vmem:[#allocation7 + $0x750] sm:$0xff] }
 0x1c1   : > { %4887 = vmatprep.subr.bf16.mxu1 %v4886_v26  ;;  %4761 = vmatpush1.bf16.msra.mxu0 %v4760_v31  ;;  %v2319_v50 = vld [vmem:[#allocation7 + $0x758] sm:$0xff]  ;;  %v4764_v61 = vpack.c.bf16 %v2316_v35, %v2308_v24  ;;  %v4892_v33 = vpack.c.bf16 %v2318_v45, %v2310_v41  ;;  %v2325_v49 = vld [vmem:[#allocation7 + $0x788] sm:$0xff]  ;;  %v2324_v13 = vld [vmem:[#allocation7 + $0x780] sm:$0xff]  ;;  %v6859_v2 = vsub.s32 %v6180_v5, %v6854_v3  ;;  %v2777_v24 = vadd.s32 4294967280, %v6180_v5 }
 0x1c2   : > { %1926 = vadd.xlane.f32.xlu1 %v5454_v59  ;;  %v4890_v42 = vpack.c.bf16 %v2319_v50, %v2311_v9  ;;  %v5457_v62 = vld [vmem:[#allocation2 + $0x100] sm:$0xff]  ;;  %4763 = vmatprep.subr.bf16.mxu0 %v4762_v29  ;;  %v2333_v1 = vld [vmem:[#allocation7 + $0x7c8] sm:$0xff]  ;;  %v2326_v51 = vld [vmem:[#allocation7 + $0x790] sm:$0xff]  ;;  %v6862_v31 = vsub.s32 %v2770_v19, %v6854_v3 }
 0x1c3   : > { %1924 = vadd.xlane.f32.xlu0 %v5455_v7  ;;  %v2327_v36 = vld [vmem:[#allocation7 + $0x798] sm:$0xff]  ;;  %v4766_v52 = vpack.c.bf16 %v2333_v1, %v2325_v49  ;;  %v2332_v55 = vld [vmem:[#allocation7 + $0x7c0] sm:$0xff]  ;;  %v2334_v48 = vld [vmem:[#allocation7 + $0x7d0] sm:$0xff] }
 0x1c4   : > { %4889 = vmatpush1.bf16.msra.mxu1 %v4888_v39  ;;  %v2335_v6 = vld [vmem:[#allocation7 + $0x7d8] sm:$0xff]  ;;  %v4768_v63 = vpack.c.bf16 %v2332_v55, %v2324_v13  ;;  %v5459_v44 = vld [vmem:[#allocation2 + $0x190] sm:$0xff]  ;;  %v4896_v14 = vpack.c.bf16 %v2334_v48, %v2326_v51  ;;  %v5461_v26 = vld [vmem:[#allocation2 + $0x308] sm:$0xff] }
 0x1c5   : > { %4891 = vmatprep.subr.bf16.mxu1 %v4890_v42  ;;  %4765 = vmatpush1.bf16.msra.mxu0 %v4764_v61  ;;  %v4894_v40 = vpack.c.bf16 %v2335_v6, %v2327_v36  ;;  %v5458_v10 = vld [vmem:[#allocation2 + $0x300] sm:$0xff]  ;;  %v5460_v38 = vld [vmem:[#allocation2 + $0x390] sm:$0xff]  ;;  %v5462_v29 = vld [vmem:[#allocation2 + $0x198] sm:$0xff]  ;;  %v6874_v36 = vsub.s32 %v2777_v24, %v6854_v3 }
 0x1c6   : > { %1766 = vadd.xlane.f32.xlu1 %v5456_v12  ;;  %4767 = vmatprep.subr.bf16.mxu0 %v4766_v52  ;;  %v5463_v50 = vld [vmem:[#allocation2 + $0x110] sm:$0xff]  ;;  %v5464_v49 = vld [vmem:[#allocation2 + $0x398] sm:$0xff]  ;;  %v5466_v48 = vld [vmem:[#allocation2 + $0x1a0] sm:$0xff] }
 0x1c7   : > { %1764 = vadd.xlane.f32.xlu0 %v5457_v62  ;;  %v1861_v20 = vpop.xlane.xlu1 %1860  ;;  %v1733_v15 = vpop.xlane.xlu0 %1732  ;;  %v5465_v1 = vld [vmem:[#allocation2 + $0x310] sm:$0xff]  ;;  %v5470_v24 = vld [vmem:[#allocation2 + $0x1a8] sm:$0xff] }
 0x1c8   : > { %4893 = vmatpush1.bf16.msra.mxu1 %v4892_v33  ;;  %v2036_v27 = vmul.f32 0.0052083335, %v1861_v20  ;;  %v1972_v25 = vmul.f32 0.0052083335, %v1733_v15 }
 0x1c9   : > { %4895 = vmatprep.subr.bf16.mxu1 %v4894_v40  ;;  %4769 = vmatpush1.bf16.msra.mxu0 %v4768_v63  ;;  %v2784_v40 = vadd.s32 4294967272, %v6180_v5 }
 0x1ca   : > { %1892 = vadd.xlane.f32.xlu1 %v5458_v10  ;;  %v3194_v39 = vrot.slane %v2036_v27, %v6859_v2  ;;  %v2878_v34 = vrot.slane %v1972_v25, %v6859_v2  ;;  %v5467_v10 = vld [vmem:[#allocation2 + $0x118] sm:$0xff] }
 0x1cb   : > { %1800 = vadd.xlane.f32.xlu0 %v5459_v44  ;;  %v1863_v43 = vpop.xlane.xlu1 %1862  ;;  %v1735_v32 = vpop.xlane.xlu0 %1734  ;;  %v6881_v27 = vsub.s32 %v2784_v40, %v6854_v3 }
 0x1cc   : > { %4897 = vmatpush1.bf16.msra.mxu1 %v4896_v14  ;;  %v2037_v59 = vmul.f32 0.0052083335, %v1863_v43  ;;  %v1973_v7 = vmul.f32 0.0052083335, %v1735_v32  ;;  %v5468_v43 = vld [vmem:[#allocation2 + $0x3a0] sm:$0xff]  ;;  %v5469_v32 = vld [vmem:[#allocation2 + $0x318] sm:$0xff] }
 0x1ce   : > { %1928 = vadd.xlane.f32.xlu1 %v5460_v38  ;;  %v3198_v57 = vrot.slane %v2037_v59, %v6862_v31  ;;  %v2882_v9 = vrot.slane %v1973_v7, %v6862_v31 }
 0x1cf   : > { %1894 = vadd.xlane.f32.xlu0 %v5461_v26  ;;  %v1703_v35 = vpop.xlane.xlu1 %1702  ;;  %v1701_v42 = vpop.xlane.xlu0 %1700 }
 0x1d0   : > { %v3199_v61 = vsel %vm2775_vm1, %v3198_v57, %v3194_v39  ;;  %v2883_v41 = vsel %vm2775_vm1, %v2882_v9, %v2878_v34  ;;  %v1957_v45 = vmul.f32 0.0052083335, %v1703_v35  ;;  %v1956_v12 = vmul.f32 0.0052083335, %v1701_v42  ;;  %v5471_v35 = vld [vmem:[#allocation2 + $0x120] sm:$0xff] }
 0x1d1   : > { %v2791_v42 = vadd.s32 4294967264, %v6180_v5 }
 0x1d2   : > { %1802 = vadd.xlane.f32.xlu1 %v5462_v29  ;;  %v2774_v62 = vrot.slane %v1957_v45, %v6862_v31  ;;  %v2769_v33 = vrot.slane %v1956_v12, %v6859_v2 }
 0x1d3   : > { %1768 = vadd.xlane.f32.xlu0 %v5463_v50  ;;  %v1829_v52 = vpop.xlane.xlu1 %1828  ;;  %v1737_v6 = vpop.xlane.xlu0 %1736 }
 0x1d4   : > { %v2776_v13 = vsel %vm2775_vm1, %v2774_v62, %v2769_v33  ;;  %v1974_v55 = vmul.f32 0.0052083335, %v1737_v6  ;;  %v2020_v63 = vmul.f32 0.0052083335, %v1829_v52  ;;  %v5472_v52 = vld [vmem:[#allocation2 + $0x3a8] sm:$0xff]  ;;  %v5473_v6 = vld [vmem:[#allocation2 + $0x320] sm:$0xff] }
 0x1d6   : > { %1930 = vadd.xlane.f32.xlu1 %v5464_v49  ;;  %v2887_v51 = vrot.slane %v1974_v55, %v6874_v36  ;;  %v3115_v25 = vrot.slane %v2020_v63, %v6859_v2  ;;  %v6896_v55 = vsub.s32 %v2791_v42, %v6854_v3 }
 0x1d7   : > { %1896 = vadd.xlane.f32.xlu0 %v5465_v1  ;;  %v1865_v44 = vpop.xlane.xlu1 %1864  ;;  %v1831_v19 = vpop.xlane.xlu0 %1830 }
 0x1d8   : > { %v2888_v14 = vsel %vm2782_vm2, %v2887_v51, %v2883_v41  ;;  %v2038_v20 = vmul.f32 0.0052083335, %v1865_v44  ;;  %v2021_v15 = vmul.f32 0.0052083335, %v1831_v19 }
 0x1da   : > { %1804 = vadd.xlane.f32.xlu1 %v5466_v48  ;;  %v3203_v38 = vrot.slane %v2038_v20, %v6874_v36  ;;  %v3119_v26 = vrot.slane %v2021_v15, %v6862_v31  ;;  %v5475_v20 = vld [vmem:[#allocation2 + $0x128] sm:$0xff]  ;;  %v2798_v15 = vadd.s32 4294967256, %v6180_v5 }
 0x1db   : > { %1770 = vadd.xlane.f32.xlu0 %v5467_v10  ;;  %v1739_v59 = vpop.xlane.xlu1 %1738  ;;  %v1705_v7 = vpop.xlane.xlu0 %1704 }
 0x1dc   : > { %v3204_v39 = vsel %vm2782_vm2, %v3203_v38, %v3199_v61  ;;  %v3120_v34 = vsel %vm2775_vm1, %v3119_v26, %v3115_v25  ;;  %v1975_v57 = vmul.f32 0.0052083335, %v1739_v59  ;;  %v1958_v9 = vmul.f32 0.0052083335, %v1705_v7 }
 0x1de   : > { %1932 = vadd.xlane.f32.xlu1 %v5468_v43  ;;  %v2892_v29 = vrot.slane %v1975_v57, %v6881_v27  ;;  %v2781_v50 = vrot.slane %v1958_v9, %v6874_v36  ;;  %v5477_v57 = vld [vmem:[#allocation2 + $0x328] sm:$0xff]  ;;  %v6908_v9 = vsub.s32 %v2798_v15, %v6854_v3 }
 0x1df   : > { %1898 = vadd.xlane.f32.xlu0 %v5469_v32  ;;  %v1867_v41 = vpop.xlane.xlu1 %1866  ;;  %v1833_v45 = vpop.xlane.xlu0 %1832 }
 0x1e0   : > { %v2893_v12 = vsel %vm2789_vm3, %v2892_v29, %v2888_v14  ;;  %v2783_v61 = vsel %vm2782_vm2, %v2781_v50, %v2776_v13  ;;  %v2039_v62 = vmul.f32 0.0052083335, %v1867_v41  ;;  %v2022_v33 = vmul.f32 0.0052083335, %v1833_v45  ;;  %v5474_v14 = vld [vmem:[#allocation2 + $0x1b0] sm:$0xff] }
 0x1e2   : > { %1806 = vadd.xlane.f32.xlu1 %v5470_v24  ;;  %v3208_v49 = vrot.slane %v2039_v62, %v6881_v27  ;;  %v3124_v1 = vrot.slane %v2022_v33, %v6874_v36  ;;  %v5479_v62 = vld [vmem:[#allocation2 + $0x130] sm:$0xff]  ;;  %v2805_v33 = vadd.s32 4294967248, %v6180_v5 }
 0x1e3   : > { %1772 = vadd.xlane.f32.xlu0 %v5471_v35  ;;  %v1741_v40 = vpop.xlane.xlu1 %1740  ;;  %v1707_v63 = vpop.xlane.xlu0 %1706 }
 0x1e4   : > { %v3209_v51 = vsel %vm2789_vm3, %v3208_v49, %v3204_v39  ;;  %v3125_v48 = vsel %vm2782_vm2, %v3124_v1, %v3120_v34  ;;  %v1976_v13 = vmul.f32 0.0052083335, %v1741_v40  ;;  %v1959_v10 = vmul.f32 0.0052083335, %v1707_v63  ;;  %v5476_v34 = vld [vmem:[#allocation2 + $0x3b0] sm:$0xff] }
 0x1e6   : > { %1934 = vadd.xlane.f32.xlu1 %v5472_v52  ;;  %v2897_v44 = vrot.slane %v1976_v13, %v6896_v55  ;;  %v2788_v19 = vrot.slane %v1959_v10, %v6881_v27  ;;  %v5480_v13 = vld [vmem:[#allocation2 + $0x3b8] sm:$0xff]  ;;  %v5481_v10 = vld [vmem:[#allocation2 + $0x330] sm:$0xff] }
 0x1e7   : > { %1900 = vadd.xlane.f32.xlu0 %v5473_v6  ;;  %v1869_v25 = vpop.xlane.xlu1 %1868  ;;  %v1835_v38 = vpop.xlane.xlu0 %1834 }
 0x1e8   : > { %v2898_v26 = vsel %vm2796_vm4, %v2897_v44, %v2893_v12  ;;  %v2790_v43 = vsel %vm2789_vm3, %v2788_v19, %v2783_v61  ;;  %v2040_v32 = vmul.f32 0.0052083335, %v1869_v25  ;;  %v2023_v59 = vmul.f32 0.0052083335, %v1835_v38  ;;  %v5478_v61 = vld [vmem:[#allocation2 + $0x1b8] sm:$0xff] }
 0x1e9   : > { %v6920_v44 = vsub.s32 %v2805_v33, %v6854_v3 }
 0x1ea   : > { %1808 = vadd.xlane.f32.xlu1 %v5474_v14  ;;  %v3213_v7 = vrot.slane %v2040_v32, %v6896_v55  ;;  %v3129_v39 = vrot.slane %v2023_v59, %v6881_v27  ;;  %v5482_v32 = vld [vmem:[#allocation2 + $0x1c0] sm:$0xff]  ;;  %v5483_v59 = vld [vmem:[#allocation2 + $0x138] sm:$0xff] }
 0x1eb   : > { %1774 = vadd.xlane.f32.xlu0 %v5475_v20  ;;  %v1743_v29 = vpop.xlane.xlu1 %1742  ;;  %v1709_v50 = vpop.xlane.xlu0 %1708 }
 0x1ec   : > { %v3214_v24 = vsel %vm2796_vm4, %v3213_v7, %v3209_v51  ;;  %v3130_v35 = vsel %vm2789_vm3, %v3129_v39, %v3125_v48  ;;  %v1977_v42 = vmul.f32 0.0052083335, %v1743_v29  ;;  %v1960_v41 = vmul.f32 0.0052083335, %v1709_v50 }
 0x1ee   : > { %1936 = vadd.xlane.f32.xlu1 %v5476_v34  ;;  %v2902_v45 = vrot.slane %v1977_v42, %v6908_v9  ;;  %v2795_v12 = vrot.slane %v1960_v41, %v6896_v55 }
 0x1ef   : > { %1902 = vadd.xlane.f32.xlu0 %v5477_v57  ;;  %v1871_v49 = vpop.xlane.xlu1 %1870  ;;  %v1837_v1 = vpop.xlane.xlu0 %1836 }
 0x1f0   : > { %v2903_v52 = vsel %vm2803_vm5, %v2902_v45, %v2898_v26  ;;  %v2797_v6 = vsel %vm2796_vm4, %v2795_v12, %v2790_v43  ;;  %v2041_v40 = vmul.f32 0.0052083335, %v1871_v49  ;;  %v2024_v63 = vmul.f32 0.0052083335, %v1837_v1  ;;  %v5486_v12 = vld [vmem:[#allocation2 + $0x1c8] sm:$0xff]  ;;  %v5489_v1 = vld [vmem:[#allocation2 + $0x340] sm:$0xff] }
 0x1f1   : > { %v5488_v49 = vld [vmem:[#allocation2 + $0x3c8] sm:$0xff] }
 0x1f2   : > { %1810 = vadd.xlane.f32.xlu1 %v5478_v61  ;;  %v3218_v51 = vrot.slane %v2041_v40, %v6908_v9  ;;  %v3134_v48 = vrot.slane %v2024_v63, %v6896_v55  ;;  %v5487_v61 = vld [vmem:[#allocation2 + $0x140] sm:$0xff]  ;;  %v5490_v40 = vld [vmem:[#allocation2 + $0x1d0] sm:$0xff]  ;;  %v5491_v63 = vld [vmem:[#allocation2 + $0x148] sm:$0xff] }
 0x1f3   : > { %1776 = vadd.xlane.f32.xlu0 %v5479_v62  ;;  %v1745_v19 = vpop.xlane.xlu1 %1744  ;;  %v1711_v14 = vpop.xlane.xlu0 %1710 }
 0x1f4   : > { %v6923_v20 = vsel %vm2803_vm5, %v3218_v51, %v3214_v24  ;;  %v3135_v15 = vsel %vm2796_vm4, %v3134_v48, %v3130_v35  ;;  %v1978_v25 = vmul.f32 0.0052083335, %v1745_v19  ;;  %v1961_v38 = vmul.f32 0.0052083335, %v1711_v14  ;;  %v5484_v24 = vld [vmem:[#allocation2 + $0x3c0] sm:$0xff]  ;;  %v5485_v35 = vld [vmem:[#allocation2 + $0x338] sm:$0xff] }
 0x1f5   : > { %v2341_v51 = vld [vmem:[#allocation7 + $0x808] sm:$0xff] }
 0x1f6   : > { %1938 = vadd.xlane.f32.xlu1 %v5480_v13  ;;  %v2907_v26 = vrot.slane %v1978_v25, %v6920_v44  ;;  %v2802_v43 = vrot.slane %v1961_v38, %v6908_v9  ;;  %v2349_v48 = vld [vmem:[#allocation7 + $0x848] sm:$0xff]  ;;  %v2343_v13 = vld [vmem:[#allocation7 + $0x818] sm:$0xff] }
 0x1f7   : > { %1904 = vadd.xlane.f32.xlu0 %v5481_v10  ;;  %v6928_v7 = vpop.xlane.xlu1 %1872  ;;  %v1839_v39 = vpop.xlane.xlu0 %1838  ;;  %v4770_v14 = vpack.c.bf16 %v2349_v48, %v2341_v51  ;;  %v5492_v38 = vld [vmem:[#allocation2 + $0x3d0] sm:$0xff]  ;;  %v2847_v48 = vadd.s32 4294967200, %v6180_v5 }
 0x1f8   : > { %v6931_v34 = vsel %vm2810_vm6, %v2907_v26, %v2903_v52  ;;  %v6934_v57 = vsel %vm2803_vm5, %v2802_v43, %v2797_v6  ;;  %v2025_v29 = vmul.f32 0.0052083335, %v1839_v39  ;;  %v5493_v26 = vld [vmem:[#allocation2 + $0x348] sm:$0xff]  ;;  %v5495_v39 = vld [vmem:[#allocation2 + $0x150] sm:$0xff] }
 0x1f9   : > { %4771 = vmatprep.subr.bf16.mxu0 %v4770_v14 }
 0x1fa   : > { %1812 = vadd.xlane.f32.xlu1 %v5482_v32  ;;  %v3139_v50 = vrot.slane %v2025_v29, %v6908_v9 }
 0x1fb   : > { %1778 = vadd.xlane.f32.xlu0 %v5483_v59  ;;  %v6937_v42 = vpop.xlane.xlu1 %1746  ;;  %v6939_v41 = vpop.xlane.xlu0 %1712  ;;  %v5494_v59 = vld [vmem:[#allocation2 + $0x1d8] sm:$0xff] }
 0x1fc   : > { %v6942_v45 = vsel %vm2803_vm5, %v3139_v50, %v3135_v15  ;;  %v2351_v15 = vld [vmem:[#allocation7 + $0x858] sm:$0xff]  ;;  %v1962_v51 = vmul.f32 0.0052083335, %v6939_v41 }
 0x1fd   : > { %v4898_v25 = vpack.c.bf16 %v2351_v15, %v2343_v13 }
 0x1fe   : > { %1940 = vadd.xlane.f32.xlu1 %v5484_v24 }
 0x1ff   : > { %1906 = vadd.xlane.f32.xlu0 %v5485_v35  ;;  %v6944_v62 = vpop.xlane.xlu1 %1874  ;;  %v6946_v33 = vpop.xlane.xlu0 %1840  ;;  %4899 = vmatprep.subr.bf16.mxu1 %v4898_v25 }
 0x200   : > { %v2026_v15 = vmul.f32 0.0052083335, %v6946_v33 }
 0x202   : > { %1814 = vadd.xlane.f32.xlu1 %v5486_v12 }
 0x203   : > { %1780 = vadd.xlane.f32.xlu0 %v5487_v61  ;;  %v6948_v52 = vpop.xlane.xlu1 %1748  ;;  %v6950_v6 = vpop.xlane.xlu0 %1714 }
 0x206   : > { %1942 = vadd.xlane.f32.xlu1 %v5488_v49 }
 0x207   : > { %1908 = vadd.xlane.f32.xlu0 %v5489_v1  ;;  %v6952_v10 = vpop.xlane.xlu1 %1876  ;;  %v6954_v19 = vpop.xlane.xlu0 %1842  ;;  %v2819_v1 = vadd.s32 4294967232, %v6180_v5 }
 0x209   : > { %v7016_v25 = vsub.s32 %v2819_v1, %v6854_v3 }
 0x20a   : > { %1816 = vadd.xlane.f32.xlu1 %v5490_v40  ;;  %v2826_v40 = vadd.s32 4294967224, %v6180_v5 }
 0x20b   : > { %1782 = vadd.xlane.f32.xlu0 %v5491_v63  ;;  %v6956_v43 = vpop.xlane.xlu1 %1750  ;;  %v6958_v32 = vpop.xlane.xlu0 %1716  ;;  %v1979_v63 = vmul.f32 0.0052083335, %v6937_v42  ;;  %v2854_v42 = vadd.s32 4294967192, %v6180_v5 }
 0x20e   : > { %1944 = vadd.xlane.f32.xlu1 %v5492_v38  ;;  %v2868_v38 = vadd.s32 4294967176, %v6180_v5 }
 0x20f   : > { %1910 = vadd.xlane.f32.xlu0 %v5493_v26  ;;  %v6960_v29 = vpop.xlane.xlu1 %1878  ;;  %v6962_v50 = vpop.xlane.xlu0 %1844 }
 0x212   : > { %1818 = vadd.xlane.f32.xlu1 %v5494_v59  ;;  %v1963_v59 = vmul.f32 0.0052083335, %v6950_v6  ;;  %v7041_v6 = vsub.s32 %v2854_v42, %v6854_v3 }
 0x213   : > { %1784 = vadd.xlane.f32.xlu0 %v5495_v39  ;;  %v6966_v24 = vpop.xlane.xlu1 %1752  ;;  %v6968_v35 = vpop.xlane.xlu0 %1718  ;;  %v2809_v39 = vrot.slane %v1962_v51, %v6920_v44  ;;  %v1981_v51 = vmul.f32 0.0052083335, %v6956_v43  ;;  %v2028_v43 = vmul.f32 0.0052083335, %v6962_v50 }
 0x216   : > { %1946 = vadd.xlane.f32.xlu1 %v6723_v8 }
 0x217   : > { %1912 = vadd.xlane.f32.xlu0 %v6725_v16  ;;  %v6972_v12 = vpop.xlane.xlu1 %1880  ;;  %v6974_v61 = vpop.xlane.xlu0 %1846 }
 0x21a   : > { %1820 = vadd.xlane.f32.xlu1 %v6737_v30 }
 0x21b   : > { %1786 = vadd.xlane.f32.xlu0 %v6739_v18  ;;  %v6978_v49 = vpop.xlane.xlu1 %1754  ;;  %v6980_v8 = vpop.xlane.xlu0 %1720  ;;  %v2812_v18 = vadd.s32 4294967240, %v6180_v5 }
 0x21e   : > { %1948 = vadd.xlane.f32.xlu1 %v6751_v54 }
 0x21f   : > { %1914 = vadd.xlane.f32.xlu0 %v6753_v60  ;;  %v6984_v16 = vpop.xlane.xlu1 %1882  ;;  %v6986_v30 = vpop.xlane.xlu0 %1848 }
 0x222   : > { %1822 = vadd.xlane.f32.xlu1 %v6765_v53  ;;  %v2042_v53 = vmul.f32 0.0052083335, %v6928_v7  ;;  %v2043_v7 = vmul.f32 0.0052083335, %v6944_v62  ;;  %v7022_v62 = vsub.s32 %v2826_v40, %v6854_v3  ;;  %v3144_v40 = vrot.slane %v2026_v15, %v6920_v44 }
 0x223   : > { %1788 = vadd.xlane.f32.xlu0 %v6767_v11  ;;  %v6991_v54 = vpop.xlane.xlu1 %1756  ;;  %v6993_v60 = vpop.xlane.xlu0 %1722  ;;  %v6998_v11 = vsub.s32 %v2812_v18, %v6854_v3  ;;  %v2045_v15 = vmul.f32 0.0052083335, %v6960_v29  ;;  %v1965_v29 = vmul.f32 0.0052083335, %v6968_v35  ;;  %v1983_v35 = vmul.f32 0.0052083335, %v6978_v49 }
 0x224   : > { %v3223_v41 = vrot.slane %v2042_v53, %v6920_v44 }
 0x225   : > { %v2912_v26 = vrot.slane %v1979_v63, %v6998_v11  ;;  %v3228_v18 = vrot.slane %v2043_v7, %v6998_v11  ;;  %v7058_v7 = vsub.s32 %v2868_v38, %v6854_v3  ;;  %v2816_v42 = vrot.slane %v1963_v59, %v6998_v11 }
 0x226   : > { %1950 = vadd.xlane.f32.xlu1 %v6779_v46  ;;  %v2833_v46 = vadd.s32 4294967216, %v6180_v5  ;;  %v2046_v38 = vmul.f32 0.0052083335, %v6972_v12  ;;  %v1966_v12 = vmul.f32 0.0052083335, %v6980_v8  ;;  %v2830_v49 = vrot.slane %v1965_v29, %v7022_v62 }
 0x227   : > { %1916 = vadd.xlane.f32.xlu0 %v6781_v28  ;;  %v2840_v28 = vadd.s32 4294967208, %v6180_v5  ;;  %v7009_v13 = vpop.xlane.xlu1 %1884  ;;  %v7011_v14 = vpop.xlane.xlu0 %1850 }
 0x228   : > { %v7028_v33 = vsub.s32 %v2833_v46, %v6854_v3  ;;  %v3224_v46 = vsel %vm2810_vm6, %v3223_v41, %v6923_v20  ;;  %v2811_v20 = vsel %vm2810_vm6, %v2809_v39, %v6934_v57  ;;  %v7079_v57 = vld [vmem:[#allocation7 + $0x800] sm:$0xff]  ;;  %v3238_v39 = vrot.slane %v2045_v15, %v7022_v62 }
 0x229   : > { %v7081_v41 = vld [vmem:[#allocation7 + $0x840] sm:$0xff] }
 0x22a   : > { %1824 = vadd.xlane.f32.xlu1 %v6793_v17  ;;  %v1980_v17 = vmul.f32 0.0052083335, %v6948_v52  ;;  %v7031_v52 = vsub.s32 %v2840_v28, %v6854_v3  ;;  %v2027_v28 = vmul.f32 0.0052083335, %v6954_v19  ;;  %v3229_v19 = vsel %vm2817_vm7, %v3228_v18, %v3224_v46 }
 0x22b   : > { %1790 = vadd.xlane.f32.xlu0 %v6795_v0  ;;  %v2861_v0 = vadd.s32 4294967184, %v6180_v5  ;;  %v7038_v5 = vsub.s32 %v2847_v48, %v6854_v3  ;;  %v7043_v1 = vpop.xlane.xlu1 %1758  ;;  %v7045_v53 = vpop.xlane.xlu0 %1724  ;;  %v2913_v48 = vsel %vm2817_vm7, %v2912_v26, %v6931_v34  ;;  %v2029_v26 = vmul.f32 0.0052083335, %v6974_v61 }
 0x22c   : > { %v3149_v50 = vrot.slane %v2027_v28, %v6998_v11  ;;  %v3154_v18 = vrot.slane %v2028_v43, %v7016_v25  ;;  %v3243_v8 = vrot.slane %v2046_v38, %v7028_v33  ;;  %v2932_v15 = vrot.slane %v1983_v35, %v7031_v52 }
 0x22d   : > { %v7051_v63 = vsub.s32 %v2861_v0, %v6854_v3  ;;  %v1967_v43 = vmul.f32 0.0052083335, %v6993_v60 }
 0x22e   : > { %1952 = vadd.xlane.f32.xlu1 %v6807_v22  ;;  %v2917_v22 = vrot.slane %v1980_v17, %v7016_v25  ;;  %v1982_v17 = vmul.f32 0.0052083335, %v6966_v24  ;;  %v2922_v24 = vrot.slane %v1981_v51, %v7022_v62 }
 0x22f   : > { %1918 = vadd.xlane.f32.xlu0 %v6809_v23  ;;  %v2044_v23 = vmul.f32 0.0052083335, %v6952_v10  ;;  %v1964_v10 = vmul.f32 0.0052083335, %v6958_v32  ;;  %v1887_v34 = vpop.xlane.xlu1 %1886  ;;  %v7072_v0 = vpop.xlane.xlu0 %1852  ;;  %v3145_v32 = vsel %vm2810_vm6, %v3144_v40, %v6942_v45  ;;  %v2818_v45 = vsel %vm2817_vm7, %v2816_v42, %v2811_v20 }
 0x230   : > { %v2927_v40 = vrot.slane %v1982_v17, %v7028_v33  ;;  %v3150_v28 = vsel %vm2817_vm7, %v3149_v50, %v3145_v32  ;;  %v1984_v20 = vmul.f32 0.0052083335, %v6991_v54  ;;  %v2031_v50 = vmul.f32 0.0052083335, %v7011_v14 }
 0x231   : > { %v2823_v59 = vrot.slane %v1964_v10, %v7016_v25 }
 0x232   : > { %1826 = vadd.xlane.f32.xlu1 %v6821_v4  ;;  %v2918_v4 = vsel %vm2824_vm8, %v2917_v22, %v2913_v48  ;;  %v3159_v48 = vrot.slane %v2029_v26, %v7022_v62  ;;  %v2937_v38 = vrot.slane %v1984_v20, %v7038_v5  ;;  %v1968_v26 = vmul.f32 0.0052083335, %v7045_v53 }
 0x233   : > { %1792 = vadd.xlane.f32.xlu0 %v6823_v47  ;;  %v3233_v47 = vrot.slane %v2044_v23, %v7016_v25  ;;  %v1761_v61 = vpop.xlane.xlu1 %1760  ;;  %v1727_v22 = vpop.xlane.xlu0 %1726  ;;  %v4772_v23 = vpack.c.bf16 %v7081_v41, %v7079_v57  ;;  %v2923_v51 = vsel %vm2831_vm9, %v2922_v24, %v2918_v4  ;;  %v2825_v42 = vsel %vm2824_vm8, %v2823_v59, %v2818_v45  ;;  %v2399_v57 = vld [vmem:[#allocation7 + $0x9d8] sm:$0xff] }
 0x234   : > { %v2832_v4 = vsel %vm2831_vm9, %v2830_v49, %v2825_v42  ;;  %v1985_v24 = vmul.f32 0.0052083335, %v7043_v1  ;;  %v2049_v45 = vmul.f32 0.0052083335, %v1887_v34  ;;  %v2844_v59 = vrot.slane %v1967_v43, %v7031_v52 }
 0x235   : > { %v3234_v46 = vsel %vm2824_vm8, %v3233_v47, %v3229_v19  ;;  %v2837_v19 = vrot.slane %v1966_v12, %v7028_v33  ;;  %v3169_v49 = vrot.slane %v2031_v50, %v7031_v52  ;;  %v2032_v34 = vmul.f32 0.0052083335, %v7072_v0 }
 0x236   : > { %1954 = vadd.xlane.f32.xlu1 %v6835_v56  ;;  %v2047_v56 = vmul.f32 0.0052083335, %v6984_v16  ;;  %v3239_v10 = vsel %vm2831_vm9, %v3238_v39, %v3234_v46  ;;  %v3155_v16 = vsel %vm2824_vm8, %v3154_v18, %v3150_v28  ;;  %v1986_v39 = vmul.f32 0.0052083335, %v1761_v61 }
 0x237   : > { %1920 = vadd.xlane.f32.xlu0 %v6837_v21  ;;  %v2030_v21 = vmul.f32 0.0052083335, %v6986_v30  ;;  %v2928_v30 = vsel %vm2838_vm10, %v2927_v40, %v2923_v51  ;;  %v1889_v17 = vpop.xlane.xlu1 %1888  ;;  %v1855_v32 = vpop.xlane.xlu0 %1854  ;;  %v3160_v29 = vsel %vm2831_vm9, %v3159_v48, %v3155_v16  ;;  %v2942_v53 = vrot.slane %v1985_v24, %v7041_v6 }
 0x238   : > { %v3248_v47 = vrot.slane %v2047_v56, %v7031_v52  ;;  %v2933_v60 = vsel %vm2845_vm11, %v2932_v15, %v2928_v30  ;;  %v2050_v35 = vmul.f32 0.0052083335, %v1889_v17  ;;  %v1969_v56 = vmul.f32 0.0052083335, %v1727_v22 }
 0x239   : > { %v3164_v54 = vrot.slane %v2030_v21, %v7028_v33  ;;  %v2938_v21 = vsel %vm2852_vm12, %v2937_v38, %v2933_v60  ;;  %v2851_v61 = vrot.slane %v1968_v26, %v7038_v5  ;;  %v3258_v28 = vrot.slane %v2049_v45, %v7041_v6 }
 0x23a   : > { %1922 = vadd.xlane.f32.xlu1 %v6847_v37  ;;  %v2048_v37 = vmul.f32 0.0052083335, %v7009_v13  ;;  %v2839_v13 = vsel %vm2838_vm10, %v2837_v19, %v2832_v4  ;;  %v2033_v51 = vmul.f32 0.0052083335, %v1855_v32  ;;  %v2947_v48 = vrot.slane %v1986_v39, %v7051_v63 }
 0x23b   : > { %1794 = vadd.xlane.f32.xlu0 %v6849_v58  ;;  %v3244_v58 = vsel %vm2838_vm10, %v3243_v8, %v3239_v10  ;;  %v1763_v18 = vpop.xlane.xlu1 %1762  ;;  %v1729_v40 = vpop.xlane.xlu0 %1728  ;;  %v3165_v1 = vsel %vm2838_vm10, %v3164_v54, %v3160_v29  ;;  %v2846_v8 = vsel %vm2845_vm11, %v2844_v59, %v2839_v13  ;;  %v3263_v42 = vrot.slane %v2050_v35, %v7051_v63  ;;  %v2350_v29 = vld [vmem:[#allocation7 + $0x850] sm:$0xff]  ;;  %v2357_v13 = vld [vmem:[#allocation7 + $0x888] sm:$0xff] }
 0x23c   : > { %v3249_v14 = vsel %vm2845_vm11, %v3248_v47, %v3244_v58  ;;  %v3253_v12 = vrot.slane %v2048_v37, %v7038_v5  ;;  %v1987_v46 = vmul.f32 0.0052083335, %v1763_v18  ;;  %v1970_v10 = vmul.f32 0.0052083335, %v1729_v40  ;;  %v2342_v58 = vld [vmem:[#allocation7 + $0x810] sm:$0xff]  ;;  %v2365_v59 = vld [vmem:[#allocation7 + $0x8c8] sm:$0xff] }
 0x23d   : > { %v3170_v19 = vsel %vm2845_vm11, %v3169_v49, %v3165_v1  ;;  %v2943_v43 = vsel %vm2859_vm13, %v2942_v53, %v2938_v21  ;;  %v3174_v17 = vrot.slane %v2032_v34, %v7038_v5  ;;  %v2858_v32 = vrot.slane %v1969_v56, %v7041_v6  ;;  %v2367_v1 = vld [vmem:[#allocation7 + $0x8d8] sm:$0xff] }
 0x23e   : > { %v3254_v16 = vsel %vm2852_vm12, %v3253_v12, %v3249_v14  ;;  %v2952_v0 = vrot.slane %v1987_v46, %v7058_v7  ;;  %v2853_v4 = vsel %vm2852_vm12, %v2851_v61, %v2846_v8  ;;  %v3179_v54 = vrot.slane %v2033_v51, %v7041_v6  ;;  %v2359_v14 = vld [vmem:[#allocation7 + $0x898] sm:$0xff]  ;;  %v2356_v61 = vld [vmem:[#allocation7 + $0x880] sm:$0xff] }
 0x23f   : > { %v3259_v47 = vsel %vm2859_vm13, %v3258_v28, %v3254_v16  ;;  %v2948_v50 = vsel %vm2866_vm14, %v2947_v48, %v2943_v43  ;;  %v2865_v60 = vrot.slane %v1970_v10, %v7051_v63  ;;  %v3175_v12 = vsel %vm2852_vm12, %v3174_v17, %v3170_v19  ;;  %v2366_v16 = vld [vmem:[#allocation7 + $0x8d0] sm:$0xff]  ;;  %v2373_v43 = vld [vmem:[#allocation7 + $0x908] sm:$0xff] }
 0x240   : > { %v3264_v24 = vsel %vm2866_vm14, %v3263_v42, %v3259_v47  ;;  %v2953_v18 = vsel %vm2873_vm15, %v2952_v0, %v2948_v50  ;;  %v2860_v46 = vsel %vm2859_vm13, %v2858_v32, %v2853_v4  ;;  %v4900_v53 = vpack.c.bf16 %v2350_v29, %v2342_v58  ;;  %v2381_v17 = vld [vmem:[#allocation7 + $0x948] sm:$0xff]  ;;  %v2375_v4 = vld [vmem:[#allocation7 + $0x918] sm:$0xff]  ;;  %v2372_v58 = vld [vmem:[#allocation7 + $0x900] sm:$0xff] }
 0x241   : > { %v1891_v15 = vpop.xlane.xlu1 %1890  ;;  %v1857_v20 = vpop.xlane.xlu0 %1856  ;;  %v3180_v34 = vsel %vm2859_vm13, %v3179_v54, %v3175_v12  ;;  %v2867_v28 = vsel %vm2866_vm14, %v2865_v60, %v2860_v46  ;;  %v4774_v42 = vpack.c.bf16 %v2365_v59, %v2357_v13  ;;  %v4902_v10 = vpack.c.bf16 %v2367_v1, %v2359_v14  ;;  %v2383_v47 = vld [vmem:[#allocation7 + $0x958] sm:$0xff]  ;;  %v2382_v13 = vld [vmem:[#allocation7 + $0x950] sm:$0xff]  ;;  %v2397_v14 = vld [vmem:[#allocation7 + $0x9c8] sm:$0xff] }
 0x242   : > { %v2051_v22 = vmul.f32 0.0052083335, %v1891_v15  ;;  %v2034_v30 = vmul.f32 0.0052083335, %v1857_v20  ;;  %v2364_v15 = vld [vmem:[#allocation7 + $0x8c0] sm:$0xff]  ;;  %v2358_v20 = vld [vmem:[#allocation7 + $0x890] sm:$0xff] }
 0x243   : > { %v4904_v60 = vpack.c.bf16 %v2366_v16, %v2358_v20  ;;  %v2391_v1 = vld [vmem:[#allocation7 + $0x998] sm:$0xff]  ;;  %v2413_v20 = vld [vmem:[#allocation7 + $0xa48] sm:$0xff] }
 0x244   : > { %v3268_v37 = vrot.slane %v2051_v22, %v7058_v7  ;;  %v3184_v38 = vrot.slane %v2034_v30, %v7051_v63  ;;  %v2407_v16 = vld [vmem:[#allocation7 + $0xa18] sm:$0xff] }
 0x246   : > { %v3269_v40 = vsel %vm2873_vm15, %v3268_v37, %v3264_v24  ;;  %v3185_v51 = vsel %vm2866_vm14, %v3184_v38, %v3180_v34  ;;  %v4776_v24 = vpack.c.bf16 %v2364_v15, %v2356_v61  ;;  %v4778_v38 = vpack.c.bf16 %v2381_v17, %v2373_v43  ;;  %v2396_v61 = vld [vmem:[#allocation7 + $0x9c0] sm:$0xff]  ;;  %v2405_v15 = vld [vmem:[#allocation7 + $0xa08] sm:$0xff] }
 0x247   : > { %v1859_v26 = vpop.xlane.xlu1 %1858  ;;  %v7160_v49 = vsel %vm3428_vm0, %v3269_v40, %v2953_v18  ;;  %v4906_v18 = vpack.c.bf16 %v2383_v47, %v2375_v4  ;;  %v2389_v40 = vld [vmem:[#allocation7 + $0x988] sm:$0xff]  ;;  %v2404_v47 = vld [vmem:[#allocation7 + $0xa00] sm:$0xff] }
 0x248   : > { %v1731_v45 = vpop.xlane.xlu0 %1730  ;;  %v2035_v39 = vmul.f32 0.0052083335, %v1859_v26  ;;  %3501 = vmatprep.mubr.f32.mxu0 %v7160_v49  ;;  %3643 = vmatprep.mubr.f32.mxu1 %v7160_v49  ;;  %v2380_v26 = vld [vmem:[#allocation7 + $0x940] sm:$0xff] }
 0x249   : > { %v1971_v35 = vmul.f32 0.0052083335, %v1731_v45  ;;  %v2374_v45 = vld [vmem:[#allocation7 + $0x910] sm:$0xff] }
 0x24a   : > { %v3189_v56 = vrot.slane %v2035_v39, %v7058_v7  ;;  %v4908_v34 = vpack.c.bf16 %v2382_v13, %v2374_v45  ;;  %v2423_v45 = vld [vmem:[#allocation7 + $0xa98] sm:$0xff] }
 0x24b   : > { %v2872_v21 = vrot.slane %v1971_v35, %v7058_v7  ;;  %v1799_v8 = vpop.xlane.xlu1 %1798  ;;  %v2431_v13 = vld [vmem:[#allocation7 + $0xad8] sm:$0xff] }
 0x24c   : > { %v1797_v48 = vpop.xlane.xlu0 %1796  ;;  %v2005_v0 = vmul.f32 0.0052083335, %v1799_v8  ;;  %v3190_v19 = vsel %vm2873_vm15, %v3189_v56, %v3185_v51  ;;  %v4782_v56 = vpack.c.bf16 %v2397_v14, %v2389_v40  ;;  %v2428_v40 = vld [vmem:[#allocation7 + $0xac0] sm:$0xff]  ;;  %v2422_v14 = vld [vmem:[#allocation7 + $0xa90] sm:$0xff] }
 0x24d   : > { %v2004_v22 = vmul.f32 0.0052083335, %v1797_v48  ;;  %v2874_v30 = vsel %vm2873_vm15, %v2872_v21, %v2867_v28  ;;  %v2388_v21 = vld [vmem:[#allocation7 + $0x980] sm:$0xff]  ;;  %v2390_v28 = vld [vmem:[#allocation7 + $0x990] sm:$0xff] }
 0x24e   : > { %v7172_v32 = vsel %vm3428_vm0, %v3190_v19, %v2874_v30  ;;  %v3040_v54 = vrot.slane %v2005_v0, %v6862_v31  ;;  %v2415_v0 = vld [vmem:[#allocation7 + $0xa58] sm:$0xff]  ;;  %v4784_v17 = vpack.c.bf16 %v2396_v61, %v2388_v21 }
 0x24f   : > { %v3036_v37 = vrot.slane %v2004_v22, %v6859_v2  ;;  %3502 = vmatmul.mubr.f32.vlgmr.msra.gmra.mrb[0].mxu0 %v7172_v32  ;;  %3644 = vmatmul.mubr.f32.vlgmr.msra.gmra.mrb[0].mxu1 %v7172_v32  ;;  %v1927_v29 = vpop.xlane.xlu1 %1926 }
 0x250   : > { %v1925_v50 = vpop.xlane.xlu0 %1924  ;;  %4773 = vmatpush1.bf16.msra.mxu0 %v4772_v23  ;;  %4901 = vmatpush1.bf16.msra.mxu1 %v4900_v53  ;;  %v2069_v39 = vmul.f32 0.0052083335, %v1927_v29  ;;  %v4780_v53 = vpack.c.bf16 %v2380_v26, %v2372_v58  ;;  %v2429_v26 = vld [vmem:[#allocation7 + $0xac8] sm:$0xff] }
 0x251   : > { %v7182_v59 = vsel %vm2775_vm1, %v3040_v54, %v3036_v37  ;;  %v2068_v35 = vmul.f32 0.0052083335, %v1925_v50  ;;  %4775 = vmatprep.subr.bf16.mxu0 %v4774_v42  ;;  %4903 = vmatprep.subr.bf16.mxu1 %v4902_v10  ;;  %v4910_v42 = vpack.c.bf16 %v2399_v57, %v2391_v1  ;;  %v2398_v10 = vld [vmem:[#allocation7 + $0x9d0] sm:$0xff]  ;;  %v2412_v54 = vld [vmem:[#allocation7 + $0xa40] sm:$0xff]  ;;  %v4786_v50 = vpack.c.bf16 %v2413_v20, %v2405_v15 }
 0x252   : > { %v3356_v41 = vrot.slane %v2069_v39, %v6862_v31  ;;  %v4912_v4 = vpack.c.bf16 %v2398_v10, %v2390_v28  ;;  %v2406_v37 = vld [vmem:[#allocation7 + $0xa10] sm:$0xff]  ;;  %v4918_v28 = vpack.c.bf16 %v2431_v13, %v2423_v45  ;;  %v2452_v45 = vld [vmem:[#allocation7 + $0xb80] sm:$0xff] }
 0x253   : > { %v3352_v23 = vrot.slane %v2068_v35, %v6859_v2  ;;  %v1767_v12 = vpop.xlane.xlu1 %1766  ;;  %v2460_v13 = vld [vmem:[#allocation7 + $0xbc0] sm:$0xff] }
 0x254   : > { %v1765_v46 = vpop.xlane.xlu0 %1764  ;;  %4777 = vmatpush1.bf16.msra.mxu0 %v4776_v24  ;;  %4905 = vmatpush1.bf16.msra.mxu1 %v4904_v60  ;;  %v1989_v8 = vmul.f32 0.0052083335, %v1767_v12  ;;  %v4914_v24 = vpack.c.bf16 %v2415_v0, %v2407_v16  ;;  %v2414_v60 = vld [vmem:[#allocation7 + $0xa50] sm:$0xff]  ;;  %v2436_v16 = vld [vmem:[#allocation7 + $0xb00] sm:$0xff] }
 0x255   : > { %v7187_v51 = vsel %vm2775_vm1, %v3356_v41, %v3352_v23  ;;  %v1988_v48 = vmul.f32 0.0052083335, %v1765_v46  ;;  %4779 = vmatprep.subr.bf16.mxu0 %v4778_v38  ;;  %4907 = vmatprep.subr.bf16.mxu1 %v4906_v18  ;;  %v2421_v38 = vld [vmem:[#allocation7 + $0xa88] sm:$0xff]  ;;  %v2420_v18 = vld [vmem:[#allocation7 + $0xa80] sm:$0xff]  ;;  %v4788_v41 = vpack.c.bf16 %v2412_v54, %v2404_v47  ;;  %v4916_v23 = vpack.c.bf16 %v2414_v60, %v2406_v37  ;;  %v2430_v46 = vld [vmem:[#allocation7 + $0xad0] sm:$0xff] }
 0x256   : > { %v2961_v22 = vrot.slane %v1989_v8, %v6862_v31  ;;  %v4790_v12 = vpack.c.bf16 %v2429_v26, %v2421_v38  ;;  %v2439_v8 = vld [vmem:[#allocation7 + $0xb18] sm:$0xff]  ;;  %v4792_v20 = vpack.c.bf16 %v2428_v40, %v2420_v18  ;;  %v2444_v0 = vld [vmem:[#allocation7 + $0xb40] sm:$0xff]  ;;  %v2453_v47 = vld [vmem:[#allocation7 + $0xb88] sm:$0xff] }
 0x257   : > { %v2957_v30 = vrot.slane %v1988_v48, %v6859_v2  ;;  %v1893_v19 = vpop.xlane.xlu1 %1892  ;;  %v2447_v48 = vld [vmem:[#allocation7 + $0xb58] sm:$0xff]  ;;  %v2461_v54 = vld [vmem:[#allocation7 + $0xbc8] sm:$0xff]  ;;  %v4796_v26 = vpack.c.bf16 %v2444_v0, %v2436_v16  ;;  %v2478_v0 = vld [vmem:[#allocation7 + $0xc50] sm:$0xff] }
 0x258   : > { %v1801_v43 = vpop.xlane.xlu0 %1800  ;;  %4781 = vmatpush1.bf16.msra.mxu0 %v4780_v53  ;;  %4909 = vmatpush1.bf16.msra.mxu1 %v4908_v34  ;;  %v2052_v39 = vmul.f32 0.0052083335, %v1893_v19  ;;  %v2437_v53 = vld [vmem:[#allocation7 + $0xb08] sm:$0xff]  ;;  %v4798_v40 = vpack.c.bf16 %v2461_v54, %v2453_v47 }
 0x259   : > { %v7192_v58 = vsel %vm2775_vm1, %v2961_v22, %v2957_v30  ;;  %v2006_v29 = vmul.f32 0.0052083335, %v1801_v43  ;;  %4783 = vmatprep.subr.bf16.mxu0 %v4782_v56  ;;  %4911 = vmatprep.subr.bf16.mxu1 %v4910_v42  ;;  %v2445_v34 = vld [vmem:[#allocation7 + $0xb48] sm:$0xff]  ;;  %v2438_v22 = vld [vmem:[#allocation7 + $0xb10] sm:$0xff] }
 0x25a   : > { %v3273_v42 = vrot.slane %v2052_v39, %v6859_v2  ;;  %v4794_v43 = vpack.c.bf16 %v2445_v34, %v2437_v53  ;;  %v2454_v39 = vld [vmem:[#allocation7 + $0xb90] sm:$0xff]  ;;  %v2471_v34 = vld [vmem:[#allocation7 + $0xc18] sm:$0xff] }
 0x25b   : > { %v3045_v35 = vrot.slane %v2006_v29, %v6874_v36  ;;  %v1929_v1 = vpop.xlane.xlu1 %1928 }
 0x25c   : > { %v1895_v57 = vpop.xlane.xlu0 %1894  ;;  %4785 = vmatpush1.bf16.msra.mxu0 %v4784_v17  ;;  %4913 = vmatpush1.bf16.msra.mxu1 %v4912_v4  ;;  %v2070_v21 = vmul.f32 0.0052083335, %v1929_v1  ;;  %v4922_v17 = vpack.c.bf16 %v2447_v48, %v2439_v8  ;;  %v2446_v4 = vld [vmem:[#allocation7 + $0xb50] sm:$0xff]  ;;  %v4800_v8 = vpack.c.bf16 %v2460_v13, %v2452_v45  ;;  %v2468_v48 = vld [vmem:[#allocation7 + $0xc00] sm:$0xff]  ;;  %v2501_v13 = vld [vmem:[#allocation7 + $0xd08] sm:$0xff] }
 0x25d   : > { %v3046_v56 = vsel %vm2782_vm2, %v3045_v35, %v7182_v59  ;;  %v2053_v61 = vmul.f32 0.0052083335, %v1895_v57  ;;  %4787 = vmatprep.subr.bf16.mxu0 %v4786_v50  ;;  %4915 = vmatprep.subr.bf16.mxu1 %v4914_v24  ;;  %v4920_v59 = vpack.c.bf16 %v2430_v46, %v2422_v14  ;;  %v2455_v50 = vld [vmem:[#allocation7 + $0xb98] sm:$0xff]  ;;  %v2462_v1 = vld [vmem:[#allocation7 + $0xbd0] sm:$0xff]  ;;  %v2469_v57 = vld [vmem:[#allocation7 + $0xc08] sm:$0xff] }
 0x25e   : > { %v3361_v10 = vrot.slane %v2070_v21, %v6874_v36  ;;  %v2463_v24 = vld [vmem:[#allocation7 + $0xbd8] sm:$0xff]  ;;  %v2494_v45 = vld [vmem:[#allocation7 + $0xcd0] sm:$0xff] }
 0x25f   : > { %v3277_v15 = vrot.slane %v2053_v61, %v6862_v31  ;;  %v1803_v30 = vpop.xlane.xlu1 %1802  ;;  %v4926_v14 = vpack.c.bf16 %v2463_v24, %v2455_v50  ;;  %v2479_v21 = vld [vmem:[#allocation7 + $0xc58] sm:$0xff]  ;;  %v2492_v50 = vld [vmem:[#allocation7 + $0xcc0] sm:$0xff]  ;;  %v2486_v24 = vld [vmem:[#allocation7 + $0xc90] sm:$0xff] }
 0x260   : > { %v1769_v19 = vpop.xlane.xlu0 %1768  ;;  %4789 = vmatpush1.bf16.msra.mxu0 %v4788_v41  ;;  %4917 = vmatpush1.bf16.msra.mxu1 %v4916_v23  ;;  %v3362_v2 = vsel %vm2782_vm2, %v3361_v10, %v7187_v51  ;;  %v2007_v31 = vmul.f32 0.0052083335, %v1803_v30  ;;  %v4924_v51 = vpack.c.bf16 %v2446_v4, %v2438_v22  ;;  %v2477_v41 = vld [vmem:[#allocation7 + $0xc48] sm:$0xff]  ;;  %v2470_v10 = vld [vmem:[#allocation7 + $0xc10] sm:$0xff]  ;;  %v4930_v16 = vpack.c.bf16 %v2479_v21, %v2471_v34  ;;  %v2495_v4 = vld [vmem:[#allocation7 + $0xcd8] sm:$0xff] }
 0x261   : > { %v3278_v37 = vsel %vm2775_vm1, %v3277_v15, %v3273_v42  ;;  %v1990_v29 = vmul.f32 0.0052083335, %v1769_v19  ;;  %4791 = vmatprep.subr.bf16.mxu0 %v4790_v12  ;;  %4919 = vmatprep.subr.bf16.mxu1 %v4918_v28  ;;  %v2476_v42 = vld [vmem:[#allocation7 + $0xc40] sm:$0xff]  ;;  %v2485_v22 = vld [vmem:[#allocation7 + $0xc88] sm:$0xff]  ;;  %v2502_v21 = vld [vmem:[#allocation7 + $0xd10] sm:$0xff]  ;;  %vm4453_vm1 = vcmask 0  }
 0x262   : > { %v3050_v60 = vrot.slane %v2007_v31, %v6881_v27  ;;  %v2493_v30 = vld [vmem:[#allocation7 + $0xcc8] sm:$0xff]  ;;  %v4804_v31 = vpack.c.bf16 %v2476_v42, %v2468_v48  ;;  %v2508_v34 = vld [vmem:[#allocation7 + $0xd40] sm:$0xff]  ;;  %v2510_v48 = vld [vmem:[#allocation7 + $0xd50] sm:$0xff] }
 0x263   : > { %v2966_v38 = vrot.slane %v1990_v29, %v6874_v36  ;;  %v1931_v35 = vpop.xlane.xlu1 %1930  ;;  %v2484_v29 = vld [vmem:[#allocation7 + $0xc80] sm:$0xff]  ;;  %v2517_v42 = vld [vmem:[#allocation7 + $0xd88] sm:$0xff] }
 0x264   : > { %v1897_v18 = vpop.xlane.xlu0 %1896  ;;  %4793 = vmatpush1.bf16.msra.mxu0 %v4792_v20  ;;  %4921 = vmatpush1.bf16.msra.mxu1 %v4920_v59  ;;  %v3051_v23 = vsel %vm2789_vm3, %v3050_v60, %v3046_v56  ;;  %v2071_v46 = vmul.f32 0.0052083335, %v1931_v35  ;;  %v4928_v56 = vpack.c.bf16 %v2462_v1, %v2454_v39  ;;  %v2509_v39 = vld [vmem:[#allocation7 + $0xd48] sm:$0xff]  ;;  %v2511_v1 = vld [vmem:[#allocation7 + $0xd58] sm:$0xff] }
 0x265   : > { %v2967_v12 = vsel %vm2782_vm2, %v2966_v38, %v7192_v58  ;;  %v2054_v53 = vmul.f32 0.0052083335, %v1897_v18  ;;  %4795 = vmatprep.subr.bf16.mxu0 %v4794_v43  ;;  %4923 = vmatprep.subr.bf16.mxu1 %v4922_v17  ;;  %v4802_v58 = vpack.c.bf16 %v2477_v41, %v2469_v57  ;;  %v2487_v17 = vld [vmem:[#allocation7 + $0xc98] sm:$0xff] }
 0x266   : > { %v3366_v61 = vrot.slane %v2071_v46, %v6881_v27  ;;  %v4808_v46 = vpack.c.bf16 %v2492_v50, %v2484_v29  ;;  %v2533_v29 = vld [vmem:[#allocation7 + $0xe08] sm:$0xff] }
 0x267   : > { %v3282_v28 = vrot.slane %v2054_v53, %v6874_v36  ;;  %v1805_v15 = vpop.xlane.xlu1 %1804  ;;  %v2500_v53 = vld [vmem:[#allocation7 + $0xd00] sm:$0xff]  ;;  %v2541_v50 = vld [vmem:[#allocation7 + $0xe48] sm:$0xff] }
 0x268   : > { %v1771_v20 = vpop.xlane.xlu0 %1770  ;;  %4797 = vmatpush1.bf16.msra.mxu0 %v4796_v26  ;;  %4925 = vmatpush1.bf16.msra.mxu1 %v4924_v51  ;;  %v3367_v19 = vsel %vm2789_vm3, %v3366_v61, %v3362_v2  ;;  %v2008_v43 = vmul.f32 0.0052083335, %v1805_v15  ;;  %v4932_v2 = vpack.c.bf16 %v2478_v0, %v2470_v10  ;;  %v4934_v26 = vpack.c.bf16 %v2495_v4, %v2487_v17  ;;  %v2525_v10 = vld [vmem:[#allocation7 + $0xdc8] sm:$0xff]  ;;  %v2518_v17 = vld [vmem:[#allocation7 + $0xd90] sm:$0xff] }
 0x269   : > { %v3283_v59 = vsel %vm2782_vm2, %v3282_v28, %v3278_v37  ;;  %v1991_v36 = vmul.f32 0.0052083335, %v1771_v20  ;;  %4799 = vmatprep.subr.bf16.mxu0 %v4798_v40  ;;  %4927 = vmatprep.subr.bf16.mxu1 %v4926_v14  ;;  %v4806_v37 = vpack.c.bf16 %v2493_v30, %v2485_v22  ;;  %v2503_v14 = vld [vmem:[#allocation7 + $0xd18] sm:$0xff]  ;;  %v4812_v30 = vpack.c.bf16 %v2508_v34, %v2500_v53 }
 0x26a   : > { %v3055_v47 = vrot.slane %v2008_v43, %v6896_v55  ;;  %v2516_v43 = vld [vmem:[#allocation7 + $0xd80] sm:$0xff] }
 0x26b   : > { %v2971_v54 = vrot.slane %v1991_v36, %v6881_v27  ;;  %v1933_v60 = vpop.xlane.xlu1 %1932  ;;  %v2524_v36 = vld [vmem:[#allocation7 + $0xdc0] sm:$0xff] }
 0x26c   : > { %v1899_v38 = vpop.xlane.xlu0 %1898  ;;  %4801 = vmatpush1.bf16.msra.mxu0 %v4800_v8  ;;  %4929 = vmatpush1.bf16.msra.mxu1 %v4928_v56  ;;  %v3056_v35 = vsel %vm2796_vm4, %v3055_v47, %v3051_v23  ;;  %v2072_v51 = vmul.f32 0.0052083335, %v1933_v60  ;;  %v4936_v23 = vpack.c.bf16 %v2494_v45, %v2486_v24  ;;  %v4938_v8 = vpack.c.bf16 %v2511_v1, %v2503_v14 }
 0x26d   : > { %v2972_v18 = vsel %vm2789_vm3, %v2971_v54, %v2967_v12  ;;  %v2055_v40 = vmul.f32 0.0052083335, %v1899_v38  ;;  %4803 = vmatprep.subr.bf16.mxu0 %v4802_v58  ;;  %4931 = vmatprep.subr.bf16.mxu1 %v4930_v16  ;;  %v4810_v12 = vpack.c.bf16 %v2509_v39, %v2501_v13  ;;  %v2519_v58 = vld [vmem:[#allocation7 + $0xd98] sm:$0xff]  ;;  %v4816_v39 = vpack.c.bf16 %v2524_v36, %v2516_v43  ;;  %v2550_v43 = vld [vmem:[#allocation7 + $0xe90] sm:$0xff] }
 0x26e   : > { %v3371_v57 = vrot.slane %v2072_v51, %v6896_v55  ;;  %v2527_v16 = vld [vmem:[#allocation7 + $0xdd8] sm:$0xff]  ;;  %v2532_v51 = vld [vmem:[#allocation7 + $0xe00] sm:$0xff]  ;;  %v2558_v36 = vld [vmem:[#allocation7 + $0xed0] sm:$0xff] }
 0x26f   : > { %v3287_v41 = vrot.slane %v2055_v40, %v6881_v27  ;;  %v1807_v61 = vpop.xlane.xlu1 %1806  ;;  %v4942_v54 = vpack.c.bf16 %v2527_v16, %v2519_v58  ;;  %v2556_v58 = vld [vmem:[#allocation7 + $0xec0] sm:$0xff] }
 0x270   : > { %v1773_v28 = vpop.xlane.xlu0 %1772  ;;  %4805 = vmatpush1.bf16.msra.mxu0 %v4804_v31  ;;  %4933 = vmatpush1.bf16.msra.mxu1 %v4932_v2  ;;  %v3372_v15 = vsel %vm2796_vm4, %v3371_v57, %v3367_v19  ;;  %v2009_v56 = vmul.f32 0.0052083335, %v1807_v61  ;;  %v4940_v19 = vpack.c.bf16 %v2510_v48, %v2502_v21  ;;  %v2526_v31 = vld [vmem:[#allocation7 + $0xdd0] sm:$0xff] }
 0x271   : > { %v3288_v20 = vsel %vm2789_vm3, %v3287_v41, %v3283_v59  ;;  %v1992_v27 = vmul.f32 0.0052083335, %v1773_v28  ;;  %4807 = vmatprep.subr.bf16.mxu0 %v4806_v37  ;;  %4935 = vmatprep.subr.bf16.mxu1 %v4934_v26  ;;  %v4814_v59 = vpack.c.bf16 %v2525_v10, %v2517_v42  ;;  %v2535_v37 = vld [vmem:[#allocation7 + $0xe18] sm:$0xff]  ;;  %v4944_v1 = vpack.c.bf16 %v2526_v31, %v2518_v17  ;;  %v2534_v41 = vld [vmem:[#allocation7 + $0xe10] sm:$0xff]  ;;  %v2557_v28 = vld [vmem:[#allocation7 + $0xec8] sm:$0xff] }
 0x272   : > { %v3060_v0 = vrot.slane %v2009_v56, %v6908_v9  ;;  %v2543_v26 = vld [vmem:[#allocation7 + $0xe58] sm:$0xff]  ;;  %v2565_v17 = vld [vmem:[#allocation7 + $0xf08] sm:$0xff] }
 0x273   : > { %v2976_v22 = vrot.slane %v1992_v27, %v6896_v55  ;;  %v1935_v4 = vpop.xlane.xlu1 %1934  ;;  %v4946_v57 = vpack.c.bf16 %v2543_v26, %v2535_v37  ;;  %v2548_v27 = vld [vmem:[#allocation7 + $0xe80] sm:$0xff]  ;;  %v2566_v26 = vld [vmem:[#allocation7 + $0xf10] sm:$0xff] }
 0x274   : > { %v1901_v47 = vpop.xlane.xlu0 %1900  ;;  %4809 = vmatpush1.bf16.msra.mxu0 %v4808_v46  ;;  %4937 = vmatpush1.bf16.msra.mxu1 %v4936_v23  ;;  %v3061_v24 = vsel %vm2803_vm5, %v3060_v0, %v3056_v35  ;;  %v2073_v38 = vmul.f32 0.0052083335, %v1935_v4  ;;  %v4818_v35 = vpack.c.bf16 %v2541_v50, %v2533_v29  ;;  %v2542_v46 = vld [vmem:[#allocation7 + $0xe50] sm:$0xff]  ;;  %v2551_v23 = vld [vmem:[#allocation7 + $0xe98] sm:$0xff]  ;;  %v2573_v4 = vld [vmem:[#allocation7 + $0xf48] sm:$0xff]  ;;  %v4824_v29 = vpack.c.bf16 %v2556_v58, %v2548_v27 }
 0x275   : > { %v2977_v60 = vsel %vm2796_vm4, %v2976_v22, %v2972_v18  ;;  %v2056_v2 = vmul.f32 0.0052083335, %v1901_v47  ;;  %4811 = vmatprep.subr.bf16.mxu0 %v4810_v12  ;;  %4939 = vmatprep.subr.bf16.mxu1 %v4938_v8  ;;  %v2540_v18 = vld [vmem:[#allocation7 + $0xe40] sm:$0xff]  ;;  %v2559_v12 = vld [vmem:[#allocation7 + $0xed8] sm:$0xff]  ;;  %v4948_v56 = vpack.c.bf16 %v2542_v46, %v2534_v41  ;;  %v4952_v50 = vpack.c.bf16 %v2558_v36, %v2550_v43 }
 0x276   : > { %v3376_v45 = vrot.slane %v2073_v38, %v6908_v9  ;;  %v2567_v47 = vld [vmem:[#allocation7 + $0xf18] sm:$0xff] }
 0x277   : > { %v3292_v13 = vrot.slane %v2056_v2, %v6896_v55  ;;  %v1809_v40 = vpop.xlane.xlu1 %1808  ;;  %v2549_v55 = vld [vmem:[#allocation7 + $0xe88] sm:$0xff]  ;;  %v4826_v2 = vpack.c.bf16 %v2573_v4, %v2565_v17 }
 0x278   : > { %v1775_v14 = vpop.xlane.xlu0 %1774  ;;  %4813 = vmatpush1.bf16.msra.mxu0 %v4812_v30  ;;  %4941 = vmatpush1.bf16.msra.mxu1 %v4940_v19  ;;  %v7227_v53 = vsel %vm2803_vm5, %v3376_v45, %v3372_v15  ;;  %v2010_v21 = vmul.f32 0.0052083335, %v1809_v40  ;;  %v4820_v15 = vpack.c.bf16 %v2540_v18, %v2532_v51  ;;  %v4950_v30 = vpack.c.bf16 %v2559_v12, %v2551_v23  ;;  %v2575_v19 = vld [vmem:[#allocation7 + $0xf58] sm:$0xff]  ;;  %v2574_v45 = vld [vmem:[#allocation7 + $0xf50] sm:$0xff]  ;;  %v2588_v18 = vld [vmem:[#allocation7 + $0xfc0] sm:$0xff] }
 0x279   : > { %v3293_v34 = vsel %vm2796_vm4, %v3292_v13, %v3288_v20  ;;  %v1993_v61 = vmul.f32 0.0052083335, %v1775_v14  ;;  %4815 = vmatprep.subr.bf16.mxu0 %v4814_v59  ;;  %4943 = vmatprep.subr.bf16.mxu1 %v4942_v54  ;;  %v4822_v20 = vpack.c.bf16 %v2557_v28, %v2549_v55  ;;  %v4954_v37 = vpack.c.bf16 %v2575_v19, %v2567_v47  ;;  %v2589_v13 = vld [vmem:[#allocation7 + $0xfc8] sm:$0xff]  ;;  %v2591_v51 = vld [vmem:[#allocation7 + $0xfd8] sm:$0xff] }
 0x27a   : > { %v3065_v8 = vrot.slane %v2010_v21, %v6920_v44  ;;  %v2590_v21 = vld [vmem:[#allocation7 + $0xfd0] sm:$0xff]  ;;  %v2097_v55 = vld [vmem:[#allocation7 + $0x68] sm:$0xff]  ;;  %v2091_v28 = vld [vmem:[#allocation7 + $0x38] sm:$0xff] }
 0x27b   : > { %v2981_v48 = vrot.slane %v1993_v61, %v6908_v9  ;;  %v7232_v42 = vpop.xlane.xlu1 %1936  ;;  %v2089_v61 = vld [vmem:[#allocation7 + $0x28] sm:$0xff]  ;;  %v2099_v23 = vld [vmem:[#allocation7 + $0x78] sm:$0xff] }
 0x27c   : > { %v1903_v10 = vpop.xlane.xlu0 %1902  ;;  %4817 = vmatpush1.bf16.msra.mxu0 %v4816_v39  ;;  %4945 = vmatpush1.bf16.msra.mxu1 %v4944_v1  ;;  %v7235_v16 = vsel %vm2810_vm6, %v3065_v8, %v3061_v24  ;;  %v2564_v24 = vld [vmem:[#allocation7 + $0xf00] sm:$0xff]  ;;  %v2583_v39 = vld [vmem:[#allocation7 + $0xf98] sm:$0xff] }
 0x27d   : > { %v7238_v0 = vsel %vm2803_vm5, %v2981_v48, %v2977_v60  ;;  %v2057_v22 = vmul.f32 0.0052083335, %v1903_v10  ;;  %4819 = vmatprep.subr.bf16.mxu0 %v4818_v35  ;;  %4947 = vmatprep.subr.bf16.mxu1 %v4946_v57  ;;  %v2572_v60 = vld [vmem:[#allocation7 + $0xf40] sm:$0xff]  ;;  %v4956_v35 = vpack.c.bf16 %v2574_v45, %v2566_v26  ;;  %v4958_v46 = vpack.c.bf16 %v2591_v51, %v2583_v39 }
 0x27e   : > { %v4828_v1 = vpack.c.bf16 %v2572_v60, %v2564_v24  ;;  %v2580_v57 = vld [vmem:[#allocation7 + $0xf80] sm:$0xff] }
 0x27f   : > { %v3297_v59 = vrot.slane %v2057_v22, %v6908_v9  ;;  %v7241_v54 = vpop.xlane.xlu1 %1810  ;;  %v2581_v9 = vld [vmem:[#allocation7 + $0xf88] sm:$0xff]  ;;  %v4832_v48 = vpack.c.bf16 %v2588_v18, %v2580_v57 }
 0x280   : > { %v7243_v31 = vpop.xlane.xlu0 %1776  ;;  %4821 = vmatpush1.bf16.msra.mxu0 %v4820_v15  ;;  %4949 = vmatpush1.bf16.msra.mxu1 %v4948_v56  ;;  %v4830_v41 = vpack.c.bf16 %v2589_v13, %v2581_v9  ;;  %v4962_v15 = vpack.c.bf16 %v2097_v55, %v2089_v61  ;;  %v5090_v56 = vpack.c.bf16 %v2099_v23, %v2091_v28 }
 0x281   : > { %v7246_v38 = vsel %vm2803_vm5, %v3297_v59, %v3293_v34  ;;  %4823 = vmatprep.subr.bf16.mxu0 %v4822_v20  ;;  %4951 = vmatprep.subr.bf16.mxu1 %v4950_v30  ;;  %v2582_v34 = vld [vmem:[#allocation7 + $0xf90] sm:$0xff]  ;;  %v1994_v26 = vmul.f32 0.0052083335, %v7243_v31 }
 0x282   : > { %v4960_v10 = vpack.c.bf16 %v2590_v21, %v2582_v34 }
 0x283   : > { %v1939_v40 = vpop.xlane.xlu1 %1938  ;;  %v2986_v57 = vrot.slane %v1994_v26, %v6920_v44 }
 0x284   : > { %v1905_v14 = vpop.xlane.xlu0 %1904  ;;  %4825 = vmatpush1.bf16.msra.mxu0 %v4824_v29  ;;  %4953 = vmatpush1.bf16.msra.mxu1 %v4952_v50  ;;  %v2075_v13 = vmul.f32 0.0052083335, %v1939_v40 }
 0x285   : > { %4827 = vmatprep.subr.bf16.mxu0 %v4826_v2  ;;  %4955 = vmatprep.subr.bf16.mxu1 %v4954_v37  ;;  %v2074_v2 = vmul.f32 0.0052083335, %v7232_v42  ;;  %v2011_v37 = vmul.f32 0.0052083335, %v7241_v54  ;;  %v2058_v39 = vmul.f32 0.0052083335, %v1905_v14  ;;  %v2987_v23 = vsel %vm2810_vm6, %v2986_v57, %v7238_v0 }
 0x286   : > { %v3386_v54 = vrot.slane %v2075_v13, %v6998_v11 }
 0x287   : > { %v1813_v12 = vpop.xlane.xlu1 %1812  ;;  %v3381_v51 = vrot.slane %v2074_v2, %v6920_v44  ;;  %v3302_v31 = vrot.slane %v2058_v39, %v6920_v44 }
 0x288   : > { %v1779_v8 = vpop.xlane.xlu0 %1778  ;;  %4829 = vmatpush1.bf16.msra.mxu0 %v4828_v1  ;;  %4957 = vmatpush1.bf16.msra.mxu1 %v4956_v35  ;;  %v3070_v1 = vrot.slane %v2011_v37, %v6998_v11  ;;  %v2012_v35 = vmul.f32 0.0052083335, %v1813_v12 }
 0x289   : > { %4831 = vmatprep.subr.bf16.mxu0 %v4830_v41  ;;  %4959 = vmatprep.subr.bf16.mxu1 %v4958_v46  ;;  %v1995_v18 = vmul.f32 0.0052083335, %v1779_v8  ;;  %v3382_v40 = vsel %vm2810_vm6, %v3381_v51, %v7227_v53 }
 0x28a   : > { %v3071_v21 = vsel %vm2817_vm7, %v3070_v1, %v7235_v16  ;;  %v3075_v61 = vrot.slane %v2012_v35, %v7016_v25  ;;  %v3387_v53 = vsel %vm2817_vm7, %v3386_v54, %v3382_v40 }
 0x28b   : > { %v1941_v20 = vpop.xlane.xlu1 %1940  ;;  %v2991_v12 = vrot.slane %v1995_v18, %v6998_v11 }
 0x28c   : > { %v1907_v27 = vpop.xlane.xlu0 %1906  ;;  %4833 = vmatpush1.bf16.msra.mxu0 %v4832_v48  ;;  %4961 = vmatpush1.bf16.msra.mxu1 %v4960_v10  ;;  %v2076_v46 = vmul.f32 0.0052083335, %v1941_v20 }
 0x28d   : > { %4963 = vmatprep.subr.bf16.mxu0 %v4962_v15  ;;  %5091 = vmatprep.subr.bf16.mxu1 %v5090_v56  ;;  %v2059_v14 = vmul.f32 0.0052083335, %v1907_v27  ;;  %v3303_v15 = vsel %vm2810_vm6, %v3302_v31, %v7246_v38  ;;  %v2992_v2 = vsel %vm2817_vm7, %v2991_v12, %v2987_v23 }
 0x28e   : > { %v3391_v16 = vrot.slane %v2076_v46, %v7016_v25 }
 0x28f   : > { %v1815_v58 = vpop.xlane.xlu1 %1814  ;;  %v3307_v20 = vrot.slane %v2059_v14, %v6998_v11 }
 0x290   : > { %v1781_v22 = vpop.xlane.xlu0 %1780  ;;  %v2013_v34 = vmul.f32 0.0052083335, %v1815_v58  ;;  %v3392_v13 = vsel %vm2824_vm8, %v3391_v16, %v3387_v53 }
 0x291   : > { %v1996_v55 = vmul.f32 0.0052083335, %v1781_v22  ;;  %v3076_v22 = vsel %vm2824_vm8, %v3075_v61, %v3071_v21  ;;  %v3308_v51 = vsel %vm2817_vm7, %v3307_v20, %v3303_v15 }
 0x292   : > { %v3080_v27 = vrot.slane %v2013_v34, %v7022_v62 }
 0x293   : > { %v1943_v30 = vpop.xlane.xlu1 %1942 }
 0x294   : > { %v1909_v43 = vpop.xlane.xlu0 %1908  ;;  %v2077_v28 = vmul.f32 0.0052083335, %v1943_v30  ;;  %v2996_v30 = vrot.slane %v1996_v55, %v7016_v25  ;;  %v3081_v1 = vsel %vm2831_vm9, %v3080_v27, %v3076_v22 }
 0x295   : > { %v2060_v8 = vmul.f32 0.0052083335, %v1909_v43 }
 0x296   : > { %v3396_v43 = vrot.slane %v2077_v28, %v7022_v62 }
 0x297   : > { %v1817_v36 = vpop.xlane.xlu1 %1816  ;;  %v3312_v38 = vrot.slane %v2060_v8, %v7016_v25  ;;  %v2997_v25 = vsel %vm2824_vm8, %v2996_v30, %v2992_v2 }
 0x298   : > { %v1783_v17 = vpop.xlane.xlu0 %1782  ;;  %v2014_v44 = vmul.f32 0.0052083335, %v1817_v36 }
 0x299   : > { %v1997_v56 = vmul.f32 0.0052083335, %v1783_v17  ;;  %v3313_v54 = vsel %vm2824_vm8, %v3312_v38, %v3308_v51 }
 0x29a   : > { %v3085_v37 = vrot.slane %v2014_v44, %v7028_v33 }
 0x29b   : > { %v1945_v4 = vpop.xlane.xlu1 %1944 }
 0x29c   : > { %v1911_v47 = vpop.xlane.xlu0 %1910  ;;  %v2078_v58 = vmul.f32 0.0052083335, %v1945_v4  ;;  %v3001_v4 = vrot.slane %v1997_v56, %v7022_v62 }
 0x29d   : > { %v2061_v0 = vmul.f32 0.0052083335, %v1911_v47 }
 0x29e   : > { %v3002_v14 = vsel %vm2831_vm9, %v3001_v4, %v2997_v25 }
 0x29f   : > { %v1819_v19 = vpop.xlane.xlu1 %1818  ;;  %v3317_v35 = vrot.slane %v2061_v0, %v7022_v62 }
 0x2a0   : > { %v1785_v59 = vpop.xlane.xlu0 %1784  ;;  %v2015_v36 = vmul.f32 0.0052083335, %v1819_v19  ;;  %v3401_v19 = vrot.slane %v2078_v58, %v7028_v33 }
 0x2a1   : > { %v1998_v17 = vmul.f32 0.0052083335, %v1785_v59  ;;  %v3397_v59 = vsel %vm2831_vm9, %v3396_v43, %v3392_v13  ;;  %v3318_v61 = vsel %vm2831_vm9, %v3317_v35, %v3313_v54 }
 0x2a2   : > { %v3090_v57 = vrot.slane %v2015_v36, %v7031_v52 }
 0x2a3   : > { %v1947_v29 = vpop.xlane.xlu1 %1946 }
 0x2a4   : > { %v1913_v50 = vpop.xlane.xlu0 %1912  ;;  %v2079_v47 = vmul.f32 0.0052083335, %v1947_v29  ;;  %v3086_v29 = vsel %vm2838_vm10, %v3085_v37, %v3081_v1 }
 0x2a5   : > { %v2062_v39 = vmul.f32 0.0052083335, %v1913_v50  ;;  %v3006_v50 = vrot.slane %v1998_v17, %v7028_v33  ;;  %v3091_v23 = vsel %vm2845_vm11, %v3090_v57, %v3086_v29 }
 0x2a6   : > { %v3406_v62 = vrot.slane %v2079_v47, %v7031_v52 }
 0x2a7   : > { %v1821_v24 = vpop.xlane.xlu1 %1820  ;;  %v3322_v34 = vrot.slane %v2062_v39, %v7028_v33  ;;  %v3007_v44 = vsel %vm2838_vm10, %v3006_v50, %v3002_v14  ;;  %v2088_v50 = vld [vmem:[#allocation7 + $0x20] sm:$0xff] }
 0x2a8   : > { %v7248_v60 = vpop.xlane.xlu0 %1786  ;;  %v2016_v18 = vmul.f32 0.0052083335, %v1821_v24  ;;  %v3402_v24 = vsel %vm2838_vm10, %v3401_v19, %v3397_v59 }
 0x2a9   : > { %v1999_v31 = vmul.f32 0.0052083335, %v7248_v60  ;;  %v3407_v56 = vsel %vm2845_vm11, %v3406_v62, %v3402_v24  ;;  %v2090_v62 = vld [vmem:[#allocation7 + $0x30] sm:$0xff] }
 0x2aa   : > { %v3095_v60 = vrot.slane %v2016_v18, %v7038_v5 }
 0x2ab   : > { %v7253_v45 = vpop.xlane.xlu1 %1948  ;;  %v3011_v33 = vrot.slane %v1999_v31, %v7031_v52  ;;  %v2096_v31 = vld [vmem:[#allocation7 + $0x60] sm:$0xff] }
 0x2ac   : > { %v7255_v9 = vpop.xlane.xlu0 %1914  ;;  %v2080_v21 = vmul.f32 0.0052083335, %v7253_v45  ;;  %v3096_v0 = vsel %vm2852_vm12, %v3095_v60, %v3091_v23  ;;  %v2113_v60 = vld [vmem:[#allocation7 + $0xe8] sm:$0xff] }
 0x2ad   : > { %v2063_v55 = vmul.f32 0.0052083335, %v7255_v9  ;;  %v3323_v9 = vsel %vm2838_vm10, %v3322_v34, %v3318_v61  ;;  %v3012_v36 = vsel %vm2845_vm11, %v3011_v33, %v3007_v44  ;;  %v2098_v34 = vld [vmem:[#allocation7 + $0x70] sm:$0xff] }
 0x2af   : > { %v1823_v41 = vpop.xlane.xlu1 %1822  ;;  %v3327_v27 = vrot.slane %v2063_v55, %v7031_v52 }
 0x2b0   : > { %v7260_v42 = vpop.xlane.xlu0 %1788  ;;  %v2017_v28 = vmul.f32 0.0052083335, %v1823_v41  ;;  %v3411_v41 = vrot.slane %v2080_v21, %v7038_v5 }
 0x2b1   : > { %v2000_v12 = vmul.f32 0.0052083335, %v7260_v42  ;;  %v3328_v4 = vsel %vm2845_vm11, %v3327_v27, %v3323_v9 }
 0x2b2   : > { %v3100_v42 = vrot.slane %v2017_v28, %v7041_v6 }
 0x2b3   : > { %v1951_v48 = vpop.xlane.xlu1 %1950  ;;  %v3016_v22 = vrot.slane %v2000_v12, %v7038_v5  ;;  %v2107_v12 = vld [vmem:[#allocation7 + $0xb8] sm:$0xff] }
 0x2b4   : > { %v1917_v10 = vpop.xlane.xlu0 %1916  ;;  %v2081_v8 = vmul.f32 0.0052083335, %v1951_v48  ;;  %v3101_v47 = vsel %vm2859_vm13, %v3100_v42, %v3096_v0  ;;  %v2123_v0 = vld [vmem:[#allocation7 + $0x138] sm:$0xff] }
 0x2b5   : > { %v2064_v48 = vmul.f32 0.0052083335, %v1917_v10  ;;  %v3017_v1 = vsel %vm2852_vm12, %v3016_v22, %v3012_v36  ;;  %v2131_v22 = vld [vmem:[#allocation7 + $0x178] sm:$0xff]  ;;  %v2120_v36 = vld [vmem:[#allocation7 + $0x120] sm:$0xff] }
 0x2b6   : > { %v3416_v30 = vrot.slane %v2081_v8, %v7041_v6  ;;  %v2115_v8 = vld [vmem:[#allocation7 + $0xf8] sm:$0xff] }
 0x2b7   : > { %v1825_v26 = vpop.xlane.xlu1 %1824  ;;  %v3332_v39 = vrot.slane %v2064_v48, %v7038_v5  ;;  %v5094_v48 = vpack.c.bf16 %v2115_v8, %v2107_v12  ;;  %v2170_v12 = vld [vmem:[#allocation7 + $0x2b0] sm:$0xff] }
 0x2b8   : > { %v1791_v11 = vpop.xlane.xlu0 %1790  ;;  %v2018_v53 = vmul.f32 0.0052083335, %v1825_v26  ;;  %v3412_v26 = vsel %vm2852_vm12, %v3411_v41, %v3407_v56  ;;  %v2114_v41 = vld [vmem:[#allocation7 + $0xf0] sm:$0xff] }
 0x2b9   : > { %v2001_v58 = vmul.f32 0.0052083335, %v1791_v11  ;;  %v3417_v19 = vsel %vm2859_vm13, %v3416_v30, %v3412_v26  ;;  %v3333_v21 = vsel %vm2852_vm12, %v3332_v39, %v3328_v4  ;;  %v2137_v26 = vld [vmem:[#allocation7 + $0x1a8] sm:$0xff]  ;;  %v2136_v39 = vld [vmem:[#allocation7 + $0x1a0] sm:$0xff]  ;;  %v2178_v8 = vld [vmem:[#allocation7 + $0x2f0] sm:$0xff] }
 0x2ba   : > { %v3105_v2 = vrot.slane %v2018_v53, %v7051_v63  ;;  %v4964_v53 = vpack.c.bf16 %v2096_v31, %v2088_v50  ;;  %v2160_v50 = vld [vmem:[#allocation7 + $0x260] sm:$0xff] }
 0x2bb   : > { %v1953_v46 = vpop.xlane.xlu1 %1952  ;;  %v3021_v51 = vrot.slane %v2001_v58, %v7041_v6  ;;  %v2129_v58 = vld [vmem:[#allocation7 + $0x168] sm:$0xff] }
 0x2bc   : > { %v1919_v40 = vpop.xlane.xlu0 %1918  ;;  %v2082_v45 = vmul.f32 0.0052083335, %v1953_v46  ;;  %v3106_v59 = vsel %vm2866_vm14, %v3105_v2, %v3101_v47  ;;  %v2128_v2 = vld [vmem:[#allocation7 + $0x160] sm:$0xff] }
 0x2bd   : > { %v2065_v43 = vmul.f32 0.0052083335, %v1919_v40  ;;  %v3022_v24 = vsel %vm2859_vm13, %v3021_v51, %v3017_v1  ;;  %v4972_v4 = vpack.c.bf16 %v2128_v2, %v2120_v36  ;;  %v2144_v51 = vld [vmem:[#allocation7 + $0x1e0] sm:$0xff] }
 0x2be   : > { %v3421_v38 = vrot.slane %v2082_v45, %v7051_v63  ;;  %v5092_v45 = vpack.c.bf16 %v2098_v34, %v2090_v62  ;;  %v2177_v62 = vld [vmem:[#allocation7 + $0x2e8] sm:$0xff]  ;;  %v2171_v34 = vld [vmem:[#allocation7 + $0x2b8] sm:$0xff]  ;;  %v2200_v36 = vld [vmem:[#allocation7 + $0x3a0] sm:$0xff] }
 0x2bf   : > { %v1827_v15 = vpop.xlane.xlu1 %1826  ;;  %v3337_v35 = vrot.slane %v2065_v43, %v7041_v6  ;;  %v2208_v2 = vld [vmem:[#allocation7 + $0x3e0] sm:$0xff] }
 0x2c0   : > { %v1793_v16 = vpop.xlane.xlu0 %1792  ;;  %v2019_v20 = vmul.f32 0.0052083335, %v1827_v15  ;;  %v3422_v57 = vsel %vm2866_vm14, %v3421_v38, %v3417_v19  ;;  %v2104_v15 = vld [vmem:[#allocation7 + $0xa0] sm:$0xff]  ;;  %v2138_v19 = vld [vmem:[#allocation7 + $0x1b0] sm:$0xff] }
 0x2c1   : > { %v2002_v37 = vmul.f32 0.0052083335, %v1793_v16  ;;  %v3338_v55 = vsel %vm2859_vm13, %v3337_v35, %v3333_v21  ;;  %v2112_v16 = vld [vmem:[#allocation7 + $0xe0] sm:$0xff]  ;;  %v2146_v35 = vld [vmem:[#allocation7 + $0x1f0] sm:$0xff]  ;;  %v2179_v21 = vld [vmem:[#allocation7 + $0x2f8] sm:$0xff] }
 0x2c2   : > { %v3110_v10 = vrot.slane %v2019_v20, %v7058_v7  ;;  %v2121_v20 = vld [vmem:[#allocation7 + $0x128] sm:$0xff]  ;;  %v4968_v30 = vpack.c.bf16 %v2112_v16, %v2104_v15  ;;  %v5112_v16 = vpack.c.bf16 %v2178_v8, %v2170_v12  ;;  %v2250_v12 = vld [vmem:[#allocation7 + $0x530] sm:$0xff] }
 0x2c3   : > { %v1955_v17 = vpop.xlane.xlu1 %1954  ;;  %v3026_v18 = vrot.slane %v2002_v37, %v7051_v63  ;;  %v4970_v38 = vpack.c.bf16 %v2129_v58, %v2121_v20  ;;  %v5098_v37 = vpack.c.bf16 %v2131_v22, %v2123_v0  ;;  %v2186_v20 = vld [vmem:[#allocation7 + $0x330] sm:$0xff]  ;;  %v2209_v58 = vld [vmem:[#allocation7 + $0x3e8] sm:$0xff]  ;;  %v2203_v0 = vld [vmem:[#allocation7 + $0x3b8] sm:$0xff] }
 0x2c4   : > { %v1921_v52 = vpop.xlane.xlu0 %1920  ;;  %v2083_v11 = vmul.f32 0.0052083335, %v1955_v17  ;;  %v3111_v14 = vsel %vm2873_vm15, %v3110_v10, %v3106_v59  ;;  %v2122_v17 = vld [vmem:[#allocation7 + $0x130] sm:$0xff]  ;;  %v2145_v10 = vld [vmem:[#allocation7 + $0x1e8] sm:$0xff]  ;;  %v2211_v22 = vld [vmem:[#allocation7 + $0x3f8] sm:$0xff] }
 0x2c5   : > { %v2066_v13 = vmul.f32 0.0052083335, %v1921_v52  ;;  %v3027_v44 = vsel %vm2866_vm14, %v3026_v18, %v3022_v24  ;;  %v2130_v52 = vld [vmem:[#allocation7 + $0x170] sm:$0xff]  ;;  %v4974_v1 = vpack.c.bf16 %v2145_v10, %v2137_v26  ;;  %v2161_v59 = vld [vmem:[#allocation7 + $0x268] sm:$0xff]  ;;  %v2163_v18 = vld [vmem:[#allocation7 + $0x278] sm:$0xff] }
 0x2c6   : > { %v3426_v25 = vrot.slane %v2083_v11, %v7058_v7  ;;  %v2139_v11 = vld [vmem:[#allocation7 + $0x1b8] sm:$0xff]  ;;  %v5100_v47 = vpack.c.bf16 %v2130_v52, %v2122_v17  ;;  %v2202_v17 = vld [vmem:[#allocation7 + $0x3b0] sm:$0xff]  ;;  %v2217_v26 = vld [vmem:[#allocation7 + $0x428] sm:$0xff] }
 0x2c7   : > { %v3342_v54 = vrot.slane %v2066_v13, %v7051_v63  ;;  %v1923_v29 = vpop.xlane.xlu1 %1922  ;;  %v2105_v63 = vld [vmem:[#allocation7 + $0xa8] sm:$0xff]  ;;  %v2147_v13 = vld [vmem:[#allocation7 + $0x1f8] sm:$0xff]  ;;  %v2210_v52 = vld [vmem:[#allocation7 + $0x3f0] sm:$0xff] }
 0x2c8   : > { %v1795_v5 = vpop.xlane.xlu0 %1794  ;;  %v2067_v46 = vmul.f32 0.0052083335, %v1923_v29  ;;  %v3427_v6 = vsel %vm2873_vm15, %v3426_v25, %v3422_v57  ;;  %v4966_v42 = vpack.c.bf16 %v2113_v60, %v2105_v63  ;;  %v2153_v25 = vld [vmem:[#allocation7 + $0x228] sm:$0xff]  ;;  %v2155_v57 = vld [vmem:[#allocation7 + $0x238] sm:$0xff]  ;;  %v5104_v29 = vpack.c.bf16 %v2146_v35, %v2138_v19  ;;  %v2218_v19 = vld [vmem:[#allocation7 + $0x430] sm:$0xff] }
 0x2c9   : > { %v2003_v40 = vmul.f32 0.0052083335, %v1795_v5  ;;  %v7339_v61 = vsel %vm3428_vm0, %v3427_v6, %v3111_v14  ;;  %v3343_v33 = vsel %vm2866_vm14, %v3342_v54, %v3338_v55  ;;  %v4976_v54 = vpack.c.bf16 %v2144_v51, %v2136_v39  ;;  %v2152_v5 = vld [vmem:[#allocation7 + $0x220] sm:$0xff]  ;;  %v2162_v14 = vld [vmem:[#allocation7 + $0x270] sm:$0xff]  ;;  %v2169_v6 = vld [vmem:[#allocation7 + $0x2a8] sm:$0xff] }
 0x2ca   : > { %v3347_v28 = vrot.slane %v2067_v46, %v7058_v7  ;;  %3572 = vmatprep.mubr.f32.mxu0 %v7339_v61  ;;  %3714 = vmatprep.mubr.f32.mxu1 %v7339_v61  ;;  %v4978_v31 = vpack.c.bf16 %v2161_v59, %v2153_v25  ;;  %v5106_v46 = vpack.c.bf16 %v2163_v18, %v2155_v57  ;;  %v2168_v55 = vld [vmem:[#allocation7 + $0x2a0] sm:$0xff]  ;;  %v2225_v10 = vld [vmem:[#allocation7 + $0x468] sm:$0xff]  ;;  %v2226_v35 = vld [vmem:[#allocation7 + $0x470] sm:$0xff] }
 0x2cb   : > { %v3031_v23 = vrot.slane %v2003_v40, %v7058_v7  ;;  %v2106_v7 = vld [vmem:[#allocation7 + $0xb0] sm:$0xff]  ;;  %v4980_v24 = vpack.c.bf16 %v2160_v50, %v2152_v5  ;;  %v5110_v60 = vpack.c.bf16 %v2179_v21, %v2171_v34  ;;  %v2216_v39 = vld [vmem:[#allocation7 + $0x420] sm:$0xff]  ;;  %v2233_v25 = vld [vmem:[#allocation7 + $0x4a8] sm:$0xff] }
 0x2cc   : > { %v3348_v9 = vsel %vm2873_vm15, %v3347_v28, %v3343_v33  ;;  %v5096_v43 = vpack.c.bf16 %v2114_v41, %v2106_v7  ;;  %v2154_v40 = vld [vmem:[#allocation7 + $0x230] sm:$0xff]  ;;  %v2176_v28 = vld [vmem:[#allocation7 + $0x2e0] sm:$0xff]  ;;  %v2193_v33 = vld [vmem:[#allocation7 + $0x368] sm:$0xff] }
 0x2cd   : > { %v3032_v56 = vsel %vm2873_vm15, %v3031_v23, %v3027_v44  ;;  %v5108_v63 = vpack.c.bf16 %v2162_v14, %v2154_v40  ;;  %v4982_v23 = vpack.c.bf16 %v2177_v62, %v2169_v6  ;;  %v2185_v44 = vld [vmem:[#allocation7 + $0x328] sm:$0xff]  ;;  %v4984_v15 = vpack.c.bf16 %v2176_v28, %v2168_v55  ;;  %v2224_v51 = vld [vmem:[#allocation7 + $0x460] sm:$0xff]  ;;  %v2235_v57 = vld [vmem:[#allocation7 + $0x4b8] sm:$0xff] }
 0x2ce   : > { %v7351_v27 = vsel %vm3428_vm0, %v3348_v9, %v3032_v56  ;;  %v2184_v56 = vld [vmem:[#allocation7 + $0x320] sm:$0xff]  ;;  %v4986_v7 = vpack.c.bf16 %v2193_v33, %v2185_v44  ;;  %v2241_v59 = vld [vmem:[#allocation7 + $0x4e8] sm:$0xff]  ;;  %v2243_v18 = vld [vmem:[#allocation7 + $0x4f8] sm:$0xff] }
 0x2cf   : > { %3573 = vmatmul.mubr.f32.vlgmr.msra.gmra.mrb[0].mxu0 %v7351_v27  ;;  %3715 = vmatmul.mubr.f32.vlgmr.msra.gmra.mrb[0].mxu1 %v7351_v27  ;;  %v2192_v9 = vld [vmem:[#allocation7 + $0x360] sm:$0xff]  ;;  %v2234_v40 = vld [vmem:[#allocation7 + $0x4b0] sm:$0xff]  ;;  %v2249_v6 = vld [vmem:[#allocation7 + $0x528] sm:$0xff] }
 0x2d0   : > { %4965 = vmatpush1.bf16.msra.mxu0 %v4964_v53  ;;  %5093 = vmatpush1.bf16.msra.mxu1 %v5092_v45  ;;  %v2187_v53 = vld [vmem:[#allocation7 + $0x338] sm:$0xff]  ;;  %v2232_v5 = vld [vmem:[#allocation7 + $0x4a0] sm:$0xff]  ;;  %v2242_v14 = vld [vmem:[#allocation7 + $0x4f0] sm:$0xff] }
 0x2d1   : > { %3785 = vmatprep.mubr.f32.mxu0 %v7160_v49  ;;  %3927 = vmatprep.mubr.f32.mxu1 %v7160_v49  ;;  %v5102_v49 = vpack.c.bf16 %v2147_v13, %v2139_v11  ;;  %v2195_v45 = vld [vmem:[#allocation7 + $0x378] sm:$0xff]  ;;  %v2240_v50 = vld [vmem:[#allocation7 + $0x4e0] sm:$0xff]  ;;  %v2257_v62 = vld [vmem:[#allocation7 + $0x568] sm:$0xff] }
 0x2d2   : > { %4967 = vmatprep.subr.bf16.mxu0 %v4966_v42  ;;  %5095 = vmatprep.subr.bf16.mxu1 %v5094_v48  ;;  %v5114_v41 = vpack.c.bf16 %v2195_v45, %v2187_v53  ;;  %v2194_v42 = vld [vmem:[#allocation7 + $0x370] sm:$0xff]  ;;  %v2201_v48 = vld [vmem:[#allocation7 + $0x3a8] sm:$0xff]  ;;  %v2219_v11 = vld [vmem:[#allocation7 + $0x438] sm:$0xff] }
 0x2d3   : > { %v2227_v13 = vld [vmem:[#allocation7 + $0x478] sm:$0xff]  ;;  %v2248_v55 = vld [vmem:[#allocation7 + $0x520] sm:$0xff]  ;;  %v2258_v8 = vld [vmem:[#allocation7 + $0x570] sm:$0xff] }
 0x2d4   : > { %4969 = vmatpush1.bf16.msra.mxu0 %v4968_v30  ;;  %5097 = vmatpush1.bf16.msra.mxu1 %v5096_v43  ;;  %v4988_v30 = vpack.c.bf16 %v2192_v9, %v2184_v56  ;;  %v5116_v43 = vpack.c.bf16 %v2194_v42, %v2186_v20  ;;  %v2251_v34 = vld [vmem:[#allocation7 + $0x538] sm:$0xff]  ;;  %v2256_v28 = vld [vmem:[#allocation7 + $0x560] sm:$0xff]  ;;  %v2265_v44 = vld [vmem:[#allocation7 + $0x5a8] sm:$0xff] }
 0x2d5   : > { %4971 = vmatprep.subr.bf16.mxu0 %v4970_v38  ;;  %5099 = vmatprep.subr.bf16.mxu1 %v5098_v37  ;;  %v4990_v38 = vpack.c.bf16 %v2209_v58, %v2201_v48  ;;  %v5118_v37 = vpack.c.bf16 %v2211_v22, %v2203_v0  ;;  %v2259_v21 = vld [vmem:[#allocation7 + $0x578] sm:$0xff]  ;;  %v2273_v33 = vld [vmem:[#allocation7 + $0x5e8] sm:$0xff]  ;;  %v2264_v56 = vld [vmem:[#allocation7 + $0x5a0] sm:$0xff] }
 0x2d6   : > { %v2267_v53 = vld [vmem:[#allocation7 + $0x5b8] sm:$0xff]  ;;  %v2272_v9 = vld [vmem:[#allocation7 + $0x5e0] sm:$0xff]  ;;  %v2266_v20 = vld [vmem:[#allocation7 + $0x5b0] sm:$0xff] }
 0x2d7   : > { %v2275_v45 = vld [vmem:[#allocation7 + $0x5f8] sm:$0xff]  ;;  %v2274_v42 = vld [vmem:[#allocation7 + $0x5f0] sm:$0xff]  ;;  %v2281_v48 = vld [vmem:[#allocation7 + $0x628] sm:$0xff] }
 0x2d8   : > { %4973 = vmatpush1.bf16.msra.mxu0 %v4972_v4  ;;  %5101 = vmatpush1.bf16.msra.mxu1 %v5100_v47  ;;  %v4992_v4 = vpack.c.bf16 %v2208_v2, %v2200_v36  ;;  %v5120_v47 = vpack.c.bf16 %v2210_v52, %v2202_v17  ;;  %v2289_v58 = vld [vmem:[#allocation7 + $0x668] sm:$0xff]  ;;  %v2283_v0 = vld [vmem:[#allocation7 + $0x638] sm:$0xff]  ;;  %v2280_v36 = vld [vmem:[#allocation7 + $0x620] sm:$0xff] }
 0x2d9   : > { %4975 = vmatprep.subr.bf16.mxu0 %v4974_v1  ;;  %5103 = vmatprep.subr.bf16.mxu1 %v5102_v49  ;;  %v4994_v1 = vpack.c.bf16 %v2225_v10, %v2217_v26  ;;  %v5122_v49 = vpack.c.bf16 %v2227_v13, %v2219_v11  ;;  %v2291_v22 = vld [vmem:[#allocation7 + $0x678] sm:$0xff]  ;;  %v2288_v2 = vld [vmem:[#allocation7 + $0x660] sm:$0xff]  ;;  %v2282_v17 = vld [vmem:[#allocation7 + $0x630] sm:$0xff] }
 0x2da   : > { %v2290_v52 = vld [vmem:[#allocation7 + $0x670] sm:$0xff]  ;;  %v2297_v26 = vld [vmem:[#allocation7 + $0x6a8] sm:$0xff]  ;;  %v2299_v11 = vld [vmem:[#allocation7 + $0x6b8] sm:$0xff] }
 0x2db   : > { %v2305_v10 = vld [vmem:[#allocation7 + $0x6e8] sm:$0xff]  ;;  %v2307_v13 = vld [vmem:[#allocation7 + $0x6f8] sm:$0xff] }
 0x2dc   : > { %4977 = vmatpush1.bf16.msra.mxu0 %v4976_v54  ;;  %5105 = vmatpush1.bf16.msra.mxu1 %v5104_v29  ;;  %v4996_v54 = vpack.c.bf16 %v2224_v51, %v2216_v39  ;;  %v5124_v29 = vpack.c.bf16 %v2226_v35, %v2218_v19  ;;  %v2296_v39 = vld [vmem:[#allocation7 + $0x6a0] sm:$0xff]  ;;  %v2298_v19 = vld [vmem:[#allocation7 + $0x6b0] sm:$0xff] }
 0x2dd   : > { %4979 = vmatprep.subr.bf16.mxu0 %v4978_v31  ;;  %5107 = vmatprep.subr.bf16.mxu1 %v5106_v46  ;;  %v4998_v31 = vpack.c.bf16 %v2241_v59, %v2233_v25  ;;  %v5126_v46 = vpack.c.bf16 %v2243_v18, %v2235_v57  ;;  %v2304_v51 = vld [vmem:[#allocation7 + $0x6e0] sm:$0xff]  ;;  %v2306_v35 = vld [vmem:[#allocation7 + $0x6f0] sm:$0xff]  ;;  %v2313_v25 = vld [vmem:[#allocation7 + $0x728] sm:$0xff] }
 0x2de   : > { %v2321_v59 = vld [vmem:[#allocation7 + $0x768] sm:$0xff]  ;;  %v2315_v57 = vld [vmem:[#allocation7 + $0x738] sm:$0xff] }
 0x2df   : > { %v2323_v18 = vld [vmem:[#allocation7 + $0x778] sm:$0xff] }
 0x2e0   : > { %4981 = vmatpush1.bf16.msra.mxu0 %v4980_v24  ;;  %5109 = vmatpush1.bf16.msra.mxu1 %v5108_v63  ;;  %v5000_v24 = vpack.c.bf16 %v2240_v50, %v2232_v5  ;;  %v5128_v63 = vpack.c.bf16 %v2242_v14, %v2234_v40  ;;  %v2312_v5 = vld [vmem:[#allocation7 + $0x720] sm:$0xff]  ;;  %v2314_v40 = vld [vmem:[#allocation7 + $0x730] sm:$0xff] }
 0x2e1   : > { %4983 = vmatprep.subr.bf16.mxu0 %v4982_v23  ;;  %5111 = vmatprep.subr.bf16.mxu1 %v5110_v60  ;;  %v5002_v23 = vpack.c.bf16 %v2257_v62, %v2249_v6  ;;  %v5130_v60 = vpack.c.bf16 %v2259_v21, %v2251_v34  ;;  %v2320_v50 = vld [vmem:[#allocation7 + $0x760] sm:$0xff]  ;;  %v2322_v14 = vld [vmem:[#allocation7 + $0x770] sm:$0xff]  ;;  %v2329_v6 = vld [vmem:[#allocation7 + $0x7a8] sm:$0xff] }
 0x2e2   : > { %v2337_v62 = vld [vmem:[#allocation7 + $0x7e8] sm:$0xff]  ;;  %v2331_v34 = vld [vmem:[#allocation7 + $0x7b8] sm:$0xff] }
 0x2e3   : > { %v2339_v21 = vld [vmem:[#allocation7 + $0x7f8] sm:$0xff] }
 0x2e4   : > { %4985 = vmatpush1.bf16.msra.mxu0 %v4984_v15  ;;  %5113 = vmatpush1.bf16.msra.mxu1 %v5112_v16  ;;  %v5004_v15 = vpack.c.bf16 %v2256_v28, %v2248_v55  ;;  %v5132_v16 = vpack.c.bf16 %v2258_v8, %v2250_v12  ;;  %v2328_v55 = vld [vmem:[#allocation7 + $0x7a0] sm:$0xff]  ;;  %v2330_v12 = vld [vmem:[#allocation7 + $0x7b0] sm:$0xff] }
 0x2e5   : > { %4987 = vmatprep.subr.bf16.mxu0 %v4986_v7  ;;  %5115 = vmatprep.subr.bf16.mxu1 %v5114_v41  ;;  %v5006_v7 = vpack.c.bf16 %v2273_v33, %v2265_v44  ;;  %v5134_v41 = vpack.c.bf16 %v2275_v45, %v2267_v53  ;;  %v2336_v28 = vld [vmem:[#allocation7 + $0x7e0] sm:$0xff]  ;;  %v2338_v8 = vld [vmem:[#allocation7 + $0x7f0] sm:$0xff]  ;;  %v2345_v44 = vld [vmem:[#allocation7 + $0x828] sm:$0xff] }
 0x2e6   : > { %v2353_v33 = vld [vmem:[#allocation7 + $0x868] sm:$0xff]  ;;  %v2347_v53 = vld [vmem:[#allocation7 + $0x838] sm:$0xff] }
 0x2e7   : > { %v2355_v45 = vld [vmem:[#allocation7 + $0x878] sm:$0xff] }
 0x2e8   : > { %4989 = vmatpush1.bf16.msra.mxu0 %v4988_v30  ;;  %5117 = vmatpush1.bf16.msra.mxu1 %v5116_v43  ;;  %v5008_v30 = vpack.c.bf16 %v2272_v9, %v2264_v56  ;;  %v5136_v43 = vpack.c.bf16 %v2274_v42, %v2266_v20  ;;  %v5026_v56 = vpack.c.bf16 %v2353_v33, %v2345_v44  ;;  %v2346_v20 = vld [vmem:[#allocation7 + $0x830] sm:$0xff]  ;;  %v2427_v44 = vld [vmem:[#allocation7 + $0xab8] sm:$0xff] }
 0x2e9   : > { %4991 = vmatprep.subr.bf16.mxu0 %v4990_v38  ;;  %5119 = vmatprep.subr.bf16.mxu1 %v5118_v37  ;;  %v5010_v38 = vpack.c.bf16 %v2289_v58, %v2281_v48  ;;  %v5138_v37 = vpack.c.bf16 %v2291_v22, %v2283_v0  ;;  %v5154_v9 = vpack.c.bf16 %v2355_v45, %v2347_v53  ;;  %v2354_v42 = vld [vmem:[#allocation7 + $0x870] sm:$0xff]  ;;  %v2361_v48 = vld [vmem:[#allocation7 + $0x8a8] sm:$0xff]  ;;  %v2363_v0 = vld [vmem:[#allocation7 + $0x8b8] sm:$0xff] }
 0x2ea   : > { %v2369_v58 = vld [vmem:[#allocation7 + $0x8e8] sm:$0xff]  ;;  %v2371_v22 = vld [vmem:[#allocation7 + $0x8f8] sm:$0xff] }
 0x2eb   : > { %v2435_v33 = vld [vmem:[#allocation7 + $0xaf8] sm:$0xff] }
 0x2ec   : > { %4993 = vmatpush1.bf16.msra.mxu0 %v4992_v4  ;;  %5121 = vmatpush1.bf16.msra.mxu1 %v5120_v47  ;;  %v5012_v4 = vpack.c.bf16 %v2288_v2, %v2280_v36  ;;  %v5140_v47 = vpack.c.bf16 %v2290_v52, %v2282_v17  ;;  %v2360_v36 = vld [vmem:[#allocation7 + $0x8a0] sm:$0xff]  ;;  %v5158_v17 = vpack.c.bf16 %v2371_v22, %v2363_v0  ;;  %v2370_v52 = vld [vmem:[#allocation7 + $0x8f0] sm:$0xff] }
 0x2ed   : > { %4995 = vmatprep.subr.bf16.mxu0 %v4994_v1  ;;  %5123 = vmatprep.subr.bf16.mxu1 %v5122_v49  ;;  %v5014_v1 = vpack.c.bf16 %v2305_v10, %v2297_v26  ;;  %v5142_v49 = vpack.c.bf16 %v2307_v13, %v2299_v11  ;;  %v2368_v2 = vld [vmem:[#allocation7 + $0x8e0] sm:$0xff]  ;;  %v2377_v26 = vld [vmem:[#allocation7 + $0x928] sm:$0xff]  ;;  %v2379_v11 = vld [vmem:[#allocation7 + $0x938] sm:$0xff] }
 0x2ee   : > { %v2385_v10 = vld [vmem:[#allocation7 + $0x968] sm:$0xff]  ;;  %v2387_v13 = vld [vmem:[#allocation7 + $0x978] sm:$0xff] }
 0x2f0   : > { %4997 = vmatpush1.bf16.msra.mxu0 %v4996_v54  ;;  %5125 = vmatpush1.bf16.msra.mxu1 %v5124_v29  ;;  %v5016_v54 = vpack.c.bf16 %v2304_v51, %v2296_v39  ;;  %v5144_v29 = vpack.c.bf16 %v2306_v35, %v2298_v19  ;;  %v5034_v39 = vpack.c.bf16 %v2385_v10, %v2377_v26  ;;  %v2376_v51 = vld [vmem:[#allocation7 + $0x920] sm:$0xff]  ;;  %v2386_v35 = vld [vmem:[#allocation7 + $0x970] sm:$0xff]  ;;  %v2459_v26 = vld [vmem:[#allocation7 + $0xbb8] sm:$0xff] }
 0x2f1   : > { %4999 = vmatprep.subr.bf16.mxu0 %v4998_v31  ;;  %5127 = vmatprep.subr.bf16.mxu1 %v5126_v46  ;;  %v5018_v31 = vpack.c.bf16 %v2321_v59, %v2313_v25  ;;  %v5146_v46 = vpack.c.bf16 %v2323_v18, %v2315_v57  ;;  %v5162_v19 = vpack.c.bf16 %v2387_v13, %v2379_v11  ;;  %v2393_v25 = vld [vmem:[#allocation7 + $0x9a8] sm:$0xff]  ;;  %v2395_v59 = vld [vmem:[#allocation7 + $0x9b8] sm:$0xff] }
 0x2f2   : > { %v2403_v57 = vld [vmem:[#allocation7 + $0x9f8] sm:$0xff] }
 0x2f3   : > { %v2467_v10 = vld [vmem:[#allocation7 + $0xbf8] sm:$0xff] }
 0x2f4   : > { %5001 = vmatpush1.bf16.msra.mxu0 %v5000_v24  ;;  %5129 = vmatpush1.bf16.msra.mxu1 %v5128_v63  ;;  %v5020_v24 = vpack.c.bf16 %v2320_v50, %v2312_v5  ;;  %v5148_v63 = vpack.c.bf16 %v2322_v14, %v2314_v40  ;;  %v2400_v5 = vld [vmem:[#allocation7 + $0x9e0] sm:$0xff]  ;;  %v2394_v50 = vld [vmem:[#allocation7 + $0x9b0] sm:$0xff]  ;;  %v2409_v40 = vld [vmem:[#allocation7 + $0xa28] sm:$0xff] }
 0x2f5   : > { %5003 = vmatprep.subr.bf16.mxu0 %v5002_v23  ;;  %5131 = vmatprep.subr.bf16.mxu1 %v5130_v60  ;;  %v5022_v23 = vpack.c.bf16 %v2337_v62, %v2329_v6  ;;  %v5150_v60 = vpack.c.bf16 %v2339_v21, %v2331_v34  ;;  %v2417_v14 = vld [vmem:[#allocation7 + $0xa68] sm:$0xff]  ;;  %v2411_v6 = vld [vmem:[#allocation7 + $0xa38] sm:$0xff] }
 0x2f6   : > { %v2419_v62 = vld [vmem:[#allocation7 + $0xa78] sm:$0xff] }
 0x2f8   : > { %5005 = vmatpush1.bf16.msra.mxu0 %v5004_v15  ;;  %5133 = vmatpush1.bf16.msra.mxu1 %v5132_v16  ;;  %v5024_v15 = vpack.c.bf16 %v2336_v28, %v2328_v55  ;;  %v5152_v16 = vpack.c.bf16 %v2338_v8, %v2330_v12  ;;  %v2416_v55 = vld [vmem:[#allocation7 + $0xa60] sm:$0xff]  ;;  %v2410_v28 = vld [vmem:[#allocation7 + $0xa30] sm:$0xff]  ;;  %v2425_v12 = vld [vmem:[#allocation7 + $0xaa8] sm:$0xff] }
 0x2f9   : > { %5007 = vmatprep.subr.bf16.mxu0 %v5006_v7  ;;  %5135 = vmatprep.subr.bf16.mxu1 %v5134_v41  ;;  %v2344_v7 = vld [vmem:[#allocation7 + $0x820] sm:$0xff]  ;;  %v2433_v8 = vld [vmem:[#allocation7 + $0xae8] sm:$0xff] }
 0x2fa   : > { %v2352_v41 = vld [vmem:[#allocation7 + $0x860] sm:$0xff] }
 0x2fc   : > { %5009 = vmatpush1.bf16.msra.mxu0 %v5008_v30  ;;  %5137 = vmatpush1.bf16.msra.mxu1 %v5136_v43  ;;  %v5028_v30 = vpack.c.bf16 %v2352_v41, %v2344_v7  ;;  %v5156_v43 = vpack.c.bf16 %v2354_v42, %v2346_v20  ;;  %v5174_v7 = vpack.c.bf16 %v2435_v33, %v2427_v44  ;;  %v2434_v41 = vld [vmem:[#allocation7 + $0xaf0] sm:$0xff]  ;;  %v2441_v20 = vld [vmem:[#allocation7 + $0xb28] sm:$0xff] }
 0x2fd   : > { %5011 = vmatprep.subr.bf16.mxu0 %v5010_v38  ;;  %5139 = vmatprep.subr.bf16.mxu1 %v5138_v37  ;;  %v2362_v38 = vld [vmem:[#allocation7 + $0x8b0] sm:$0xff]  ;;  %v5030_v37 = vpack.c.bf16 %v2369_v58, %v2361_v48  ;;  %v2449_v42 = vld [vmem:[#allocation7 + $0xb68] sm:$0xff]  ;;  %v2443_v48 = vld [vmem:[#allocation7 + $0xb38] sm:$0xff] }
 0x2fe   : > { %v2451_v58 = vld [vmem:[#allocation7 + $0xb78] sm:$0xff] }
 0x300   : > { %5013 = vmatpush1.bf16.msra.mxu0 %v5012_v4  ;;  %5141 = vmatpush1.bf16.msra.mxu1 %v5140_v47  ;;  %v5032_v4 = vpack.c.bf16 %v2368_v2, %v2360_v36  ;;  %v5160_v47 = vpack.c.bf16 %v2370_v52, %v2362_v38  ;;  %v2448_v36 = vld [vmem:[#allocation7 + $0xb60] sm:$0xff]  ;;  %v2442_v2 = vld [vmem:[#allocation7 + $0xb30] sm:$0xff]  ;;  %v5178_v38 = vpack.c.bf16 %v2451_v58, %v2443_v48  ;;  %v2465_v52 = vld [vmem:[#allocation7 + $0xbe8] sm:$0xff] }
 0x301   : > { %5015 = vmatprep.subr.bf16.mxu0 %v5014_v1  ;;  %5143 = vmatprep.subr.bf16.mxu1 %v5142_v49  ;;  %v2384_v1 = vld [vmem:[#allocation7 + $0x960] sm:$0xff]  ;;  %v2378_v49 = vld [vmem:[#allocation7 + $0x930] sm:$0xff] }
 0x302   : > { %v5036_v18 = vpack.c.bf16 %v2384_v1, %v2376_v51  ;;  %v2458_v51 = vld [vmem:[#allocation7 + $0xbb0] sm:$0xff]  ;;  %v5182_v1 = vpack.c.bf16 %v2467_v10, %v2459_v26 }
 0x304   : > { %5017 = vmatpush1.bf16.msra.mxu0 %v5016_v54  ;;  %5145 = vmatpush1.bf16.msra.mxu1 %v5144_v29  ;;  %v5164_v54 = vpack.c.bf16 %v2386_v35, %v2378_v49  ;;  %v2466_v49 = vld [vmem:[#allocation7 + $0xbf0] sm:$0xff]  ;;  %v2481_v35 = vld [vmem:[#allocation7 + $0xc68] sm:$0xff] }
 0x305   : > { %5019 = vmatprep.subr.bf16.mxu0 %v5018_v31  ;;  %5147 = vmatprep.subr.bf16.mxu1 %v5146_v46  ;;  %v5166_v31 = vpack.c.bf16 %v2403_v57, %v2395_v59  ;;  %v2402_v46 = vld [vmem:[#allocation7 + $0x9f0] sm:$0xff]  ;;  %v5184_v57 = vpack.c.bf16 %v2466_v49, %v2458_v51  ;;  %v2561_v49 = vld [vmem:[#allocation7 + $0xee8] sm:$0xff] }
 0x306   : > { %v5168_v21 = vpack.c.bf16 %v2402_v46, %v2394_v50  ;;  %v2482_v50 = vld [vmem:[#allocation7 + $0xc70] sm:$0xff]  ;;  %v2497_v46 = vld [vmem:[#allocation7 + $0xce8] sm:$0xff] }
 0x307   : > { %v2546_v51 = vld [vmem:[#allocation7 + $0xe70] sm:$0xff] }
 0x308   : > { %5021 = vmatpush1.bf16.msra.mxu0 %v5020_v24  ;;  %5149 = vmatpush1.bf16.msra.mxu1 %v5148_v63  ;;  %v5042_v24 = vpack.c.bf16 %v2417_v14, %v2409_v40  ;;  %v2408_v63 = vld [vmem:[#allocation7 + $0xa20] sm:$0xff]  ;;  %v2491_v40 = vld [vmem:[#allocation7 + $0xcb8] sm:$0xff] }
 0x309   : > { %5023 = vmatprep.subr.bf16.mxu0 %v5022_v23  ;;  %5151 = vmatprep.subr.bf16.mxu1 %v5150_v60  ;;  %v5170_v23 = vpack.c.bf16 %v2419_v62, %v2411_v6  ;;  %v2418_v60 = vld [vmem:[#allocation7 + $0xa70] sm:$0xff]  ;;  %v5044_v53 = vpack.c.bf16 %v2416_v55, %v2408_v63  ;;  %v2499_v14 = vld [vmem:[#allocation7 + $0xcf8] sm:$0xff] }
 0x30a   : > { %v5172_v45 = vpack.c.bf16 %v2418_v60, %v2410_v28  ;;  %v2490_v63 = vld [vmem:[#allocation7 + $0xcb0] sm:$0xff]  ;;  %v5190_v55 = vpack.c.bf16 %v2499_v14, %v2491_v40  ;;  %v2513_v60 = vld [vmem:[#allocation7 + $0xd68] sm:$0xff] }
 0x30b   : > { %v2498_v28 = vld [vmem:[#allocation7 + $0xcf0] sm:$0xff] }
 0x30c   : > { %5025 = vmatpush1.bf16.msra.mxu0 %v5024_v15  ;;  %5153 = vmatpush1.bf16.msra.mxu1 %v5152_v16  ;;  %v5046_v15 = vpack.c.bf16 %v2433_v8, %v2425_v12  ;;  %v2424_v16 = vld [vmem:[#allocation7 + $0xaa0] sm:$0xff]  ;;  %v2507_v12 = vld [vmem:[#allocation7 + $0xd38] sm:$0xff]  ;;  %v5192_v33 = vpack.c.bf16 %v2498_v28, %v2490_v63  ;;  %v2578_v63 = vld [vmem:[#allocation7 + $0xf70] sm:$0xff] }
 0x30d   : > { %5027 = vmatprep.subr.bf16.mxu0 %v5026_v56  ;;  %5155 = vmatprep.subr.bf16.mxu1 %v5154_v9  ;;  %v2432_v56 = vld [vmem:[#allocation7 + $0xae0] sm:$0xff]  ;;  %v2426_v9 = vld [vmem:[#allocation7 + $0xab0] sm:$0xff]  ;;  %v2515_v8 = vld [vmem:[#allocation7 + $0xd78] sm:$0xff] }
 0x30e   : > { %v5048_v0 = vpack.c.bf16 %v2432_v56, %v2424_v16  ;;  %v5176_v22 = vpack.c.bf16 %v2434_v41, %v2426_v9  ;;  %v2506_v16 = vld [vmem:[#allocation7 + $0xd30] sm:$0xff]  ;;  %v5194_v56 = vpack.c.bf16 %v2515_v8, %v2507_v12  ;;  %v2529_v41 = vld [vmem:[#allocation7 + $0xde8] sm:$0xff] }
 0x30f   : > { %3786 = vmatmul.mubr.f32.vlgmr.msra.gmra.mrb[2].mxu0 %v7172_v32  ;;  %3928 = vmatmul.mubr.f32.vlgmr.msra.gmra.mrb[2].mxu1 %v7172_v32  ;;  %v2401_v32 = vld [vmem:[#allocation7 + $0x9e8] sm:$0xff]  ;;  %v2514_v9 = vld [vmem:[#allocation7 + $0xd70] sm:$0xff] }
 0x310   : > { %5029 = vmatpush1.bf16.msra.mxu0 %v5028_v30  ;;  %3856 = vmatprep.mubr.f32.mxu0 %v7339_v61  ;;  %v5038_v29 = vpack.c.bf16 %v2401_v32, %v2393_v25  ;;  %v5050_v30 = vpack.c.bf16 %v2449_v42, %v2441_v20  ;;  %v2475_v25 = vld [vmem:[#allocation7 + $0xc38] sm:$0xff]  ;;  %v5196_v58 = vpack.c.bf16 %v2514_v9, %v2506_v16  ;;  %v2593_v28 = vld [vmem:[#allocation7 + $0xfe8] sm:$0xff]  ;;  %v2594_v16 = vld [vmem:[#allocation7 + $0xff0] sm:$0xff] }
 0x311   : > { %5157 = vmatpush1.bf16.msra.mxu1 %v5156_v43  ;;  %3998 = vmatprep.mubr.f32.mxu1 %v7339_v61  ;;  %v2392_v61 = vld [vmem:[#allocation7 + $0x9a0] sm:$0xff]  ;;  %v2483_v32 = vld [vmem:[#allocation7 + $0xc78] sm:$0xff]  ;;  %v4030_v9 = vld [vmem:[#allocation10 + $0x88] sm:$0xff] }
 0x312   : > { %5031 = vmatprep.subr.bf16.mxu0 %v5030_v37  ;;  %5159 = vmatprep.subr.bf16.mxu1 %v5158_v17  ;;  %v5040_v34 = vpack.c.bf16 %v2400_v5, %v2392_v61  ;;  %v2440_v43 = vld [vmem:[#allocation7 + $0xb20] sm:$0xff]  ;;  %v2450_v37 = vld [vmem:[#allocation7 + $0xb70] sm:$0xff]  ;;  %v2457_v17 = vld [vmem:[#allocation7 + $0xba8] sm:$0xff]  ;;  %v5186_v5 = vpack.c.bf16 %v2483_v32, %v2475_v25 }
 0x313   : > { %v5052_v11 = vpack.c.bf16 %v2448_v36, %v2440_v43  ;;  %v5180_v13 = vpack.c.bf16 %v2450_v37, %v2442_v2  ;;  %v2474_v61 = vld [vmem:[#allocation7 + $0xc30] sm:$0xff]  ;;  %v2523_v20 = vld [vmem:[#allocation7 + $0xdb8] sm:$0xff]  ;;  %v2545_v37 = vld [vmem:[#allocation7 + $0xe68] sm:$0xff] }
 0x314   : > { %5033 = vmatpush1.bf16.msra.mxu0 %v5032_v4  ;;  %v5054_v4 = vpack.c.bf16 %v2465_v52, %v2457_v17  ;;  %v5188_v62 = vpack.c.bf16 %v2482_v50, %v2474_v61  ;;  %v2531_v42 = vld [vmem:[#allocation7 + $0xdf8] sm:$0xff]  ;;  %v2522_v43 = vld [vmem:[#allocation7 + $0xdb0] sm:$0xff]  ;;  %v2577_v50 = vld [vmem:[#allocation7 + $0xf68] sm:$0xff] }
 0x315   : > { %5161 = vmatpush1.bf16.msra.mxu1 %v5160_v47  ;;  %5035 = vmatprep.subr.bf16.mxu0 %v5034_v39  ;;  %v2456_v47 = vld [vmem:[#allocation7 + $0xba0] sm:$0xff]  ;;  %v5198_v36 = vpack.c.bf16 %v2531_v42, %v2523_v20  ;;  %v2530_v2 = vld [vmem:[#allocation7 + $0xdf0] sm:$0xff]  ;;  %v2539_v17 = vld [vmem:[#allocation7 + $0xe38] sm:$0xff] }
 0x316   : > { %5163 = vmatprep.subr.bf16.mxu1 %v5162_v19  ;;  %v2464_v39 = vld [vmem:[#allocation7 + $0xbe0] sm:$0xff]  ;;  %v2473_v19 = vld [vmem:[#allocation7 + $0xc28] sm:$0xff]  ;;  %v2547_v52 = vld [vmem:[#allocation7 + $0xe78] sm:$0xff]  ;;  %v5200_v10 = vpack.c.bf16 %v2530_v2, %v2522_v43 }
 0x317   : > { %v5056_v59 = vpack.c.bf16 %v2464_v39, %v2456_v47  ;;  %v2538_v47 = vld [vmem:[#allocation7 + $0xe30] sm:$0xff]  ;;  %v5202_v39 = vpack.c.bf16 %v2547_v52, %v2539_v17  ;;  %v4032_v2 = vld [vmem:[#allocation10 + $0x98] sm:$0xff] }
 0x318   : > { %5037 = vmatpush1.bf16.msra.mxu0 %v5036_v18  ;;  %v5058_v18 = vpack.c.bf16 %v2481_v35, %v2473_v19  ;;  %v2555_v19 = vld [vmem:[#allocation7 + $0xeb8] sm:$0xff]  ;;  %v5204_v32 = vpack.c.bf16 %v2546_v51, %v2538_v47  ;;  %v2562_v61 = vld [vmem:[#allocation7 + $0xef0] sm:$0xff]  ;;  %v4048_v47 = vld [vmem:[#allocation10 + $0x118] sm:$0xff] }
 0x319   : > { %5165 = vmatpush1.bf16.msra.mxu1 %v5164_v54  ;;  %5039 = vmatprep.subr.bf16.mxu0 %v5038_v29  ;;  %v2472_v54 = vld [vmem:[#allocation7 + $0xc20] sm:$0xff]  ;;  %v2563_v35 = vld [vmem:[#allocation7 + $0xef8] sm:$0xff]  ;;  %v4046_v43 = vld [vmem:[#allocation10 + $0x108] sm:$0xff] }
 0x31a   : > { %5167 = vmatprep.subr.bf16.mxu1 %v5166_v31  ;;  %v2480_v29 = vld [vmem:[#allocation7 + $0xc60] sm:$0xff]  ;;  %v2489_v31 = vld [vmem:[#allocation7 + $0xca8] sm:$0xff]  ;;  %v4034_v51 = vld [vmem:[#allocation10 + $0xa8] sm:$0xff] }
 0x31b   : > { %v5060_v6 = vpack.c.bf16 %v2480_v29, %v2472_v54  ;;  %v2554_v54 = vld [vmem:[#allocation7 + $0xeb0] sm:$0xff]  ;;  %v5206_v29 = vpack.c.bf16 %v2563_v35, %v2555_v19 }
 0x31c   : > { %5041 = vmatpush1.bf16.msra.mxu0 %v5040_v34  ;;  %v5062_v34 = vpack.c.bf16 %v2497_v46, %v2489_v31  ;;  %v2571_v31 = vld [vmem:[#allocation7 + $0xf38] sm:$0xff]  ;;  %v5208_v14 = vpack.c.bf16 %v2562_v61, %v2554_v54  ;;  %v4050_v54 = vld [vmem:[#allocation10 + $0x128] sm:$0xff]  ;;  %v4036_v61 = vld [vmem:[#allocation10 + $0xb8] sm:$0xff] }
 0x31d   : > { %5169 = vmatpush1.bf16.msra.mxu1 %v5168_v21  ;;  %5043 = vmatprep.subr.bf16.mxu0 %v5042_v24  ;;  %v2488_v21 = vld [vmem:[#allocation7 + $0xca0] sm:$0xff]  ;;  %v2579_v46 = vld [vmem:[#allocation7 + $0xf78] sm:$0xff] }
 0x31e   : > { %5171 = vmatprep.subr.bf16.mxu1 %v5170_v23  ;;  %v2496_v24 = vld [vmem:[#allocation7 + $0xce0] sm:$0xff]  ;;  %v2505_v23 = vld [vmem:[#allocation7 + $0xd28] sm:$0xff] }
 0x31f   : > { %v5064_v44 = vpack.c.bf16 %v2496_v24, %v2488_v21  ;;  %v2570_v21 = vld [vmem:[#allocation7 + $0xf30] sm:$0xff]  ;;  %v5210_v24 = vpack.c.bf16 %v2579_v46, %v2571_v31 }
 0x320   : > { %5045 = vmatpush1.bf16.msra.mxu0 %v5044_v53  ;;  %v5066_v53 = vpack.c.bf16 %v2513_v60, %v2505_v23  ;;  %v2587_v23 = vld [vmem:[#allocation7 + $0xfb8] sm:$0xff]  ;;  %v5212_v8 = vpack.c.bf16 %v2578_v63, %v2570_v21  ;;  %v4037_v21 = vld [vmem:[#allocation10 + $0xc0] sm:$0xff] }
 0x321   : > { %5173 = vmatpush1.bf16.msra.mxu1 %v5172_v45  ;;  %5047 = vmatprep.subr.bf16.mxu0 %v5046_v15  ;;  %v2504_v45 = vld [vmem:[#allocation7 + $0xd20] sm:$0xff]  ;;  %v2595_v60 = vld [vmem:[#allocation7 + $0xff8] sm:$0xff]  ;;  %v4069_v63 = vld [vmem:[#allocation10 + $0x1c0] sm:$0xff] }
 0x322   : > { %5175 = vmatprep.subr.bf16.mxu1 %v5174_v7  ;;  %v2512_v15 = vld [vmem:[#allocation7 + $0xd60] sm:$0xff]  ;;  %v2521_v7 = vld [vmem:[#allocation7 + $0xda8] sm:$0xff] }
 0x323   : > { %v5068_v48 = vpack.c.bf16 %v2512_v15, %v2504_v45  ;;  %v2586_v45 = vld [vmem:[#allocation7 + $0xfb0] sm:$0xff]  ;;  %v5214_v15 = vpack.c.bf16 %v2595_v60, %v2587_v23 }
 0x324   : > { %5049 = vmatpush1.bf16.msra.mxu0 %v5048_v0  ;;  %v5070_v0 = vpack.c.bf16 %v2529_v41, %v2521_v7  ;;  %v4061_v7 = vld [vmem:[#allocation10 + $0x180] sm:$0xff]  ;;  %v4062_v41 = vld [vmem:[#allocation10 + $0x188] sm:$0xff]  ;;  %v5216_v42 = vpack.c.bf16 %v2594_v16, %v2586_v45  ;;  %v4039_v45 = vld [vmem:[#allocation10 + $0xd0] sm:$0xff] }
 0x325   : > { %5177 = vmatpush1.bf16.msra.mxu1 %v5176_v22  ;;  %5051 = vmatprep.subr.bf16.mxu0 %v5050_v30  ;;  %v2520_v22 = vld [vmem:[#allocation7 + $0xda0] sm:$0xff]  ;;  %v4071_v16 = vld [vmem:[#allocation10 + $0x1d0] sm:$0xff] }
 0x326   : > { %5179 = vmatprep.subr.bf16.mxu1 %v5178_v38  ;;  %v2528_v30 = vld [vmem:[#allocation7 + $0xde0] sm:$0xff]  ;;  %v2537_v38 = vld [vmem:[#allocation7 + $0xe28] sm:$0xff] }
 0x327   : > { %v5072_v26 = vpack.c.bf16 %v2528_v30, %v2520_v22  ;;  %v4045_v22 = vld [vmem:[#allocation10 + $0x100] sm:$0xff]  ;;  %v5250_v30 = vpack.c.bf16 %v4062_v41, %v4061_v7 }
 0x328   : > { %5053 = vmatpush1.bf16.msra.mxu0 %v5052_v11  ;;  %v5074_v11 = vpack.c.bf16 %v2545_v37, %v2537_v38  ;;  %v4063_v38 = vld [vmem:[#allocation10 + $0x190] sm:$0xff]  ;;  %v4064_v37 = vld [vmem:[#allocation10 + $0x198] sm:$0xff]  ;;  %v5252_v52 = vpack.c.bf16 %v4046_v43, %v4045_v22  ;;  %v4041_v22 = vld [vmem:[#allocation10 + $0xe0] sm:$0xff] }
 0x329   : > { %5181 = vmatpush1.bf16.msra.mxu1 %v5180_v13  ;;  %5055 = vmatprep.subr.bf16.mxu0 %v5054_v4  ;;  %v2536_v13 = vld [vmem:[#allocation7 + $0xe20] sm:$0xff]  ;;  %v4073_v43 = vld [vmem:[#allocation10 + $0x1e0] sm:$0xff] }
 0x32a   : > { %5183 = vmatprep.subr.bf16.mxu1 %v5182_v1  ;;  %v2544_v4 = vld [vmem:[#allocation7 + $0xe60] sm:$0xff]  ;;  %v2553_v1 = vld [vmem:[#allocation7 + $0xea8] sm:$0xff] }
 0x32b   : > { %v5076_v25 = vpack.c.bf16 %v2544_v4, %v2536_v13  ;;  %v4047_v13 = vld [vmem:[#allocation10 + $0x110] sm:$0xff]  ;;  %v5254_v4 = vpack.c.bf16 %v4064_v37, %v4063_v38 }
 0x32c   : > { %5057 = vmatpush1.bf16.msra.mxu0 %v5056_v59  ;;  %v5078_v59 = vpack.c.bf16 %v2561_v49, %v2553_v1  ;;  %v4065_v1 = vld [vmem:[#allocation10 + $0x1a0] sm:$0xff]  ;;  %v4066_v49 = vld [vmem:[#allocation10 + $0x1a8] sm:$0xff]  ;;  %v5256_v35 = vpack.c.bf16 %v4048_v47, %v4047_v13  ;;  %v4043_v13 = vld [vmem:[#allocation10 + $0xf0] sm:$0xff] }
 0x32d   : > { %5185 = vmatpush1.bf16.msra.mxu1 %v5184_v57  ;;  %5059 = vmatprep.subr.bf16.mxu0 %v5058_v18  ;;  %v2552_v57 = vld [vmem:[#allocation7 + $0xea0] sm:$0xff]  ;;  %v4075_v47 = vld [vmem:[#allocation10 + $0x1f0] sm:$0xff] }
 0x32e   : > { %5187 = vmatprep.subr.bf16.mxu1 %v5186_v5  ;;  %v2560_v18 = vld [vmem:[#allocation7 + $0xee0] sm:$0xff]  ;;  %v2569_v5 = vld [vmem:[#allocation7 + $0xf28] sm:$0xff] }
 0x32f   : > { %v5080_v40 = vpack.c.bf16 %v2560_v18, %v2552_v57  ;;  %v4049_v57 = vld [vmem:[#allocation10 + $0x120] sm:$0xff]  ;;  %v5258_v18 = vpack.c.bf16 %v4066_v49, %v4065_v1 }
 0x330   : > { %5061 = vmatpush1.bf16.msra.mxu0 %v5060_v6  ;;  %v5082_v6 = vpack.c.bf16 %v2577_v50, %v2569_v5  ;;  %v4067_v5 = vld [vmem:[#allocation10 + $0x1b0] sm:$0xff]  ;;  %v4068_v50 = vld [vmem:[#allocation10 + $0x1b8] sm:$0xff] }
 0x331   : > { %5189 = vmatpush1.bf16.msra.mxu1 %v5188_v62  ;;  %5063 = vmatprep.subr.bf16.mxu0 %v5062_v34  ;;  %v2568_v62 = vld [vmem:[#allocation7 + $0xf20] sm:$0xff] }
 0x332   : > { %5191 = vmatprep.subr.bf16.mxu1 %v5190_v55  ;;  %v2576_v34 = vld [vmem:[#allocation7 + $0xf60] sm:$0xff]  ;;  %v2585_v55 = vld [vmem:[#allocation7 + $0xfa8] sm:$0xff] }
 0x333   : > { %v5084_v12 = vpack.c.bf16 %v2576_v34, %v2568_v62  ;;  %v5262_v62 = vpack.c.bf16 %v4068_v50, %v4067_v5  ;;  %v4052_v34 = vld [vmem:[#allocation10 + $0x138] sm:$0xff] }
 0x334   : > { %5065 = vmatpush1.bf16.msra.mxu0 %v5064_v44  ;;  %v5086_v44 = vpack.c.bf16 %v2593_v28, %v2585_v55  ;;  %v4070_v55 = vld [vmem:[#allocation10 + $0x1c8] sm:$0xff] }
 0x335   : > { %5193 = vmatpush1.bf16.msra.mxu1 %v5192_v33  ;;  %5067 = vmatprep.subr.bf16.mxu0 %v5066_v53  ;;  %v2584_v33 = vld [vmem:[#allocation7 + $0xfa0] sm:$0xff] }
 0x336   : > { %5195 = vmatprep.subr.bf16.mxu1 %v5194_v56  ;;  %v2592_v53 = vld [vmem:[#allocation7 + $0xfe0] sm:$0xff]  ;;  %v4029_v56 = vld [vmem:[#allocation10 + $0x80] sm:$0xff] }
 0x337   : > { %v5088_v20 = vpack.c.bf16 %v2592_v53, %v2584_v33  ;;  %v5266_v33 = vpack.c.bf16 %v4070_v55, %v4069_v63  ;;  %v4054_v53 = vld [vmem:[#allocation10 + $0x148] sm:$0xff] }
 0x338   : > { %5069 = vmatpush1.bf16.msra.mxu0 %v5068_v48  ;;  %v5218_v48 = vpack.c.bf16 %v4030_v9, %v4029_v56  ;;  %v4072_v56 = vld [vmem:[#allocation10 + $0x1d8] sm:$0xff] }
 0x339   : > { %5197 = vmatpush1.bf16.msra.mxu1 %v5196_v58  ;;  %5071 = vmatprep.subr.bf16.mxu0 %v5070_v0  ;;  %v4013_v58 = vld [vmem:[#allocation10] sm:$0xff]  ;;  %v4014_v0 = vld [vmem:[#allocation10 + $0x8] sm:$0xff] }
 0x33a   : > { %5199 = vmatprep.subr.bf16.mxu1 %v5198_v36  ;;  %v4031_v36 = vld [vmem:[#allocation10 + $0x90] sm:$0xff]  ;;  %v5220_v17 = vpack.c.bf16 %v4014_v0, %v4013_v58  ;;  %v5270_v58 = vpack.c.bf16 %v4072_v56, %v4071_v16  ;;  %v4056_v0 = vld [vmem:[#allocation10 + $0x158] sm:$0xff] }
 0x33b   : > { %v4096_v56 = vld [vmem:[#allocation10 + $0x298] sm:$0xff] }
 0x33c   : > { %5073 = vmatpush1.bf16.msra.mxu0 %v5072_v26  ;;  %v5222_v26 = vpack.c.bf16 %v4032_v2, %v4031_v36  ;;  %v4074_v36 = vld [vmem:[#allocation10 + $0x1e8] sm:$0xff] }
 0x33d   : > { %5201 = vmatpush1.bf16.msra.mxu1 %v5200_v10  ;;  %5075 = vmatprep.subr.bf16.mxu0 %v5074_v11  ;;  %v4015_v10 = vld [vmem:[#allocation10 + $0x10] sm:$0xff]  ;;  %v4016_v11 = vld [vmem:[#allocation10 + $0x18] sm:$0xff] }
 0x33e   : > { %5203 = vmatprep.subr.bf16.mxu1 %v5202_v39  ;;  %v4033_v39 = vld [vmem:[#allocation10 + $0xa0] sm:$0xff]  ;;  %v5224_v19 = vpack.c.bf16 %v4016_v11, %v4015_v10  ;;  %v5274_v10 = vpack.c.bf16 %v4074_v36, %v4073_v43  ;;  %v4058_v11 = vld [vmem:[#allocation10 + $0x168] sm:$0xff] }
 0x340   : > { %5077 = vmatpush1.bf16.msra.mxu0 %v5076_v25  ;;  %v5226_v25 = vpack.c.bf16 %v4034_v51, %v4033_v39  ;;  %v4076_v39 = vld [vmem:[#allocation10 + $0x1f8] sm:$0xff] }
 0x341   : > { %5205 = vmatpush1.bf16.msra.mxu1 %v5204_v32  ;;  %5079 = vmatprep.subr.bf16.mxu0 %v5078_v59  ;;  %v4017_v32 = vld [vmem:[#allocation10 + $0x20] sm:$0xff]  ;;  %v4018_v59 = vld [vmem:[#allocation10 + $0x28] sm:$0xff] }
 0x342   : > { %5207 = vmatprep.subr.bf16.mxu1 %v5206_v29  ;;  %v4035_v29 = vld [vmem:[#allocation10 + $0xb0] sm:$0xff]  ;;  %v5228_v31 = vpack.c.bf16 %v4018_v59, %v4017_v32  ;;  %v5278_v32 = vpack.c.bf16 %v4076_v39, %v4075_v47  ;;  %v4060_v59 = vld [vmem:[#allocation10 + $0x178] sm:$0xff] }
 0x343   : > { %v5230_v46 = vpack.c.bf16 %v4036_v61, %v4035_v29  ;;  %v4126_v29 = vld [vmem:[#allocation10 + $0x388] sm:$0xff] }
 0x344   : > { %5081 = vmatpush1.bf16.msra.mxu0 %v5080_v40  ;;  %v4019_v40 = vld [vmem:[#allocation10 + $0x30] sm:$0xff] }
 0x345   : > { %5209 = vmatpush1.bf16.msra.mxu1 %v5208_v14  ;;  %5083 = vmatprep.subr.bf16.mxu0 %v5082_v6  ;;  %v4020_v14 = vld [vmem:[#allocation10 + $0x38] sm:$0xff]  ;;  %v4051_v6 = vld [vmem:[#allocation10 + $0x130] sm:$0xff] }
 0x346   : > { %5211 = vmatprep.subr.bf16.mxu1 %v5210_v24  ;;  %v4038_v24 = vld [vmem:[#allocation10 + $0xc8] sm:$0xff]  ;;  %v5232_v28 = vpack.c.bf16 %v4020_v14, %v4019_v40  ;;  %v5264_v23 = vpack.c.bf16 %v4052_v34, %v4051_v6  ;;  %v7365_v40 = vld [vmem:[#allocation9] sm:$0xff]  ;;  %v2604_v14 = vsub.s32 1, %v6854_v3  ;;  %v2612_v6 = vsub.s32 3, %v6854_v3 }
 0x347   : > { %v5234_v60 = vpack.c.bf16 %v4038_v24, %v4037_v21 }
 0x348   : > { %5085 = vmatpush1.bf16.msra.mxu0 %v5084_v12  ;;  %v4021_v12 = vld [vmem:[#allocation10 + $0x40] sm:$0xff]  ;;  %v2605_v21 = vrot.slane %v7365_v40, %v2604_v14  ;;  %v2613_v24 = vrot.slane %v7365_v40, %v2612_v6 }
 0x349   : > { %5213 = vmatpush1.bf16.msra.mxu1 %v5212_v8  ;;  %5087 = vmatprep.subr.bf16.mxu0 %v5086_v44  ;;  %v4022_v8 = vld [vmem:[#allocation10 + $0x48] sm:$0xff]  ;;  %v4053_v44 = vld [vmem:[#allocation10 + $0x140] sm:$0xff] }
 0x34a   : > { %5215 = vmatprep.subr.bf16.mxu1 %v5214_v15  ;;  %v4040_v15 = vld [vmem:[#allocation10 + $0xd8] sm:$0xff]  ;;  %v5236_v9 = vpack.c.bf16 %v4022_v8, %v4021_v12  ;;  %v5268_v7 = vpack.c.bf16 %v4054_v53, %v4053_v44  ;;  %v4110_v53 = vld [vmem:[#allocation10 + $0x308] sm:$0xff] }
 0x34b   : > { %v5238_v41 = vpack.c.bf16 %v4040_v15, %v4039_v45  ;;  %v4095_v45 = vld [vmem:[#allocation10 + $0x290] sm:$0xff] }
 0x34c   : > { %5089 = vmatpush1.bf16.msra.mxu0 %v5088_v20  ;;  %v4023_v20 = vld [vmem:[#allocation10 + $0x50] sm:$0xff]  ;;  %v5286_v43 = vpack.c.bf16 %v4096_v56, %v4095_v45  ;;  %v4120_v56 = vld [vmem:[#allocation10 + $0x358] sm:$0xff] }
 0x34d   : > { %5217 = vmatpush1.bf16.msra.mxu1 %v5216_v42  ;;  %5219 = vmatprep.subr.bf16.mxu0 %v5218_v48  ;;  %v4024_v42 = vld [vmem:[#allocation10 + $0x58] sm:$0xff]  ;;  %v4055_v48 = vld [vmem:[#allocation10 + $0x150] sm:$0xff] }
 0x34e   : > { %5251 = vmatprep.subr.bf16.mxu1 %v5250_v30  ;;  %v4042_v30 = vld [vmem:[#allocation10 + $0xe8] sm:$0xff]  ;;  %v5240_v2 = vpack.c.bf16 %v4024_v42, %v4023_v20  ;;  %v5272_v38 = vpack.c.bf16 %v4056_v0, %v4055_v48  ;;  %v4080_v0 = vld [vmem:[#allocation10 + $0x218] sm:$0xff] }
 0x34f   : > { %3857 = vmatmul.mubr.f32.vlgmr.msra.gmra.mrb[2].mxu0 %v7351_v27  ;;  %v5242_v37 = vpack.c.bf16 %v4042_v30, %v4041_v22 }
 0x350   : > { %3999 = vmatmul.mubr.f32.vlgmr.msra.gmra.mrb[2].mxu1 %v7351_v27  ;;  %5221 = vmatpush3.bf16.msra.mxu0 %v5220_v17  ;;  %v5260_v27 = vpack.c.bf16 %v4050_v54, %v4049_v57  ;;  %v4025_v17 = vld [vmem:[#allocation10 + $0x60] sm:$0xff] }
 0x351   : > { %5253 = vmatpush3.bf16.msra.mxu1 %v5252_v52  ;;  %5223 = vmatprep.subr.bf16.mxu0 %v5222_v26  ;;  %v4026_v52 = vld [vmem:[#allocation10 + $0x68] sm:$0xff]  ;;  %v4057_v26 = vld [vmem:[#allocation10 + $0x160] sm:$0xff] }
 0x352   : > { %5255 = vmatprep.subr.bf16.mxu1 %v5254_v4  ;;  %v4044_v4 = vld [vmem:[#allocation10 + $0xf8] sm:$0xff]  ;;  %v5244_v51 = vpack.c.bf16 %v4026_v52, %v4025_v17  ;;  %v5276_v1 = vpack.c.bf16 %v4058_v11, %v4057_v26  ;;  %v4093_v57 = vld [vmem:[#allocation10 + $0x280] sm:$0xff]  ;;  %v4098_v17 = vld [vmem:[#allocation10 + $0x2a8] sm:$0xff] }
 0x353   : > { %v5246_v49 = vpack.c.bf16 %v4044_v4, %v4043_v13  ;;  %v4125_v54 = vld [vmem:[#allocation10 + $0x380] sm:$0xff]  ;;  %v4130_v26 = vld [vmem:[#allocation10 + $0x3a8] sm:$0xff] }
 0x354   : > { %5225 = vmatpush3.bf16.msra.mxu0 %v5224_v19  ;;  %v4027_v19 = vld [vmem:[#allocation10 + $0x70] sm:$0xff]  ;;  %v4129_v52 = vld [vmem:[#allocation10 + $0x3a0] sm:$0xff]  ;;  %v4082_v4 = vld [vmem:[#allocation10 + $0x228] sm:$0xff] }
 0x355   : > { %5257 = vmatpush3.bf16.msra.mxu1 %v5256_v35  ;;  %5227 = vmatprep.subr.bf16.mxu0 %v5226_v25  ;;  %v4028_v35 = vld [vmem:[#allocation10 + $0x78] sm:$0xff]  ;;  %v4059_v25 = vld [vmem:[#allocation10 + $0x170] sm:$0xff]  ;;  %v4081_v13 = vld [vmem:[#allocation10 + $0x220] sm:$0xff]  ;;  %v5322_v39 = vpack.c.bf16 %v4130_v26, %v4129_v52 }
 0x356   : > { %5259 = vmatprep.subr.bf16.mxu1 %v5258_v18  ;;  %v4094_v18 = vld [vmem:[#allocation10 + $0x288] sm:$0xff]  ;;  %v5248_v61 = vpack.c.bf16 %v4028_v35, %v4027_v19  ;;  %v5280_v5 = vpack.c.bf16 %v4060_v59, %v4059_v25  ;;  %v4100_v19 = vld [vmem:[#allocation10 + $0x2b8] sm:$0xff]  ;;  %v4131_v35 = vld [vmem:[#allocation10 + $0x3b0] sm:$0xff] }
 0x357   : > { %v5282_v50 = vpack.c.bf16 %v4094_v18, %v4093_v57  ;;  %v4132_v25 = vld [vmem:[#allocation10 + $0x3b8] sm:$0xff]  ;;  %v4083_v57 = vld [vmem:[#allocation10 + $0x230] sm:$0xff] }
 0x358   : > { %5229 = vmatpush3.bf16.msra.mxu0 %v5228_v31  ;;  %v5314_v31 = vpack.c.bf16 %v4126_v29, %v4125_v54  ;;  %v4084_v18 = vld [vmem:[#allocation10 + $0x238] sm:$0xff]  ;;  %v5326_v29 = vpack.c.bf16 %v4132_v25, %v4131_v35  ;;  %v2620_v35 = vsub.s32 5, %v6854_v3  ;;  %v2628_v25 = vsub.s32 7, %v6854_v3 }
 0x359   : > { %5261 = vmatpush3.bf16.msra.mxu1 %v5260_v27  ;;  %5231 = vmatprep.subr.bf16.mxu0 %v5230_v46  ;;  %v2600_v27 = vsub.s32 0, %v6854_v3  ;;  %v2608_v46 = vsub.s32 2, %v6854_v3  ;;  %v5296_v14 = vpack.c.bf16 %v4084_v18, %v4083_v57 }
 0x35a   : > { %5263 = vmatprep.subr.bf16.mxu1 %v5262_v62  ;;  %v2621_v57 = vrot.slane %v7365_v40, %v2620_v35  ;;  %v2629_v18 = vrot.slane %v7365_v40, %v2628_v25 }
 0x35b   : > { %v2601_v62 = vrot.slane %v7365_v40, %v2600_v27  ;;  %v2609_v34 = vrot.slane %v7365_v40, %v2608_v46  ;;  %v4133_v27 = vld [vmem:[#allocation10 + $0x3c0] sm:$0xff]  ;;  %v4134_v46 = vld [vmem:[#allocation10 + $0x3c8] sm:$0xff] }
 0x35c   : > { %5233 = vmatpush3.bf16.msra.mxu0 %v5232_v28  ;;  %v4077_v28 = vld [vmem:[#allocation10 + $0x200] sm:$0xff] }
 0x35d   : > { %5265 = vmatpush3.bf16.msra.mxu1 %v5264_v23  ;;  %5235 = vmatprep.subr.bf16.mxu0 %v5234_v60  ;;  %v4078_v23 = vld [vmem:[#allocation10 + $0x208] sm:$0xff] }
 0x35e   : > { %5267 = vmatprep.subr.bf16.mxu1 %v5266_v33  ;;  %v4109_v33 = vld [vmem:[#allocation10 + $0x300] sm:$0xff]  ;;  %v5284_v42 = vpack.c.bf16 %v4078_v23, %v4077_v28  ;;  %v4103_v28 = vld [vmem:[#allocation10 + $0x2d0] sm:$0xff]  ;;  %v4104_v23 = vld [vmem:[#allocation10 + $0x2d8] sm:$0xff] }
 0x35f   : > { %v5316_v48 = vpack.c.bf16 %v4110_v53, %v4109_v33  ;;  %v4087_v33 = vld [vmem:[#allocation10 + $0x250] sm:$0xff]  ;;  %v4088_v53 = vld [vmem:[#allocation10 + $0x258] sm:$0xff]  ;;  %v5302_v45 = vpack.c.bf16 %v4104_v23, %v4103_v28 }
 0x360   : > { %5237 = vmatpush3.bf16.msra.mxu0 %v5236_v9  ;;  %v4127_v9 = vld [vmem:[#allocation10 + $0x390] sm:$0xff] }
 0x361   : > { %5269 = vmatpush3.bf16.msra.mxu1 %v5268_v7  ;;  %5239 = vmatprep.subr.bf16.mxu0 %v5238_v41  ;;  %v4128_v7 = vld [vmem:[#allocation10 + $0x398] sm:$0xff] }
 0x362   : > { %5271 = vmatprep.subr.bf16.mxu1 %v5270_v58  ;;  %v4079_v58 = vld [vmem:[#allocation10 + $0x210] sm:$0xff]  ;;  %v5318_v36 = vpack.c.bf16 %v4128_v7, %v4127_v9  ;;  %v4105_v9 = vld [vmem:[#allocation10 + $0x2e0] sm:$0xff]  ;;  %v4106_v7 = vld [vmem:[#allocation10 + $0x2e8] sm:$0xff] }
 0x364   : > { %5241 = vmatpush3.bf16.msra.mxu0 %v5240_v2  ;;  %v4111_v2 = vld [vmem:[#allocation10 + $0x310] sm:$0xff] }
 0x365   : > { %5273 = vmatpush3.bf16.msra.mxu1 %v5272_v38  ;;  %5243 = vmatprep.subr.bf16.mxu0 %v5242_v37  ;;  %v4112_v38 = vld [vmem:[#allocation10 + $0x318] sm:$0xff]  ;;  %v4097_v37 = vld [vmem:[#allocation10 + $0x2a0] sm:$0xff] }
 0x366   : > { %5275 = vmatprep.subr.bf16.mxu1 %v5274_v10  ;;  %v5288_v10 = vpack.c.bf16 %v4080_v0, %v4079_v58  ;;  %v5320_v11 = vpack.c.bf16 %v4112_v38, %v4111_v2  ;;  %v5290_v47 = vpack.c.bf16 %v4098_v17, %v4097_v37  ;;  %v4089_v58 = vld [vmem:[#allocation10 + $0x260] sm:$0xff]  ;;  %v4090_v0 = vld [vmem:[#allocation10 + $0x268] sm:$0xff]  ;;  %v4107_v2 = vld [vmem:[#allocation10 + $0x2f0] sm:$0xff] }
 0x367   : > { %v4108_v38 = vld [vmem:[#allocation10 + $0x2f8] sm:$0xff]  ;;  %v4139_v37 = vld [vmem:[#allocation10 + $0x3f0] sm:$0xff]  ;;  %v5308_v52 = vpack.c.bf16 %v4090_v0, %v4089_v58 }
 0x368   : > { %5245 = vmatpush3.bf16.msra.mxu0 %v5244_v51  ;;  %v4113_v51 = vld [vmem:[#allocation10 + $0x320] sm:$0xff]  ;;  %v4140_v17 = vld [vmem:[#allocation10 + $0x3f8] sm:$0xff] }
 0x369   : > { %5277 = vmatpush3.bf16.msra.mxu1 %v5276_v1  ;;  %5247 = vmatprep.subr.bf16.mxu0 %v5246_v49  ;;  %v4114_v1 = vld [vmem:[#allocation10 + $0x328] sm:$0xff]  ;;  %v4099_v49 = vld [vmem:[#allocation10 + $0x2b0] sm:$0xff] }
 0x36a   : > { %5279 = vmatprep.subr.bf16.mxu1 %v5278_v32  ;;  %v5292_v32 = vpack.c.bf16 %v4082_v4, %v4081_v13  ;;  %v5324_v59 = vpack.c.bf16 %v4114_v1, %v4113_v51  ;;  %v5294_v54 = vpack.c.bf16 %v4100_v19, %v4099_v49  ;;  %v5342_v13 = vpack.c.bf16 %v4140_v17, %v4139_v37  ;;  %v4092_v4 = vld [vmem:[#allocation10 + $0x278] sm:$0xff] }
 0x36b   : > { %v2616_v49 = vsub.s32 4, %v6854_v3  ;;  %v2624_v19 = vsub.s32 6, %v6854_v3 }
 0x36c   : > { %5249 = vmatpush3.bf16.msra.mxu0 %v5248_v61  ;;  %v4115_v61 = vld [vmem:[#allocation10 + $0x330] sm:$0xff] }
 0x36d   : > { %5281 = vmatpush3.bf16.msra.mxu1 %v5280_v5  ;;  %5283 = vmatprep.subr.bf16.mxu0 %v5282_v50  ;;  %v4116_v5 = vld [vmem:[#allocation10 + $0x338] sm:$0xff]  ;;  %v4101_v50 = vld [vmem:[#allocation10 + $0x2c0] sm:$0xff] }
 0x36e   : > { %5315 = vmatprep.subr.bf16.mxu1 %v5314_v31  ;;  %v4102_v31 = vld [vmem:[#allocation10 + $0x2c8] sm:$0xff]  ;;  %v5328_v6 = vpack.c.bf16 %v4116_v5, %v4115_v61 }
 0x3a2   : > { %v3574_v63 = vpop.f32.mrb[0].mxu0  ;;  %v3716_v55 = vpop.f32.mrb[0].mxu1 }
 0x3a3   : > { %v5346_v60 = vadd.f32 %v3574_v63, %v2601_v62  ;;  %v5348_v12 = vadd.f32 %v3716_v55, %v2609_v34  ;;  %v3576_v8 = vpop.f32.mrb[1].mxu0  ;;  %v3718_v44 = vpop.f32.mrb[1].mxu1  ;;  %v4085_v62 = vld [vmem:[#allocation10 + $0x240] sm:$0xff]  ;;  %v4086_v34 = vld [vmem:[#allocation10 + $0x248] sm:$0xff] }
 0x3a4   : > { %v5347_v15 = vadd.f32 %v3576_v8, %v2605_v21  ;;  %v5349_v16 = vadd.f32 %v3718_v44, %v2613_v24  ;;  %v5298_v21 = vpack.c.bf16 %v4102_v31, %v4101_v50  ;;  %v5330_v24 = vpack.c.bf16 %v4134_v46, %v4133_v27  ;;  %v4117_v63 = vld [vmem:[#allocation10 + $0x340] sm:$0xff]  ;;  %v4118_v55 = vld [vmem:[#allocation10 + $0x348] sm:$0xff] }
 0x3a5   : > { %v4005_v22 = vmax.f32 %v5346_v60, 0.0  ;;  %v4007_v30 = vmax.f32 %v5348_v12, 0.0  ;;  %v4135_v60 = vld [vmem:[#allocation10 + $0x3d0] sm:$0xff]  ;;  %v4136_v12 = vld [vmem:[#allocation10 + $0x3d8] sm:$0xff]  ;;  %v5300_v8 = vpack.c.bf16 %v4086_v34, %v4085_v62  ;;  %v5332_v44 = vpack.c.bf16 %v4118_v55, %v4117_v63 }
 0x3a6   : > { %v4006_v41 = vmax.f32 %v5347_v15, 0.0  ;;  %v4008_v20 = vmax.f32 %v5349_v16, 0.0  ;;  %v5334_v15 = vpack.c.bf16 %v4136_v12, %v4135_v60  ;;  %v4119_v16 = vld [vmem:[#allocation10 + $0x350] sm:$0xff] }
 0x3a7   : > { %v4561_v63 = vld [vmem:[#allocation3] ss:$0 sm:$0xff] }
 0x3a8   : > { %4212 = vmatprep.mubr.f32.mxu0 %v4006_v41  ;;  %4282 = vmatprep.mubr.f32.mxu1 %v4008_v20  ;;  %v4137_v41 = vld [vmem:[#allocation10 + $0x3e0] sm:$0xff]  ;;  %v4138_v20 = vld [vmem:[#allocation10 + $0x3e8] sm:$0xff] }
 0x3a9   : > { %4213 = vmatmul.mubr.f32.vlgmr.msra.gmra.mrb[4].mxu0 %v4005_v22  ;;  %4283 = vmatmul.mubr.f32.vlgmr.msra.gmra.mrb[4].mxu1 %v4007_v30  ;;  %v5306_v22 = vpack.c.bf16 %v4106_v7, %v4105_v9  ;;  %v5338_v30 = vpack.c.bf16 %v4138_v20, %v4137_v41 }
 0x3aa   : > { %5285 = vmatpush3.bf16.msra.mxu0 %v5284_v42  ;;  %5317 = vmatpush3.bf16.msra.mxu1 %v5316_v48  ;;  %v5304_v42 = vpack.c.bf16 %v4088_v53, %v4087_v33  ;;  %v5336_v48 = vpack.c.bf16 %v4120_v56, %v4119_v16 }
 0x3ab   : > { %5287 = vmatprep.subr.bf16.mxu0 %v5286_v43  ;;  %5319 = vmatprep.subr.bf16.mxu1 %v5318_v36  ;;  %v4121_v43 = vld [vmem:[#allocation10 + $0x360] sm:$0xff]  ;;  %v4122_v36 = vld [vmem:[#allocation10 + $0x368] sm:$0xff] }
 0x3ac   : > { %v5340_v26 = vpack.c.bf16 %v4122_v36, %v4121_v43 }
 0x3ae   : > { %5289 = vmatpush3.bf16.msra.mxu0 %v5288_v10  ;;  %5321 = vmatpush3.bf16.msra.mxu1 %v5320_v11  ;;  %v4091_v10 = vld [vmem:[#allocation10 + $0x270] sm:$0xff]  ;;  %v5310_v11 = vpack.c.bf16 %v4108_v38, %v4107_v2 }
 0x3af   : > { %5291 = vmatprep.subr.bf16.mxu0 %v5290_v47  ;;  %5323 = vmatprep.subr.bf16.mxu1 %v5322_v39  ;;  %v4123_v47 = vld [vmem:[#allocation10 + $0x370] sm:$0xff]  ;;  %v4124_v39 = vld [vmem:[#allocation10 + $0x378] sm:$0xff]  ;;  %v5312_v51 = vpack.c.bf16 %v4092_v4, %v4091_v10 }
 0x3b0   : > { %v5344_v1 = vpack.c.bf16 %v4124_v39, %v4123_v47 }
 0x3b2   : > { %5293 = vmatpush3.bf16.msra.mxu0 %v5292_v32  ;;  %5325 = vmatpush3.bf16.msra.mxu1 %v5324_v59  ;;  %v2617_v32 = vrot.slane %v7365_v40, %v2616_v49  ;;  %v2625_v59 = vrot.slane %v7365_v40, %v2624_v19 }
 0x3b3   : > { %5295 = vmatprep.subr.bf16.mxu0 %v5294_v54  ;;  %5327 = vmatprep.subr.bf16.mxu1 %v5326_v29 }
 0x3b6   : > { %5297 = vmatpush3.bf16.msra.mxu0 %v5296_v14  ;;  %5329 = vmatpush3.bf16.msra.mxu1 %v5328_v6 }
 0x3b7   : > { %5299 = vmatprep.subr.bf16.mxu0 %v5298_v21  ;;  %5331 = vmatprep.subr.bf16.mxu1 %v5330_v24 }
 0x3ba   : > { %5301 = vmatpush3.bf16.msra.mxu0 %v5300_v8  ;;  %5333 = vmatpush3.bf16.msra.mxu1 %v5332_v44  ;;  %v5694_v8 = vmov 1966171168  }
 0x3bb   : > { %5303 = vmatprep.subr.bf16.mxu0 %v5302_v45  ;;  %5335 = vmatprep.subr.bf16.mxu1 %v5334_v15  ;;  %v4430_v44 = vunpack.c.l.s4 %v5694_v8 }
 0x3bd   : > { %v4431_v53 = vunpack.c.0.s8 %v4430_v44 }
 0x3be   : > { %5305 = vmatpush3.bf16.msra.mxu0 %v5304_v42  ;;  %5337 = vmatpush3.bf16.msra.mxu1 %v5336_v48 }
 0x3bf   : > { %5307 = vmatprep.subr.bf16.mxu0 %v5306_v22  ;;  %5339 = vmatprep.subr.bf16.mxu1 %v5338_v30  ;;  %v4434_v41 = vsub.s32 %v4431_v53, %v6854_v3 }
 0x3c2   : > { %5309 = vmatpush3.bf16.msra.mxu0 %v5308_v52  ;;  %5341 = vmatpush3.bf16.msra.mxu1 %v5340_v26 }
 0x3c3   : > { %5311 = vmatprep.subr.bf16.mxu0 %v5310_v11  ;;  %5343 = vmatprep.subr.bf16.mxu1 %v5342_v13 }
 0x3c6   : > { %5313 = vmatpush3.bf16.msra.mxu0 %v5312_v51  ;;  %5345 = vmatpush3.bf16.msra.mxu1 %v5344_v1 }
 0x422   : > { %v3858_v54 = vpop.f32.mrb[2].mxu0 }
 0x423   : > { %v5350_v29 = vadd.f32 %v3858_v54, %v2617_v32  ;;  %v4000_v61 = vpop.f32.mrb[2].mxu1  ;;  %v3860_v5 = vpop.f32.mrb[3].mxu0 }
 0x424   : > { %v5352_v50 = vadd.f32 %v4000_v61, %v2625_v59  ;;  %v5351_v31 = vadd.f32 %v3860_v5, %v2621_v57  ;;  %v4002_v27 = vpop.f32.mrb[3].mxu1 }
 0x425   : > { %v5353_v46 = vadd.f32 %v4002_v27, %v2629_v18  ;;  %v4009_v6 = vmax.f32 %v5350_v29, 0.0 }
 0x426   : > { %v4010_v14 = vmax.f32 %v5351_v31, 0.0  ;;  %v4011_v34 = vmax.f32 %v5352_v50, 0.0 }
 0x427   : > { %v4012_v62 = vmax.f32 %v5353_v46, 0.0 }
 0x428   : > { %4352 = vmatprep.mubr.f32.mxu0 %v4010_v14 }
 0x429   : > { %4422 = vmatprep.mubr.f32.mxu1 %v4012_v62  ;;  %4353 = vmatmul.mubr.f32.vlgmr.msra.gmra.mrb[6].mxu0 %v4009_v6 }
 0x42a   : > { %4423 = vmatmul.mubr.f32.vlgmr.msra.gmra.mrb[6].mxu1 %v4011_v34 }
 0x47c   : > { %v4598_v21 = vpop.f32.mrb[4].mxu0  ;;  %v4633_v24 = vpop.f32.mrb[4].mxu1 }
 0x47d   : > { %v4599_v40 = vpop.f32.mrb[5].mxu0  ;;  %v4634_v55 = vpop.f32.mrb[5].mxu1 }
 0x47e   : > { %v4600_v28 = vadd.f32 %v4599_v40, %v4598_v21  ;;  %v4635_v23 = vadd.f32 %v4634_v55, %v4633_v24 }
 0x480   : > { %v4215_v60 = vadd.f32 %v4600_v28, %v4561_v63 }
 0x482   : > { %v4285_v12 = vadd.f32 %v4635_v23, %v4215_v60 }
 0x4fc   : > { %v4668_v33 = vpop.f32.mrb[6].mxu0 }
 0x4fd   : > { %v4703_v45 = vpop.f32.mrb[6].mxu1  ;;  %v4669_v15 = vpop.f32.mrb[7].mxu0 }
 0x4fe   : > { %v4670_v16 = vadd.f32 %v4669_v15, %v4668_v33  ;;  %v4704_v56 = vpop.f32.mrb[7].mxu1 }
 0x4ff   : > { %v4705_v9 = vadd.f32 %v4704_v56, %v4703_v45 }
 0x500   : > { %v4355_v7 = vadd.f32 %v4670_v16, %v4285_v12 }
 0x502   : > { %v4425_v20 = vadd.f32 %v4705_v9, %v4355_v7 }
 0x504   : > { %v4435_v42 = vrot.slane %v4425_v20, %v4434_v41 }
 0x506   : > { %v4436_v48 = vcombine.high %v4435_v42, %v4435_v42  ;;  %v4443_v58 = vrot.slane %v4435_v42, %v4434_v41 }
 0x508   : > { %v4450_v0 = vrot.slane %v4436_v48, %v4434_v41  ;;  %4454 = vst.msk [vmem:[#allocation12] sm:$0x1] %vm4453_vm1, %v4443_v58 }
 0x50a   : > { %4455 = vst.msk [vmem:[#allocation12 + $0x1] sm:$0x1] %vm4453_vm1, %v4450_v0 }
 0x50b PF: > { %p5401_p13 = scmp.eq.s32.totalorder %s5750_s4, 1  ;;  %s5695_s30 = smov [#allocation12]  }
 0x50c   : > { %s4462_s9 = sshll.u32 %s5695_s30, 4  ;;  %s4463_s9 = int_to_ptr.vmem [resolvable:$true] %s4462_s9 }
 0x50d   : > { %s5610_s16 = scalar_lea.vmem %s4463_s9, 32  ;;  %p5617_p0 = scmp.lt.s32.totalorder %s4463_s9, %s4463_s9 }
 0x50e   : > { %p5611_p2 = scmp.ne.s32.totalorder %s4463_s9, %s5610_s16  ;;  %p5618_p5 = scmp.lt.s32.totalorder %s5610_s16, %s5610_s16 }
 0x510   : > { %p5612_p8 = pnand %p5611_p2, %p5401_p13  ;;  %p5619_p9 = por %p5618_p5, %p5617_p0 }
 0x512   : > { %p5613_p10 = pneg %p5612_p8 }
 0x514   : > { %p5620_p1 = pnand %p5619_p9, %p5613_p10 }
 0x516   : > { %5623 = shalt.err (!%p5620_p1)
}
 0x517   : > { %s5624_s8 = scalar_lea.hbm %s7423_s5, 32 }
 0x518   : > { %p5625_p12 = scmp.ne.s32.totalorder %s7423_s5, %s5624_s8  ;;  %p5630_p6 = scmp.lt.u32.totalorder %s5624_s8, %s7423_s5 }
 0x51a   : > { %p5626_p3 = pnand %p5625_p12, %p5401_p13 }
 0x51c   : > { %p5627_p4 = pneg %p5626_p3 }
 0x51e   : > { %p5632_p7 = pnand %p5630_p6, %p5627_p4 }
 0x520   : > { %5635 = shalt.err (!%p5632_p7)
}
 0x521   : > { %s5696_s14 = smov 16   ;;  %s5697_s6 = smov 1  }
 0x522   : > { %5377 = dma.vmem_to_hbm [thread:$0]  (%p5401_p13), %s4463_s9, 32, %s7423_s5, [#allocation6], %s5696_s14, %s5696_s14, %s5697_s6  }
 0x523   : > { %5665 = dma.done.wait (%p5401_p13), [#allocation6], 32  }
 0x524   : > { %5667 = vsyncadd (%p5401_p13), [#allocation6], 4294967264 }
 0x525 PF: > { %s7443_s7 = sld [smem:[#allocation17_spill]]  ;;  %p20_p11 = scmp.ge.s32.totalorder %s5753_s24, 4  }
 0x526   : > { %s7444_s20 = smov %s5674_s21  ;;  %s7445_s21 = smov %s5678_s22 }
 0x527   : > { %s7447_s23 = smov %s5753_s24  ;;  %22 = sbr.rel (!%p20_p11) target bundleno = 9 (0x9), region = 101 }
 0x52b   : > { %s7446_s22 = smov %s7443_s7 }
 0x52e   :  { %4478 = vsyncpa [#allocation5], 1 }
 0x52f   :  { %4480 = vsyncpa [#allocation5 + $0x1], 1 }
 0x530   :  { %4481 = vsyncpa [#allocation8], 1 }
 0x531   :  { %4482 = vsyncpa [#allocation11], 1 }
 0x532   :  { %4483 = vsyncpa [#allocation6], 1 }
 0x533   :  { %4485 = vsyncpa [#allocation6 + $0x1], 1 }

// kernel: tpu_custom_call.1
= control target key start
LH: loop header
LB: loop body
LE: loop exit
PB: predicated region body
PF: predicated region fallthrough
CT: control target
= control target key end

     0   :  { %s7418_s0 = inlined_call_operand.hbm [shape: f32[2,512,192], index: 0, kind: input, shape index: {}]   ;;  %s7419_s1 = inlined_call_operand.hbm [shape: f32[512,1024], index: 1, kind: input, shape index: {}]   ;;  %s7420_s2 = inlined_call_operand.hbm [shape: f32[1,1024], index: 2, kind: input, shape index: {}]   ;;  %s7421_s3 = inlined_call_operand.hbm [shape: f32[1024,1], index: 3, kind: input, shape index: {}]   ;;  %s7422_s4 = inlined_call_operand.<no memory space> [shape: f32[1,1], index: 4, kind: input, shape index: {}]   ;;  %s7423_s5 = inlined_call_operand.hbm [shape: f32[2,1,1], index: 5, kind: output, shape index: {}]  }
   0x1   :  { %v10_v0 = vstv %s7422_s4 }
   0x2   :  { %11 = vst [vmem:[#allocation3] sm:$0x1] %v10_v0 }
   0x3   :  { %12 = vsyncpa [#allocation5], 0 }
   0x4   :  { %14 = vsyncpa [#allocation5 + $0x1], 0 }
   0x5   :  { %15 = vsyncpa [#allocation8], 0 }
   0x6   :  { %16 = vsyncpa [#allocation11], 0 }
   0x7   :  { %17 = vsyncpa [#allocation6], 0  ;;  %s5731_s20 = smov 0   ;;  %s5733_s21 = smov 0  }
   0x8   :  { %s5735_s22 = smov 0   ;;  %s5737_s23 = smov 0  }
   0x9 LB: > { %s5750_s4 = sadd.s32 4294967295, %s5682_s23   ;;  %s5753_s24 = sadd.s32 1, %s5682_s23   ;;  %s5682_s23 = sphi %s5737_s23, %s7447_s23   ;;  %s5678_s22 = sphi %s5735_s22, %s7446_s22   ;;  %s5674_s21 = sphi %s5733_s21, %s7445_s21   ;;  %s5670_s20 = sphi %s5731_s20, %s7444_s20  }
   0xa   : > { %s27_s25 = ssub.s32 %s5682_s23, %s5753_s24  ;;  %s30_s26 = sadd.s32 1, %s5678_s22 }
   0xb   : > { %p28_p0 = scmp.eq.s32.totalorder %s27_s25, 0  ;;  %p37_p1 = scmp.ne.s32.totalorder %s5678_s22, %s5674_s21 }
   0xc   : > { %p38_p2 = scmp.eq.s32.totalorder %s5682_s23, 0  ;;  %p43_p3 = scmp.ne.s32.totalorder %s5674_s21, %s5670_s20 }
   0xd   : > { %s5763_s27 = scalar_select %p28_p0, %s5678_s22, %s30_s26  }
   0xe   : > { %p5765_p4 = por %p38_p2, %p37_p1  ;;  %p7424_p5 = scmp.eq.s32.totalorder %s5750_s4, 0 }
   0xf   : > { %7428 = sst [smem:[#allocation17_spill]] %s5763_s27  ;;  %p4545_p6 = scmp.ge.s32.totalorder %s5682_s23, 1 }
  0x10   : > { %p159_p7 = scmp.lt.s32.totalorder %s5682_s23, 3  ;;  %p5774_p8 = por %p7424_p5, %p43_p3 }
  0x11   : > { %s5684_s6 = smov [#allocation7]   ;;  %p5397_p13 = scmp.lt.s32.totalorder %s5682_s23, 2 }
  0x12   : > { %s7430_s29 = scalar_select %p5774_p8, 1, 0 }
  0x13   : > { %p5779_p10 = pnand %p4545_p6, %p159_p7  ;;  %s171_s7 = sshll.u32 %s5684_s6, 4  ;;  %s172_s7 = int_to_ptr.vmem [resolvable:$true] %s171_s7 }
  0x14   : > { %p5794_p0 = pnand %p5397_p13, %p5765_p4  ;;  %s5496_s12 = scalar_lea.hbm %s7419_s1, 65536 }
  0x15   : > { %s7431_s30 = scalar_select %p5779_p10, 1, 0 }
  0x16   : > { %p5380_p11 = pneg %p5779_p10  ;;  %p5497_p1 = scmp.ne.s32.totalorder %s7419_s1, %s5496_s12 }
  0x17   : > { %s7433_s9 = scalar_select %p5794_p0, 1, 0 }
  0x18   : > { %p5787_p12 = pnand %p5380_p11, %p7424_p5  ;;  %p5503_p6 = scmp.lt.u32.totalorder %s5496_s12, %s7419_s1 }
  0x1a   : > { %p5806_p2 = pneg %p5787_p12 }
  0x1c   : > { %p5499_p3 = pnand %p5806_p2, %p5497_p1 }
  0x1e   : > { %p5500_p4 = pneg %p5499_p3 }
  0x20   : > { %p5505_p7 = pnand %p5503_p6, %p5500_p4 }
  0x22   : > { %5508 = shalt.err (!%p5505_p7)
}
  0x23   : > { %s5509_s18 = scalar_lea.vmem %s172_s7, 65536  ;;  %p5517_p5 = scmp.lt.s32.totalorder %s172_s7, %s172_s7 }
  0x24   : > { %p5510_p11 = scmp.ne.s32.totalorder %s172_s7, %s5509_s18  ;;  %p5518_p8 = scmp.lt.s32.totalorder %s5509_s18, %s5509_s18 }
  0x26   : > { %p5512_p13 = pnand %p5510_p11, %p5806_p2  ;;  %p5519_p10 = por %p5518_p8, %p5517_p5 }
  0x28   : > { %p5513_p9 = pneg %p5512_p13 }
  0x2a   : > { %p5520_p0 = pnand %p5519_p10, %p5513_p9 }
  0x2c   : > { %5523 = shalt.err (!%p5520_p0)
}
  0x2d   : > { %s5685_s19 = smov 1024   ;;  %s5686_s20 = smov 64  }
  0x2e   : > { %5383 = dma.hbm_to_vmem [thread:$0]  (!%p5787_p12), %s7419_s1, 65536, %s172_s7, [#allocation8], %s5685_s19, %s5685_s19, %s5686_s20  }
  0x2f   : > { %s5687_s28 = smov [#allocation9]   ;;  %s5688_s10 = smov [#allocation10]  }
  0x30   : > { %s185_s6 = sshll.u32 %s5687_s28, 4  ;;  %s195_s11 = sshll.u32 %s5688_s10, 4  ;;  %s186_s6 = int_to_ptr.vmem [resolvable:$true] %s185_s6  ;;  %s196_s11 = int_to_ptr.vmem [resolvable:$true] %s195_s11 }
  0x31   : > { %s5524_s14 = scalar_lea.hbm %s7420_s2, 128 }
  0x32   : > { %p5525_p5 = scmp.ne.s32.totalorder %s7420_s2, %s5524_s14  ;;  %p5531_p10 = scmp.lt.u32.totalorder %s5524_s14, %s7420_s2 }
  0x34   : > { %p5527_p8 = pnand %p5525_p5, %p5806_p2 }
  0x36   : > { %p5528_p9 = pneg %p5527_p8 }
  0x38   : > { %p5533_p0 = pnand %p5531_p10, %p5528_p9 }
  0x3a   : > { %5536 = shalt.err (!%p5533_p0)
}
  0x3b   : > { %s5537_s7 = scalar_lea.vmem %s186_s6, 128  ;;  %p5545_p6 = scmp.lt.s32.totalorder %s186_s6, %s186_s6 }
  0x3c   : > { %p5538_p1 = scmp.ne.s32.totalorder %s186_s6, %s5537_s7  ;;  %p5546_p7 = scmp.lt.s32.totalorder %s5537_s7, %s5537_s7 }
  0x3e   : > { %p5540_p3 = pnand %p5538_p1, %p5806_p2  ;;  %p5547_p11 = por %p5546_p7, %p5545_p6 }
  0x40   : > { %p5541_p4 = pneg %p5540_p3 }
  0x42   : > { %p5548_p13 = pnand %p5547_p11, %p5541_p4 }
  0x44   : > { %5551 = shalt.err (!%p5548_p13)
}
  0x45   : > { %5386 = dma.hbm_to_vmem [thread:$0]  (!%p5787_p12), %s7420_s2, 128, %s186_s6, [#allocation8]  }
  0x46   : > { %s212_s27 = sand.u32 1, %s5678_s22   ;;  %s5552_s28 = scalar_lea.hbm %s7421_s3, 16384 }
  0x47   : > { %p5553_p5 = scmp.ne.s32.totalorder %s7421_s3, %s5552_s28  ;;  %p5559_p10 = scmp.lt.u32.totalorder %s5552_s28, %s7421_s3 }
  0x49   : > { %p5555_p8 = pnand %p5553_p5, %p5806_p2 }
  0x4b   : > { %p5556_p9 = pneg %p5555_p8 }
  0x4d   : > { %p5561_p0 = pnand %p5559_p10, %p5556_p9 }
  0x4f   : > { %5564 = shalt.err (!%p5561_p0)
}
  0x50   : > { %s5565_s6 = scalar_lea.vmem %s196_s11, 16384  ;;  %p5573_p6 = scmp.lt.s32.totalorder %s196_s11, %s196_s11 }
  0x51   : > { %p5566_p1 = scmp.ne.s32.totalorder %s196_s11, %s5565_s6  ;;  %p5574_p7 = scmp.lt.s32.totalorder %s5565_s6, %s5565_s6 }
  0x53   : > { %p5568_p3 = pnand %p5566_p1, %p5806_p2  ;;  %p5575_p11 = por %p5574_p7, %p5573_p6 }
  0x55   : > { %p5569_p4 = pneg %p5568_p3 }
  0x57   : > { %p5576_p13 = pnand %p5575_p11, %p5569_p4 }
  0x59   : > { %5579 = shalt.err (!%p5576_p13)
}
  0x5a   : > { %s5689_s16 = smov 128   ;;  %s5690_s17 = smov 8  }
  0x5b   : > { %5389 = dma.hbm_to_vmem [thread:$0]  (!%p5787_p12), %s7421_s3, 16384, %s196_s11, [#allocation11], %s5689_s16, %s5689_s16, %s5690_s17  }
  0x5c   : > { %s4550_s15 = sshll.u32 %s212_s27, 10  ;;  %s4551_s19 = sshll.u32 %s5682_s23, 7 }
  0x5d   : > { %s5866_s26 = scalar_lea.hbm %s7418_s0, %s4551_s19  ;;  %s216_s28 = scalar_lea.vmem [#allocation4], %s4550_s15 }
  0x5e   : > { %s222_s8 = sshll.u32 %s216_s28, 4  ;;  %s5870_s10 = scalar_lea.sflag [#allocation5], %s212_s27  ;;  %s5868_s8 = int_to_ptr.vmem [resolvable:$true] %s222_s8 }
  0x5f   : > { %s5580_s12 = scalar_lea.hbm %s5866_s26, 16384  ;;  %p7435_p12 = scmp.ne.s32.totalorder %s7433_s9, 0 }
  0x60   : > { %p5581_p2 = scmp.ne.s32.totalorder %s5866_s26, %s5580_s12  ;;  %s5585_s13 = scalar_lea.hbm %s7418_s0, 32768 }
  0x61   : > { %p5582_p5 = pneg %p7435_p12  ;;  %p5586_p10 = scmp.lt.u32.totalorder %s5866_s26, %s7418_s0 }
  0x62   : > { %p5587_p0 = scmp.lt.u32.totalorder %s5585_s13, %s5580_s12  ;;  %p5589_p3 = scmp.lt.u32.totalorder %s5580_s12, %s5866_s26 }
  0x63   : > { %p5583_p8 = pnand %p5582_p5, %p5581_p2 }
  0x64   : > { %p5588_p1 = por %p5587_p0, %p5586_p10 }
  0x65   : > { %p5584_p9 = pneg %p5583_p8 }
  0x66   : > { %p5590_p4 = por %p5589_p3, %p5588_p1 }
  0x68   : > { %p5591_p6 = pnand %p5590_p4, %p5584_p9 }
  0x6a   : > { %5594 = shalt.err (!%p5591_p6)
}
  0x6b   : > { %s5595_s27 = scalar_lea.vmem %s5868_s8, 16384  ;;  %s5691_s18 = smov [#allocation4]  }
  0x6c   : > { %p5596_p7 = scmp.ne.s32.totalorder %s5868_s8, %s5595_s27  ;;  %s5600_s7 = sshll.u32 %s5691_s18, 4  ;;  %s5601_s7 = int_to_ptr.vmem [resolvable:$false] %s5600_s7 }
  0x6d   : > { %s5602_s15 = scalar_lea.vmem %s5601_s7, 32768  ;;  %p5603_p2 = scmp.lt.s32.totalorder %s5868_s8, %s5601_s7 }
  0x6e   : > { %p5598_p11 = pnand %p5596_p7, %p5582_p5  ;;  %p5604_p8 = scmp.lt.s32.totalorder %s5602_s15, %s5595_s27 }
  0x70   : > { %p5599_p13 = pneg %p5598_p11  ;;  %p5605_p10 = por %p5604_p8, %p5603_p2 }
  0x72   : > { %p5606_p0 = pnand %p5605_p10, %p5599_p13 }
  0x74   : > { %5609 = shalt.err (!%p5606_p0)
}
  0x75   : > { %s5692_s19 = smov 256   ;;  %p7436_p5 = scmp.ne.s32.totalorder %s7431_s30, 0 }
  0x76   : > { %5393 = dma.hbm_to_vmem [thread:$0]  (!%p7435_p12), %s5866_s26, 16384, %s5868_s8, %s5870_s10, %s5692_s19, %s5689_s16, %s5690_s17  }
  0x77   : > { %234 = sbr.rel (%p7436_p5) target bundleno = 1317 (0x525), region = 40  ;;  %s236_s20 = sand.u32 (!%p7436_p5), 1, %s5674_s21  }
  0x78   : > { %s4553_s25 = sshll.u32 (!%p7436_p5), %s236_s20, 10  ;;  %s237_s28 = scalar_lea.sflag (!%p7436_p5), [#allocation5], %s236_s20 }
  0x79   : > { %s5903_s12 = scalar_lea.vmem (!%p7436_p5), [#allocation4], %s4553_s25  ;;  %p7437_p9 = scmp.ne.s32.totalorder (!%p7436_p5), %s7430_s29, 0 }
  0x7e   : > { %5653 = dma.done.wait (%p7437_p9), %s237_s28, 16384  }
  0x7f   : > { %5655 = vsyncadd (%p7437_p9), %s237_s28, 4294950912  ;;  %p7438_p1 = scmp.eq.s32.totalorder %s5750_s4, 0 }
  0x81   : > { %5657 = dma.done.wait (%p7438_p1), [#allocation8], 65664   ;;  %p7439_p12 = pmov %p7438_p1 }
  0x82   : > { %p7440_p3 = pmov %p7438_p1 }
  0x83   : > { %5659 = vsyncadd (%p7439_p12), [#allocation8], 4294901632 }
  0x84   : > { %5661 = dma.done.wait (%p7440_p3), [#allocation11], 16384   ;;  %p7441_p4 = pmov %p7438_p1 }
  0x85   : > { %p7442_p6 = scmp.ne.s32.totalorder %s5750_s4, 0 }
  0x86   : > { %5663 = vsyncadd (%p7441_p4), [#allocation11], 4294950912  ;;  %v5693_v1 = vmov (!%p7442_p6), 0.0  }
  0x87   : > { %277 = sbr.rel (%p7442_p6) target bundleno = 199 (0xc7), region = 60  ;;  %278 = vst [vmem:[#allocation2] sm:$0xff] (!%p7442_p6), %v5693_v1  ;;  %279 = vst [vmem:[#allocation2 + $0x8] sm:$0xff] (!%p7442_p6), %v5693_v1 }
  0x88   : > { %280 = vst [vmem:[#allocation2 + $0x10] sm:$0xff] (!%p7442_p6), %v5693_v1  ;;  %281 = vst [vmem:[#allocation2 + $0x18] sm:$0xff] (!%p7442_p6), %v5693_v1 }
  0x89   : > { %282 = vst [vmem:[#allocation2 + $0x20] sm:$0xff] (!%p7442_p6), %v5693_v1  ;;  %283 = vst [vmem:[#allocation2 + $0x28] sm:$0xff] (!%p7442_p6), %v5693_v1 }
  0x8a   : > { %284 = vst [vmem:[#allocation2 + $0x30] sm:$0xff] (!%p7442_p6), %v5693_v1  ;;  %285 = vst [vmem:[#allocation2 + $0x38] sm:$0xff] (!%p7442_p6), %v5693_v1 }
  0x8b   : > { %286 = vst [vmem:[#allocation2 + $0x40] sm:$0xff] (!%p7442_p6), %v5693_v1  ;;  %287 = vst [vmem:[#allocation2 + $0x48] sm:$0xff] (!%p7442_p6), %v5693_v1 }
  0x8c   : > { %288 = vst [vmem:[#allocation2 + $0x50] sm:$0xff] (!%p7442_p6), %v5693_v1  ;;  %289 = vst [vmem:[#allocation2 + $0x58] sm:$0xff] (!%p7442_p6), %v5693_v1 }
  0x8d   : > { %290 = vst [vmem:[#allocation2 + $0x60] sm:$0xff] (!%p7442_p6), %v5693_v1  ;;  %291 = vst [vmem:[#allocation2 + $0x68] sm:$0xff] (!%p7442_p6), %v5693_v1 }
  0x8e   : > { %292 = vst [vmem:[#allocation2 + $0x70] sm:$0xff] %v5693_v1  ;;  %293 = vst [vmem:[#allocation2 + $0x78] sm:$0xff] %v5693_v1 }
  0x8f   : > { %294 = vst [vmem:[#allocation2 + $0x80] sm:$0xff] %v5693_v1  ;;  %295 = vst [vmem:[#allocation2 + $0x88] sm:$0xff] %v5693_v1 }
  0x90   : > { %296 = vst [vmem:[#allocation2 + $0x90] sm:$0xff] %v5693_v1  ;;  %297 = vst [vmem:[#allocation2 + $0x98] sm:$0xff] %v5693_v1 }
  0x91   : > { %298 = vst [vmem:[#allocation2 + $0xa0] sm:$0xff] %v5693_v1  ;;  %299 = vst [vmem:[#allocation2 + $0xa8] sm:$0xff] %v5693_v1 }
  0x92   : > { %300 = vst [vmem:[#allocation2 + $0xb0] sm:$0xff] %v5693_v1  ;;  %301 = vst [vmem:[#allocation2 + $0xb8] sm:$0xff] %v5693_v1 }
  0x93   : > { %302 = vst [vmem:[#allocation2 + $0xc0] sm:$0xff] %v5693_v1  ;;  %303 = vst [vmem:[#allocation2 + $0xc8] sm:$0xff] %v5693_v1 }
  0x94   : > { %304 = vst [vmem:[#allocation2 + $0xd0] sm:$0xff] %v5693_v1  ;;  %305 = vst [vmem:[#allocation2 + $0xd8] sm:$0xff] %v5693_v1 }
  0x95   : > { %306 = vst [vmem:[#allocation2 + $0xe0] sm:$0xff] %v5693_v1  ;;  %307 = vst [vmem:[#allocation2 + $0xe8] sm:$0xff] %v5693_v1 }
  0x96   : > { %308 = vst [vmem:[#allocation2 + $0xf0] sm:$0xff] %v5693_v1  ;;  %309 = vst [vmem:[#allocation2 + $0xf8] sm:$0xff] %v5693_v1 }
  0x97   : > { %310 = vst [vmem:[#allocation2 + $0x100] sm:$0xff] %v5693_v1  ;;  %311 = vst [vmem:[#allocation2 + $0x108] sm:$0xff] %v5693_v1 }
  0x98   : > { %312 = vst [vmem:[#allocation2 + $0x110] sm:$0xff] %v5693_v1  ;;  %313 = vst [vmem:[#allocation2 + $0x118] sm:$0xff] %v5693_v1 }
  0x99   : > { %314 = vst [vmem:[#allocation2 + $0x120] sm:$0xff] %v5693_v1  ;;  %315 = vst [vmem:[#allocation2 + $0x128] sm:$0xff] %v5693_v1 }
  0x9a   : > { %316 = vst [vmem:[#allocation2 + $0x130] sm:$0xff] %v5693_v1  ;;  %317 = vst [vmem:[#allocation2 + $0x138] sm:$0xff] %v5693_v1 }
  0x9b   : > { %318 = vst [vmem:[#allocation2 + $0x140] sm:$0xff] %v5693_v1  ;;  %319 = vst [vmem:[#allocation2 + $0x148] sm:$0xff] %v5693_v1 }
  0x9c   : > { %320 = vst [vmem:[#allocation2 + $0x150] sm:$0xff] %v5693_v1  ;;  %321 = vst [vmem:[#allocation2 + $0x158] sm:$0xff] %v5693_v1 }
  0x9d   : > { %322 = vst [vmem:[#allocation2 + $0x160] sm:$0xff] %v5693_v1  ;;  %323 = vst [vmem:[#allocation2 + $0x168] sm:$0xff] %v5693_v1 }
  0x9e   : > { %324 = vst [vmem:[#allocation2 + $0x170] sm:$0xff] %v5693_v1  ;;  %325 = vst [vmem:[#allocation2 + $0x178] sm:$0xff] %v5693_v1 }
  0x9f   : > { %326 = vst [vmem:[#allocation2 + $0x180] sm:$0xff] %v5693_v1  ;;  %327 = vst [vmem:[#allocation2 + $0x188] sm:$0xff] %v5693_v1 }
  0xa0   : > { %328 = vst [vmem:[#allocation2 + $0x190] sm:$0xff] %v5693_v1  ;;  %329 = vst [vmem:[#allocation2 + $0x198] sm:$0xff] %v5693_v1 }
  0xa1   : > { %330 = vst [vmem:[#allocation2 + $0x1a0] sm:$0xff] %v5693_v1  ;;  %331 = vst [vmem:[#allocation2 + $0x1a8] sm:$0xff] %v5693_v1 }
  0xa2   : > { %332 = vst [vmem:[#allocation2 + $0x1b0] sm:$0xff] %v5693_v1  ;;  %333 = vst [vmem:[#allocation2 + $0x1b8] sm:$0xff] %v5693_v1 }
  0xa3   : > { %334 = vst [vmem:[#allocation2 + $0x1c0] sm:$0xff] %v5693_v1  ;;  %335 = vst [vmem:[#allocation2 + $0x1c8] sm:$0xff] %v5693_v1 }
  0xa4   : > { %336 = vst [vmem:[#allocation2 + $0x1d0] sm:$0xff] %v5693_v1  ;;  %337 = vst [vmem:[#allocation2 + $0x1d8] sm:$0xff] %v5693_v1 }
  0xa5   : > { %338 = vst [vmem:[#allocation2 + $0x1e0] sm:$0xff] %v5693_v1  ;;  %339 = vst [vmem:[#allocation2 + $0x1e8] sm:$0xff] %v5693_v1 }
  0xa6   : > { %340 = vst [vmem:[#allocation2 + $0x1f0] sm:$0xff] %v5693_v1  ;;  %341 = vst [vmem:[#allocation2 + $0x1f8] sm:$0xff] %v5693_v1 }
  0xa7   : > { %342 = vst [vmem:[#allocation2 + $0x200] sm:$0xff] %v5693_v1  ;;  %343 = vst [vmem:[#allocation2 + $0x208] sm:$0xff] %v5693_v1 }
  0xa8   : > { %344 = vst [vmem:[#allocation2 + $0x210] sm:$0xff] %v5693_v1  ;;  %345 = vst [vmem:[#allocation2 + $0x218] sm:$0xff] %v5693_v1 }
  0xa9   : > { %346 = vst [vmem:[#allocation2 + $0x220] sm:$0xff] %v5693_v1  ;;  %347 = vst [vmem:[#allocation2 + $0x228] sm:$0xff] %v5693_v1 }
  0xaa   : > { %348 = vst [vmem:[#allocation2 + $0x230] sm:$0xff] %v5693_v1  ;;  %349 = vst [vmem:[#allocation2 + $0x238] sm:$0xff] %v5693_v1 }
  0xab   : > { %350 = vst [vmem:[#allocation2 + $0x240] sm:$0xff] %v5693_v1  ;;  %351 = vst [vmem:[#allocation2 + $0x248] sm:$0xff] %v5693_v1 }
  0xac   : > { %352 = vst [vmem:[#allocation2 + $0x250] sm:$0xff] %v5693_v1  ;;  %353 = vst [vmem:[#allocation2 + $0x258] sm:$0xff] %v5693_v1 }
  0xad   : > { %354 = vst [vmem:[#allocation2 + $0x260] sm:$0xff] %v5693_v1  ;;  %355 = vst [vmem:[#allocation2 + $0x268] sm:$0xff] %v5693_v1 }
  0xae   : > { %356 = vst [vmem:[#allocation2 + $0x270] sm:$0xff] %v5693_v1  ;;  %357 = vst [vmem:[#allocation2 + $0x278] sm:$0xff] %v5693_v1 }
  0xaf   : > { %358 = vst [vmem:[#allocation2 + $0x280] sm:$0xff] %v5693_v1  ;;  %359 = vst [vmem:[#allocation2 + $0x288] sm:$0xff] %v5693_v1 }
  0xb0   : > { %360 = vst [vmem:[#allocation2 + $0x290] sm:$0xff] %v5693_v1  ;;  %361 = vst [vmem:[#allocation2 + $0x298] sm:$0xff] %v5693_v1 }
  0xb1   : > { %362 = vst [vmem:[#allocation2 + $0x2a0] sm:$0xff] %v5693_v1  ;;  %363 = vst [vmem:[#allocation2 + $0x2a8] sm:$0xff] %v5693_v1 }
  0xb2   : > { %364 = vst [vmem:[#allocation2 + $0x2b0] sm:$0xff] %v5693_v1  ;;  %365 = vst [vmem:[#allocation2 + $0x2b8] sm:$0xff] %v5693_v1 }
  0xb3   : > { %366 = vst [vmem:[#allocation2 + $0x2c0] sm:$0xff] %v5693_v1  ;;  %367 = vst [vmem:[#allocation2 + $0x2c8] sm:$0xff] %v5693_v1 }
  0xb4   : > { %368 = vst [vmem:[#allocation2 + $0x2d0] sm:$0xff] %v5693_v1  ;;  %369 = vst [vmem:[#allocation2 + $0x2d8] sm:$0xff] %v5693_v1 }
  0xb5   : > { %370 = vst [vmem:[#allocation2 + $0x2e0] sm:$0xff] %v5693_v1  ;;  %371 = vst [vmem:[#allocation2 + $0x2e8] sm:$0xff] %v5693_v1 }
  0xb6   : > { %372 = vst [vmem:[#allocation2 + $0x2f0] sm:$0xff] %v5693_v1  ;;  %373 = vst [vmem:[#allocation2 + $0x2f8] sm:$0xff] %v5693_v1 }
  0xb7   : > { %374 = vst [vmem:[#allocation2 + $0x300] sm:$0xff] %v5693_v1  ;;  %375 = vst [vmem:[#allocation2 + $0x308] sm:$0xff] %v5693_v1 }
  0xb8   : > { %376 = vst [vmem:[#allocation2 + $0x310] sm:$0xff] %v5693_v1  ;;  %377 = vst [vmem:[#allocation2 + $0x318] sm:$0xff] %v5693_v1 }
  0xb9   : > { %378 = vst [vmem:[#allocation2 + $0x320] sm:$0xff] %v5693_v1  ;;  %379 = vst [vmem:[#allocation2 + $0x328] sm:$0xff] %v5693_v1 }
  0xba   : > { %380 = vst [vmem:[#allocation2 + $0x330] sm:$0xff] %v5693_v1  ;;  %381 = vst [vmem:[#allocation2 + $0x338] sm:$0xff] %v5693_v1 }
  0xbb   : > { %382 = vst [vmem:[#allocation2 + $0x340] sm:$0xff] %v5693_v1  ;;  %383 = vst [vmem:[#allocation2 + $0x348] sm:$0xff] %v5693_v1 }
  0xbc   : > { %384 = vst [vmem:[#allocation2 + $0x350] sm:$0xff] %v5693_v1  ;;  %385 = vst [vmem:[#allocation2 + $0x358] sm:$0xff] %v5693_v1 }
  0xbd   : > { %386 = vst [vmem:[#allocation2 + $0x360] sm:$0xff] %v5693_v1  ;;  %387 = vst [vmem:[#allocation2 + $0x368] sm:$0xff] %v5693_v1 }
  0xbe   : > { %388 = vst [vmem:[#allocation2 + $0x370] sm:$0xff] %v5693_v1  ;;  %389 = vst [vmem:[#allocation2 + $0x378] sm:$0xff] %v5693_v1 }
  0xbf   : > { %390 = vst [vmem:[#allocation2 + $0x380] sm:$0xff] %v5693_v1  ;;  %391 = vst [vmem:[#allocation2 + $0x388] sm:$0xff] %v5693_v1 }
  0xc0   : > { %392 = vst [vmem:[#allocation2 + $0x390] sm:$0xff] %v5693_v1  ;;  %393 = vst [vmem:[#allocation2 + $0x398] sm:$0xff] %v5693_v1 }
  0xc1   : > { %394 = vst [vmem:[#allocation2 + $0x3a0] sm:$0xff] %v5693_v1  ;;  %395 = vst [vmem:[#allocation2 + $0x3a8] sm:$0xff] %v5693_v1 }
  0xc2   : > { %396 = vst [vmem:[#allocation2 + $0x3b0] sm:$0xff] %v5693_v1  ;;  %397 = vst [vmem:[#allocation2 + $0x3b8] sm:$0xff] %v5693_v1 }
  0xc3   : > { %398 = vst [vmem:[#allocation2 + $0x3c0] sm:$0xff] %v5693_v1  ;;  %399 = vst [vmem:[#allocation2 + $0x3c8] sm:$0xff] %v5693_v1 }
  0xc4   : > { %400 = vst [vmem:[#allocation2 + $0x3d0] sm:$0xff] %v5693_v1  ;;  %401 = vst [vmem:[#allocation2 + $0x3d8] sm:$0xff] %v5693_v1 }
  0xc5   : > { %402 = vst [vmem:[#allocation2 + $0x3e0] sm:$0xff] %v5693_v1  ;;  %403 = vst [vmem:[#allocation2 + $0x3e8] sm:$0xff] %v5693_v1 }
  0xc6   : > { %404 = vst [vmem:[#allocation2 + $0x3f0] sm:$0xff] %v5693_v1  ;;  %405 = vst [vmem:[#allocation2 + $0x3f8] sm:$0xff] %v5693_v1 }
  0xc7 PF: > { %p4558_p7 = scmp.ge.s32.totalorder %s5750_s4, 1 }
  0xc8   : > { %v410_v2 = vld [vmem:[#allocation2] sm:$0xff] (!%p4558_p7)  ;;  %v411_v4 = vld [vmem:[#allocation2 + $0x8] sm:$0xff] (!%p4558_p7)  ;;  %v412_v7 = vld [vmem:[#allocation2 + $0x10] sm:$0xff] (!%p4558_p7) }
  0xc9   : > { %409 = sbr.rel (%p4558_p7) target bundleno = 303 (0x12f), region = 64  ;;  %v538_v3 = vld [vmem:[%s5903_s12] sm:$0xff] (!%p4558_p7)  ;;  %v539_v6 = vld [vmem:[%s5903_s12 + $0x8] sm:$0xff] (!%p4558_p7)  ;;  %v540_v8 = vld [vmem:[%s5903_s12 + $0x10] sm:$0xff] (!%p4558_p7) }
  0xca   : > { %v666_v5 = vadd.f32 (!%p4558_p7), %v538_v3, %v410_v2  ;;  %v667_v9 = vadd.f32 (!%p4558_p7), %v539_v6, %v411_v4  ;;  %v668_v10 = vadd.f32 (!%p4558_p7), %v540_v8, %v412_v7  ;;  %v413_v11 = vld [vmem:[#allocation2 + $0x18] sm:$0xff] (!%p4558_p7)  ;;  %v414_v13 = vld [vmem:[#allocation2 + $0x20] sm:$0xff] (!%p4558_p7)  ;;  %v415_v16 = vld [vmem:[#allocation2 + $0x28] sm:$0xff] (!%p4558_p7) }
  0xcb   : > { %v541_v12 = vld [vmem:[%s5903_s12 + $0x18] sm:$0xff] (!%p4558_p7)  ;;  %v542_v15 = vld [vmem:[%s5903_s12 + $0x20] sm:$0xff] (!%p4558_p7)  ;;  %v543_v17 = vld [vmem:[%s5903_s12 + $0x28] sm:$0xff] (!%p4558_p7) }
  0xcc   : > { %794 = vst [vmem:[#allocation2] sm:$0xff] (!%p4558_p7), %v666_v5  ;;  %v669_v14 = vadd.f32 (!%p4558_p7), %v541_v12, %v413_v11  ;;  %795 = vst [vmem:[#allocation2 + $0x8] sm:$0xff] (!%p4558_p7), %v667_v9  ;;  %v670_v18 = vadd.f32 (!%p4558_p7), %v542_v15, %v414_v13  ;;  %v671_v19 = vadd.f32 (!%p4558_p7), %v543_v17, %v415_v16  ;;  %v416_v20 = vld [vmem:[#allocation2 + $0x30] sm:$0xff] (!%p4558_p7)  ;;  %v417_v22 = vld [vmem:[#allocation2 + $0x38] sm:$0xff] (!%p4558_p7) }
  0xcd   : > { %796 = vst [vmem:[#allocation2 + $0x10] sm:$0xff] (!%p4558_p7), %v668_v10  ;;  %v544_v21 = vld [vmem:[%s5903_s12 + $0x30] sm:$0xff] (!%p4558_p7)  ;;  %v545_v24 = vld [vmem:[%s5903_s12 + $0x38] sm:$0xff] (!%p4558_p7)  ;;  %v546_v26 = vld [vmem:[%s5903_s12 + $0x40] sm:$0xff] (!%p4558_p7) }
  0xce   : > { %797 = vst [vmem:[#allocation2 + $0x18] sm:$0xff] (!%p4558_p7), %v669_v14  ;;  %v672_v23 = vadd.f32 (!%p4558_p7), %v544_v21, %v416_v20  ;;  %v418_v25 = vld [vmem:[#allocation2 + $0x40] sm:$0xff] (!%p4558_p7)  ;;  %798 = vst [vmem:[#allocation2 + $0x20] sm:$0xff] (!%p4558_p7), %v670_v18  ;;  %v673_v27 = vadd.f32 (!%p4558_p7), %v545_v24, %v417_v22  ;;  %v419_v29 = vld [vmem:[#allocation2 + $0x48] sm:$0xff] (!%p4558_p7) }
  0xcf   : > { %799 = vst [vmem:[#allocation2 + $0x28] sm:$0xff] (!%p4558_p7), %v671_v19  ;;  %v674_v28 = vadd.f32 (!%p4558_p7), %v546_v26, %v418_v25  ;;  %v547_v30 = vld [vmem:[%s5903_s12 + $0x48] sm:$0xff] (!%p4558_p7)  ;;  %v548_v33 = vld [vmem:[%s5903_s12 + $0x50] sm:$0xff] (!%p4558_p7)  ;;  %v549_v35 = vld [vmem:[%s5903_s12 + $0x58] sm:$0xff] (!%p4558_p7) }
  0xd0   : > { %v420_v31 = vld [vmem:[#allocation2 + $0x50] sm:$0xff]  ;;  %800 = vst [vmem:[#allocation2 + $0x30] sm:$0xff] %v672_v23  ;;  %v675_v32 = vadd.f32 %v547_v30, %v419_v29  ;;  %v421_v34 = vld [vmem:[#allocation2 + $0x58] sm:$0xff]  ;;  %801 = vst [vmem:[#allocation2 + $0x38] sm:$0xff] %v673_v27 }
  0xd1   : > { %802 = vst [vmem:[#allocation2 + $0x40] sm:$0xff] %v674_v28  ;;  %v676_v36 = vadd.f32 %v548_v33, %v420_v31  ;;  %v677_v37 = vadd.f32 %v549_v35, %v421_v34  ;;  %v422_v38 = vld [vmem:[#allocation2 + $0x60] sm:$0xff]  ;;  %v423_v40 = vld [vmem:[#allocation2 + $0x68] sm:$0xff]  ;;  %v424_v43 = vld [vmem:[#allocation2 + $0x70] sm:$0xff] }
  0xd2   : > { %v550_v39 = vld [vmem:[%s5903_s12 + $0x60] sm:$0xff]  ;;  %803 = vst [vmem:[#allocation2 + $0x48] sm:$0xff] %v675_v32  ;;  %v551_v42 = vld [vmem:[%s5903_s12 + $0x68] sm:$0xff]  ;;  %v552_v44 = vld [vmem:[%s5903_s12 + $0x70] sm:$0xff] }
  0xd3   : > { %v678_v41 = vadd.f32 %v550_v39, %v422_v38  ;;  %804 = vst [vmem:[#allocation2 + $0x50] sm:$0xff] %v676_v36  ;;  %805 = vst [vmem:[#allocation2 + $0x58] sm:$0xff] %v677_v37  ;;  %v679_v45 = vadd.f32 %v551_v42, %v423_v40  ;;  %v680_v46 = vadd.f32 %v552_v44, %v424_v43  ;;  %v425_v47 = vld [vmem:[#allocation2 + $0x78] sm:$0xff]  ;;  %v426_v49 = vld [vmem:[#allocation2 + $0x80] sm:$0xff] }
  0xd4   : > { %v553_v48 = vld [vmem:[%s5903_s12 + $0x78] sm:$0xff]  ;;  %v554_v51 = vld [vmem:[%s5903_s12 + $0x80] sm:$0xff]  ;;  %v555_v53 = vld [vmem:[%s5903_s12 + $0x88] sm:$0xff] }
  0xd5   : > { %806 = vst [vmem:[#allocation2 + $0x60] sm:$0xff] %v678_v41  ;;  %v681_v50 = vadd.f32 %v553_v48, %v425_v47  ;;  %v427_v52 = vld [vmem:[#allocation2 + $0x88] sm:$0xff]  ;;  %807 = vst [vmem:[#allocation2 + $0x68] sm:$0xff] %v679_v45  ;;  %v682_v54 = vadd.f32 %v554_v51, %v426_v49  ;;  %v428_v56 = vld [vmem:[#allocation2 + $0x90] sm:$0xff] }
  0xd6   : > { %808 = vst [vmem:[#allocation2 + $0x70] sm:$0xff] %v680_v46  ;;  %v683_v55 = vadd.f32 %v555_v53, %v427_v52  ;;  %v556_v57 = vld [vmem:[%s5903_s12 + $0x90] sm:$0xff]  ;;  %v557_v60 = vld [vmem:[%s5903_s12 + $0x98] sm:$0xff]  ;;  %v558_v62 = vld [vmem:[%s5903_s12 + $0xa0] sm:$0xff] }
  0xd7   : > { %v429_v58 = vld [vmem:[#allocation2 + $0x98] sm:$0xff]  ;;  %809 = vst [vmem:[#allocation2 + $0x78] sm:$0xff] %v681_v50  ;;  %v684_v59 = vadd.f32 %v556_v57, %v428_v56  ;;  %v430_v61 = vld [vmem:[#allocation2 + $0xa0] sm:$0xff]  ;;  %810 = vst [vmem:[#allocation2 + $0x80] sm:$0xff] %v682_v54 }
  0xd8   : > { %811 = vst [vmem:[#allocation2 + $0x88] sm:$0xff] %v683_v55  ;;  %v685_v63 = vadd.f32 %v557_v60, %v429_v58  ;;  %v686_v0 = vadd.f32 %v558_v62, %v430_v61  ;;  %v431_v1 = vld [vmem:[#allocation2 + $0xa8] sm:$0xff]  ;;  %v432_v3 = vld [vmem:[#allocation2 + $0xb0] sm:$0xff]  ;;  %v433_v6 = vld [vmem:[#allocation2 + $0xb8] sm:$0xff] }
  0xd9   : > { %v559_v2 = vld [vmem:[%s5903_s12 + $0xa8] sm:$0xff]  ;;  %812 = vst [vmem:[#allocation2 + $0x90] sm:$0xff] %v684_v59  ;;  %v560_v5 = vld [vmem:[%s5903_s12 + $0xb0] sm:$0xff]  ;;  %v561_v7 = vld [vmem:[%s5903_s12 + $0xb8] sm:$0xff] }
  0xda   : > { %v687_v4 = vadd.f32 %v559_v2, %v431_v1  ;;  %813 = vst [vmem:[#allocation2 + $0x98] sm:$0xff] %v685_v63  ;;  %814 = vst [vmem:[#allocation2 + $0xa0] sm:$0xff] %v686_v0  ;;  %v688_v8 = vadd.f32 %v560_v5, %v432_v3  ;;  %v689_v9 = vadd.f32 %v561_v7, %v433_v6  ;;  %v434_v10 = vld [vmem:[#allocation2 + $0xc0] sm:$0xff]  ;;  %v435_v12 = vld [vmem:[#allocation2 + $0xc8] sm:$0xff] }
  0xdb   : > { %v562_v11 = vld [vmem:[%s5903_s12 + $0xc0] sm:$0xff]  ;;  %v563_v14 = vld [vmem:[%s5903_s12 + $0xc8] sm:$0xff]  ;;  %v564_v16 = vld [vmem:[%s5903_s12 + $0xd0] sm:$0xff] }
  0xdc   : > { %815 = vst [vmem:[#allocation2 + $0xa8] sm:$0xff] %v687_v4  ;;  %v690_v13 = vadd.f32 %v562_v11, %v434_v10  ;;  %v436_v15 = vld [vmem:[#allocation2 + $0xd0] sm:$0xff]  ;;  %816 = vst [vmem:[#allocation2 + $0xb0] sm:$0xff] %v688_v8  ;;  %v691_v17 = vadd.f32 %v563_v14, %v435_v12  ;;  %v437_v19 = vld [vmem:[#allocation2 + $0xd8] sm:$0xff] }
  0xdd   : > { %817 = vst [vmem:[#allocation2 + $0xb8] sm:$0xff] %v689_v9  ;;  %v692_v18 = vadd.f32 %v564_v16, %v436_v15  ;;  %v565_v20 = vld [vmem:[%s5903_s12 + $0xd8] sm:$0xff]  ;;  %v566_v23 = vld [vmem:[%s5903_s12 + $0xe0] sm:$0xff]  ;;  %v567_v25 = vld [vmem:[%s5903_s12 + $0xe8] sm:$0xff] }
  0xde   : > { %v438_v21 = vld [vmem:[#allocation2 + $0xe0] sm:$0xff]  ;;  %818 = vst [vmem:[#allocation2 + $0xc0] sm:$0xff] %v690_v13  ;;  %v693_v22 = vadd.f32 %v565_v20, %v437_v19  ;;  %v439_v24 = vld [vmem:[#allocation2 + $0xe8] sm:$0xff]  ;;  %819 = vst [vmem:[#allocation2 + $0xc8] sm:$0xff] %v691_v17 }
  0xdf   : > { %820 = vst [vmem:[#allocation2 + $0xd0] sm:$0xff] %v692_v18  ;;  %v694_v26 = vadd.f32 %v566_v23, %v438_v21  ;;  %v695_v27 = vadd.f32 %v567_v25, %v439_v24  ;;  %v440_v28 = vld [vmem:[#allocation2 + $0xf0] sm:$0xff]  ;;  %v441_v30 = vld [vmem:[#allocation2 + $0xf8] sm:$0xff]  ;;  %v442_v33 = vld [vmem:[#allocation2 + $0x100] sm:$0xff] }
  0xe0   : > { %v568_v29 = vld [vmem:[%s5903_s12 + $0xf0] sm:$0xff]  ;;  %821 = vst [vmem:[#allocation2 + $0xd8] sm:$0xff] %v693_v22  ;;  %v569_v32 = vld [vmem:[%s5903_s12 + $0xf8] sm:$0xff]  ;;  %v570_v34 = vld [vmem:[%s5903_s12 + $0x100] sm:$0xff] }
  0xe1   : > { %v696_v31 = vadd.f32 %v568_v29, %v440_v28  ;;  %822 = vst [vmem:[#allocation2 + $0xe0] sm:$0xff] %v694_v26  ;;  %823 = vst [vmem:[#allocation2 + $0xe8] sm:$0xff] %v695_v27  ;;  %v697_v35 = vadd.f32 %v569_v32, %v441_v30  ;;  %v698_v36 = vadd.f32 %v570_v34, %v442_v33  ;;  %v443_v37 = vld [vmem:[#allocation2 + $0x108] sm:$0xff]  ;;  %v444_v39 = vld [vmem:[#allocation2 + $0x110] sm:$0xff] }
  0xe2   : > { %v571_v38 = vld [vmem:[%s5903_s12 + $0x108] sm:$0xff]  ;;  %v572_v41 = vld [vmem:[%s5903_s12 + $0x110] sm:$0xff]  ;;  %v573_v43 = vld [vmem:[%s5903_s12 + $0x118] sm:$0xff] }
  0xe3   : > { %824 = vst [vmem:[#allocation2 + $0xf0] sm:$0xff] %v696_v31  ;;  %v699_v40 = vadd.f32 %v571_v38, %v443_v37  ;;  %v445_v42 = vld [vmem:[#allocation2 + $0x118] sm:$0xff]  ;;  %825 = vst [vmem:[#allocation2 + $0xf8] sm:$0xff] %v697_v35  ;;  %v700_v44 = vadd.f32 %v572_v41, %v444_v39  ;;  %v446_v46 = vld [vmem:[#allocation2 + $0x120] sm:$0xff] }
  0xe4   : > { %826 = vst [vmem:[#allocation2 + $0x100] sm:$0xff] %v698_v36  ;;  %v701_v45 = vadd.f32 %v573_v43, %v445_v42  ;;  %v574_v47 = vld [vmem:[%s5903_s12 + $0x120] sm:$0xff]  ;;  %v575_v50 = vld [vmem:[%s5903_s12 + $0x128] sm:$0xff]  ;;  %v576_v52 = vld [vmem:[%s5903_s12 + $0x130] sm:$0xff] }
  0xe5   : > { %v447_v48 = vld [vmem:[#allocation2 + $0x128] sm:$0xff]  ;;  %827 = vst [vmem:[#allocation2 + $0x108] sm:$0xff] %v699_v40  ;;  %v702_v49 = vadd.f32 %v574_v47, %v446_v46  ;;  %v448_v51 = vld [vmem:[#allocation2 + $0x130] sm:$0xff]  ;;  %828 = vst [vmem:[#allocation2 + $0x110] sm:$0xff] %v700_v44 }
  0xe6   : > { %829 = vst [vmem:[#allocation2 + $0x118] sm:$0xff] %v701_v45  ;;  %v703_v53 = vadd.f32 %v575_v50, %v447_v48  ;;  %v704_v54 = vadd.f32 %v576_v52, %v448_v51  ;;  %v449_v55 = vld [vmem:[#allocation2 + $0x138] sm:$0xff]  ;;  %v450_v57 = vld [vmem:[#allocation2 + $0x140] sm:$0xff]  ;;  %v451_v60 = vld [vmem:[#allocation2 + $0x148] sm:$0xff] }
  0xe7   : > { %v577_v56 = vld [vmem:[%s5903_s12 + $0x138] sm:$0xff]  ;;  %830 = vst [vmem:[#allocation2 + $0x120] sm:$0xff] %v702_v49  ;;  %v578_v59 = vld [vmem:[%s5903_s12 + $0x140] sm:$0xff]  ;;  %v579_v61 = vld [vmem:[%s5903_s12 + $0x148] sm:$0xff] }
  0xe8   : > { %v705_v58 = vadd.f32 %v577_v56, %v449_v55  ;;  %831 = vst [vmem:[#allocation2 + $0x128] sm:$0xff] %v703_v53  ;;  %832 = vst [vmem:[#allocation2 + $0x130] sm:$0xff] %v704_v54  ;;  %v706_v62 = vadd.f32 %v578_v59, %v450_v57  ;;  %v707_v63 = vadd.f32 %v579_v61, %v451_v60  ;;  %v452_v0 = vld [vmem:[#allocation2 + $0x150] sm:$0xff]  ;;  %v453_v2 = vld [vmem:[#allocation2 + $0x158] sm:$0xff] }
  0xe9   : > { %v580_v1 = vld [vmem:[%s5903_s12 + $0x150] sm:$0xff]  ;;  %v581_v4 = vld [vmem:[%s5903_s12 + $0x158] sm:$0xff]  ;;  %v582_v6 = vld [vmem:[%s5903_s12 + $0x160] sm:$0xff] }
  0xea   : > { %833 = vst [vmem:[#allocation2 + $0x138] sm:$0xff] %v705_v58  ;;  %v708_v3 = vadd.f32 %v580_v1, %v452_v0  ;;  %v454_v5 = vld [vmem:[#allocation2 + $0x160] sm:$0xff]  ;;  %834 = vst [vmem:[#allocation2 + $0x140] sm:$0xff] %v706_v62  ;;  %v709_v7 = vadd.f32 %v581_v4, %v453_v2  ;;  %v455_v9 = vld [vmem:[#allocation2 + $0x168] sm:$0xff] }
  0xeb   : > { %835 = vst [vmem:[#allocation2 + $0x148] sm:$0xff] %v707_v63  ;;  %v710_v8 = vadd.f32 %v582_v6, %v454_v5  ;;  %v583_v10 = vld [vmem:[%s5903_s12 + $0x168] sm:$0xff]  ;;  %v584_v13 = vld [vmem:[%s5903_s12 + $0x170] sm:$0xff]  ;;  %v585_v15 = vld [vmem:[%s5903_s12 + $0x178] sm:$0xff] }
  0xec   : > { %v456_v11 = vld [vmem:[#allocation2 + $0x170] sm:$0xff]  ;;  %836 = vst [vmem:[#allocation2 + $0x150] sm:$0xff] %v708_v3  ;;  %v711_v12 = vadd.f32 %v583_v10, %v455_v9  ;;  %v457_v14 = vld [vmem:[#allocation2 + $0x178] sm:$0xff]  ;;  %837 = vst [vmem:[#allocation2 + $0x158] sm:$0xff] %v709_v7 }
  0xed   : > { %838 = vst [vmem:[#allocation2 + $0x160] sm:$0xff] %v710_v8  ;;  %v712_v16 = vadd.f32 %v584_v13, %v456_v11  ;;  %v713_v17 = vadd.f32 %v585_v15, %v457_v14  ;;  %v458_v18 = vld [vmem:[#allocation2 + $0x180] sm:$0xff]  ;;  %v459_v20 = vld [vmem:[#allocation2 + $0x188] sm:$0xff]  ;;  %v460_v23 = vld [vmem:[#allocation2 + $0x190] sm:$0xff] }
  0xee   : > { %v586_v19 = vld [vmem:[%s5903_s12 + $0x180] sm:$0xff]  ;;  %839 = vst [vmem:[#allocation2 + $0x168] sm:$0xff] %v711_v12  ;;  %v587_v22 = vld [vmem:[%s5903_s12 + $0x188] sm:$0xff]  ;;  %v588_v24 = vld [vmem:[%s5903_s12 + $0x190] sm:$0xff] }
  0xef   : > { %v714_v21 = vadd.f32 %v586_v19, %v458_v18  ;;  %840 = vst [vmem:[#allocation2 + $0x170] sm:$0xff] %v712_v16  ;;  %841 = vst [vmem:[#allocation2 + $0x178] sm:$0xff] %v713_v17  ;;  %v715_v25 = vadd.f32 %v587_v22, %v459_v20  ;;  %v716_v26 = vadd.f32 %v588_v24, %v460_v23  ;;  %v461_v27 = vld [vmem:[#allocation2 + $0x198] sm:$0xff]  ;;  %v462_v29 = vld [vmem:[#allocation2 + $0x1a0] sm:$0xff] }
  0xf0   : > { %v589_v28 = vld [vmem:[%s5903_s12 + $0x198] sm:$0xff]  ;;  %v590_v31 = vld [vmem:[%s5903_s12 + $0x1a0] sm:$0xff]  ;;  %v591_v33 = vld [vmem:[%s5903_s12 + $0x1a8] sm:$0xff] }
  0xf1   : > { %842 = vst [vmem:[#allocation2 + $0x180] sm:$0xff] %v714_v21  ;;  %v717_v30 = vadd.f32 %v589_v28, %v461_v27  ;;  %v463_v32 = vld [vmem:[#allocation2 + $0x1a8] sm:$0xff]  ;;  %843 = vst [vmem:[#allocation2 + $0x188] sm:$0xff] %v715_v25  ;;  %v718_v34 = vadd.f32 %v590_v31, %v462_v29  ;;  %v464_v36 = vld [vmem:[#allocation2 + $0x1b0] sm:$0xff] }
  0xf2   : > { %844 = vst [vmem:[#allocation2 + $0x190] sm:$0xff] %v716_v26  ;;  %v719_v35 = vadd.f32 %v591_v33, %v463_v32  ;;  %v592_v37 = vld [vmem:[%s5903_s12 + $0x1b0] sm:$0xff]  ;;  %v593_v40 = vld [vmem:[%s5903_s12 + $0x1b8] sm:$0xff]  ;;  %v594_v42 = vld [vmem:[%s5903_s12 + $0x1c0] sm:$0xff] }
  0xf3   : > { %v465_v38 = vld [vmem:[#allocation2 + $0x1b8] sm:$0xff]  ;;  %845 = vst [vmem:[#allocation2 + $0x198] sm:$0xff] %v717_v30  ;;  %v720_v39 = vadd.f32 %v592_v37, %v464_v36  ;;  %v466_v41 = vld [vmem:[#allocation2 + $0x1c0] sm:$0xff]  ;;  %846 = vst [vmem:[#allocation2 + $0x1a0] sm:$0xff] %v718_v34 }
  0xf4   : > { %847 = vst [vmem:[#allocation2 + $0x1a8] sm:$0xff] %v719_v35  ;;  %v721_v43 = vadd.f32 %v593_v40, %v465_v38  ;;  %v722_v44 = vadd.f32 %v594_v42, %v466_v41  ;;  %v467_v45 = vld [vmem:[#allocation2 + $0x1c8] sm:$0xff]  ;;  %v468_v47 = vld [vmem:[#allocation2 + $0x1d0] sm:$0xff]  ;;  %v469_v50 = vld [vmem:[#allocation2 + $0x1d8] sm:$0xff] }
  0xf5   : > { %v595_v46 = vld [vmem:[%s5903_s12 + $0x1c8] sm:$0xff]  ;;  %848 = vst [vmem:[#allocation2 + $0x1b0] sm:$0xff] %v720_v39  ;;  %v596_v49 = vld [vmem:[%s5903_s12 + $0x1d0] sm:$0xff]  ;;  %v597_v51 = vld [vmem:[%s5903_s12 + $0x1d8] sm:$0xff] }
  0xf6   : > { %v723_v48 = vadd.f32 %v595_v46, %v467_v45  ;;  %849 = vst [vmem:[#allocation2 + $0x1b8] sm:$0xff] %v721_v43  ;;  %850 = vst [vmem:[#allocation2 + $0x1c0] sm:$0xff] %v722_v44  ;;  %v724_v52 = vadd.f32 %v596_v49, %v468_v47  ;;  %v725_v53 = vadd.f32 %v597_v51, %v469_v50  ;;  %v470_v54 = vld [vmem:[#allocation2 + $0x1e0] sm:$0xff]  ;;  %v471_v56 = vld [vmem:[#allocation2 + $0x1e8] sm:$0xff] }
  0xf7   : > { %v598_v55 = vld [vmem:[%s5903_s12 + $0x1e0] sm:$0xff]  ;;  %v599_v58 = vld [vmem:[%s5903_s12 + $0x1e8] sm:$0xff]  ;;  %v600_v60 = vld [vmem:[%s5903_s12 + $0x1f0] sm:$0xff] }
  0xf8   : > { %851 = vst [vmem:[#allocation2 + $0x1c8] sm:$0xff] %v723_v48  ;;  %v726_v57 = vadd.f32 %v598_v55, %v470_v54  ;;  %v472_v59 = vld [vmem:[#allocation2 + $0x1f0] sm:$0xff]  ;;  %852 = vst [vmem:[#allocation2 + $0x1d0] sm:$0xff] %v724_v52  ;;  %v727_v61 = vadd.f32 %v599_v58, %v471_v56  ;;  %v473_v63 = vld [vmem:[#allocation2 + $0x1f8] sm:$0xff] }
  0xf9   : > { %853 = vst [vmem:[#allocation2 + $0x1d8] sm:$0xff] %v725_v53  ;;  %v728_v62 = vadd.f32 %v600_v60, %v472_v59  ;;  %v601_v0 = vld [vmem:[%s5903_s12 + $0x1f8] sm:$0xff]  ;;  %v602_v3 = vld [vmem:[%s5903_s12 + $0x200] sm:$0xff]  ;;  %v603_v5 = vld [vmem:[%s5903_s12 + $0x208] sm:$0xff] }
  0xfa   : > { %v474_v1 = vld [vmem:[#allocation2 + $0x200] sm:$0xff]  ;;  %854 = vst [vmem:[#allocation2 + $0x1e0] sm:$0xff] %v726_v57  ;;  %v729_v2 = vadd.f32 %v601_v0, %v473_v63  ;;  %v475_v4 = vld [vmem:[#allocation2 + $0x208] sm:$0xff]  ;;  %855 = vst [vmem:[#allocation2 + $0x1e8] sm:$0xff] %v727_v61 }
  0xfb   : > { %856 = vst [vmem:[#allocation2 + $0x1f0] sm:$0xff] %v728_v62  ;;  %v730_v6 = vadd.f32 %v602_v3, %v474_v1  ;;  %v731_v7 = vadd.f32 %v603_v5, %v475_v4  ;;  %v476_v8 = vld [vmem:[#allocation2 + $0x210] sm:$0xff]  ;;  %v477_v10 = vld [vmem:[#allocation2 + $0x218] sm:$0xff]  ;;  %v478_v13 = vld [vmem:[#allocation2 + $0x220] sm:$0xff] }
  0xfc   : > { %v604_v9 = vld [vmem:[%s5903_s12 + $0x210] sm:$0xff]  ;;  %857 = vst [vmem:[#allocation2 + $0x1f8] sm:$0xff] %v729_v2  ;;  %v605_v12 = vld [vmem:[%s5903_s12 + $0x218] sm:$0xff]  ;;  %v606_v14 = vld [vmem:[%s5903_s12 + $0x220] sm:$0xff] }
  0xfd   : > { %v732_v11 = vadd.f32 %v604_v9, %v476_v8  ;;  %858 = vst [vmem:[#allocation2 + $0x200] sm:$0xff] %v730_v6  ;;  %859 = vst [vmem:[#allocation2 + $0x208] sm:$0xff] %v731_v7  ;;  %v733_v15 = vadd.f32 %v605_v12, %v477_v10  ;;  %v734_v16 = vadd.f32 %v606_v14, %v478_v13  ;;  %v479_v17 = vld [vmem:[#allocation2 + $0x228] sm:$0xff]  ;;  %v480_v19 = vld [vmem:[#allocation2 + $0x230] sm:$0xff] }
  0xfe   : > { %v607_v18 = vld [vmem:[%s5903_s12 + $0x228] sm:$0xff]  ;;  %v608_v21 = vld [vmem:[%s5903_s12 + $0x230] sm:$0xff]  ;;  %v609_v23 = vld [vmem:[%s5903_s12 + $0x238] sm:$0xff] }
  0xff   : > { %860 = vst [vmem:[#allocation2 + $0x210] sm:$0xff] %v732_v11  ;;  %v735_v20 = vadd.f32 %v607_v18, %v479_v17  ;;  %v481_v22 = vld [vmem:[#allocation2 + $0x238] sm:$0xff]  ;;  %861 = vst [vmem:[#allocation2 + $0x218] sm:$0xff] %v733_v15  ;;  %v736_v24 = vadd.f32 %v608_v21, %v480_v19  ;;  %v482_v26 = vld [vmem:[#allocation2 + $0x240] sm:$0xff] }
 0x100   : > { %862 = vst [vmem:[#allocation2 + $0x220] sm:$0xff] %v734_v16  ;;  %v737_v25 = vadd.f32 %v609_v23, %v481_v22  ;;  %v610_v27 = vld [vmem:[%s5903_s12 + $0x240] sm:$0xff]  ;;  %v611_v30 = vld [vmem:[%s5903_s12 + $0x248] sm:$0xff]  ;;  %v612_v32 = vld [vmem:[%s5903_s12 + $0x250] sm:$0xff] }
 0x101   : > { %v483_v28 = vld [vmem:[#allocation2 + $0x248] sm:$0xff]  ;;  %863 = vst [vmem:[#allocation2 + $0x228] sm:$0xff] %v735_v20  ;;  %v738_v29 = vadd.f32 %v610_v27, %v482_v26  ;;  %v484_v31 = vld [vmem:[#allocation2 + $0x250] sm:$0xff]  ;;  %864 = vst [vmem:[#allocation2 + $0x230] sm:$0xff] %v736_v24 }
 0x102   : > { %865 = vst [vmem:[#allocation2 + $0x238] sm:$0xff] %v737_v25  ;;  %v739_v33 = vadd.f32 %v611_v30, %v483_v28  ;;  %v740_v34 = vadd.f32 %v612_v32, %v484_v31  ;;  %v485_v35 = vld [vmem:[#allocation2 + $0x258] sm:$0xff]  ;;  %v486_v37 = vld [vmem:[#allocation2 + $0x260] sm:$0xff]  ;;  %v487_v40 = vld [vmem:[#allocation2 + $0x268] sm:$0xff] }
 0x103   : > { %v613_v36 = vld [vmem:[%s5903_s12 + $0x258] sm:$0xff]  ;;  %866 = vst [vmem:[#allocation2 + $0x240] sm:$0xff] %v738_v29  ;;  %v614_v39 = vld [vmem:[%s5903_s12 + $0x260] sm:$0xff]  ;;  %v615_v41 = vld [vmem:[%s5903_s12 + $0x268] sm:$0xff] }
 0x104   : > { %v741_v38 = vadd.f32 %v613_v36, %v485_v35  ;;  %867 = vst [vmem:[#allocation2 + $0x248] sm:$0xff] %v739_v33  ;;  %868 = vst [vmem:[#allocation2 + $0x250] sm:$0xff] %v740_v34  ;;  %v742_v42 = vadd.f32 %v614_v39, %v486_v37  ;;  %v743_v43 = vadd.f32 %v615_v41, %v487_v40  ;;  %v488_v44 = vld [vmem:[#allocation2 + $0x270] sm:$0xff]  ;;  %v489_v46 = vld [vmem:[#allocation2 + $0x278] sm:$0xff] }
 0x105   : > { %v616_v45 = vld [vmem:[%s5903_s12 + $0x270] sm:$0xff]  ;;  %v617_v48 = vld [vmem:[%s5903_s12 + $0x278] sm:$0xff]  ;;  %v618_v50 = vld [vmem:[%s5903_s12 + $0x280] sm:$0xff] }
 0x106   : > { %869 = vst [vmem:[#allocation2 + $0x258] sm:$0xff] %v741_v38  ;;  %v744_v47 = vadd.f32 %v616_v45, %v488_v44  ;;  %v490_v49 = vld [vmem:[#allocation2 + $0x280] sm:$0xff]  ;;  %870 = vst [vmem:[#allocation2 + $0x260] sm:$0xff] %v742_v42  ;;  %v745_v51 = vadd.f32 %v617_v48, %v489_v46  ;;  %v491_v53 = vld [vmem:[#allocation2 + $0x288] sm:$0xff] }
 0x107   : > { %871 = vst [vmem:[#allocation2 + $0x268] sm:$0xff] %v743_v43  ;;  %v746_v52 = vadd.f32 %v618_v50, %v490_v49  ;;  %v619_v54 = vld [vmem:[%s5903_s12 + $0x288] sm:$0xff]  ;;  %v620_v57 = vld [vmem:[%s5903_s12 + $0x290] sm:$0xff]  ;;  %v621_v59 = vld [vmem:[%s5903_s12 + $0x298] sm:$0xff] }
 0x108   : > { %v492_v55 = vld [vmem:[#allocation2 + $0x290] sm:$0xff]  ;;  %872 = vst [vmem:[#allocation2 + $0x270] sm:$0xff] %v744_v47  ;;  %v747_v56 = vadd.f32 %v619_v54, %v491_v53  ;;  %v493_v58 = vld [vmem:[#allocation2 + $0x298] sm:$0xff]  ;;  %873 = vst [vmem:[#allocation2 + $0x278] sm:$0xff] %v745_v51 }
 0x109   : > { %874 = vst [vmem:[#allocation2 + $0x280] sm:$0xff] %v746_v52  ;;  %v748_v60 = vadd.f32 %v620_v57, %v492_v55  ;;  %v749_v61 = vadd.f32 %v621_v59, %v493_v58  ;;  %v494_v62 = vld [vmem:[#allocation2 + $0x2a0] sm:$0xff]  ;;  %v495_v0 = vld [vmem:[#allocation2 + $0x2a8] sm:$0xff]  ;;  %v496_v3 = vld [vmem:[#allocation2 + $0x2b0] sm:$0xff] }
 0x10a   : > { %v622_v63 = vld [vmem:[%s5903_s12 + $0x2a0] sm:$0xff]  ;;  %875 = vst [vmem:[#allocation2 + $0x288] sm:$0xff] %v747_v56  ;;  %v623_v2 = vld [vmem:[%s5903_s12 + $0x2a8] sm:$0xff]  ;;  %v624_v4 = vld [vmem:[%s5903_s12 + $0x2b0] sm:$0xff] }
 0x10b   : > { %v750_v1 = vadd.f32 %v622_v63, %v494_v62  ;;  %876 = vst [vmem:[#allocation2 + $0x290] sm:$0xff] %v748_v60  ;;  %877 = vst [vmem:[#allocation2 + $0x298] sm:$0xff] %v749_v61  ;;  %v751_v5 = vadd.f32 %v623_v2, %v495_v0  ;;  %v752_v6 = vadd.f32 %v624_v4, %v496_v3  ;;  %v497_v7 = vld [vmem:[#allocation2 + $0x2b8] sm:$0xff]  ;;  %v498_v9 = vld [vmem:[#allocation2 + $0x2c0] sm:$0xff] }
 0x10c   : > { %v625_v8 = vld [vmem:[%s5903_s12 + $0x2b8] sm:$0xff]  ;;  %v626_v11 = vld [vmem:[%s5903_s12 + $0x2c0] sm:$0xff]  ;;  %v627_v13 = vld [vmem:[%s5903_s12 + $0x2c8] sm:$0xff] }
 0x10d   : > { %878 = vst [vmem:[#allocation2 + $0x2a0] sm:$0xff] %v750_v1  ;;  %v753_v10 = vadd.f32 %v625_v8, %v497_v7  ;;  %v499_v12 = vld [vmem:[#allocation2 + $0x2c8] sm:$0xff]  ;;  %879 = vst [vmem:[#allocation2 + $0x2a8] sm:$0xff] %v751_v5  ;;  %v754_v14 = vadd.f32 %v626_v11, %v498_v9  ;;  %v500_v16 = vld [vmem:[#allocation2 + $0x2d0] sm:$0xff] }
 0x10e   : > { %880 = vst [vmem:[#allocation2 + $0x2b0] sm:$0xff] %v752_v6  ;;  %v755_v15 = vadd.f32 %v627_v13, %v499_v12  ;;  %v628_v17 = vld [vmem:[%s5903_s12 + $0x2d0] sm:$0xff]  ;;  %v629_v20 = vld [vmem:[%s5903_s12 + $0x2d8] sm:$0xff]  ;;  %v630_v22 = vld [vmem:[%s5903_s12 + $0x2e0] sm:$0xff] }
 0x10f   : > { %v501_v18 = vld [vmem:[#allocation2 + $0x2d8] sm:$0xff]  ;;  %881 = vst [vmem:[#allocation2 + $0x2b8] sm:$0xff] %v753_v10  ;;  %v756_v19 = vadd.f32 %v628_v17, %v500_v16  ;;  %v502_v21 = vld [vmem:[#allocation2 + $0x2e0] sm:$0xff]  ;;  %882 = vst [vmem:[#allocation2 + $0x2c0] sm:$0xff] %v754_v14 }
 0x110   : > { %883 = vst [vmem:[#allocation2 + $0x2c8] sm:$0xff] %v755_v15  ;;  %v757_v23 = vadd.f32 %v629_v20, %v501_v18  ;;  %v758_v24 = vadd.f32 %v630_v22, %v502_v21  ;;  %v503_v25 = vld [vmem:[#allocation2 + $0x2e8] sm:$0xff]  ;;  %v504_v27 = vld [vmem:[#allocation2 + $0x2f0] sm:$0xff]  ;;  %v505_v30 = vld [vmem:[#allocation2 + $0x2f8] sm:$0xff] }
 0x111   : > { %v631_v26 = vld [vmem:[%s5903_s12 + $0x2e8] sm:$0xff]  ;;  %884 = vst [vmem:[#allocation2 + $0x2d0] sm:$0xff] %v756_v19  ;;  %v632_v29 = vld [vmem:[%s5903_s12 + $0x2f0] sm:$0xff]  ;;  %v633_v31 = vld [vmem:[%s5903_s12 + $0x2f8] sm:$0xff] }
 0x112   : > { %v759_v28 = vadd.f32 %v631_v26, %v503_v25  ;;  %885 = vst [vmem:[#allocation2 + $0x2d8] sm:$0xff] %v757_v23  ;;  %886 = vst [vmem:[#allocation2 + $0x2e0] sm:$0xff] %v758_v24  ;;  %v760_v32 = vadd.f32 %v632_v29, %v504_v27  ;;  %v761_v33 = vadd.f32 %v633_v31, %v505_v30  ;;  %v506_v34 = vld [vmem:[#allocation2 + $0x300] sm:$0xff]  ;;  %v507_v36 = vld [vmem:[#allocation2 + $0x308] sm:$0xff] }
 0x113   : > { %v634_v35 = vld [vmem:[%s5903_s12 + $0x300] sm:$0xff]  ;;  %v635_v38 = vld [vmem:[%s5903_s12 + $0x308] sm:$0xff]  ;;  %v636_v40 = vld [vmem:[%s5903_s12 + $0x310] sm:$0xff] }
 0x114   : > { %887 = vst [vmem:[#allocation2 + $0x2e8] sm:$0xff] %v759_v28  ;;  %v762_v37 = vadd.f32 %v634_v35, %v506_v34  ;;  %v508_v39 = vld [vmem:[#allocation2 + $0x310] sm:$0xff]  ;;  %888 = vst [vmem:[#allocation2 + $0x2f0] sm:$0xff] %v760_v32  ;;  %v763_v41 = vadd.f32 %v635_v38, %v507_v36  ;;  %v509_v43 = vld [vmem:[#allocation2 + $0x318] sm:$0xff] }
 0x115   : > { %889 = vst [vmem:[#allocation2 + $0x2f8] sm:$0xff] %v761_v33  ;;  %v764_v42 = vadd.f32 %v636_v40, %v508_v39  ;;  %v637_v44 = vld [vmem:[%s5903_s12 + $0x318] sm:$0xff]  ;;  %v638_v47 = vld [vmem:[%s5903_s12 + $0x320] sm:$0xff]  ;;  %v639_v49 = vld [vmem:[%s5903_s12 + $0x328] sm:$0xff] }
 0x116   : > { %v510_v45 = vld [vmem:[#allocation2 + $0x320] sm:$0xff]  ;;  %890 = vst [vmem:[#allocation2 + $0x300] sm:$0xff] %v762_v37  ;;  %v765_v46 = vadd.f32 %v637_v44, %v509_v43  ;;  %v511_v48 = vld [vmem:[#allocation2 + $0x328] sm:$0xff]  ;;  %891 = vst [vmem:[#allocation2 + $0x308] sm:$0xff] %v763_v41 }
 0x117   : > { %892 = vst [vmem:[#allocation2 + $0x310] sm:$0xff] %v764_v42  ;;  %v766_v50 = vadd.f32 %v638_v47, %v510_v45  ;;  %v767_v51 = vadd.f32 %v639_v49, %v511_v48  ;;  %v512_v52 = vld [vmem:[#allocation2 + $0x330] sm:$0xff]  ;;  %v513_v54 = vld [vmem:[#allocation2 + $0x338] sm:$0xff]  ;;  %v514_v57 = vld [vmem:[#allocation2 + $0x340] sm:$0xff] }
 0x118   : > { %v640_v53 = vld [vmem:[%s5903_s12 + $0x330] sm:$0xff]  ;;  %893 = vst [vmem:[#allocation2 + $0x318] sm:$0xff] %v765_v46  ;;  %v641_v56 = vld [vmem:[%s5903_s12 + $0x338] sm:$0xff]  ;;  %v642_v58 = vld [vmem:[%s5903_s12 + $0x340] sm:$0xff] }
 0x119   : > { %v768_v55 = vadd.f32 %v640_v53, %v512_v52  ;;  %894 = vst [vmem:[#allocation2 + $0x320] sm:$0xff] %v766_v50  ;;  %895 = vst [vmem:[#allocation2 + $0x328] sm:$0xff] %v767_v51  ;;  %v769_v59 = vadd.f32 %v641_v56, %v513_v54  ;;  %v770_v60 = vadd.f32 %v642_v58, %v514_v57  ;;  %v515_v61 = vld [vmem:[#allocation2 + $0x348] sm:$0xff]  ;;  %v516_v63 = vld [vmem:[#allocation2 + $0x350] sm:$0xff] }
 0x11a   : > { %v643_v62 = vld [vmem:[%s5903_s12 + $0x348] sm:$0xff]  ;;  %v644_v1 = vld [vmem:[%s5903_s12 + $0x350] sm:$0xff]  ;;  %v645_v3 = vld [vmem:[%s5903_s12 + $0x358] sm:$0xff] }
 0x11b   : > { %896 = vst [vmem:[#allocation2 + $0x330] sm:$0xff] %v768_v55  ;;  %v771_v0 = vadd.f32 %v643_v62, %v515_v61  ;;  %v517_v2 = vld [vmem:[#allocation2 + $0x358] sm:$0xff]  ;;  %897 = vst [vmem:[#allocation2 + $0x338] sm:$0xff] %v769_v59  ;;  %v772_v4 = vadd.f32 %v644_v1, %v516_v63  ;;  %v518_v6 = vld [vmem:[#allocation2 + $0x360] sm:$0xff] }
 0x11c   : > { %898 = vst [vmem:[#allocation2 + $0x340] sm:$0xff] %v770_v60  ;;  %v773_v5 = vadd.f32 %v645_v3, %v517_v2  ;;  %v646_v7 = vld [vmem:[%s5903_s12 + $0x360] sm:$0xff]  ;;  %v647_v10 = vld [vmem:[%s5903_s12 + $0x368] sm:$0xff]  ;;  %v648_v12 = vld [vmem:[%s5903_s12 + $0x370] sm:$0xff] }
 0x11d   : > { %v519_v8 = vld [vmem:[#allocation2 + $0x368] sm:$0xff]  ;;  %899 = vst [vmem:[#allocation2 + $0x348] sm:$0xff] %v771_v0  ;;  %v774_v9 = vadd.f32 %v646_v7, %v518_v6  ;;  %v520_v11 = vld [vmem:[#allocation2 + $0x370] sm:$0xff]  ;;  %900 = vst [vmem:[#allocation2 + $0x350] sm:$0xff] %v772_v4 }
 0x11e   : > { %901 = vst [vmem:[#allocation2 + $0x358] sm:$0xff] %v773_v5  ;;  %v775_v13 = vadd.f32 %v647_v10, %v519_v8  ;;  %v776_v14 = vadd.f32 %v648_v12, %v520_v11  ;;  %v521_v15 = vld [vmem:[#allocation2 + $0x378] sm:$0xff]  ;;  %v522_v17 = vld [vmem:[#allocation2 + $0x380] sm:$0xff]  ;;  %v523_v20 = vld [vmem:[#allocation2 + $0x388] sm:$0xff] }
 0x11f   : > { %v649_v16 = vld [vmem:[%s5903_s12 + $0x378] sm:$0xff]  ;;  %902 = vst [vmem:[#allocation2 + $0x360] sm:$0xff] %v774_v9  ;;  %v650_v19 = vld [vmem:[%s5903_s12 + $0x380] sm:$0xff]  ;;  %v651_v21 = vld [vmem:[%s5903_s12 + $0x388] sm:$0xff] }
 0x120   : > { %v777_v18 = vadd.f32 %v649_v16, %v521_v15  ;;  %903 = vst [vmem:[#allocation2 + $0x368] sm:$0xff] %v775_v13  ;;  %904 = vst [vmem:[#allocation2 + $0x370] sm:$0xff] %v776_v14  ;;  %v778_v22 = vadd.f32 %v650_v19, %v522_v17  ;;  %v779_v23 = vadd.f32 %v651_v21, %v523_v20  ;;  %v524_v24 = vld [vmem:[#allocation2 + $0x390] sm:$0xff]  ;;  %v525_v26 = vld [vmem:[#allocation2 + $0x398] sm:$0xff] }
 0x121   : > { %v652_v25 = vld [vmem:[%s5903_s12 + $0x390] sm:$0xff]  ;;  %v653_v28 = vld [vmem:[%s5903_s12 + $0x398] sm:$0xff]  ;;  %v654_v30 = vld [vmem:[%s5903_s12 + $0x3a0] sm:$0xff] }
 0x122   : > { %905 = vst [vmem:[#allocation2 + $0x378] sm:$0xff] %v777_v18  ;;  %v780_v27 = vadd.f32 %v652_v25, %v524_v24  ;;  %v526_v29 = vld [vmem:[#allocation2 + $0x3a0] sm:$0xff]  ;;  %906 = vst [vmem:[#allocation2 + $0x380] sm:$0xff] %v778_v22  ;;  %v781_v31 = vadd.f32 %v653_v28, %v525_v26  ;;  %v527_v33 = vld [vmem:[#allocation2 + $0x3a8] sm:$0xff] }
 0x123   : > { %907 = vst [vmem:[#allocation2 + $0x388] sm:$0xff] %v779_v23  ;;  %v782_v32 = vadd.f32 %v654_v30, %v526_v29  ;;  %v655_v34 = vld [vmem:[%s5903_s12 + $0x3a8] sm:$0xff]  ;;  %v656_v37 = vld [vmem:[%s5903_s12 + $0x3b0] sm:$0xff]  ;;  %v657_v39 = vld [vmem:[%s5903_s12 + $0x3b8] sm:$0xff] }
 0x124   : > { %v528_v35 = vld [vmem:[#allocation2 + $0x3b0] sm:$0xff]  ;;  %908 = vst [vmem:[#allocation2 + $0x390] sm:$0xff] %v780_v27  ;;  %v783_v36 = vadd.f32 %v655_v34, %v527_v33  ;;  %v529_v38 = vld [vmem:[#allocation2 + $0x3b8] sm:$0xff]  ;;  %909 = vst [vmem:[#allocation2 + $0x398] sm:$0xff] %v781_v31 }
 0x125   : > { %910 = vst [vmem:[#allocation2 + $0x3a0] sm:$0xff] %v782_v32  ;;  %v784_v40 = vadd.f32 %v656_v37, %v528_v35  ;;  %v785_v41 = vadd.f32 %v657_v39, %v529_v38  ;;  %v530_v42 = vld [vmem:[#allocation2 + $0x3c0] sm:$0xff]  ;;  %v531_v44 = vld [vmem:[#allocation2 + $0x3c8] sm:$0xff]  ;;  %v532_v47 = vld [vmem:[#allocation2 + $0x3d0] sm:$0xff] }
 0x126   : > { %v658_v43 = vld [vmem:[%s5903_s12 + $0x3c0] sm:$0xff]  ;;  %911 = vst [vmem:[#allocation2 + $0x3a8] sm:$0xff] %v783_v36  ;;  %v659_v46 = vld [vmem:[%s5903_s12 + $0x3c8] sm:$0xff]  ;;  %v660_v48 = vld [vmem:[%s5903_s12 + $0x3d0] sm:$0xff] }
 0x127   : > { %v786_v45 = vadd.f32 %v658_v43, %v530_v42  ;;  %912 = vst [vmem:[#allocation2 + $0x3b0] sm:$0xff] %v784_v40  ;;  %913 = vst [vmem:[#allocation2 + $0x3b8] sm:$0xff] %v785_v41  ;;  %v787_v49 = vadd.f32 %v659_v46, %v531_v44  ;;  %v788_v50 = vadd.f32 %v660_v48, %v532_v47  ;;  %v533_v51 = vld [vmem:[#allocation2 + $0x3d8] sm:$0xff]  ;;  %v534_v53 = vld [vmem:[#allocation2 + $0x3e0] sm:$0xff] }
 0x128   : > { %v661_v52 = vld [vmem:[%s5903_s12 + $0x3d8] sm:$0xff]  ;;  %v662_v55 = vld [vmem:[%s5903_s12 + $0x3e0] sm:$0xff]  ;;  %v663_v57 = vld [vmem:[%s5903_s12 + $0x3e8] sm:$0xff] }
 0x129   : > { %914 = vst [vmem:[#allocation2 + $0x3c0] sm:$0xff] %v786_v45  ;;  %v789_v54 = vadd.f32 %v661_v52, %v533_v51  ;;  %v535_v56 = vld [vmem:[#allocation2 + $0x3e8] sm:$0xff]  ;;  %915 = vst [vmem:[#allocation2 + $0x3c8] sm:$0xff] %v787_v49  ;;  %v790_v58 = vadd.f32 %v662_v55, %v534_v53  ;;  %v536_v60 = vld [vmem:[#allocation2 + $0x3f0] sm:$0xff] }
 0x12a   : > { %916 = vst [vmem:[#allocation2 + $0x3d0] sm:$0xff] %v788_v50  ;;  %v791_v59 = vadd.f32 %v663_v57, %v535_v56  ;;  %v664_v61 = vld [vmem:[%s5903_s12 + $0x3f0] sm:$0xff]  ;;  %v665_v0 = vld [vmem:[%s5903_s12 + $0x3f8] sm:$0xff] }
 0x12b   : > { %v537_v62 = vld [vmem:[#allocation2 + $0x3f8] sm:$0xff]  ;;  %917 = vst [vmem:[#allocation2 + $0x3d8] sm:$0xff] %v789_v54  ;;  %v792_v63 = vadd.f32 %v664_v61, %v536_v60  ;;  %918 = vst [vmem:[#allocation2 + $0x3e0] sm:$0xff] %v790_v58 }
 0x12c   : > { %919 = vst [vmem:[#allocation2 + $0x3e8] sm:$0xff] %v791_v59  ;;  %v793_v1 = vadd.f32 %v665_v0, %v537_v62 }
 0x12d   : > { %920 = vst [vmem:[#allocation2 + $0x3f0] sm:$0xff] %v792_v63 }
 0x12e   : > { %921 = vst [vmem:[#allocation2 + $0x3f8] sm:$0xff] %v793_v1 }
 0x12f PF: > { %p4559_p11 = scmp.ne.s32.totalorder %s5750_s4, 1 }
 0x130   : > { %v1182_v2 = vlaneseq (!%p4559_p11)  ;;  %s4560_s29 = sshll.u32 (!%p4559_p11), %s5750_s4, 7  ;;  %v1134_v4 = vld [vmem:[%s5903_s12 + $0x280] sm:$0xff] (!%p4559_p11)  ;;  %v1135_v10 = vld [vmem:[%s5903_s12 + $0x288] sm:$0xff] (!%p4559_p11)  ;;  %v1072_v20 = vld [vmem:[%s5903_s12 + $0x90] sm:$0xff] (!%p4559_p11)  ;;  %vm2775_vm1 = vcmask (!%p4559_p11), 130112   ;;  %vm2782_vm2 = vcmask (!%p4559_p11), 195712  }
 0x131   : > { %925 = sbr.rel (%p4559_p11) target bundleno = 1291 (0x50b), region = 68  ;;  %v1185_v3 = vstv (!%p4559_p11), %s4560_s29  ;;  %v1070_v6 = vld [vmem:[%s5903_s12 + $0x80] sm:$0xff] (!%p4559_p11)  ;;  %v1071_v13 = vld [vmem:[%s5903_s12 + $0x88] sm:$0xff] (!%p4559_p11)  ;;  %v1136_v23 = vld [vmem:[%s5903_s12 + $0x290] sm:$0xff] (!%p4559_p11)  ;;  %vm2789_vm3 = vcmask (!%p4559_p11), 261312   ;;  %vm2796_vm4 = vcmask (!%p4559_p11), 326912  }
 0x132   : > { %v6180_v5 = vand.u32 (!%p4559_p11), 127, %v1182_v2  ;;  %v1006_v7 = vld [vmem:[#allocation2 + $0x280] sm:$0xff] (!%p4559_p11)  ;;  %v1007_v9 = vld [vmem:[#allocation2 + $0x288] sm:$0xff] (!%p4559_p11)  ;;  %v944_v21 = vld [vmem:[#allocation2 + $0x90] sm:$0xff] (!%p4559_p11)  ;;  %vm2803_vm5 = vcmask (!%p4559_p11), 392512   ;;  %vm2810_vm6 = vcmask (!%p4559_p11), 458112  }
 0x133   : > { %v942_v8 = vld [vmem:[#allocation2 + $0x80] sm:$0xff] (!%p4559_p11)  ;;  %v943_v11 = vld [vmem:[#allocation2 + $0x88] sm:$0xff] (!%p4559_p11)  ;;  %v1008_v22 = vld [vmem:[#allocation2 + $0x290] sm:$0xff] (!%p4559_p11)  ;;  %vm2817_vm7 = vcmask (!%p4559_p11), 523712   ;;  %vm2824_vm8 = vcmask (!%p4559_p11), 589312   ;;  %vm2831_vm9 = vcmask (!%p4559_p11), 654912  }
 0x134   : > { %v6185_v12 = vadd.s32 (!%p4559_p11), %v1185_v3, %v6180_v5  ;;  %v1055_v14 = vld [vmem:[%s5903_s12 + $0x8] sm:$0xff] (!%p4559_p11)  ;;  %v1054_v15 = vld [vmem:[%s5903_s12] sm:$0xff] (!%p4559_p11)  ;;  %v945_v30 = vld [vmem:[#allocation2 + $0x98] sm:$0xff] (!%p4559_p11)  ;;  %vm2838_vm10 = vcmask (!%p4559_p11), 720512   ;;  %vm2845_vm11 = vcmask (!%p4559_p11), 786112   ;;  %vm2852_vm12 = vcmask (!%p4559_p11), 851712  }
 0x135   : > { %v927_v16 = vld [vmem:[#allocation2 + $0x8] sm:$0xff] (!%p4559_p11)  ;;  %v926_v17 = vld [vmem:[#allocation2] sm:$0xff] (!%p4559_p11)  ;;  %v928_v36 = vld [vmem:[#allocation2 + $0x10] sm:$0xff] (!%p4559_p11)  ;;  %vm2859_vm13 = vcmask (!%p4559_p11), 917312   ;;  %vm2866_vm14 = vcmask (!%p4559_p11), 982912   ;;  %vm2873_vm15 = vcmask (!%p4559_p11), 1048512  }
 0x136   : > { %v990_v18 = vld [vmem:[#allocation2 + $0x200] sm:$0xff] (!%p4559_p11)  ;;  %vm1187_vm0 = vcmp.lt.s32.totalorder (!%p4559_p11), %v6185_v12, 192  ;;  %v1119_v24 = vld [vmem:[%s5903_s12 + $0x208] sm:$0xff] (!%p4559_p11)  ;;  %v1056_v37 = vld [vmem:[%s5903_s12 + $0x10] sm:$0xff] (!%p4559_p11) }
 0x137   : > { %v1118_v19 = vld [vmem:[%s5903_s12 + $0x200] sm:$0xff] (!%p4559_p11)  ;;  %v1268_v25 = vsel (!%p4559_p11), %vm1187_vm0, %v1134_v4, 0.0  ;;  %v1204_v26 = vsel (!%p4559_p11), %vm1187_vm0, %v1070_v6, 0.0  ;;  %v1269_v27 = vsel (!%p4559_p11), %vm1187_vm0, %v1135_v10, 0.0  ;;  %v1205_v28 = vsel (!%p4559_p11), %vm1187_vm0, %v1071_v13, 0.0  ;;  %v1073_v31 = vld [vmem:[%s5903_s12 + $0x98] sm:$0xff] (!%p4559_p11) }
 0x138   : > { %v991_v29 = vld [vmem:[#allocation2 + $0x208] sm:$0xff]  ;;  %v1396_v32 = vadd.f32 %v1268_v25, %v1006_v7  ;;  %v1332_v33 = vadd.f32 %v1204_v26, %v942_v8  ;;  %v1397_v34 = vadd.f32 %v1269_v27, %v1007_v9  ;;  %v1333_v35 = vadd.f32 %v1205_v28, %v943_v11  ;;  %v1009_v38 = vld [vmem:[#allocation2 + $0x298] sm:$0xff]  ;;  %v992_v44 = vld [vmem:[#allocation2 + $0x210] sm:$0xff] }
 0x139   : > { %v1137_v39 = vld [vmem:[%s5903_s12 + $0x298] sm:$0xff]  ;;  %v1189_v40 = vsel %vm1187_vm0, %v1055_v14, 0.0  ;;  %v1188_v41 = vsel %vm1187_vm0, %v1054_v15, 0.0  ;;  %v1252_v42 = vsel %vm1187_vm0, %v1118_v19, 0.0  ;;  %v1206_v43 = vsel %vm1187_vm0, %v1072_v20, 0.0  ;;  %v1120_v45 = vld [vmem:[%s5903_s12 + $0x210] sm:$0xff] }
 0x13a   : > { %1524 = vst [vmem:[#allocation2 + $0x280] sm:$0xff] %v1396_v32  ;;  %1860 = vadd.xlane.f32.xlu1 %v1396_v32  ;;  %1460 = vst [vmem:[#allocation2 + $0x80] sm:$0xff] %v1332_v33  ;;  %1732 = vadd.xlane.f32.xlu0 %v1332_v33  ;;  %v6215_v46 = vadd.f32 %v1189_v40, %v927_v16  ;;  %v6217_v47 = vadd.f32 %v1188_v41, %v926_v17  ;;  %v1270_v49 = vsel %vm1187_vm0, %v1136_v23, 0.0  ;;  %v946_v50 = vld [vmem:[#allocation2 + $0xa0] sm:$0xff]  ;;  %v929_v52 = vld [vmem:[#allocation2 + $0x18] sm:$0xff] }
 0x13b   : > { %1525 = vst [vmem:[#allocation2 + $0x288] sm:$0xff] %v1397_v34  ;;  %1461 = vst [vmem:[#allocation2 + $0x88] sm:$0xff] %v1333_v35  ;;  %v6219_v48 = vadd.f32 %v1252_v42, %v990_v18  ;;  %v1074_v51 = vld [vmem:[%s5903_s12 + $0xa0] sm:$0xff]  ;;  %v6224_v53 = vadd.f32 %v1206_v43, %v944_v21  ;;  %v6226_v54 = vadd.f32 %v1270_v49, %v1008_v22  ;;  %v1253_v55 = vsel %vm1187_vm0, %v1119_v24, 0.0  ;;  %v1057_v57 = vld [vmem:[%s5903_s12 + $0x18] sm:$0xff] }
 0x13c   : > { %v1207_v56 = vsel %vm1187_vm0, %v1073_v31, 0.0  ;;  %v1010_v58 = vld [vmem:[#allocation2 + $0x2a0] sm:$0xff]  ;;  %1445 = vst [vmem:[#allocation2 + $0x8] sm:$0xff] %v6215_v46  ;;  %1444 = vst [vmem:[#allocation2] sm:$0xff] %v6217_v47  ;;  %v6237_v60 = vadd.f32 %v1253_v55, %v991_v29  ;;  %v1190_v62 = vsel %vm1187_vm0, %v1056_v37, 0.0  ;;  %v1271_v63 = vsel %vm1187_vm0, %v1137_v39, 0.0 }
 0x13d   : > { %v1138_v59 = vld [vmem:[%s5903_s12 + $0x2a0] sm:$0xff]  ;;  %1508 = vst [vmem:[#allocation2 + $0x200] sm:$0xff] %v6219_v48  ;;  %v6239_v61 = vadd.f32 %v1207_v56, %v945_v30  ;;  %v993_v0 = vld [vmem:[#allocation2 + $0x218] sm:$0xff]  ;;  %1462 = vst [vmem:[#allocation2 + $0x90] sm:$0xff] %v6224_v53  ;;  %v6248_v4 = vadd.f32 %v1190_v62, %v928_v36  ;;  %v6250_v6 = vadd.f32 %v1271_v63, %v1009_v38  ;;  %v1254_v7 = vsel %vm1187_vm0, %v1120_v45, 0.0 }
 0x13e   : > { %v1121_v1 = vld [vmem:[%s5903_s12 + $0x218] sm:$0xff]  ;;  %v947_v3 = vld [vmem:[#allocation2 + $0xa8] sm:$0xff]  ;;  %1526 = vst [vmem:[#allocation2 + $0x290] sm:$0xff] %v6226_v54  ;;  %v1208_v8 = vsel %vm1187_vm0, %v1074_v51, 0.0  ;;  %1862 = vadd.xlane.f32.xlu1 %v1397_v34  ;;  %1734 = vadd.xlane.f32.xlu0 %v1333_v35  ;;  %1509 = vst [vmem:[#allocation2 + $0x208] sm:$0xff] %v6237_v60  ;;  %v6260_v13 = vadd.f32 %v1254_v7, %v992_v44  ;;  %v1191_v15 = vsel %vm1187_vm0, %v1057_v57, 0.0 }
 0x13f   : > { %v1075_v9 = vld [vmem:[%s5903_s12 + $0xa8] sm:$0xff]  ;;  %v930_v10 = vld [vmem:[#allocation2 + $0x20] sm:$0xff]  ;;  %1463 = vst [vmem:[#allocation2 + $0x98] sm:$0xff] %v6239_v61  ;;  %v6262_v14 = vadd.f32 %v1208_v8, %v946_v50  ;;  %v1272_v16 = vsel %vm1187_vm0, %v1138_v59, 0.0  ;;  %1446 = vst [vmem:[#allocation2 + $0x10] sm:$0xff] %v6248_v4  ;;  %v6271_v20 = vadd.f32 %v1191_v15, %v929_v52  ;;  %v1255_v22 = vsel %vm1187_vm0, %v1121_v1, 0.0 }
 0x140   : > { %v1058_v11 = vld [vmem:[%s5903_s12 + $0x20] sm:$0xff]  ;;  %v1139_v18 = vld [vmem:[%s5903_s12 + $0x2a8] sm:$0xff]  ;;  %1527 = vst [vmem:[#allocation2 + $0x298] sm:$0xff] %v6250_v6  ;;  %v6273_v21 = vadd.f32 %v1272_v16, %v1010_v58  ;;  %v1209_v23 = vsel %vm1187_vm0, %v1075_v9, 0.0  ;;  %v1076_v26 = vld [vmem:[%s5903_s12 + $0xb0] sm:$0xff]  ;;  %v6283_v27 = vadd.f32 %v1255_v22, %v993_v0 }
 0x141   : > { %v1011_v17 = vld [vmem:[#allocation2 + $0x2a8] sm:$0xff]  ;;  %v994_v19 = vld [vmem:[#allocation2 + $0x220] sm:$0xff]  ;;  %v948_v25 = vld [vmem:[#allocation2 + $0xb0] sm:$0xff]  ;;  %1510 = vst [vmem:[#allocation2 + $0x210] sm:$0xff] %v6260_v13  ;;  %v6285_v28 = vadd.f32 %v1209_v23, %v947_v3  ;;  %v1192_v29 = vsel %vm1187_vm0, %v1058_v11, 0.0  ;;  %v1273_v30 = vsel %vm1187_vm0, %v1139_v18, 0.0 }
 0x142   : > { %v1122_v24 = vld [vmem:[%s5903_s12 + $0x220] sm:$0xff]  ;;  %1464 = vst [vmem:[#allocation2 + $0xa0] sm:$0xff] %v6262_v14  ;;  %v1059_v32 = vld [vmem:[%s5903_s12 + $0x28] sm:$0xff]  ;;  %1447 = vst [vmem:[#allocation2 + $0x18] sm:$0xff] %v6271_v20  ;;  %v6294_v34 = vadd.f32 %v1192_v29, %v930_v10  ;;  %v6296_v35 = vadd.f32 %v1273_v30, %v1011_v17  ;;  %v1210_v37 = vsel %vm1187_vm0, %v1076_v26, 0.0  ;;  %1702 = vadd.xlane.f32.xlu1 %v6215_v46  ;;  %1700 = vadd.xlane.f32.xlu0 %v6217_v47 }
 0x143   : > { %v931_v31 = vld [vmem:[#allocation2 + $0x28] sm:$0xff]  ;;  %v1012_v33 = vld [vmem:[#allocation2 + $0x2b0] sm:$0xff]  ;;  %1528 = vst [vmem:[#allocation2 + $0x2a0] sm:$0xff] %v6273_v21  ;;  %v1256_v36 = vsel %vm1187_vm0, %v1122_v24, 0.0  ;;  %1511 = vst [vmem:[#allocation2 + $0x218] sm:$0xff] %v6283_v27  ;;  %v6310_v42 = vadd.f32 %v1210_v37, %v948_v25  ;;  %v1193_v43 = vsel %vm1187_vm0, %v1059_v32, 0.0 }
 0x144   : > { %v1140_v38 = vld [vmem:[%s5903_s12 + $0x2b0] sm:$0xff]  ;;  %v995_v39 = vld [vmem:[#allocation2 + $0x228] sm:$0xff]  ;;  %1465 = vst [vmem:[#allocation2 + $0xa8] sm:$0xff] %v6285_v28  ;;  %v6308_v41 = vadd.f32 %v1256_v36, %v994_v19  ;;  %v1077_v46 = vld [vmem:[%s5903_s12 + $0xb8] sm:$0xff]  ;;  %v6319_v47 = vadd.f32 %v1193_v43, %v931_v31 }
 0x145   : > { %v1123_v40 = vld [vmem:[%s5903_s12 + $0x228] sm:$0xff]  ;;  %v1274_v44 = vsel %vm1187_vm0, %v1140_v38, 0.0  ;;  %v949_v45 = vld [vmem:[#allocation2 + $0xb8] sm:$0xff]  ;;  %1448 = vst [vmem:[#allocation2 + $0x20] sm:$0xff] %v6294_v34  ;;  %1529 = vst [vmem:[#allocation2 + $0x2a8] sm:$0xff] %v6296_v35  ;;  %v1211_v52 = vsel %vm1187_vm0, %v1077_v46, 0.0 }
 0x146   : > { %v932_v49 = vld [vmem:[#allocation2 + $0x30] sm:$0xff]  ;;  %v6321_v50 = vadd.f32 %v1274_v44, %v1012_v33  ;;  %v1257_v51 = vsel %vm1187_vm0, %v1123_v40, 0.0  ;;  %v1013_v56 = vld [vmem:[#allocation2 + $0x2b8] sm:$0xff]  ;;  %1512 = vst [vmem:[#allocation2 + $0x220] sm:$0xff] %v6308_v41  ;;  %1466 = vst [vmem:[#allocation2 + $0xb0] sm:$0xff] %v6310_v42  ;;  %v6333_v59 = vadd.f32 %v1211_v52, %v949_v45  ;;  %1828 = vadd.xlane.f32.xlu1 %v6219_v48  ;;  %1736 = vadd.xlane.f32.xlu0 %v6224_v53 }
 0x147   : > { %v1060_v55 = vld [vmem:[%s5903_s12 + $0x30] sm:$0xff]  ;;  %v1141_v57 = vld [vmem:[%s5903_s12 + $0x2b8] sm:$0xff]  ;;  %v6331_v58 = vadd.f32 %v1257_v51, %v995_v39  ;;  %1449 = vst [vmem:[#allocation2 + $0x28] sm:$0xff] %v6319_v47  ;;  %v1078_v10 = vld [vmem:[%s5903_s12 + $0xc0] sm:$0xff] }
 0x148   : > { %v1194_v62 = vsel %vm1187_vm0, %v1060_v55, 0.0  ;;  %v1275_v63 = vsel %vm1187_vm0, %v1141_v57, 0.0  ;;  %v996_v0 = vld [vmem:[#allocation2 + $0x230] sm:$0xff]  ;;  %v950_v3 = vld [vmem:[#allocation2 + $0xc0] sm:$0xff]  ;;  %1530 = vst [vmem:[#allocation2 + $0x2b0] sm:$0xff] %v6321_v50  ;;  %v933_v11 = vld [vmem:[#allocation2 + $0x38] sm:$0xff] }
 0x149   : > { %v1124_v1 = vld [vmem:[%s5903_s12 + $0x230] sm:$0xff]  ;;  %v6342_v7 = vadd.f32 %v1194_v62, %v932_v49  ;;  %v6344_v8 = vadd.f32 %v1275_v63, %v1013_v56  ;;  %v1061_v15 = vld [vmem:[%s5903_s12 + $0x38] sm:$0xff]  ;;  %1513 = vst [vmem:[#allocation2 + $0x228] sm:$0xff] %v6331_v58  ;;  %1467 = vst [vmem:[#allocation2 + $0xb8] sm:$0xff] %v6333_v59  ;;  %v1212_v17 = vsel %vm1187_vm0, %v1078_v10, 0.0 }
 0x14a   : > { %v1258_v9 = vsel %vm1187_vm0, %v1124_v1, 0.0  ;;  %v1195_v18 = vsel %vm1187_vm0, %v1061_v15, 0.0  ;;  %v1014_v19 = vld [vmem:[#allocation2 + $0x2c0] sm:$0xff]  ;;  %v997_v23 = vld [vmem:[#allocation2 + $0x238] sm:$0xff]  ;;  %v6363_v48 = vadd.f32 %v1212_v17, %v950_v3  ;;  %v951_v26 = vld [vmem:[#allocation2 + $0xc8] sm:$0xff]  ;;  %1864 = vadd.xlane.f32.xlu1 %v6226_v54  ;;  %1830 = vadd.xlane.f32.xlu0 %v6237_v60 }
 0x14b   : > { %v6354_v16 = vadd.f32 %v1258_v9, %v996_v0  ;;  %v1142_v22 = vld [vmem:[%s5903_s12 + $0x2c0] sm:$0xff]  ;;  %1450 = vst [vmem:[#allocation2 + $0x30] sm:$0xff] %v6342_v7  ;;  %1531 = vst [vmem:[#allocation2 + $0x2b8] sm:$0xff] %v6344_v8  ;;  %v6365_v53 = vadd.f32 %v1195_v18, %v933_v11  ;;  %v1125_v25 = vld [vmem:[%s5903_s12 + $0x238] sm:$0xff] }
 0x14c   : > { %v1276_v24 = vsel %vm1187_vm0, %v1142_v22, 0.0  ;;  %v1079_v29 = vld [vmem:[%s5903_s12 + $0xc8] sm:$0xff]  ;;  %v1259_v31 = vsel %vm1187_vm0, %v1125_v25, 0.0  ;;  %v934_v33 = vld [vmem:[#allocation2 + $0x40] sm:$0xff]  ;;  %1468 = vst [vmem:[#allocation2 + $0xc0] sm:$0xff] %v6363_v48  ;;  %v1080_v55 = vld [vmem:[%s5903_s12 + $0xd0] sm:$0xff] }
 0x14d   : > { %1514 = vst [vmem:[#allocation2 + $0x230] sm:$0xff] %v6354_v16  ;;  %v6372_v30 = vadd.f32 %v1276_v24, %v1014_v19  ;;  %v1213_v32 = vsel %vm1187_vm0, %v1079_v29, 0.0  ;;  %v1062_v36 = vld [vmem:[%s5903_s12 + $0x40] sm:$0xff]  ;;  %1451 = vst [vmem:[#allocation2 + $0x38] sm:$0xff] %v6365_v53  ;;  %v6381_v38 = vadd.f32 %v1259_v31, %v997_v23  ;;  %v1143_v43 = vld [vmem:[%s5903_s12 + $0x2c8] sm:$0xff]  ;;  %v1214_v57 = vsel %vm1187_vm0, %v1080_v55, 0.0 }
 0x14e   : > { %v1015_v37 = vld [vmem:[#allocation2 + $0x2c8] sm:$0xff]  ;;  %v6383_v39 = vadd.f32 %v1213_v32, %v951_v26  ;;  %v1196_v40 = vsel %vm1187_vm0, %v1062_v36, 0.0  ;;  %v998_v44 = vld [vmem:[#allocation2 + $0x240] sm:$0xff]  ;;  %v1277_v49 = vsel %vm1187_vm0, %v1143_v43, 0.0  ;;  %v952_v52 = vld [vmem:[#allocation2 + $0xd0] sm:$0xff]  ;;  %1738 = vadd.xlane.f32.xlu1 %v6239_v61  ;;  %1704 = vadd.xlane.f32.xlu0 %v6248_v4 }
 0x14f   : > { %v1126_v45 = vld [vmem:[%s5903_s12 + $0x240] sm:$0xff]  ;;  %1532 = vst [vmem:[#allocation2 + $0x2c0] sm:$0xff] %v6372_v30  ;;  %v6392_v46 = vadd.f32 %v1196_v40, %v934_v33  ;;  %1515 = vst [vmem:[#allocation2 + $0x238] sm:$0xff] %v6381_v38  ;;  %v6401_v54 = vadd.f32 %v1277_v49, %v1015_v37  ;;  %v1063_v62 = vld [vmem:[%s5903_s12 + $0x48] sm:$0xff]  ;;  %v6410_v1 = vadd.f32 %v1214_v57, %v952_v52 }
 0x150   : > { %v1260_v51 = vsel %vm1187_vm0, %v1126_v45, 0.0  ;;  %v935_v56 = vld [vmem:[#allocation2 + $0x48] sm:$0xff]  ;;  %1469 = vst [vmem:[#allocation2 + $0xc8] sm:$0xff] %v6383_v39  ;;  %v1016_v63 = vld [vmem:[#allocation2 + $0x2d0] sm:$0xff]  ;;  %v1197_v3 = vsel %vm1187_vm0, %v1063_v62, 0.0  ;;  %v953_v15 = vld [vmem:[#allocation2 + $0xd8] sm:$0xff] }
 0x151   : > { %v6403_v60 = vadd.f32 %v1260_v51, %v998_v44  ;;  %v1144_v0 = vld [vmem:[%s5903_s12 + $0x2d0] sm:$0xff]  ;;  %1452 = vst [vmem:[#allocation2 + $0x40] sm:$0xff] %v6392_v46  ;;  %v999_v10 = vld [vmem:[#allocation2 + $0x248] sm:$0xff]  ;;  %1533 = vst [vmem:[#allocation2 + $0x2c8] sm:$0xff] %v6401_v54  ;;  %v6419_v17 = vadd.f32 %v1197_v3, %v935_v56 }
 0x152   : > { %v1278_v9 = vsel %vm1187_vm0, %v1144_v0, 0.0  ;;  %v1127_v11 = vld [vmem:[%s5903_s12 + $0x248] sm:$0xff]  ;;  %v1081_v22 = vld [vmem:[%s5903_s12 + $0xd8] sm:$0xff]  ;;  %v1064_v24 = vld [vmem:[%s5903_s12 + $0x50] sm:$0xff]  ;;  %1470 = vst [vmem:[#allocation2 + $0xd0] sm:$0xff] %v6410_v1  ;;  %1866 = vadd.xlane.f32.xlu1 %v6250_v6  ;;  %1832 = vadd.xlane.f32.xlu0 %v6260_v13 }
 0x153   : > { %1516 = vst [vmem:[#allocation2 + $0x240] sm:$0xff] %v6403_v60  ;;  %v6421_v18 = vadd.f32 %v1278_v9, %v1016_v63  ;;  %v1261_v19 = vsel %vm1187_vm0, %v1127_v11, 0.0  ;;  %v936_v23 = vld [vmem:[#allocation2 + $0x50] sm:$0xff]  ;;  %v1215_v26 = vsel %vm1187_vm0, %v1081_v22, 0.0  ;;  %v1198_v29 = vsel %vm1187_vm0, %v1064_v24, 0.0  ;;  %v1017_v31 = vld [vmem:[#allocation2 + $0x2d8] sm:$0xff] }
 0x154   : > { %v6430_v25 = vadd.f32 %v1261_v19, %v999_v10  ;;  %v1145_v32 = vld [vmem:[%s5903_s12 + $0x2d8] sm:$0xff]  ;;  %v1000_v33 = vld [vmem:[#allocation2 + $0x250] sm:$0xff]  ;;  %1453 = vst [vmem:[#allocation2 + $0x48] sm:$0xff] %v6419_v17  ;;  %v6439_v61 = vadd.f32 %v1215_v26, %v953_v15  ;;  %v6441_v4 = vadd.f32 %v1198_v29, %v936_v23  ;;  %v1082_v43 = vld [vmem:[%s5903_s12 + $0xe0] sm:$0xff] }
 0x155   : > { %1534 = vst [vmem:[#allocation2 + $0x2d0] sm:$0xff] %v6421_v18  ;;  %v1279_v36 = vsel %vm1187_vm0, %v1145_v32, 0.0  ;;  %v1128_v37 = vld [vmem:[%s5903_s12 + $0x250] sm:$0xff]  ;;  %v954_v40 = vld [vmem:[#allocation2 + $0xe0] sm:$0xff]  ;;  %v1216_v49 = vsel %vm1187_vm0, %v1082_v43, 0.0  ;;  %v955_v15 = vld [vmem:[#allocation2 + $0xe8] sm:$0xff] }
 0x156   : > { %1517 = vst [vmem:[#allocation2 + $0x248] sm:$0xff] %v6430_v25  ;;  %v6448_v44 = vadd.f32 %v1279_v36, %v1017_v31  ;;  %v1262_v45 = vsel %vm1187_vm0, %v1128_v37, 0.0  ;;  %v937_v51 = vld [vmem:[#allocation2 + $0x58] sm:$0xff]  ;;  %v1018_v55 = vld [vmem:[#allocation2 + $0x2e0] sm:$0xff]  ;;  %1471 = vst [vmem:[#allocation2 + $0xd8] sm:$0xff] %v6439_v61  ;;  %v6459_v57 = vadd.f32 %v1216_v49, %v954_v40  ;;  %1740 = vadd.xlane.f32.xlu1 %v6262_v14  ;;  %1706 = vadd.xlane.f32.xlu0 %v6271_v20 }
 0x157   : > { %v1065_v52 = vld [vmem:[%s5903_s12 + $0x58] sm:$0xff]  ;;  %1454 = vst [vmem:[#allocation2 + $0x50] sm:$0xff] %v6441_v4  ;;  %v6457_v56 = vadd.f32 %v1262_v45, %v1000_v33  ;;  %v1146_v63 = vld [vmem:[%s5903_s12 + $0x2e0] sm:$0xff]  ;;  %v1083_v19 = vld [vmem:[%s5903_s12 + $0xe8] sm:$0xff] }
 0x158   : > { %v1199_v62 = vsel %vm1187_vm0, %v1065_v52, 0.0  ;;  %v1001_v0 = vld [vmem:[#allocation2 + $0x258] sm:$0xff]  ;;  %1535 = vst [vmem:[#allocation2 + $0x2d8] sm:$0xff] %v6448_v44  ;;  %v1280_v10 = vsel %vm1187_vm0, %v1146_v63, 0.0  ;;  %v938_v22 = vld [vmem:[#allocation2 + $0x60] sm:$0xff]  ;;  %1472 = vst [vmem:[#allocation2 + $0xe0] sm:$0xff] %v6459_v57 }
 0x159   : > { %v1129_v3 = vld [vmem:[%s5903_s12 + $0x258] sm:$0xff]  ;;  %v6468_v9 = vadd.f32 %v1199_v62, %v937_v51  ;;  %1518 = vst [vmem:[#allocation2 + $0x250] sm:$0xff] %v6457_v56  ;;  %v6477_v6 = vadd.f32 %v1280_v10, %v1018_v55  ;;  %v1217_v23 = vsel %vm1187_vm0, %v1083_v19, 0.0  ;;  %v1066_v24 = vld [vmem:[%s5903_s12 + $0x60] sm:$0xff]  ;;  %v1147_v29 = vld [vmem:[%s5903_s12 + $0x2e8] sm:$0xff] }
 0x15a   : > { %v1263_v11 = vsel %vm1187_vm0, %v1129_v3, 0.0  ;;  %v1019_v26 = vld [vmem:[#allocation2 + $0x2e8] sm:$0xff]  ;;  %v6486_v31 = vadd.f32 %v1217_v23, %v955_v15  ;;  %v1200_v32 = vsel %vm1187_vm0, %v1066_v24, 0.0  ;;  %v1281_v33 = vsel %vm1187_vm0, %v1147_v29, 0.0  ;;  %v1002_v36 = vld [vmem:[#allocation2 + $0x260] sm:$0xff]  ;;  %v956_v40 = vld [vmem:[#allocation2 + $0xf0] sm:$0xff]  ;;  %1868 = vadd.xlane.f32.xlu1 %v6273_v21  ;;  %1834 = vadd.xlane.f32.xlu0 %v6283_v27 }
 0x15b   : > { %v6479_v13 = vadd.f32 %v1263_v11, %v1001_v0  ;;  %1455 = vst [vmem:[#allocation2 + $0x58] sm:$0xff] %v6468_v9  ;;  %v1130_v37 = vld [vmem:[%s5903_s12 + $0x260] sm:$0xff]  ;;  %1536 = vst [vmem:[#allocation2 + $0x2e0] sm:$0xff] %v6477_v6  ;;  %v6495_v43 = vadd.f32 %v1200_v32, %v938_v22  ;;  %v6497_v45 = vadd.f32 %v1281_v33, %v1019_v26  ;;  %v1084_v51 = vld [vmem:[%s5903_s12 + $0xf0] sm:$0xff] }
 0x15c   : > { %v1264_v49 = vsel %vm1187_vm0, %v1130_v37, 0.0  ;;  %v939_v52 = vld [vmem:[#allocation2 + $0x68] sm:$0xff]  ;;  %1473 = vst [vmem:[#allocation2 + $0xe8] sm:$0xff] %v6486_v31  ;;  %v1218_v63 = vsel %vm1187_vm0, %v1084_v51, 0.0  ;;  %v1020_v3 = vld [vmem:[#allocation2 + $0x2f0] sm:$0xff]  ;;  %v957_v22 = vld [vmem:[#allocation2 + $0xf8] sm:$0xff] }
 0x15d   : > { %1519 = vst [vmem:[#allocation2 + $0x258] sm:$0xff] %v6479_v13  ;;  %v1067_v55 = vld [vmem:[%s5903_s12 + $0x68] sm:$0xff]  ;;  %v6506_v62 = vadd.f32 %v1264_v49, %v1002_v36  ;;  %v1148_v10 = vld [vmem:[%s5903_s12 + $0x2f0] sm:$0xff]  ;;  %1456 = vst [vmem:[#allocation2 + $0x60] sm:$0xff] %v6495_v43  ;;  %v6515_v14 = vadd.f32 %v1218_v63, %v956_v40 }
 0x15e   : > { %v1201_v0 = vsel %vm1187_vm0, %v1067_v55, 0.0  ;;  %v1003_v11 = vld [vmem:[#allocation2 + $0x268] sm:$0xff]  ;;  %1537 = vst [vmem:[#allocation2 + $0x2e8] sm:$0xff] %v6497_v45  ;;  %v1282_v15 = vsel %vm1187_vm0, %v1148_v10, 0.0  ;;  %v1085_v23 = vld [vmem:[%s5903_s12 + $0xf8] sm:$0xff]  ;;  %v940_v32 = vld [vmem:[#allocation2 + $0x70] sm:$0xff]  ;;  %1742 = vadd.xlane.f32.xlu1 %v6285_v28  ;;  %1708 = vadd.xlane.f32.xlu0 %v6294_v34 }
 0x15f   : > { %v6517_v20 = vadd.f32 %v1201_v0, %v939_v52  ;;  %v1131_v19 = vld [vmem:[%s5903_s12 + $0x268] sm:$0xff]  ;;  %1520 = vst [vmem:[#allocation2 + $0x260] sm:$0xff] %v6506_v62  ;;  %v6524_v24 = vadd.f32 %v1282_v15, %v1020_v3  ;;  %v1219_v29 = vsel %vm1187_vm0, %v1085_v23, 0.0  ;;  %v1068_v33 = vld [vmem:[%s5903_s12 + $0x70] sm:$0xff]  ;;  %1474 = vst [vmem:[#allocation2 + $0xf0] sm:$0xff] %v6515_v14 }
 0x160   : > { %v1265_v26 = vsel %vm1187_vm0, %v1131_v19, 0.0  ;;  %v1021_v36 = vld [vmem:[#allocation2 + $0x2f8] sm:$0xff]  ;;  %v6535_v40 = vadd.f32 %v1219_v29, %v957_v22  ;;  %v1202_v49 = vsel %vm1187_vm0, %v1068_v33, 0.0  ;;  %v1004_v52 = vld [vmem:[#allocation2 + $0x270] sm:$0xff]  ;;  %v975_v23 = vld [vmem:[#allocation2 + $0x188] sm:$0xff] }
 0x161   : > { %1457 = vst [vmem:[#allocation2 + $0x68] sm:$0xff] %v6517_v20  ;;  %v6533_v37 = vadd.f32 %v1265_v26, %v1003_v11  ;;  %v1149_v51 = vld [vmem:[%s5903_s12 + $0x2f8] sm:$0xff]  ;;  %v1132_v55 = vld [vmem:[%s5903_s12 + $0x270] sm:$0xff]  ;;  %1538 = vst [vmem:[#allocation2 + $0x2f0] sm:$0xff] %v6524_v24  ;;  %v6544_v63 = vadd.f32 %v1202_v49, %v940_v32 }
 0x162   : > { %v1283_v0 = vsel %vm1187_vm0, %v1149_v51, 0.0  ;;  %v1266_v3 = vsel %vm1187_vm0, %v1132_v55, 0.0  ;;  %v1005_v10 = vld [vmem:[#allocation2 + $0x278] sm:$0xff]  ;;  %1475 = vst [vmem:[#allocation2 + $0xf8] sm:$0xff] %v6535_v40  ;;  %v1103_v26 = vld [vmem:[%s5903_s12 + $0x188] sm:$0xff]  ;;  %v974_v49 = vld [vmem:[#allocation2 + $0x180] sm:$0xff]  ;;  %1870 = vadd.xlane.f32.xlu1 %v6296_v35  ;;  %1836 = vadd.xlane.f32.xlu0 %v6308_v41 }
 0x163   : > { %v1133_v11 = vld [vmem:[%s5903_s12 + $0x278] sm:$0xff]  ;;  %1521 = vst [vmem:[#allocation2 + $0x268] sm:$0xff] %v6533_v37  ;;  %v1411_v21 = vadd.f32 %v1283_v0, %v1021_v36  ;;  %v1394_v27 = vadd.f32 %v1266_v3, %v1004_v52  ;;  %1458 = vst [vmem:[#allocation2 + $0x70] sm:$0xff] %v6544_v63  ;;  %v1237_v33 = vsel %vm1187_vm0, %v1103_v26, 0.0  ;;  %v1102_v36 = vld [vmem:[%s5903_s12 + $0x180] sm:$0xff] }
 0x164   : > { %v941_v15 = vld [vmem:[#allocation2 + $0x78] sm:$0xff]  ;;  %v1267_v19 = vsel %vm1187_vm0, %v1133_v11, 0.0  ;;  %v1039_v51 = vld [vmem:[#allocation2 + $0x388] sm:$0xff]  ;;  %v1365_v55 = vadd.f32 %v1237_v33, %v975_v23  ;;  %v1236_v0 = vsel %vm1187_vm0, %v1102_v36, 0.0  ;;  %v1038_v11 = vld [vmem:[#allocation2 + $0x380] sm:$0xff] }
 0x165   : > { %v1069_v22 = vld [vmem:[%s5903_s12 + $0x78] sm:$0xff]  ;;  %v1395_v29 = vadd.f32 %v1267_v19, %v1005_v10  ;;  %1539 = vst [vmem:[#allocation2 + $0x2f8] sm:$0xff] %v1411_v21  ;;  %1522 = vst [vmem:[#allocation2 + $0x270] sm:$0xff] %v1394_v27  ;;  %v1167_v3 = vld [vmem:[%s5903_s12 + $0x388] sm:$0xff]  ;;  %v1364_v19 = vadd.f32 %v1236_v0, %v974_v49 }
 0x166   : > { %v1203_v32 = vsel %vm1187_vm0, %v1069_v22, 0.0  ;;  %v1166_v10 = vld [vmem:[%s5903_s12 + $0x380] sm:$0xff]  ;;  %v1301_v21 = vsel %vm1187_vm0, %v1167_v3, 0.0  ;;  %v1087_v22 = vld [vmem:[%s5903_s12 + $0x108] sm:$0xff]  ;;  %1493 = vst [vmem:[#allocation2 + $0x188] sm:$0xff] %v1365_v55  ;;  %v1104_v55 = vld [vmem:[%s5903_s12 + $0x190] sm:$0xff]  ;;  %1744 = vadd.xlane.f32.xlu1 %v6310_v42  ;;  %1710 = vadd.xlane.f32.xlu0 %v6319_v47 }
 0x167   : > { %v1331_v52 = vadd.f32 %v1203_v32, %v941_v15  ;;  %1523 = vst [vmem:[#allocation2 + $0x278] sm:$0xff] %v1395_v29  ;;  %v1300_v15 = vsel %vm1187_vm0, %v1166_v10, 0.0  ;;  %v959_v27 = vld [vmem:[#allocation2 + $0x108] sm:$0xff]  ;;  %v958_v23 = vld [vmem:[#allocation2 + $0x100] sm:$0xff]  ;;  %v1429_v26 = vadd.f32 %v1301_v21, %v1039_v51  ;;  %v1221_v28 = vsel %vm1187_vm0, %v1087_v22, 0.0  ;;  %1492 = vst [vmem:[#allocation2 + $0x180] sm:$0xff] %v1364_v19 }
 0x168   : > { %v1428_v32 = vadd.f32 %v1300_v15, %v1038_v11  ;;  %v1086_v34 = vld [vmem:[%s5903_s12 + $0x100] sm:$0xff]  ;;  %v1349_v49 = vadd.f32 %v1221_v28, %v959_v27  ;;  %v1040_v51 = vld [vmem:[#allocation2 + $0x390] sm:$0xff]  ;;  %v1238_v10 = vsel %vm1187_vm0, %v1104_v55, 0.0  ;;  %v1153_v47 = vld [vmem:[%s5903_s12 + $0x318] sm:$0xff] }
 0x169   : > { %1459 = vst [vmem:[#allocation2 + $0x78] sm:$0xff] %v1331_v52  ;;  %v1022_v29 = vld [vmem:[#allocation2 + $0x300] sm:$0xff]  ;;  %v1220_v36 = vsel %vm1187_vm0, %v1086_v34, 0.0  ;;  %v976_v52 = vld [vmem:[#allocation2 + $0x190] sm:$0xff]  ;;  %1557 = vst [vmem:[#allocation2 + $0x388] sm:$0xff] %v1429_v26 }
 0x16a   : > { %v1150_v33 = vld [vmem:[%s5903_s12 + $0x300] sm:$0xff]  ;;  %1556 = vst [vmem:[#allocation2 + $0x380] sm:$0xff] %v1428_v32  ;;  %v1348_v3 = vadd.f32 %v1220_v36, %v958_v23  ;;  %v1168_v21 = vld [vmem:[%s5903_s12 + $0x390] sm:$0xff]  ;;  %v1151_v15 = vld [vmem:[%s5903_s12 + $0x308] sm:$0xff]  ;;  %v1366_v27 = vadd.f32 %v1238_v10, %v976_v52  ;;  %1872 = vadd.xlane.f32.xlu1 %v6321_v50  ;;  %1838 = vadd.xlane.f32.xlu0 %v6331_v58 }
 0x16b   : > { %v1284_v0 = vsel %vm1187_vm0, %v1150_v33, 0.0  ;;  %v1023_v19 = vld [vmem:[#allocation2 + $0x308] sm:$0xff]  ;;  %1477 = vst [vmem:[#allocation2 + $0x108] sm:$0xff] %v1349_v49  ;;  %v1302_v22 = vsel %vm1187_vm0, %v1168_v21, 0.0  ;;  %v1285_v23 = vsel %vm1187_vm0, %v1151_v15, 0.0  ;;  %v977_v26 = vld [vmem:[#allocation2 + $0x198] sm:$0xff] }
 0x16c   : > { %v1412_v11 = vadd.f32 %v1284_v0, %v1022_v29  ;;  %v1105_v32 = vld [vmem:[%s5903_s12 + $0x198] sm:$0xff]  ;;  %v960_v28 = vld [vmem:[#allocation2 + $0x110] sm:$0xff]  ;;  %1476 = vst [vmem:[#allocation2 + $0x100] sm:$0xff] %v1348_v3  ;;  %v1430_v34 = vadd.f32 %v1302_v22, %v1040_v51  ;;  %v1413_v29 = vadd.f32 %v1285_v23, %v1023_v19  ;;  %1494 = vst [vmem:[#allocation2 + $0x190] sm:$0xff] %v1366_v27 }
 0x16d   : > { %v1239_v35 = vsel %vm1187_vm0, %v1105_v32, 0.0  ;;  %v1088_v41 = vld [vmem:[%s5903_s12 + $0x110] sm:$0xff]  ;;  %v1169_v49 = vld [vmem:[%s5903_s12 + $0x398] sm:$0xff]  ;;  %v1106_v19 = vld [vmem:[%s5903_s12 + $0x1a0] sm:$0xff] }
 0x16e   : > { %1540 = vst [vmem:[#allocation2 + $0x300] sm:$0xff] %v1412_v11  ;;  %v1041_v33 = vld [vmem:[#allocation2 + $0x398] sm:$0xff]  ;;  %v1367_v36 = vadd.f32 %v1239_v35, %v977_v26  ;;  %v1222_v0 = vsel %vm1187_vm0, %v1088_v41, 0.0  ;;  %v1303_v52 = vsel %vm1187_vm0, %v1169_v49, 0.0  ;;  %v1024_v55 = vld [vmem:[#allocation2 + $0x310] sm:$0xff]  ;;  %v978_v51 = vld [vmem:[#allocation2 + $0x1a0] sm:$0xff]  ;;  %1746 = vadd.xlane.f32.xlu1 %v6333_v59  ;;  %1712 = vadd.xlane.f32.xlu0 %v6342_v7 }
 0x16f   : > { %v1152_v3 = vld [vmem:[%s5903_s12 + $0x310] sm:$0xff]  ;;  %1558 = vst [vmem:[#allocation2 + $0x390] sm:$0xff] %v1430_v34  ;;  %1541 = vst [vmem:[#allocation2 + $0x308] sm:$0xff] %v1413_v29  ;;  %v1350_v11 = vadd.f32 %v1222_v0, %v960_v28  ;;  %v1431_v10 = vadd.f32 %v1303_v52, %v1041_v33  ;;  %v1089_v27 = vld [vmem:[%s5903_s12 + $0x118] sm:$0xff]  ;;  %v1240_v23 = vsel %vm1187_vm0, %v1106_v19, 0.0 }
 0x170   : > { %v1286_v21 = vsel %vm1187_vm0, %v1152_v3, 0.0  ;;  %v961_v15 = vld [vmem:[#allocation2 + $0x118] sm:$0xff]  ;;  %1495 = vst [vmem:[#allocation2 + $0x198] sm:$0xff] %v1367_v36  ;;  %v1223_v26 = vsel %vm1187_vm0, %v1089_v27, 0.0  ;;  %v1042_v32 = vld [vmem:[#allocation2 + $0x3a0] sm:$0xff]  ;;  %v1368_v29 = vadd.f32 %v1240_v23, %v978_v51  ;;  %v979_v41 = vld [vmem:[#allocation2 + $0x1a8] sm:$0xff] }
 0x171   : > { %v1414_v22 = vadd.f32 %v1286_v21, %v1024_v55  ;;  %v1170_v28 = vld [vmem:[%s5903_s12 + $0x3a0] sm:$0xff]  ;;  %v1025_v34 = vld [vmem:[#allocation2 + $0x318] sm:$0xff]  ;;  %1478 = vst [vmem:[#allocation2 + $0x110] sm:$0xff] %v1350_v11  ;;  %1559 = vst [vmem:[#allocation2 + $0x398] sm:$0xff] %v1431_v10  ;;  %v1351_v35 = vadd.f32 %v1223_v26, %v961_v15  ;;  %v1287_v36 = vsel %vm1187_vm0, %v1153_v47, 0.0 }
 0x172   : > { %v1304_v42 = vsel %vm1187_vm0, %v1170_v28, 0.0  ;;  %v1107_v33 = vld [vmem:[%s5903_s12 + $0x1a8] sm:$0xff]  ;;  %v962_v52 = vld [vmem:[#allocation2 + $0x120] sm:$0xff]  ;;  %1496 = vst [vmem:[#allocation2 + $0x1a0] sm:$0xff] %v1368_v29  ;;  %v1415_v51 = vadd.f32 %v1287_v36, %v1025_v34  ;;  %1874 = vadd.xlane.f32.xlu1 %v6344_v8  ;;  %1840 = vadd.xlane.f32.xlu0 %v6354_v16 }
 0x173   : > { %1542 = vst [vmem:[#allocation2 + $0x310] sm:$0xff] %v1414_v22  ;;  %v1432_v49 = vadd.f32 %v1304_v42, %v1042_v32  ;;  %v1241_v0 = vsel %vm1187_vm0, %v1107_v33, 0.0  ;;  %v1090_v55 = vld [vmem:[%s5903_s12 + $0x120] sm:$0xff]  ;;  %1479 = vst [vmem:[#allocation2 + $0x118] sm:$0xff] %v1351_v35  ;;  %v1171_v21 = vld [vmem:[%s5903_s12 + $0x3a8] sm:$0xff] }
 0x174   : > { %v1043_v3 = vld [vmem:[#allocation2 + $0x3a8] sm:$0xff]  ;;  %v1369_v11 = vadd.f32 %v1241_v0, %v979_v41  ;;  %v1224_v10 = vsel %vm1187_vm0, %v1090_v55, 0.0  ;;  %v1026_v19 = vld [vmem:[#allocation2 + $0x320] sm:$0xff]  ;;  %v1305_v22 = vsel %vm1187_vm0, %v1171_v21, 0.0  ;;  %v980_v26 = vld [vmem:[#allocation2 + $0x1b0] sm:$0xff]  ;;  %1543 = vst [vmem:[#allocation2 + $0x318] sm:$0xff] %v1415_v51 }
 0x175   : > { %v1154_v15 = vld [vmem:[%s5903_s12 + $0x320] sm:$0xff]  ;;  %1560 = vst [vmem:[#allocation2 + $0x3a0] sm:$0xff] %v1432_v49  ;;  %v1352_v27 = vadd.f32 %v1224_v10, %v962_v52  ;;  %v1108_v32 = vld [vmem:[%s5903_s12 + $0x1b0] sm:$0xff]  ;;  %v1433_v34 = vadd.f32 %v1305_v22, %v1043_v3  ;;  %v1091_v58 = vld [vmem:[%s5903_s12 + $0x128] sm:$0xff] }
 0x176   : > { %v1288_v23 = vsel %vm1187_vm0, %v1154_v15, 0.0  ;;  %v963_v28 = vld [vmem:[#allocation2 + $0x128] sm:$0xff]  ;;  %1497 = vst [vmem:[#allocation2 + $0x1a8] sm:$0xff] %v1369_v11  ;;  %v1242_v50 = vsel %vm1187_vm0, %v1108_v32, 0.0  ;;  %v1044_v35 = vld [vmem:[#allocation2 + $0x3b0] sm:$0xff]  ;;  %v1225_v41 = vsel %vm1187_vm0, %v1091_v58, 0.0  ;;  %1748 = vadd.xlane.f32.xlu1 %v6363_v48  ;;  %1714 = vadd.xlane.f32.xlu0 %v6365_v53 }
 0x177   : > { %v1416_v29 = vadd.f32 %v1288_v23, %v1026_v19  ;;  %v1172_v42 = vld [vmem:[%s5903_s12 + $0x3b0] sm:$0xff]  ;;  %1480 = vst [vmem:[#allocation2 + $0x120] sm:$0xff] %v1352_v27  ;;  %v1370_v47 = vadd.f32 %v1242_v50, %v980_v26  ;;  %v1027_v49 = vld [vmem:[#allocation2 + $0x328] sm:$0xff]  ;;  %1561 = vst [vmem:[#allocation2 + $0x3a8] sm:$0xff] %v1433_v34  ;;  %v1353_v52 = vadd.f32 %v1225_v41, %v963_v28 }
 0x178   : > { %v1306_v33 = vsel %vm1187_vm0, %v1172_v42, 0.0  ;;  %v1155_v36 = vld [vmem:[%s5903_s12 + $0x328] sm:$0xff]  ;;  %v981_v0 = vld [vmem:[#allocation2 + $0x1b8] sm:$0xff]  ;;  %v1110_v50 = vld [vmem:[%s5903_s12 + $0x1c0] sm:$0xff] }
 0x179   : > { %1544 = vst [vmem:[#allocation2 + $0x320] sm:$0xff] %v1416_v29  ;;  %v1434_v55 = vadd.f32 %v1306_v33, %v1044_v35  ;;  %v1289_v3 = vsel %vm1187_vm0, %v1155_v36, 0.0  ;;  %v1109_v51 = vld [vmem:[%s5903_s12 + $0x1b8] sm:$0xff]  ;;  %v964_v11 = vld [vmem:[#allocation2 + $0x130] sm:$0xff]  ;;  %1498 = vst [vmem:[#allocation2 + $0x1b0] sm:$0xff] %v1370_v47  ;;  %v1244_v42 = vsel %vm1187_vm0, %v1110_v50, 0.0 }
 0x17a   : > { %v1092_v10 = vld [vmem:[%s5903_s12 + $0x130] sm:$0xff]  ;;  %v1417_v21 = vadd.f32 %v1289_v3, %v1027_v49  ;;  %v1243_v19 = vsel %vm1187_vm0, %v1109_v51, 0.0  ;;  %v1173_v27 = vld [vmem:[%s5903_s12 + $0x3b8] sm:$0xff]  ;;  %1481 = vst [vmem:[#allocation2 + $0x128] sm:$0xff] %v1353_v52  ;;  %v1174_v8 = vld [vmem:[%s5903_s12 + $0x3c0] sm:$0xff]  ;;  %1876 = vadd.xlane.f32.xlu1 %v6372_v30  ;;  %1842 = vadd.xlane.f32.xlu0 %v6381_v38 }
 0x17b   : > { %v1226_v15 = vsel %vm1187_vm0, %v1092_v10, 0.0  ;;  %v1156_v22 = vld [vmem:[%s5903_s12 + $0x330] sm:$0xff]  ;;  %1562 = vst [vmem:[#allocation2 + $0x3b0] sm:$0xff] %v1434_v55  ;;  %v1371_v23 = vadd.f32 %v1243_v19, %v981_v0  ;;  %v1307_v59 = vsel %vm1187_vm0, %v1173_v27, 0.0  ;;  %v1093_v58 = vld [vmem:[%s5903_s12 + $0x138] sm:$0xff]  ;;  %v1308_v0 = vsel %vm1187_vm0, %v1174_v8, 0.0 }
 0x17c   : > { %v1354_v26 = vadd.f32 %v1226_v15, %v964_v11  ;;  %v1045_v32 = vld [vmem:[#allocation2 + $0x3b8] sm:$0xff]  ;;  %v1028_v7 = vld [vmem:[#allocation2 + $0x330] sm:$0xff]  ;;  %v1290_v28 = vsel %vm1187_vm0, %v1156_v22, 0.0  ;;  %1545 = vst [vmem:[#allocation2 + $0x328] sm:$0xff] %v1417_v21  ;;  %v982_v35 = vld [vmem:[#allocation2 + $0x1c0] sm:$0xff]  ;;  %v1227_v41 = vsel %vm1187_vm0, %v1093_v58, 0.0 }
 0x17d   : > { %v1435_v34 = vadd.f32 %v1307_v59, %v1045_v32  ;;  %v1418_v29 = vadd.f32 %v1290_v28, %v1028_v7  ;;  %1499 = vst [vmem:[#allocation2 + $0x1b8] sm:$0xff] %v1371_v23  ;;  %v965_v47 = vld [vmem:[#allocation2 + $0x138] sm:$0xff]  ;;  %v1372_v33 = vadd.f32 %v1244_v42, %v982_v35  ;;  %v1046_v36 = vld [vmem:[#allocation2 + $0x3c0] sm:$0xff]  ;;  %v1111_v48 = vld [vmem:[%s5903_s12 + $0x1c8] sm:$0xff] }
 0x17e   : > { %1482 = vst [vmem:[#allocation2 + $0x130] sm:$0xff] %v1354_v26  ;;  %v1355_v49 = vadd.f32 %v1227_v41, %v965_v47  ;;  %v1157_v16 = vld [vmem:[%s5903_s12 + $0x338] sm:$0xff]  ;;  %v1436_v3 = vadd.f32 %v1308_v0, %v1046_v36  ;;  %v1094_v53 = vld [vmem:[%s5903_s12 + $0x140] sm:$0xff]  ;;  %v1245_v10 = vsel %vm1187_vm0, %v1111_v48, 0.0  ;;  %1750 = vadd.xlane.f32.xlu1 %v6383_v39  ;;  %1716 = vadd.xlane.f32.xlu0 %v6392_v46  ;;  %v1175_v30 = vld [vmem:[%s5903_s12 + $0x3c8] sm:$0xff] }
 0x17f   : > { %1563 = vst [vmem:[#allocation2 + $0x3b8] sm:$0xff] %v1435_v34  ;;  %1546 = vst [vmem:[#allocation2 + $0x330] sm:$0xff] %v1418_v29  ;;  %v1029_v52 = vld [vmem:[#allocation2 + $0x338] sm:$0xff]  ;;  %v1291_v55 = vsel %vm1187_vm0, %v1157_v16, 0.0  ;;  %v983_v11 = vld [vmem:[#allocation2 + $0x1c8] sm:$0xff]  ;;  %v1228_v19 = vsel %vm1187_vm0, %v1094_v53, 0.0 }
 0x180   : > { %1500 = vst [vmem:[#allocation2 + $0x1c0] sm:$0xff] %v1372_v33  ;;  %1483 = vst [vmem:[#allocation2 + $0x138] sm:$0xff] %v1355_v49  ;;  %v1419_v51 = vadd.f32 %v1291_v55, %v1029_v52  ;;  %v966_v21 = vld [vmem:[#allocation2 + $0x140] sm:$0xff]  ;;  %v1373_v15 = vadd.f32 %v1245_v10, %v983_v11  ;;  %v1047_v22 = vld [vmem:[#allocation2 + $0x3c8] sm:$0xff]  ;;  %v1309_v23 = vsel %vm1187_vm0, %v1175_v30, 0.0 }
 0x181   : > { %1564 = vst [vmem:[#allocation2 + $0x3c0] sm:$0xff] %v1436_v3  ;;  %v1356_v27 = vadd.f32 %v1228_v19, %v966_v21  ;;  %v1158_v38 = vld [vmem:[%s5903_s12 + $0x340] sm:$0xff]  ;;  %v1437_v59 = vadd.f32 %v1309_v23, %v1047_v22  ;;  %v1112_v39 = vld [vmem:[%s5903_s12 + $0x1d0] sm:$0xff]  ;;  %v1095_v46 = vld [vmem:[%s5903_s12 + $0x148] sm:$0xff] }
 0x182   : > { %1547 = vst [vmem:[#allocation2 + $0x338] sm:$0xff] %v1419_v51  ;;  %1501 = vst [vmem:[#allocation2 + $0x1c8] sm:$0xff] %v1373_v15  ;;  %v1030_v26 = vld [vmem:[#allocation2 + $0x340] sm:$0xff]  ;;  %v1292_v32 = vsel %vm1187_vm0, %v1158_v38, 0.0  ;;  %1878 = vadd.xlane.f32.xlu1 %v6401_v54  ;;  %1844 = vadd.xlane.f32.xlu0 %v6403_v60  ;;  %v984_v28 = vld [vmem:[#allocation2 + $0x1d0] sm:$0xff]  ;;  %v1246_v34 = vsel %vm1187_vm0, %v1112_v39, 0.0 }
 0x183   : > { %1484 = vst [vmem:[#allocation2 + $0x140] sm:$0xff] %v1356_v27  ;;  %v1420_v7 = vadd.f32 %v1292_v32, %v1030_v26  ;;  %1565 = vst [vmem:[#allocation2 + $0x3c8] sm:$0xff] %v1437_v59  ;;  %v967_v29 = vld [vmem:[#allocation2 + $0x148] sm:$0xff]  ;;  %v1229_v50 = vsel %vm1187_vm0, %v1095_v46, 0.0  ;;  %v1374_v58 = vadd.f32 %v1246_v34, %v984_v28  ;;  %v1176_v54 = vld [vmem:[%s5903_s12 + $0x3d0] sm:$0xff] }
 0x184   : > { %v1357_v35 = vadd.f32 %v1229_v50, %v967_v29  ;;  %v1159_v60 = vld [vmem:[%s5903_s12 + $0x348] sm:$0xff]  ;;  %v2087_v41 = vld [vmem:[#allocation7 + $0x18] sm:$0xff]  ;;  %v1310_v33 = vsel %vm1187_vm0, %v1176_v54, 0.0  ;;  %v2084_v55 = vld [vmem:[#allocation7] sm:$0xff] }
 0x185   : > { %1548 = vst [vmem:[#allocation2 + $0x340] sm:$0xff] %v1420_v7  ;;  %1502 = vst [vmem:[#allocation2 + $0x1d0] sm:$0xff] %v1374_v58  ;;  %v2085_v42 = vld [vmem:[#allocation7 + $0x8] sm:$0xff]  ;;  %v1293_v49 = vsel %vm1187_vm0, %v1159_v60, 0.0  ;;  %v2095_v16 = vld [vmem:[#allocation7 + $0x58] sm:$0xff] }
 0x186   : > { %1752 = vadd.xlane.f32.xlu1 %v6410_v1  ;;  %1718 = vadd.xlane.f32.xlu0 %v6419_v17  ;;  %1485 = vst [vmem:[#allocation2 + $0x148] sm:$0xff] %v1357_v35  ;;  %v2093_v47 = vld [vmem:[#allocation7 + $0x48] sm:$0xff]  ;;  %v4834_v17 = vpack.c.bf16 %v2095_v16, %v2087_v41  ;;  %v2092_v3 = vld [vmem:[#allocation7 + $0x40] sm:$0xff]  ;;  %v2086_v51 = vld [vmem:[#allocation7 + $0x10] sm:$0xff] }
 0x187   : > { %v4706_v8 = vpack.c.bf16 %v2093_v47, %v2085_v42  ;;  %v1048_v1 = vld [vmem:[#allocation2 + $0x3d0] sm:$0xff]  ;;  %v1031_v36 = vld [vmem:[#allocation2 + $0x348] sm:$0xff]  ;;  %v4708_v48 = vpack.c.bf16 %v2092_v3, %v2084_v55  ;;  %v1113_v11 = vld [vmem:[%s5903_s12 + $0x1d8] sm:$0xff] }
 0x188   : > { %v1438_v0 = vadd.f32 %v1310_v33, %v1048_v1  ;;  %v1421_v52 = vadd.f32 %v1293_v49, %v1031_v36  ;;  %v2094_v53 = vld [vmem:[#allocation7 + $0x50] sm:$0xff]  ;;  %4835 = vmatprep.subr.bf16.mxu1 %v4834_v17  ;;  %v2101_v19 = vld [vmem:[#allocation7 + $0x88] sm:$0xff]  ;;  %v2103_v27 = vld [vmem:[#allocation7 + $0x98] sm:$0xff]  ;;  %v1247_v30 = vsel %vm1187_vm0, %v1113_v11, 0.0 }
 0x189   : > { %v1096_v10 = vld [vmem:[%s5903_s12 + $0x150] sm:$0xff]  ;;  %4707 = vmatprep.subr.bf16.mxu0 %v4706_v8  ;;  %v4836_v21 = vpack.c.bf16 %v2094_v53, %v2086_v51  ;;  %v2109_v15 = vld [vmem:[#allocation7 + $0xc8] sm:$0xff]  ;;  %v2111_v38 = vld [vmem:[#allocation7 + $0xd8] sm:$0xff] }
 0x18a   : > { %1880 = vadd.xlane.f32.xlu1 %v6421_v18  ;;  %1846 = vadd.xlane.f32.xlu0 %v6430_v25  ;;  %1566 = vst [vmem:[#allocation2 + $0x3d0] sm:$0xff] %v1438_v0  ;;  %1549 = vst [vmem:[#allocation2 + $0x348] sm:$0xff] %v1421_v52  ;;  %v1230_v18 = vsel %vm1187_vm0, %v1096_v10, 0.0  ;;  %v4710_v25 = vpack.c.bf16 %v2109_v15, %v2101_v19  ;;  %v985_v22 = vld [vmem:[#allocation2 + $0x1d8] sm:$0xff]  ;;  %v968_v23 = vld [vmem:[#allocation2 + $0x150] sm:$0xff]  ;;  %v4838_v26 = vpack.c.bf16 %v2111_v38, %v2103_v27 }
 0x18b   : > { %4709 = vmatpush1.bf16.msra.mxu0 %v4708_v48  ;;  %4837 = vmatpush1.bf16.msra.mxu1 %v4836_v21  ;;  %v1375_v32 = vadd.f32 %v1247_v30, %v985_v22  ;;  %v1358_v59 = vadd.f32 %v1230_v18, %v968_v23  ;;  %v2100_v7 = vld [vmem:[#allocation7 + $0x80] sm:$0xff]  ;;  %v2102_v46 = vld [vmem:[#allocation7 + $0x90] sm:$0xff]  ;;  %v1177_v29 = vld [vmem:[%s5903_s12 + $0x3d8] sm:$0xff] }
 0x18c   : > { %v2108_v39 = vld [vmem:[#allocation7 + $0xc0] sm:$0xff]  ;;  %v2110_v34 = vld [vmem:[#allocation7 + $0xd0] sm:$0xff]  ;;  %4711 = vmatprep.subr.bf16.mxu0 %v4710_v25  ;;  %4839 = vmatprep.subr.bf16.mxu1 %v4838_v26  ;;  %v2117_v35 = vld [vmem:[#allocation7 + $0x108] sm:$0xff]  ;;  %v1311_v42 = vsel %vm1187_vm0, %v1177_v29, 0.0 }
 0x18d   : > { %v4712_v28 = vpack.c.bf16 %v2108_v39, %v2100_v7  ;;  %v1160_v50 = vld [vmem:[%s5903_s12 + $0x350] sm:$0xff]  ;;  %1503 = vst [vmem:[#allocation2 + $0x1d8] sm:$0xff] %v1375_v32  ;;  %1486 = vst [vmem:[#allocation2 + $0x150] sm:$0xff] %v1358_v59  ;;  %v4840_v58 = vpack.c.bf16 %v2110_v34, %v2102_v46  ;;  %v2125_v54 = vld [vmem:[#allocation7 + $0x148] sm:$0xff] }
 0x18e   : > { %1754 = vadd.xlane.f32.xlu1 %v6439_v61  ;;  %1720 = vadd.xlane.f32.xlu0 %v6441_v4  ;;  %v2119_v60 = vld [vmem:[#allocation7 + $0x118] sm:$0xff]  ;;  %v1294_v61 = vsel %vm1187_vm0, %v1160_v50, 0.0  ;;  %v4714_v4 = vpack.c.bf16 %v2125_v54, %v2117_v35  ;;  %v1032_v33 = vld [vmem:[#allocation2 + $0x350] sm:$0xff]  ;;  %v2116_v1 = vld [vmem:[#allocation7 + $0x100] sm:$0xff] }
 0x18f   : > { %4713 = vmatpush1.bf16.msra.mxu0 %v4712_v28  ;;  %v2127_v47 = vld [vmem:[#allocation7 + $0x158] sm:$0xff]  ;;  %4841 = vmatpush1.bf16.msra.mxu1 %v4840_v58  ;;  %v6725_v16 = vadd.f32 %v1294_v61, %v1032_v33  ;;  %v2124_v36 = vld [vmem:[#allocation7 + $0x140] sm:$0xff]  ;;  %v2118_v17 = vld [vmem:[#allocation7 + $0x110] sm:$0xff] }
 0x190   : > { %v1049_v41 = vld [vmem:[#allocation2 + $0x3d8] sm:$0xff]  ;;  %v4842_v49 = vpack.c.bf16 %v2127_v47, %v2119_v60  ;;  %v4716_v0 = vpack.c.bf16 %v2124_v36, %v2116_v1  ;;  %v1114_v55 = vld [vmem:[%s5903_s12 + $0x1e0] sm:$0xff]  ;;  %4715 = vmatprep.subr.bf16.mxu0 %v4714_v4  ;;  %v2133_v48 = vld [vmem:[#allocation7 + $0x188] sm:$0xff] }
 0x191   : > { %v6723_v8 = vadd.f32 %v1311_v42, %v1049_v41  ;;  %v2126_v52 = vld [vmem:[#allocation7 + $0x150] sm:$0xff]  ;;  %v1097_v3 = vld [vmem:[%s5903_s12 + $0x158] sm:$0xff]  ;;  %1550 = vst [vmem:[#allocation2 + $0x350] sm:$0xff] %v6725_v16  ;;  %v2141_v53 = vld [vmem:[#allocation7 + $0x1c8] sm:$0xff]  ;;  %v1248_v10 = vsel %vm1187_vm0, %v1114_v55, 0.0 }
 0x192   : > { %1882 = vadd.xlane.f32.xlu1 %v6448_v44  ;;  %1848 = vadd.xlane.f32.xlu0 %v6457_v56  ;;  %v4844_v51 = vpack.c.bf16 %v2126_v52, %v2118_v17  ;;  %v2135_v11 = vld [vmem:[#allocation7 + $0x198] sm:$0xff]  ;;  %v1231_v44 = vsel %vm1187_vm0, %v1097_v3, 0.0  ;;  %v4718_v56 = vpack.c.bf16 %v2141_v53, %v2133_v48  ;;  %v2132_v25 = vld [vmem:[#allocation7 + $0x180] sm:$0xff]  ;;  %v2134_v22 = vld [vmem:[#allocation7 + $0x190] sm:$0xff] }
 0x193   : > { %4843 = vmatprep.subr.bf16.mxu1 %v4842_v49  ;;  %1567 = vst [vmem:[#allocation2 + $0x3d8] sm:$0xff] %v6723_v8  ;;  %4717 = vmatpush1.bf16.msra.mxu0 %v4716_v0  ;;  %v2143_v21 = vld [vmem:[#allocation7 + $0x1d8] sm:$0xff]  ;;  %v2140_v38 = vld [vmem:[#allocation7 + $0x1c0] sm:$0xff]  ;;  %v2142_v26 = vld [vmem:[#allocation7 + $0x1d0] sm:$0xff] }
 0x194   : > { %v986_v19 = vld [vmem:[#allocation2 + $0x1e0] sm:$0xff]  ;;  %v969_v15 = vld [vmem:[#allocation2 + $0x158] sm:$0xff]  ;;  %4845 = vmatpush1.bf16.msra.mxu1 %v4844_v51  ;;  %v4846_v27 = vpack.c.bf16 %v2143_v21, %v2135_v11  ;;  %v4720_v23 = vpack.c.bf16 %v2140_v38, %v2132_v25  ;;  %4719 = vmatprep.subr.bf16.mxu0 %v4718_v56  ;;  %v4848_v7 = vpack.c.bf16 %v2142_v26, %v2134_v22  ;;  %v2149_v39 = vld [vmem:[#allocation7 + $0x208] sm:$0xff] }
 0x195   : > { %v6737_v30 = vadd.f32 %v1248_v10, %v986_v19  ;;  %v6739_v18 = vadd.f32 %v1231_v44, %v969_v15  ;;  %v1178_v32 = vld [vmem:[%s5903_s12 + $0x3e0] sm:$0xff]  ;;  %v1161_v59 = vld [vmem:[%s5903_s12 + $0x358] sm:$0xff]  ;;  %v2157_v46 = vld [vmem:[#allocation7 + $0x248] sm:$0xff] }
 0x196   : > { %1756 = vadd.xlane.f32.xlu1 %v6459_v57  ;;  %1722 = vadd.xlane.f32.xlu0 %v6468_v9  ;;  %v2151_v28 = vld [vmem:[#allocation7 + $0x218] sm:$0xff]  ;;  %v1312_v34 = vsel %vm1187_vm0, %v1178_v32, 0.0  ;;  %v1295_v57 = vsel %vm1187_vm0, %v1161_v59, 0.0  ;;  %v4722_v9 = vpack.c.bf16 %v2157_v46, %v2149_v39  ;;  %v2148_v42 = vld [vmem:[#allocation7 + $0x200] sm:$0xff]  ;;  %v2150_v4 = vld [vmem:[#allocation7 + $0x210] sm:$0xff] }
 0x197   : > { %4847 = vmatprep.subr.bf16.mxu1 %v4846_v27  ;;  %1504 = vst [vmem:[#allocation2 + $0x1e0] sm:$0xff] %v6737_v30  ;;  %1487 = vst [vmem:[#allocation2 + $0x158] sm:$0xff] %v6739_v18  ;;  %4721 = vmatpush1.bf16.msra.mxu0 %v4720_v23  ;;  %v2159_v29 = vld [vmem:[#allocation7 + $0x258] sm:$0xff]  ;;  %v2156_v61 = vld [vmem:[#allocation7 + $0x240] sm:$0xff] }
 0x198   : > { %v1050_v50 = vld [vmem:[#allocation2 + $0x3e0] sm:$0xff]  ;;  %v1033_v58 = vld [vmem:[#allocation2 + $0x358] sm:$0xff]  ;;  %4849 = vmatpush1.bf16.msra.mxu1 %v4848_v7  ;;  %v4850_v35 = vpack.c.bf16 %v2159_v29, %v2151_v28  ;;  %v4724_v47 = vpack.c.bf16 %v2156_v61, %v2148_v42  ;;  %v1115_v33 = vld [vmem:[%s5903_s12 + $0x1e8] sm:$0xff]  ;;  %4723 = vmatprep.subr.bf16.mxu0 %v4722_v9 }
 0x199   : > { %v6751_v54 = vadd.f32 %v1312_v34, %v1050_v50  ;;  %v6753_v60 = vadd.f32 %v1295_v57, %v1033_v58  ;;  %v2158_v41 = vld [vmem:[#allocation7 + $0x250] sm:$0xff]  ;;  %v1098_v49 = vld [vmem:[%s5903_s12 + $0x160] sm:$0xff]  ;;  %v2165_v36 = vld [vmem:[#allocation7 + $0x288] sm:$0xff]  ;;  %v1249_v52 = vsel %vm1187_vm0, %v1115_v33, 0.0 }
 0x19a   : > { %1884 = vadd.xlane.f32.xlu1 %v6477_v6  ;;  %1850 = vadd.xlane.f32.xlu0 %v6479_v13  ;;  %v4852_v1 = vpack.c.bf16 %v2158_v41, %v2150_v4  ;;  %v2173_v17 = vld [vmem:[#allocation7 + $0x2c8] sm:$0xff]  ;;  %v2167_v0 = vld [vmem:[#allocation7 + $0x298] sm:$0xff]  ;;  %v1232_v6 = vsel %vm1187_vm0, %v1098_v49, 0.0  ;;  %v2164_v10 = vld [vmem:[#allocation7 + $0x280] sm:$0xff] }
 0x19b   : > { %4851 = vmatprep.subr.bf16.mxu1 %v4850_v35  ;;  %1568 = vst [vmem:[#allocation2 + $0x3e0] sm:$0xff] %v6751_v54  ;;  %1551 = vst [vmem:[#allocation2 + $0x358] sm:$0xff] %v6753_v60  ;;  %4725 = vmatpush1.bf16.msra.mxu0 %v4724_v47  ;;  %v4726_v13 = vpack.c.bf16 %v2173_v17, %v2165_v36  ;;  %v2175_v55 = vld [vmem:[#allocation7 + $0x2d8] sm:$0xff]  ;;  %v987_v3 = vld [vmem:[#allocation2 + $0x1e8] sm:$0xff] }
 0x19c   : > { %v970_v51 = vld [vmem:[#allocation2 + $0x160] sm:$0xff]  ;;  %4853 = vmatpush1.bf16.msra.mxu1 %v4852_v1  ;;  %v4854_v48 = vpack.c.bf16 %v2175_v55, %v2167_v0  ;;  %v6765_v53 = vadd.f32 %v1249_v52, %v987_v3  ;;  %v2166_v56 = vld [vmem:[#allocation7 + $0x290] sm:$0xff]  ;;  %v1179_v15 = vld [vmem:[%s5903_s12 + $0x3e8] sm:$0xff] }
 0x19d   : > { %v6767_v11 = vadd.f32 %v1232_v6, %v970_v51  ;;  %v2172_v44 = vld [vmem:[#allocation7 + $0x2c0] sm:$0xff]  ;;  %v2174_v19 = vld [vmem:[#allocation7 + $0x2d0] sm:$0xff]  ;;  %4727 = vmatprep.subr.bf16.mxu0 %v4726_v13  ;;  %v2181_v38 = vld [vmem:[#allocation7 + $0x308] sm:$0xff]  ;;  %v1313_v26 = vsel %vm1187_vm0, %v1179_v15, 0.0 }
 0x19e   : > { %1758 = vadd.xlane.f32.xlu1 %v6486_v31  ;;  %1724 = vadd.xlane.f32.xlu0 %v6495_v43  ;;  %v4728_v21 = vpack.c.bf16 %v2172_v44, %v2164_v10  ;;  %v1162_v27 = vld [vmem:[%s5903_s12 + $0x360] sm:$0xff]  ;;  %1505 = vst [vmem:[#allocation2 + $0x1e8] sm:$0xff] %v6765_v53  ;;  %v4856_v25 = vpack.c.bf16 %v2174_v19, %v2166_v56  ;;  %v2189_v22 = vld [vmem:[#allocation7 + $0x348] sm:$0xff]  ;;  %v2183_v23 = vld [vmem:[#allocation7 + $0x318] sm:$0xff] }
 0x19f   : > { %4855 = vmatprep.subr.bf16.mxu1 %v4854_v48  ;;  %1488 = vst [vmem:[#allocation2 + $0x160] sm:$0xff] %v6767_v11  ;;  %v1296_v31 = vsel %vm1187_vm0, %v1162_v27, 0.0  ;;  %v4730_v43 = vpack.c.bf16 %v2189_v22, %v2181_v38  ;;  %v2191_v32 = vld [vmem:[#allocation7 + $0x358] sm:$0xff]  ;;  %v1051_v59 = vld [vmem:[#allocation2 + $0x3e8] sm:$0xff]  ;;  %v2182_v9 = vld [vmem:[#allocation7 + $0x310] sm:$0xff] }
 0x1a0   : > { %4729 = vmatpush1.bf16.msra.mxu0 %v4728_v21  ;;  %v1034_v7 = vld [vmem:[#allocation2 + $0x360] sm:$0xff]  ;;  %4857 = vmatpush1.bf16.msra.mxu1 %v4856_v25  ;;  %v4858_v39 = vpack.c.bf16 %v2191_v32, %v2183_v23  ;;  %v6779_v46 = vadd.f32 %v1313_v26, %v1051_v59  ;;  %v2190_v50 = vld [vmem:[#allocation7 + $0x350] sm:$0xff]  ;;  %v1099_v35 = vld [vmem:[%s5903_s12 + $0x168] sm:$0xff] }
 0x1a1   : > { %v6781_v28 = vadd.f32 %v1296_v31, %v1034_v7  ;;  %v2180_v34 = vld [vmem:[#allocation7 + $0x300] sm:$0xff]  ;;  %v1116_v58 = vld [vmem:[%s5903_s12 + $0x1f0] sm:$0xff]  ;;  %4731 = vmatprep.subr.bf16.mxu0 %v4730_v43  ;;  %v4860_v42 = vpack.c.bf16 %v2190_v50, %v2182_v9  ;;  %v2197_v61 = vld [vmem:[#allocation7 + $0x388] sm:$0xff] }
 0x1a2   : > { %v2188_v57 = vld [vmem:[#allocation7 + $0x340] sm:$0xff]  ;;  %1886 = vadd.xlane.f32.xlu1 %v6497_v45  ;;  %1852 = vadd.xlane.f32.xlu0 %v6506_v62  ;;  %1569 = vst [vmem:[#allocation2 + $0x3e8] sm:$0xff] %v6779_v46  ;;  %v2205_v4 = vld [vmem:[#allocation7 + $0x3c8] sm:$0xff]  ;;  %v2199_v47 = vld [vmem:[#allocation7 + $0x398] sm:$0xff]  ;;  %v1250_v41 = vsel %vm1187_vm0, %v1116_v58, 0.0  ;;  %v1233_v45 = vsel %vm1187_vm0, %v1099_v35, 0.0 }
 0x1a3   : > { %v4732_v29 = vpack.c.bf16 %v2188_v57, %v2180_v34  ;;  %4859 = vmatprep.subr.bf16.mxu1 %v4858_v39  ;;  %1552 = vst [vmem:[#allocation2 + $0x360] sm:$0xff] %v6781_v28  ;;  %v4734_v62 = vpack.c.bf16 %v2205_v4, %v2197_v61  ;;  %v2207_v33 = vld [vmem:[#allocation7 + $0x3d8] sm:$0xff]  ;;  %v988_v49 = vld [vmem:[#allocation2 + $0x1f0] sm:$0xff]  ;;  %v971_v1 = vld [vmem:[#allocation2 + $0x168] sm:$0xff] }
 0x1a4   : > { %4861 = vmatpush1.bf16.msra.mxu1 %v4860_v42  ;;  %v4862_v36 = vpack.c.bf16 %v2207_v33, %v2199_v47  ;;  %v6793_v17 = vadd.f32 %v1250_v41, %v988_v49  ;;  %v6795_v0 = vadd.f32 %v1233_v45, %v971_v1  ;;  %v2196_v52 = vld [vmem:[#allocation7 + $0x380] sm:$0xff]  ;;  %v2198_v13 = vld [vmem:[#allocation7 + $0x390] sm:$0xff]  ;;  %v1163_v48 = vld [vmem:[%s5903_s12 + $0x368] sm:$0xff] }
 0x1a5   : > { %4733 = vmatpush1.bf16.msra.mxu0 %v4732_v29  ;;  %v2204_v6 = vld [vmem:[#allocation7 + $0x3c0] sm:$0xff]  ;;  %v2206_v3 = vld [vmem:[#allocation7 + $0x3d0] sm:$0xff]  ;;  %v2213_v44 = vld [vmem:[#allocation7 + $0x408] sm:$0xff] }
 0x1a6   : > { %1760 = vadd.xlane.f32.xlu1 %v6515_v14  ;;  %1726 = vadd.xlane.f32.xlu0 %v6517_v20  ;;  %v4736_v55 = vpack.c.bf16 %v2204_v6, %v2196_v52  ;;  %v1180_v51 = vld [vmem:[%s5903_s12 + $0x3f0] sm:$0xff]  ;;  %1506 = vst [vmem:[#allocation2 + $0x1f0] sm:$0xff] %v6793_v17  ;;  %1489 = vst [vmem:[#allocation2 + $0x168] sm:$0xff] %v6795_v0  ;;  %v4864_v10 = vpack.c.bf16 %v2206_v3, %v2198_v13  ;;  %v2221_v56 = vld [vmem:[#allocation7 + $0x448] sm:$0xff]  ;;  %v1297_v14 = vsel %vm1187_vm0, %v1163_v48, 0.0 }
 0x1a7   : > { %4735 = vmatprep.subr.bf16.mxu0 %v4734_v62  ;;  %4863 = vmatprep.subr.bf16.mxu1 %v4862_v36  ;;  %v2215_v21 = vld [vmem:[#allocation7 + $0x418] sm:$0xff]  ;;  %v1314_v19 = vsel %vm1187_vm0, %v1180_v51, 0.0  ;;  %v4738_v20 = vpack.c.bf16 %v2221_v56, %v2213_v44  ;;  %v1052_v27 = vld [vmem:[#allocation2 + $0x3f0] sm:$0xff]  ;;  %v1035_v25 = vld [vmem:[#allocation2 + $0x368] sm:$0xff] }
 0x1a8   : > { %v2223_v15 = vld [vmem:[#allocation7 + $0x458] sm:$0xff]  ;;  %4865 = vmatpush1.bf16.msra.mxu1 %v4864_v10  ;;  %v6807_v22 = vadd.f32 %v1314_v19, %v1052_v27  ;;  %v6809_v23 = vadd.f32 %v1297_v14, %v1035_v25  ;;  %v2212_v26 = vld [vmem:[#allocation7 + $0x400] sm:$0xff]  ;;  %v2214_v43 = vld [vmem:[#allocation7 + $0x410] sm:$0xff] }
 0x1a9   : > { %4737 = vmatpush1.bf16.msra.mxu0 %v4736_v55  ;;  %v4866_v38 = vpack.c.bf16 %v2223_v15, %v2215_v21  ;;  %v2220_v31 = vld [vmem:[#allocation7 + $0x440] sm:$0xff]  ;;  %v2222_v59 = vld [vmem:[#allocation7 + $0x450] sm:$0xff]  ;;  %v1117_v7 = vld [vmem:[%s5903_s12 + $0x1f8] sm:$0xff] }
 0x1aa   : > { %1888 = vadd.xlane.f32.xlu1 %v6524_v24  ;;  %1854 = vadd.xlane.f32.xlu0 %v6533_v37  ;;  %v4740_v32 = vpack.c.bf16 %v2220_v31, %v2212_v26  ;;  %v1100_v39 = vld [vmem:[%s5903_s12 + $0x170] sm:$0xff]  ;;  %1570 = vst [vmem:[#allocation2 + $0x3f0] sm:$0xff] %v6807_v22  ;;  %1553 = vst [vmem:[#allocation2 + $0x368] sm:$0xff] %v6809_v23  ;;  %v4868_v34 = vpack.c.bf16 %v2222_v59, %v2214_v43  ;;  %v2229_v57 = vld [vmem:[#allocation7 + $0x488] sm:$0xff]  ;;  %v1251_v50 = vsel %vm1187_vm0, %v1117_v7, 0.0 }
 0x1ab   : > { %4739 = vmatprep.subr.bf16.mxu0 %v4738_v20  ;;  %4867 = vmatprep.subr.bf16.mxu1 %v4866_v38  ;;  %v2237_v9 = vld [vmem:[#allocation7 + $0x4c8] sm:$0xff]  ;;  %v2231_v29 = vld [vmem:[#allocation7 + $0x498] sm:$0xff]  ;;  %v1234_v24 = vsel %vm1187_vm0, %v1100_v39, 0.0  ;;  %v2228_v41 = vld [vmem:[#allocation7 + $0x480] sm:$0xff] }
 0x1ac   : > { %v4742_v37 = vpack.c.bf16 %v2237_v9, %v2229_v57  ;;  %v2239_v58 = vld [vmem:[#allocation7 + $0x4d8] sm:$0xff]  ;;  %v972_v42 = vld [vmem:[#allocation2 + $0x170] sm:$0xff]  ;;  %4869 = vmatpush1.bf16.msra.mxu1 %v4868_v34  ;;  %v2236_v45 = vld [vmem:[#allocation7 + $0x4c0] sm:$0xff] }
 0x1ad   : > { %4741 = vmatpush1.bf16.msra.mxu0 %v4740_v32  ;;  %v989_v35 = vld [vmem:[#allocation2 + $0x1f8] sm:$0xff]  ;;  %v4870_v61 = vpack.c.bf16 %v2239_v58, %v2231_v29  ;;  %v6823_v47 = vadd.f32 %v1234_v24, %v972_v42  ;;  %v4744_v33 = vpack.c.bf16 %v2236_v45, %v2228_v41  ;;  %v2245_v6 = vld [vmem:[#allocation7 + $0x508] sm:$0xff]  ;;  %v2244_v19 = vld [vmem:[#allocation7 + $0x500] sm:$0xff] }
 0x1ae   : > { %v6821_v4 = vadd.f32 %v1251_v50, %v989_v35  ;;  %v2230_v62 = vld [vmem:[#allocation7 + $0x490] sm:$0xff]  ;;  %1762 = vadd.xlane.f32.xlu1 %v6535_v40  ;;  %1728 = vadd.xlane.f32.xlu0 %v6544_v63  ;;  %v1181_v1 = vld [vmem:[%s5903_s12 + $0x3f8] sm:$0xff]  ;;  %v2253_v13 = vld [vmem:[#allocation7 + $0x548] sm:$0xff] }
 0x1af   : > { %v2238_v49 = vld [vmem:[#allocation7 + $0x4d0] sm:$0xff]  ;;  %4743 = vmatprep.subr.bf16.mxu0 %v4742_v37  ;;  %4871 = vmatprep.subr.bf16.mxu1 %v4870_v61  ;;  %1490 = vst [vmem:[#allocation2 + $0x170] sm:$0xff] %v6823_v47  ;;  %v2247_v55 = vld [vmem:[#allocation7 + $0x518] sm:$0xff]  ;;  %v1315_v3 = vsel %vm1187_vm0, %v1181_v1, 0.0  ;;  %v4746_v63 = vpack.c.bf16 %v2253_v13, %v2245_v6  ;;  %v2252_v14 = vld [vmem:[#allocation7 + $0x540] sm:$0xff] }
 0x1b0   : > { %v1164_v36 = vld [vmem:[%s5903_s12 + $0x370] sm:$0xff]  ;;  %1507 = vst [vmem:[#allocation2 + $0x1f8] sm:$0xff] %v6821_v4  ;;  %v4872_v52 = vpack.c.bf16 %v2238_v49, %v2230_v62  ;;  %v2255_v51 = vld [vmem:[#allocation7 + $0x558] sm:$0xff]  ;;  %v4748_v25 = vpack.c.bf16 %v2252_v14, %v2244_v19  ;;  %v2261_v32 = vld [vmem:[#allocation7 + $0x588] sm:$0xff] }
 0x1b1   : > { %v1298_v40 = vsel %vm1187_vm0, %v1164_v36, 0.0  ;;  %4745 = vmatpush1.bf16.msra.mxu0 %v4744_v33  ;;  %v1053_v48 = vld [vmem:[#allocation2 + $0x3f8] sm:$0xff]  ;;  %v1036_v10 = vld [vmem:[#allocation2 + $0x370] sm:$0xff]  ;;  %v4874_v44 = vpack.c.bf16 %v2255_v51, %v2247_v55  ;;  %v2260_v35 = vld [vmem:[#allocation7 + $0x580] sm:$0xff] }
 0x1b2   : > { %4873 = vmatpush1.bf16.msra.mxu1 %v4872_v52  ;;  %v6835_v56 = vadd.f32 %v1315_v3, %v1053_v48  ;;  %v6837_v21 = vadd.f32 %v1298_v40, %v1036_v10  ;;  %v2246_v20 = vld [vmem:[#allocation7 + $0x510] sm:$0xff]  ;;  %v1165_v26 = vld [vmem:[%s5903_s12 + $0x378] sm:$0xff]  ;;  %4747 = vmatprep.subr.bf16.mxu0 %v4746_v63  ;;  %v2269_v59 = vld [vmem:[#allocation7 + $0x5c8] sm:$0xff] }
 0x1b3   : > { %v5448_v15 = vld [vmem:[#allocation2 + $0x2f8] sm:$0xff]  ;;  %v5449_v27 = vld [vmem:[#allocation2 + $0x270] sm:$0xff]  ;;  %4875 = vmatprep.subr.bf16.mxu1 %v4874_v44  ;;  %v1299_v39 = vsel %vm1187_vm0, %v1165_v26, 0.0  ;;  %v4750_v57 = vpack.c.bf16 %v2269_v59, %v2261_v32  ;;  %v2268_v42 = vld [vmem:[#allocation7 + $0x5c0] sm:$0xff] }
 0x1b4   : > { %1890 = vadd.xlane.f32.xlu1 %v5448_v15  ;;  %1856 = vadd.xlane.f32.xlu0 %v5449_v27  ;;  %v2254_v38 = vld [vmem:[#allocation7 + $0x550] sm:$0xff]  ;;  %v1101_v31 = vld [vmem:[%s5903_s12 + $0x178] sm:$0xff]  ;;  %1571 = vst [vmem:[#allocation2 + $0x3f8] sm:$0xff] %v6835_v56  ;;  %1554 = vst [vmem:[#allocation2 + $0x370] sm:$0xff] %v6837_v21  ;;  %v4752_v12 = vpack.c.bf16 %v2268_v42, %v2260_v35 }
 0x1b5   : > { %v4876_v43 = vpack.c.bf16 %v2254_v38, %v2246_v20  ;;  %v2263_v7 = vld [vmem:[#allocation7 + $0x598] sm:$0xff]  ;;  %v1235_v34 = vsel %vm1187_vm0, %v1101_v31, 0.0  ;;  %4749 = vmatpush1.bf16.msra.mxu0 %v4748_v25  ;;  %v2262_v61 = vld [vmem:[#allocation7 + $0x590] sm:$0xff]  ;;  %v2277_v49 = vld [vmem:[#allocation7 + $0x608] sm:$0xff]  ;;  %vm3428_vm0 = vcmask 1041409  }
 0x1b6   : > { %v2271_v9 = vld [vmem:[#allocation7 + $0x5d8] sm:$0xff]  ;;  %v2270_v62 = vld [vmem:[#allocation7 + $0x5d0] sm:$0xff]  ;;  %4751 = vmatprep.subr.bf16.mxu0 %v4750_v57  ;;  %v2285_v1 = vld [vmem:[#allocation7 + $0x648] sm:$0xff] }
 0x1b7   : > { %v1037_v29 = vld [vmem:[#allocation2 + $0x378] sm:$0xff]  ;;  %4877 = vmatpush1.bf16.msra.mxu1 %v4876_v43  ;;  %v4878_v24 = vpack.c.bf16 %v2271_v9, %v2263_v7  ;;  %v4880_v33 = vpack.c.bf16 %v2270_v62, %v2262_v61  ;;  %v4754_v52 = vpack.c.bf16 %v2285_v1, %v2277_v49  ;;  %v2276_v13 = vld [vmem:[#allocation7 + $0x600] sm:$0xff]  ;;  %v2293_v19 = vld [vmem:[#allocation7 + $0x688] sm:$0xff] }
 0x1b8   : > { %v973_v50 = vld [vmem:[#allocation2 + $0x178] sm:$0xff]  ;;  %v6847_v37 = vadd.f32 %v1299_v39, %v1037_v29  ;;  %v2284_v55 = vld [vmem:[#allocation7 + $0x640] sm:$0xff]  ;;  %v2301_v14 = vld [vmem:[#allocation7 + $0x6c8] sm:$0xff] }
 0x1b9   : > { %v6849_v58 = vadd.f32 %v1235_v34, %v973_v50  ;;  %v5450_v41 = vld [vmem:[#allocation2 + $0x278] sm:$0xff]  ;;  %4879 = vmatprep.subr.bf16.mxu1 %v4878_v24  ;;  %4753 = vmatpush1.bf16.msra.mxu0 %v4752_v12  ;;  %v4756_v40 = vpack.c.bf16 %v2284_v55, %v2276_v13  ;;  %v5452_v48 = vld [vmem:[#allocation2 + $0x188] sm:$0xff]  ;;  %v5453_v10 = vld [vmem:[#allocation2 + $0x180] sm:$0xff]  ;;  %v4758_v15 = vpack.c.bf16 %v2301_v14, %v2293_v19  ;;  %v2770_v19 = vadd.s32 4294967288, %v6180_v5 }
 0x1ba   : > { %1858 = vadd.xlane.f32.xlu1 %v5450_v41  ;;  %v5451_v45 = vld [vmem:[#allocation2 + $0x78] sm:$0xff]  ;;  %1555 = vst [vmem:[#allocation2 + $0x378] sm:$0xff] %v6847_v37  ;;  %4755 = vmatprep.subr.bf16.mxu0 %v4754_v52  ;;  %v2292_v25 = vld [vmem:[#allocation7 + $0x680] sm:$0xff]  ;;  %v2309_v34 = vld [vmem:[#allocation7 + $0x708] sm:$0xff] }
 0x1bb   : > { %1730 = vadd.xlane.f32.xlu0 %v5451_v45  ;;  %1491 = vst [vmem:[#allocation2 + $0x178] sm:$0xff] %v6849_v58  ;;  %v2279_v36 = vld [vmem:[#allocation7 + $0x618] sm:$0xff]  ;;  %4881 = vmatpush1.bf16.msra.mxu1 %v4880_v33  ;;  %v2278_v63 = vld [vmem:[#allocation7 + $0x610] sm:$0xff]  ;;  %v2300_v38 = vld [vmem:[#allocation7 + $0x6c0] sm:$0xff] }
 0x1bc   : > { %v2287_v6 = vld [vmem:[#allocation7 + $0x658] sm:$0xff]  ;;  %v2286_v51 = vld [vmem:[#allocation7 + $0x650] sm:$0xff]  ;;  %v4760_v31 = vpack.c.bf16 %v2300_v38, %v2292_v25  ;;  %v5454_v59 = vld [vmem:[#allocation2 + $0x388] sm:$0xff] }
 0x1bd   : > { %v4882_v3 = vpack.c.bf16 %v2287_v6, %v2279_v36  ;;  %v4884_v44 = vpack.c.bf16 %v2286_v51, %v2278_v63  ;;  %v2295_v20 = vld [vmem:[#allocation7 + $0x698] sm:$0xff]  ;;  %4757 = vmatpush1.bf16.msra.mxu0 %v4756_v40  ;;  %v2294_v43 = vld [vmem:[#allocation7 + $0x690] sm:$0xff]  ;;  %v2317_v57 = vld [vmem:[#allocation7 + $0x748] sm:$0xff] }
 0x1be   : > { %1798 = vadd.xlane.f32.xlu1 %v5452_v48  ;;  %v2303_v27 = vld [vmem:[#allocation7 + $0x6d8] sm:$0xff]  ;;  %v2302_v32 = vld [vmem:[#allocation7 + $0x6d0] sm:$0xff]  ;;  %4759 = vmatprep.subr.bf16.mxu0 %v4758_v15  ;;  %v4762_v29 = vpack.c.bf16 %v2317_v57, %v2309_v34  ;;  %v2308_v24 = vld [vmem:[#allocation7 + $0x700] sm:$0xff] }
 0x1bf   : > { %1796 = vadd.xlane.f32.xlu0 %v5453_v10  ;;  %4883 = vmatprep.subr.bf16.mxu1 %v4882_v3  ;;  %v4886_v26 = vpack.c.bf16 %v2303_v27, %v2295_v20  ;;  %v5455_v7 = vld [vmem:[#allocation2 + $0x380] sm:$0xff]  ;;  %v4888_v39 = vpack.c.bf16 %v2302_v32, %v2294_v43  ;;  %v2310_v41 = vld [vmem:[#allocation7 + $0x710] sm:$0xff]  ;;  %v5456_v12 = vld [vmem:[#allocation2 + $0x108] sm:$0xff]  ;;  %v6854_v3 = vshrl.u32 %v1182_v2, 7 }
 0x1c0   : > { %4885 = vmatpush1.bf16.msra.mxu1 %v4884_v44  ;;  %v2311_v9 = vld [vmem:[#allocation7 + $0x718] sm:$0xff]  ;;  %v2316_v35 = vld [vmem:[#allocation7 + $0x740] sm:$0xff]  ;;  %v2318_v45 = vld [vmem:[#allocation7 + $0x750] sm:$0xff] }
 0x1c1   : > { %4887 = vmatprep.subr.bf16.mxu1 %v4886_v26  ;;  %4761 = vmatpush1.bf16.msra.mxu0 %v4760_v31  ;;  %v2319_v50 = vld [vmem:[#allocation7 + $0x758] sm:$0xff]  ;;  %v4764_v61 = vpack.c.bf16 %v2316_v35, %v2308_v24  ;;  %v4892_v33 = vpack.c.bf16 %v2318_v45, %v2310_v41  ;;  %v2325_v49 = vld [vmem:[#allocation7 + $0x788] sm:$0xff]  ;;  %v2324_v13 = vld [vmem:[#allocation7 + $0x780] sm:$0xff]  ;;  %v6859_v2 = vsub.s32 %v6180_v5, %v6854_v3  ;;  %v2777_v24 = vadd.s32 4294967280, %v6180_v5 }
 0x1c2   : > { %1926 = vadd.xlane.f32.xlu1 %v5454_v59  ;;  %v4890_v42 = vpack.c.bf16 %v2319_v50, %v2311_v9  ;;  %v5457_v62 = vld [vmem:[#allocation2 + $0x100] sm:$0xff]  ;;  %4763 = vmatprep.subr.bf16.mxu0 %v4762_v29  ;;  %v2333_v1 = vld [vmem:[#allocation7 + $0x7c8] sm:$0xff]  ;;  %v2326_v51 = vld [vmem:[#allocation7 + $0x790] sm:$0xff]  ;;  %v6862_v31 = vsub.s32 %v2770_v19, %v6854_v3 }
 0x1c3   : > { %1924 = vadd.xlane.f32.xlu0 %v5455_v7  ;;  %v2327_v36 = vld [vmem:[#allocation7 + $0x798] sm:$0xff]  ;;  %v4766_v52 = vpack.c.bf16 %v2333_v1, %v2325_v49  ;;  %v2332_v55 = vld [vmem:[#allocation7 + $0x7c0] sm:$0xff]  ;;  %v2334_v48 = vld [vmem:[#allocation7 + $0x7d0] sm:$0xff] }
 0x1c4   : > { %4889 = vmatpush1.bf16.msra.mxu1 %v4888_v39  ;;  %v2335_v6 = vld [vmem:[#allocation7 + $0x7d8] sm:$0xff]  ;;  %v4768_v63 = vpack.c.bf16 %v2332_v55, %v2324_v13  ;;  %v5459_v44 = vld [vmem:[#allocation2 + $0x190] sm:$0xff]  ;;  %v4896_v14 = vpack.c.bf16 %v2334_v48, %v2326_v51  ;;  %v5461_v26 = vld [vmem:[#allocation2 + $0x308] sm:$0xff] }
 0x1c5   : > { %4891 = vmatprep.subr.bf16.mxu1 %v4890_v42  ;;  %4765 = vmatpush1.bf16.msra.mxu0 %v4764_v61  ;;  %v4894_v40 = vpack.c.bf16 %v2335_v6, %v2327_v36  ;;  %v5458_v10 = vld [vmem:[#allocation2 + $0x300] sm:$0xff]  ;;  %v5460_v38 = vld [vmem:[#allocation2 + $0x390] sm:$0xff]  ;;  %v5462_v29 = vld [vmem:[#allocation2 + $0x198] sm:$0xff]  ;;  %v6874_v36 = vsub.s32 %v2777_v24, %v6854_v3 }
 0x1c6   : > { %1766 = vadd.xlane.f32.xlu1 %v5456_v12  ;;  %4767 = vmatprep.subr.bf16.mxu0 %v4766_v52  ;;  %v5463_v50 = vld [vmem:[#allocation2 + $0x110] sm:$0xff]  ;;  %v5464_v49 = vld [vmem:[#allocation2 + $0x398] sm:$0xff]  ;;  %v5466_v48 = vld [vmem:[#allocation2 + $0x1a0] sm:$0xff] }
 0x1c7   : > { %1764 = vadd.xlane.f32.xlu0 %v5457_v62  ;;  %v1861_v20 = vpop.xlane.xlu1 %1860  ;;  %v1733_v15 = vpop.xlane.xlu0 %1732  ;;  %v5465_v1 = vld [vmem:[#allocation2 + $0x310] sm:$0xff]  ;;  %v5470_v24 = vld [vmem:[#allocation2 + $0x1a8] sm:$0xff] }
 0x1c8   : > { %4893 = vmatpush1.bf16.msra.mxu1 %v4892_v33  ;;  %v2036_v27 = vmul.f32 0.0052083335, %v1861_v20  ;;  %v1972_v25 = vmul.f32 0.0052083335, %v1733_v15 }
 0x1c9   : > { %4895 = vmatprep.subr.bf16.mxu1 %v4894_v40  ;;  %4769 = vmatpush1.bf16.msra.mxu0 %v4768_v63  ;;  %v2784_v40 = vadd.s32 4294967272, %v6180_v5 }
 0x1ca   : > { %1892 = vadd.xlane.f32.xlu1 %v5458_v10  ;;  %v3194_v39 = vrot.slane %v2036_v27, %v6859_v2  ;;  %v2878_v34 = vrot.slane %v1972_v25, %v6859_v2  ;;  %v5467_v10 = vld [vmem:[#allocation2 + $0x118] sm:$0xff] }
 0x1cb   : > { %1800 = vadd.xlane.f32.xlu0 %v5459_v44  ;;  %v1863_v43 = vpop.xlane.xlu1 %1862  ;;  %v1735_v32 = vpop.xlane.xlu0 %1734  ;;  %v6881_v27 = vsub.s32 %v2784_v40, %v6854_v3 }
 0x1cc   : > { %4897 = vmatpush1.bf16.msra.mxu1 %v4896_v14  ;;  %v2037_v59 = vmul.f32 0.0052083335, %v1863_v43  ;;  %v1973_v7 = vmul.f32 0.0052083335, %v1735_v32  ;;  %v5468_v43 = vld [vmem:[#allocation2 + $0x3a0] sm:$0xff]  ;;  %v5469_v32 = vld [vmem:[#allocation2 + $0x318] sm:$0xff] }
 0x1ce   : > { %1928 = vadd.xlane.f32.xlu1 %v5460_v38  ;;  %v3198_v57 = vrot.slane %v2037_v59, %v6862_v31  ;;  %v2882_v9 = vrot.slane %v1973_v7, %v6862_v31 }
 0x1cf   : > { %1894 = vadd.xlane.f32.xlu0 %v5461_v26  ;;  %v1703_v35 = vpop.xlane.xlu1 %1702  ;;  %v1701_v42 = vpop.xlane.xlu0 %1700 }
 0x1d0   : > { %v3199_v61 = vsel %vm2775_vm1, %v3198_v57, %v3194_v39  ;;  %v2883_v41 = vsel %vm2775_vm1, %v2882_v9, %v2878_v34  ;;  %v1957_v45 = vmul.f32 0.0052083335, %v1703_v35  ;;  %v1956_v12 = vmul.f32 0.0052083335, %v1701_v42  ;;  %v5471_v35 = vld [vmem:[#allocation2 + $0x120] sm:$0xff] }
 0x1d1   : > { %v2791_v42 = vadd.s32 4294967264, %v6180_v5 }
 0x1d2   : > { %1802 = vadd.xlane.f32.xlu1 %v5462_v29  ;;  %v2774_v62 = vrot.slane %v1957_v45, %v6862_v31  ;;  %v2769_v33 = vrot.slane %v1956_v12, %v6859_v2 }
 0x1d3   : > { %1768 = vadd.xlane.f32.xlu0 %v5463_v50  ;;  %v1829_v52 = vpop.xlane.xlu1 %1828  ;;  %v1737_v6 = vpop.xlane.xlu0 %1736 }
 0x1d4   : > { %v2776_v13 = vsel %vm2775_vm1, %v2774_v62, %v2769_v33  ;;  %v1974_v55 = vmul.f32 0.0052083335, %v1737_v6  ;;  %v2020_v63 = vmul.f32 0.0052083335, %v1829_v52  ;;  %v5472_v52 = vld [vmem:[#allocation2 + $0x3a8] sm:$0xff]  ;;  %v5473_v6 = vld [vmem:[#allocation2 + $0x320] sm:$0xff] }
 0x1d6   : > { %1930 = vadd.xlane.f32.xlu1 %v5464_v49  ;;  %v2887_v51 = vrot.slane %v1974_v55, %v6874_v36  ;;  %v3115_v25 = vrot.slane %v2020_v63, %v6859_v2  ;;  %v6896_v55 = vsub.s32 %v2791_v42, %v6854_v3 }
 0x1d7   : > { %1896 = vadd.xlane.f32.xlu0 %v5465_v1  ;;  %v1865_v44 = vpop.xlane.xlu1 %1864  ;;  %v1831_v19 = vpop.xlane.xlu0 %1830 }
 0x1d8   : > { %v2888_v14 = vsel %vm2782_vm2, %v2887_v51, %v2883_v41  ;;  %v2038_v20 = vmul.f32 0.0052083335, %v1865_v44  ;;  %v2021_v15 = vmul.f32 0.0052083335, %v1831_v19 }
 0x1da   : > { %1804 = vadd.xlane.f32.xlu1 %v5466_v48  ;;  %v3203_v38 = vrot.slane %v2038_v20, %v6874_v36  ;;  %v3119_v26 = vrot.slane %v2021_v15, %v6862_v31  ;;  %v5475_v20 = vld [vmem:[#allocation2 + $0x128] sm:$0xff]  ;;  %v2798_v15 = vadd.s32 4294967256, %v6180_v5 }
 0x1db   : > { %1770 = vadd.xlane.f32.xlu0 %v5467_v10  ;;  %v1739_v59 = vpop.xlane.xlu1 %1738  ;;  %v1705_v7 = vpop.xlane.xlu0 %1704 }
 0x1dc   : > { %v3204_v39 = vsel %vm2782_vm2, %v3203_v38, %v3199_v61  ;;  %v3120_v34 = vsel %vm2775_vm1, %v3119_v26, %v3115_v25  ;;  %v1975_v57 = vmul.f32 0.0052083335, %v1739_v59  ;;  %v1958_v9 = vmul.f32 0.0052083335, %v1705_v7 }
 0x1de   : > { %1932 = vadd.xlane.f32.xlu1 %v5468_v43  ;;  %v2892_v29 = vrot.slane %v1975_v57, %v6881_v27  ;;  %v2781_v50 = vrot.slane %v1958_v9, %v6874_v36  ;;  %v5477_v57 = vld [vmem:[#allocation2 + $0x328] sm:$0xff]  ;;  %v6908_v9 = vsub.s32 %v2798_v15, %v6854_v3 }
 0x1df   : > { %1898 = vadd.xlane.f32.xlu0 %v5469_v32  ;;  %v1867_v41 = vpop.xlane.xlu1 %1866  ;;  %v1833_v45 = vpop.xlane.xlu0 %1832 }
 0x1e0   : > { %v2893_v12 = vsel %vm2789_vm3, %v2892_v29, %v2888_v14  ;;  %v2783_v61 = vsel %vm2782_vm2, %v2781_v50, %v2776_v13  ;;  %v2039_v62 = vmul.f32 0.0052083335, %v1867_v41  ;;  %v2022_v33 = vmul.f32 0.0052083335, %v1833_v45  ;;  %v5474_v14 = vld [vmem:[#allocation2 + $0x1b0] sm:$0xff] }
 0x1e2   : > { %1806 = vadd.xlane.f32.xlu1 %v5470_v24  ;;  %v3208_v49 = vrot.slane %v2039_v62, %v6881_v27  ;;  %v3124_v1 = vrot.slane %v2022_v33, %v6874_v36  ;;  %v5479_v62 = vld [vmem:[#allocation2 + $0x130] sm:$0xff]  ;;  %v2805_v33 = vadd.s32 4294967248, %v6180_v5 }
 0x1e3   : > { %1772 = vadd.xlane.f32.xlu0 %v5471_v35  ;;  %v1741_v40 = vpop.xlane.xlu1 %1740  ;;  %v1707_v63 = vpop.xlane.xlu0 %1706 }
 0x1e4   : > { %v3209_v51 = vsel %vm2789_vm3, %v3208_v49, %v3204_v39  ;;  %v3125_v48 = vsel %vm2782_vm2, %v3124_v1, %v3120_v34  ;;  %v1976_v13 = vmul.f32 0.0052083335, %v1741_v40  ;;  %v1959_v10 = vmul.f32 0.0052083335, %v1707_v63  ;;  %v5476_v34 = vld [vmem:[#allocation2 + $0x3b0] sm:$0xff] }
 0x1e6   : > { %1934 = vadd.xlane.f32.xlu1 %v5472_v52  ;;  %v2897_v44 = vrot.slane %v1976_v13, %v6896_v55  ;;  %v2788_v19 = vrot.slane %v1959_v10, %v6881_v27  ;;  %v5480_v13 = vld [vmem:[#allocation2 + $0x3b8] sm:$0xff]  ;;  %v5481_v10 = vld [vmem:[#allocation2 + $0x330] sm:$0xff] }
 0x1e7   : > { %1900 = vadd.xlane.f32.xlu0 %v5473_v6  ;;  %v1869_v25 = vpop.xlane.xlu1 %1868  ;;  %v1835_v38 = vpop.xlane.xlu0 %1834 }
 0x1e8   : > { %v2898_v26 = vsel %vm2796_vm4, %v2897_v44, %v2893_v12  ;;  %v2790_v43 = vsel %vm2789_vm3, %v2788_v19, %v2783_v61  ;;  %v2040_v32 = vmul.f32 0.0052083335, %v1869_v25  ;;  %v2023_v59 = vmul.f32 0.0052083335, %v1835_v38  ;;  %v5478_v61 = vld [vmem:[#allocation2 + $0x1b8] sm:$0xff] }
 0x1e9   : > { %v6920_v44 = vsub.s32 %v2805_v33, %v6854_v3 }
 0x1ea   : > { %1808 = vadd.xlane.f32.xlu1 %v5474_v14  ;;  %v3213_v7 = vrot.slane %v2040_v32, %v6896_v55  ;;  %v3129_v39 = vrot.slane %v2023_v59, %v6881_v27  ;;  %v5482_v32 = vld [vmem:[#allocation2 + $0x1c0] sm:$0xff]  ;;  %v5483_v59 = vld [vmem:[#allocation2 + $0x138] sm:$0xff] }
 0x1eb   : > { %1774 = vadd.xlane.f32.xlu0 %v5475_v20  ;;  %v1743_v29 = vpop.xlane.xlu1 %1742  ;;  %v1709_v50 = vpop.xlane.xlu0 %1708 }
 0x1ec   : > { %v3214_v24 = vsel %vm2796_vm4, %v3213_v7, %v3209_v51  ;;  %v3130_v35 = vsel %vm2789_vm3, %v3129_v39, %v3125_v48  ;;  %v1977_v42 = vmul.f32 0.0052083335, %v1743_v29  ;;  %v1960_v41 = vmul.f32 0.0052083335, %v1709_v50 }
 0x1ee   : > { %1936 = vadd.xlane.f32.xlu1 %v5476_v34  ;;  %v2902_v45 = vrot.slane %v1977_v42, %v6908_v9  ;;  %v2795_v12 = vrot.slane %v1960_v41, %v6896_v55 }
 0x1ef   : > { %1902 = vadd.xlane.f32.xlu0 %v5477_v57  ;;  %v1871_v49 = vpop.xlane.xlu1 %1870  ;;  %v1837_v1 = vpop.xlane.xlu0 %1836 }
 0x1f0   : > { %v2903_v52 = vsel %vm2803_vm5, %v2902_v45, %v2898_v26  ;;  %v2797_v6 = vsel %vm2796_vm4, %v2795_v12, %v2790_v43  ;;  %v2041_v40 = vmul.f32 0.0052083335, %v1871_v49  ;;  %v2024_v63 = vmul.f32 0.0052083335, %v1837_v1  ;;  %v5486_v12 = vld [vmem:[#allocation2 + $0x1c8] sm:$0xff]  ;;  %v5489_v1 = vld [vmem:[#allocation2 + $0x340] sm:$0xff] }
 0x1f1   : > { %v5488_v49 = vld [vmem:[#allocation2 + $0x3c8] sm:$0xff] }
 0x1f2   : > { %1810 = vadd.xlane.f32.xlu1 %v5478_v61  ;;  %v3218_v51 = vrot.slane %v2041_v40, %v6908_v9  ;;  %v3134_v48 = vrot.slane %v2024_v63, %v6896_v55  ;;  %v5487_v61 = vld [vmem:[#allocation2 + $0x140] sm:$0xff]  ;;  %v5490_v40 = vld [vmem:[#allocation2 + $0x1d0] sm:$0xff]  ;;  %v5491_v63 = vld [vmem:[#allocation2 + $0x148] sm:$0xff] }
 0x1f3   : > { %1776 = vadd.xlane.f32.xlu0 %v5479_v62  ;;  %v1745_v19 = vpop.xlane.xlu1 %1744  ;;  %v1711_v14 = vpop.xlane.xlu0 %1710 }
 0x1f4   : > { %v6923_v20 = vsel %vm2803_vm5, %v3218_v51, %v3214_v24  ;;  %v3135_v15 = vsel %vm2796_vm4, %v3134_v48, %v3130_v35  ;;  %v1978_v25 = vmul.f32 0.0052083335, %v1745_v19  ;;  %v1961_v38 = vmul.f32 0.0052083335, %v1711_v14  ;;  %v5484_v24 = vld [vmem:[#allocation2 + $0x3c0] sm:$0xff]  ;;  %v5485_v35 = vld [vmem:[#allocation2 + $0x338] sm:$0xff] }
 0x1f5   : > { %v2341_v51 = vld [vmem:[#allocation7 + $0x808] sm:$0xff] }
 0x1f6   : > { %1938 = vadd.xlane.f32.xlu1 %v5480_v13  ;;  %v2907_v26 = vrot.slane %v1978_v25, %v6920_v44  ;;  %v2802_v43 = vrot.slane %v1961_v38, %v6908_v9  ;;  %v2349_v48 = vld [vmem:[#allocation7 + $0x848] sm:$0xff]  ;;  %v2343_v13 = vld [vmem:[#allocation7 + $0x818] sm:$0xff] }
 0x1f7   : > { %1904 = vadd.xlane.f32.xlu0 %v5481_v10  ;;  %v6928_v7 = vpop.xlane.xlu1 %1872  ;;  %v1839_v39 = vpop.xlane.xlu0 %1838  ;;  %v4770_v14 = vpack.c.bf16 %v2349_v48, %v2341_v51  ;;  %v5492_v38 = vld [vmem:[#allocation2 + $0x3d0] sm:$0xff]  ;;  %v2847_v48 = vadd.s32 4294967200, %v6180_v5 }
 0x1f8   : > { %v6931_v34 = vsel %vm2810_vm6, %v2907_v26, %v2903_v52  ;;  %v6934_v57 = vsel %vm2803_vm5, %v2802_v43, %v2797_v6  ;;  %v2025_v29 = vmul.f32 0.0052083335, %v1839_v39  ;;  %v5493_v26 = vld [vmem:[#allocation2 + $0x348] sm:$0xff]  ;;  %v5495_v39 = vld [vmem:[#allocation2 + $0x150] sm:$0xff] }
 0x1f9   : > { %4771 = vmatprep.subr.bf16.mxu0 %v4770_v14 }
 0x1fa   : > { %1812 = vadd.xlane.f32.xlu1 %v5482_v32  ;;  %v3139_v50 = vrot.slane %v2025_v29, %v6908_v9 }
 0x1fb   : > { %1778 = vadd.xlane.f32.xlu0 %v5483_v59  ;;  %v6937_v42 = vpop.xlane.xlu1 %1746  ;;  %v6939_v41 = vpop.xlane.xlu0 %1712  ;;  %v5494_v59 = vld [vmem:[#allocation2 + $0x1d8] sm:$0xff] }
 0x1fc   : > { %v6942_v45 = vsel %vm2803_vm5, %v3139_v50, %v3135_v15  ;;  %v2351_v15 = vld [vmem:[#allocation7 + $0x858] sm:$0xff]  ;;  %v1962_v51 = vmul.f32 0.0052083335, %v6939_v41 }
 0x1fd   : > { %v4898_v25 = vpack.c.bf16 %v2351_v15, %v2343_v13 }
 0x1fe   : > { %1940 = vadd.xlane.f32.xlu1 %v5484_v24 }
 0x1ff   : > { %1906 = vadd.xlane.f32.xlu0 %v5485_v35  ;;  %v6944_v62 = vpop.xlane.xlu1 %1874  ;;  %v6946_v33 = vpop.xlane.xlu0 %1840  ;;  %4899 = vmatprep.subr.bf16.mxu1 %v4898_v25 }
 0x200   : > { %v2026_v15 = vmul.f32 0.0052083335, %v6946_v33 }
 0x202   : > { %1814 = vadd.xlane.f32.xlu1 %v5486_v12 }
 0x203   : > { %1780 = vadd.xlane.f32.xlu0 %v5487_v61  ;;  %v6948_v52 = vpop.xlane.xlu1 %1748  ;;  %v6950_v6 = vpop.xlane.xlu0 %1714 }
 0x206   : > { %1942 = vadd.xlane.f32.xlu1 %v5488_v49 }
 0x207   : > { %1908 = vadd.xlane.f32.xlu0 %v5489_v1  ;;  %v6952_v10 = vpop.xlane.xlu1 %1876  ;;  %v6954_v19 = vpop.xlane.xlu0 %1842  ;;  %v2819_v1 = vadd.s32 4294967232, %v6180_v5 }
 0x209   : > { %v7016_v25 = vsub.s32 %v2819_v1, %v6854_v3 }
 0x20a   : > { %1816 = vadd.xlane.f32.xlu1 %v5490_v40  ;;  %v2826_v40 = vadd.s32 4294967224, %v6180_v5 }
 0x20b   : > { %1782 = vadd.xlane.f32.xlu0 %v5491_v63  ;;  %v6956_v43 = vpop.xlane.xlu1 %1750  ;;  %v6958_v32 = vpop.xlane.xlu0 %1716  ;;  %v1979_v63 = vmul.f32 0.0052083335, %v6937_v42  ;;  %v2854_v42 = vadd.s32 4294967192, %v6180_v5 }
 0x20e   : > { %1944 = vadd.xlane.f32.xlu1 %v5492_v38  ;;  %v2868_v38 = vadd.s32 4294967176, %v6180_v5 }
 0x20f   : > { %1910 = vadd.xlane.f32.xlu0 %v5493_v26  ;;  %v6960_v29 = vpop.xlane.xlu1 %1878  ;;  %v6962_v50 = vpop.xlane.xlu0 %1844 }
 0x212   : > { %1818 = vadd.xlane.f32.xlu1 %v5494_v59  ;;  %v1963_v59 = vmul.f32 0.0052083335, %v6950_v6  ;;  %v7041_v6 = vsub.s32 %v2854_v42, %v6854_v3 }
 0x213   : > { %1784 = vadd.xlane.f32.xlu0 %v5495_v39  ;;  %v6966_v24 = vpop.xlane.xlu1 %1752  ;;  %v6968_v35 = vpop.xlane.xlu0 %1718  ;;  %v2809_v39 = vrot.slane %v1962_v51, %v6920_v44  ;;  %v1981_v51 = vmul.f32 0.0052083335, %v6956_v43  ;;  %v2028_v43 = vmul.f32 0.0052083335, %v6962_v50 }
 0x216   : > { %1946 = vadd.xlane.f32.xlu1 %v6723_v8 }
 0x217   : > { %1912 = vadd.xlane.f32.xlu0 %v6725_v16  ;;  %v6972_v12 = vpop.xlane.xlu1 %1880  ;;  %v6974_v61 = vpop.xlane.xlu0 %1846 }
 0x21a   : > { %1820 = vadd.xlane.f32.xlu1 %v6737_v30 }
 0x21b   : > { %1786 = vadd.xlane.f32.xlu0 %v6739_v18  ;;  %v6978_v49 = vpop.xlane.xlu1 %1754  ;;  %v6980_v8 = vpop.xlane.xlu0 %1720  ;;  %v2812_v18 = vadd.s32 4294967240, %v6180_v5 }
 0x21e   : > { %1948 = vadd.xlane.f32.xlu1 %v6751_v54 }
 0x21f   : > { %1914 = vadd.xlane.f32.xlu0 %v6753_v60  ;;  %v6984_v16 = vpop.xlane.xlu1 %1882  ;;  %v6986_v30 = vpop.xlane.xlu0 %1848 }
 0x222   : > { %1822 = vadd.xlane.f32.xlu1 %v6765_v53  ;;  %v2042_v53 = vmul.f32 0.0052083335, %v6928_v7  ;;  %v2043_v7 = vmul.f32 0.0052083335, %v6944_v62  ;;  %v7022_v62 = vsub.s32 %v2826_v40, %v6854_v3  ;;  %v3144_v40 = vrot.slane %v2026_v15, %v6920_v44 }
 0x223   : > { %1788 = vadd.xlane.f32.xlu0 %v6767_v11  ;;  %v6991_v54 = vpop.xlane.xlu1 %1756  ;;  %v6993_v60 = vpop.xlane.xlu0 %1722  ;;  %v6998_v11 = vsub.s32 %v2812_v18, %v6854_v3  ;;  %v2045_v15 = vmul.f32 0.0052083335, %v6960_v29  ;;  %v1965_v29 = vmul.f32 0.0052083335, %v6968_v35  ;;  %v1983_v35 = vmul.f32 0.0052083335, %v6978_v49 }
 0x224   : > { %v3223_v41 = vrot.slane %v2042_v53, %v6920_v44 }
 0x225   : > { %v2912_v26 = vrot.slane %v1979_v63, %v6998_v11  ;;  %v3228_v18 = vrot.slane %v2043_v7, %v6998_v11  ;;  %v7058_v7 = vsub.s32 %v2868_v38, %v6854_v3  ;;  %v2816_v42 = vrot.slane %v1963_v59, %v6998_v11 }
 0x226   : > { %1950 = vadd.xlane.f32.xlu1 %v6779_v46  ;;  %v2833_v46 = vadd.s32 4294967216, %v6180_v5  ;;  %v2046_v38 = vmul.f32 0.0052083335, %v6972_v12  ;;  %v1966_v12 = vmul.f32 0.0052083335, %v6980_v8  ;;  %v2830_v49 = vrot.slane %v1965_v29, %v7022_v62 }
 0x227   : > { %1916 = vadd.xlane.f32.xlu0 %v6781_v28  ;;  %v2840_v28 = vadd.s32 4294967208, %v6180_v5  ;;  %v7009_v13 = vpop.xlane.xlu1 %1884  ;;  %v7011_v14 = vpop.xlane.xlu0 %1850 }
 0x228   : > { %v7028_v33 = vsub.s32 %v2833_v46, %v6854_v3  ;;  %v3224_v46 = vsel %vm2810_vm6, %v3223_v41, %v6923_v20  ;;  %v2811_v20 = vsel %vm2810_vm6, %v2809_v39, %v6934_v57  ;;  %v7079_v57 = vld [vmem:[#allocation7 + $0x800] sm:$0xff]  ;;  %v3238_v39 = vrot.slane %v2045_v15, %v7022_v62 }
 0x229   : > { %v7081_v41 = vld [vmem:[#allocation7 + $0x840] sm:$0xff] }
 0x22a   : > { %1824 = vadd.xlane.f32.xlu1 %v6793_v17  ;;  %v1980_v17 = vmul.f32 0.0052083335, %v6948_v52  ;;  %v7031_v52 = vsub.s32 %v2840_v28, %v6854_v3  ;;  %v2027_v28 = vmul.f32 0.0052083335, %v6954_v19  ;;  %v3229_v19 = vsel %vm2817_vm7, %v3228_v18, %v3224_v46 }
 0x22b   : > { %1790 = vadd.xlane.f32.xlu0 %v6795_v0  ;;  %v2861_v0 = vadd.s32 4294967184, %v6180_v5  ;;  %v7038_v5 = vsub.s32 %v2847_v48, %v6854_v3  ;;  %v7043_v1 = vpop.xlane.xlu1 %1758  ;;  %v7045_v53 = vpop.xlane.xlu0 %1724  ;;  %v2913_v48 = vsel %vm2817_vm7, %v2912_v26, %v6931_v34  ;;  %v2029_v26 = vmul.f32 0.0052083335, %v6974_v61 }
 0x22c   : > { %v3149_v50 = vrot.slane %v2027_v28, %v6998_v11  ;;  %v3154_v18 = vrot.slane %v2028_v43, %v7016_v25  ;;  %v3243_v8 = vrot.slane %v2046_v38, %v7028_v33  ;;  %v2932_v15 = vrot.slane %v1983_v35, %v7031_v52 }
 0x22d   : > { %v7051_v63 = vsub.s32 %v2861_v0, %v6854_v3  ;;  %v1967_v43 = vmul.f32 0.0052083335, %v6993_v60 }
 0x22e   : > { %1952 = vadd.xlane.f32.xlu1 %v6807_v22  ;;  %v2917_v22 = vrot.slane %v1980_v17, %v7016_v25  ;;  %v1982_v17 = vmul.f32 0.0052083335, %v6966_v24  ;;  %v2922_v24 = vrot.slane %v1981_v51, %v7022_v62 }
 0x22f   : > { %1918 = vadd.xlane.f32.xlu0 %v6809_v23  ;;  %v2044_v23 = vmul.f32 0.0052083335, %v6952_v10  ;;  %v1964_v10 = vmul.f32 0.0052083335, %v6958_v32  ;;  %v1887_v34 = vpop.xlane.xlu1 %1886  ;;  %v7072_v0 = vpop.xlane.xlu0 %1852  ;;  %v3145_v32 = vsel %vm2810_vm6, %v3144_v40, %v6942_v45  ;;  %v2818_v45 = vsel %vm2817_vm7, %v2816_v42, %v2811_v20 }
 0x230   : > { %v2927_v40 = vrot.slane %v1982_v17, %v7028_v33  ;;  %v3150_v28 = vsel %vm2817_vm7, %v3149_v50, %v3145_v32  ;;  %v1984_v20 = vmul.f32 0.0052083335, %v6991_v54  ;;  %v2031_v50 = vmul.f32 0.0052083335, %v7011_v14 }
 0x231   : > { %v2823_v59 = vrot.slane %v1964_v10, %v7016_v25 }
 0x232   : > { %1826 = vadd.xlane.f32.xlu1 %v6821_v4  ;;  %v2918_v4 = vsel %vm2824_vm8, %v2917_v22, %v2913_v48  ;;  %v3159_v48 = vrot.slane %v2029_v26, %v7022_v62  ;;  %v2937_v38 = vrot.slane %v1984_v20, %v7038_v5  ;;  %v1968_v26 = vmul.f32 0.0052083335, %v7045_v53 }
 0x233   : > { %1792 = vadd.xlane.f32.xlu0 %v6823_v47  ;;  %v3233_v47 = vrot.slane %v2044_v23, %v7016_v25  ;;  %v1761_v61 = vpop.xlane.xlu1 %1760  ;;  %v1727_v22 = vpop.xlane.xlu0 %1726  ;;  %v4772_v23 = vpack.c.bf16 %v7081_v41, %v7079_v57  ;;  %v2923_v51 = vsel %vm2831_vm9, %v2922_v24, %v2918_v4  ;;  %v2825_v42 = vsel %vm2824_vm8, %v2823_v59, %v2818_v45  ;;  %v2399_v57 = vld [vmem:[#allocation7 + $0x9d8] sm:$0xff] }
 0x234   : > { %v2832_v4 = vsel %vm2831_vm9, %v2830_v49, %v2825_v42  ;;  %v1985_v24 = vmul.f32 0.0052083335, %v7043_v1  ;;  %v2049_v45 = vmul.f32 0.0052083335, %v1887_v34  ;;  %v2844_v59 = vrot.slane %v1967_v43, %v7031_v52 }
 0x235   : > { %v3234_v46 = vsel %vm2824_vm8, %v3233_v47, %v3229_v19  ;;  %v2837_v19 = vrot.slane %v1966_v12, %v7028_v33  ;;  %v3169_v49 = vrot.slane %v2031_v50, %v7031_v52  ;;  %v2032_v34 = vmul.f32 0.0052083335, %v7072_v0 }
 0x236   : > { %1954 = vadd.xlane.f32.xlu1 %v6835_v56  ;;  %v2047_v56 = vmul.f32 0.0052083335, %v6984_v16  ;;  %v3239_v10 = vsel %vm2831_vm9, %v3238_v39, %v3234_v46  ;;  %v3155_v16 = vsel %vm2824_vm8, %v3154_v18, %v3150_v28  ;;  %v1986_v39 = vmul.f32 0.0052083335, %v1761_v61 }
 0x237   : > { %1920 = vadd.xlane.f32.xlu0 %v6837_v21  ;;  %v2030_v21 = vmul.f32 0.0052083335, %v6986_v30  ;;  %v2928_v30 = vsel %vm2838_vm10, %v2927_v40, %v2923_v51  ;;  %v1889_v17 = vpop.xlane.xlu1 %1888  ;;  %v1855_v32 = vpop.xlane.xlu0 %1854  ;;  %v3160_v29 = vsel %vm2831_vm9, %v3159_v48, %v3155_v16  ;;  %v2942_v53 = vrot.slane %v1985_v24, %v7041_v6 }
 0x238   : > { %v3248_v47 = vrot.slane %v2047_v56, %v7031_v52  ;;  %v2933_v60 = vsel %vm2845_vm11, %v2932_v15, %v2928_v30  ;;  %v2050_v35 = vmul.f32 0.0052083335, %v1889_v17  ;;  %v1969_v56 = vmul.f32 0.0052083335, %v1727_v22 }
 0x239   : > { %v3164_v54 = vrot.slane %v2030_v21, %v7028_v33  ;;  %v2938_v21 = vsel %vm2852_vm12, %v2937_v38, %v2933_v60  ;;  %v2851_v61 = vrot.slane %v1968_v26, %v7038_v5  ;;  %v3258_v28 = vrot.slane %v2049_v45, %v7041_v6 }
 0x23a   : > { %1922 = vadd.xlane.f32.xlu1 %v6847_v37  ;;  %v2048_v37 = vmul.f32 0.0052083335, %v7009_v13  ;;  %v2839_v13 = vsel %vm2838_vm10, %v2837_v19, %v2832_v4  ;;  %v2033_v51 = vmul.f32 0.0052083335, %v1855_v32  ;;  %v2947_v48 = vrot.slane %v1986_v39, %v7051_v63 }
 0x23b   : > { %1794 = vadd.xlane.f32.xlu0 %v6849_v58  ;;  %v3244_v58 = vsel %vm2838_vm10, %v3243_v8, %v3239_v10  ;;  %v1763_v18 = vpop.xlane.xlu1 %1762  ;;  %v1729_v40 = vpop.xlane.xlu0 %1728  ;;  %v3165_v1 = vsel %vm2838_vm10, %v3164_v54, %v3160_v29  ;;  %v2846_v8 = vsel %vm2845_vm11, %v2844_v59, %v2839_v13  ;;  %v3263_v42 = vrot.slane %v2050_v35, %v7051_v63  ;;  %v2350_v29 = vld [vmem:[#allocation7 + $0x850] sm:$0xff]  ;;  %v2357_v13 = vld [vmem:[#allocation7 + $0x888] sm:$0xff] }
 0x23c   : > { %v3249_v14 = vsel %vm2845_vm11, %v3248_v47, %v3244_v58  ;;  %v3253_v12 = vrot.slane %v2048_v37, %v7038_v5  ;;  %v1987_v46 = vmul.f32 0.0052083335, %v1763_v18  ;;  %v1970_v10 = vmul.f32 0.0052083335, %v1729_v40  ;;  %v2342_v58 = vld [vmem:[#allocation7 + $0x810] sm:$0xff]  ;;  %v2365_v59 = vld [vmem:[#allocation7 + $0x8c8] sm:$0xff] }
 0x23d   : > { %v3170_v19 = vsel %vm2845_vm11, %v3169_v49, %v3165_v1  ;;  %v2943_v43 = vsel %vm2859_vm13, %v2942_v53, %v2938_v21  ;;  %v3174_v17 = vrot.slane %v2032_v34, %v7038_v5  ;;  %v2858_v32 = vrot.slane %v1969_v56, %v7041_v6  ;;  %v2367_v1 = vld [vmem:[#allocation7 + $0x8d8] sm:$0xff] }
 0x23e   : > { %v3254_v16 = vsel %vm2852_vm12, %v3253_v12, %v3249_v14  ;;  %v2952_v0 = vrot.slane %v1987_v46, %v7058_v7  ;;  %v2853_v4 = vsel %vm2852_vm12, %v2851_v61, %v2846_v8  ;;  %v3179_v54 = vrot.slane %v2033_v51, %v7041_v6  ;;  %v2359_v14 = vld [vmem:[#allocation7 + $0x898] sm:$0xff]  ;;  %v2356_v61 = vld [vmem:[#allocation7 + $0x880] sm:$0xff] }
 0x23f   : > { %v3259_v47 = vsel %vm2859_vm13, %v3258_v28, %v3254_v16  ;;  %v2948_v50 = vsel %vm2866_vm14, %v2947_v48, %v2943_v43  ;;  %v2865_v60 = vrot.slane %v1970_v10, %v7051_v63  ;;  %v3175_v12 = vsel %vm2852_vm12, %v3174_v17, %v3170_v19  ;;  %v2366_v16 = vld [vmem:[#allocation7 + $0x8d0] sm:$0xff]  ;;  %v2373_v43 = vld [vmem:[#allocation7 + $0x908] sm:$0xff] }
 0x240   : > { %v3264_v24 = vsel %vm2866_vm14, %v3263_v42, %v3259_v47  ;;  %v2953_v18 = vsel %vm2873_vm15, %v2952_v0, %v2948_v50  ;;  %v2860_v46 = vsel %vm2859_vm13, %v2858_v32, %v2853_v4  ;;  %v4900_v53 = vpack.c.bf16 %v2350_v29, %v2342_v58  ;;  %v2381_v17 = vld [vmem:[#allocation7 + $0x948] sm:$0xff]  ;;  %v2375_v4 = vld [vmem:[#allocation7 + $0x918] sm:$0xff]  ;;  %v2372_v58 = vld [vmem:[#allocation7 + $0x900] sm:$0xff] }
 0x241   : > { %v1891_v15 = vpop.xlane.xlu1 %1890  ;;  %v1857_v20 = vpop.xlane.xlu0 %1856  ;;  %v3180_v34 = vsel %vm2859_vm13, %v3179_v54, %v3175_v12  ;;  %v2867_v28 = vsel %vm2866_vm14, %v2865_v60, %v2860_v46  ;;  %v4774_v42 = vpack.c.bf16 %v2365_v59, %v2357_v13  ;;  %v4902_v10 = vpack.c.bf16 %v2367_v1, %v2359_v14  ;;  %v2383_v47 = vld [vmem:[#allocation7 + $0x958] sm:$0xff]  ;;  %v2382_v13 = vld [vmem:[#allocation7 + $0x950] sm:$0xff]  ;;  %v2397_v14 = vld [vmem:[#allocation7 + $0x9c8] sm:$0xff] }
 0x242   : > { %v2051_v22 = vmul.f32 0.0052083335, %v1891_v15  ;;  %v2034_v30 = vmul.f32 0.0052083335, %v1857_v20  ;;  %v2364_v15 = vld [vmem:[#allocation7 + $0x8c0] sm:$0xff]  ;;  %v2358_v20 = vld [vmem:[#allocation7 + $0x890] sm:$0xff] }
 0x243   : > { %v4904_v60 = vpack.c.bf16 %v2366_v16, %v2358_v20  ;;  %v2391_v1 = vld [vmem:[#allocation7 + $0x998] sm:$0xff]  ;;  %v2413_v20 = vld [vmem:[#allocation7 + $0xa48] sm:$0xff] }
 0x244   : > { %v3268_v37 = vrot.slane %v2051_v22, %v7058_v7  ;;  %v3184_v38 = vrot.slane %v2034_v30, %v7051_v63  ;;  %v2407_v16 = vld [vmem:[#allocation7 + $0xa18] sm:$0xff] }
 0x246   : > { %v3269_v40 = vsel %vm2873_vm15, %v3268_v37, %v3264_v24  ;;  %v3185_v51 = vsel %vm2866_vm14, %v3184_v38, %v3180_v34  ;;  %v4776_v24 = vpack.c.bf16 %v2364_v15, %v2356_v61  ;;  %v4778_v38 = vpack.c.bf16 %v2381_v17, %v2373_v43  ;;  %v2396_v61 = vld [vmem:[#allocation7 + $0x9c0] sm:$0xff]  ;;  %v2405_v15 = vld [vmem:[#allocation7 + $0xa08] sm:$0xff] }
 0x247   : > { %v1859_v26 = vpop.xlane.xlu1 %1858  ;;  %v7160_v49 = vsel %vm3428_vm0, %v3269_v40, %v2953_v18  ;;  %v4906_v18 = vpack.c.bf16 %v2383_v47, %v2375_v4  ;;  %v2389_v40 = vld [vmem:[#allocation7 + $0x988] sm:$0xff]  ;;  %v2404_v47 = vld [vmem:[#allocation7 + $0xa00] sm:$0xff] }
 0x248   : > { %v1731_v45 = vpop.xlane.xlu0 %1730  ;;  %v2035_v39 = vmul.f32 0.0052083335, %v1859_v26  ;;  %3501 = vmatprep.mubr.f32.mxu0 %v7160_v49  ;;  %3643 = vmatprep.mubr.f32.mxu1 %v7160_v49  ;;  %v2380_v26 = vld [vmem:[#allocation7 + $0x940] sm:$0xff] }
 0x249   : > { %v1971_v35 = vmul.f32 0.0052083335, %v1731_v45  ;;  %v2374_v45 = vld [vmem:[#allocation7 + $0x910] sm:$0xff] }
 0x24a   : > { %v3189_v56 = vrot.slane %v2035_v39, %v7058_v7  ;;  %v4908_v34 = vpack.c.bf16 %v2382_v13, %v2374_v45  ;;  %v2423_v45 = vld [vmem:[#allocation7 + $0xa98] sm:$0xff] }
 0x24b   : > { %v2872_v21 = vrot.slane %v1971_v35, %v7058_v7  ;;  %v1799_v8 = vpop.xlane.xlu1 %1798  ;;  %v2431_v13 = vld [vmem:[#allocation7 + $0xad8] sm:$0xff] }
 0x24c   : > { %v1797_v48 = vpop.xlane.xlu0 %1796  ;;  %v2005_v0 = vmul.f32 0.0052083335, %v1799_v8  ;;  %v3190_v19 = vsel %vm2873_vm15, %v3189_v56, %v3185_v51  ;;  %v4782_v56 = vpack.c.bf16 %v2397_v14, %v2389_v40  ;;  %v2428_v40 = vld [vmem:[#allocation7 + $0xac0] sm:$0xff]  ;;  %v2422_v14 = vld [vmem:[#allocation7 + $0xa90] sm:$0xff] }
 0x24d   : > { %v2004_v22 = vmul.f32 0.0052083335, %v1797_v48  ;;  %v2874_v30 = vsel %vm2873_vm15, %v2872_v21, %v2867_v28  ;;  %v2388_v21 = vld [vmem:[#allocation7 + $0x980] sm:$0xff]  ;;  %v2390_v28 = vld [vmem:[#allocation7 + $0x990] sm:$0xff] }
 0x24e   : > { %v7172_v32 = vsel %vm3428_vm0, %v3190_v19, %v2874_v30  ;;  %v3040_v54 = vrot.slane %v2005_v0, %v6862_v31  ;;  %v2415_v0 = vld [vmem:[#allocation7 + $0xa58] sm:$0xff]  ;;  %v4784_v17 = vpack.c.bf16 %v2396_v61, %v2388_v21 }
 0x24f   : > { %v3036_v37 = vrot.slane %v2004_v22, %v6859_v2  ;;  %3502 = vmatmul.mubr.f32.vlgmr.msra.gmra.mrb[0].mxu0 %v7172_v32  ;;  %3644 = vmatmul.mubr.f32.vlgmr.msra.gmra.mrb[0].mxu1 %v7172_v32  ;;  %v1927_v29 = vpop.xlane.xlu1 %1926 }
 0x250   : > { %v1925_v50 = vpop.xlane.xlu0 %1924  ;;  %4773 = vmatpush1.bf16.msra.mxu0 %v4772_v23  ;;  %4901 = vmatpush1.bf16.msra.mxu1 %v4900_v53  ;;  %v2069_v39 = vmul.f32 0.0052083335, %v1927_v29  ;;  %v4780_v53 = vpack.c.bf16 %v2380_v26, %v2372_v58  ;;  %v2429_v26 = vld [vmem:[#allocation7 + $0xac8] sm:$0xff] }
 0x251   : > { %v7182_v59 = vsel %vm2775_vm1, %v3040_v54, %v3036_v37  ;;  %v2068_v35 = vmul.f32 0.0052083335, %v1925_v50  ;;  %4775 = vmatprep.subr.bf16.mxu0 %v4774_v42  ;;  %4903 = vmatprep.subr.bf16.mxu1 %v4902_v10  ;;  %v4910_v42 = vpack.c.bf16 %v2399_v57, %v2391_v1  ;;  %v2398_v10 = vld [vmem:[#allocation7 + $0x9d0] sm:$0xff]  ;;  %v2412_v54 = vld [vmem:[#allocation7 + $0xa40] sm:$0xff]  ;;  %v4786_v50 = vpack.c.bf16 %v2413_v20, %v2405_v15 }
 0x252   : > { %v3356_v41 = vrot.slane %v2069_v39, %v6862_v31  ;;  %v4912_v4 = vpack.c.bf16 %v2398_v10, %v2390_v28  ;;  %v2406_v37 = vld [vmem:[#allocation7 + $0xa10] sm:$0xff]  ;;  %v4918_v28 = vpack.c.bf16 %v2431_v13, %v2423_v45  ;;  %v2452_v45 = vld [vmem:[#allocation7 + $0xb80] sm:$0xff] }
 0x253   : > { %v3352_v23 = vrot.slane %v2068_v35, %v6859_v2  ;;  %v1767_v12 = vpop.xlane.xlu1 %1766  ;;  %v2460_v13 = vld [vmem:[#allocation7 + $0xbc0] sm:$0xff] }
 0x254   : > { %v1765_v46 = vpop.xlane.xlu0 %1764  ;;  %4777 = vmatpush1.bf16.msra.mxu0 %v4776_v24  ;;  %4905 = vmatpush1.bf16.msra.mxu1 %v4904_v60  ;;  %v1989_v8 = vmul.f32 0.0052083335, %v1767_v12  ;;  %v4914_v24 = vpack.c.bf16 %v2415_v0, %v2407_v16  ;;  %v2414_v60 = vld [vmem:[#allocation7 + $0xa50] sm:$0xff]  ;;  %v2436_v16 = vld [vmem:[#allocation7 + $0xb00] sm:$0xff] }
 0x255   : > { %v7187_v51 = vsel %vm2775_vm1, %v3356_v41, %v3352_v23  ;;  %v1988_v48 = vmul.f32 0.0052083335, %v1765_v46  ;;  %4779 = vmatprep.subr.bf16.mxu0 %v4778_v38  ;;  %4907 = vmatprep.subr.bf16.mxu1 %v4906_v18  ;;  %v2421_v38 = vld [vmem:[#allocation7 + $0xa88] sm:$0xff]  ;;  %v2420_v18 = vld [vmem:[#allocation7 + $0xa80] sm:$0xff]  ;;  %v4788_v41 = vpack.c.bf16 %v2412_v54, %v2404_v47  ;;  %v4916_v23 = vpack.c.bf16 %v2414_v60, %v2406_v37  ;;  %v2430_v46 = vld [vmem:[#allocation7 + $0xad0] sm:$0xff] }
 0x256   : > { %v2961_v22 = vrot.slane %v1989_v8, %v6862_v31  ;;  %v4790_v12 = vpack.c.bf16 %v2429_v26, %v2421_v38  ;;  %v2439_v8 = vld [vmem:[#allocation7 + $0xb18] sm:$0xff]  ;;  %v4792_v20 = vpack.c.bf16 %v2428_v40, %v2420_v18  ;;  %v2444_v0 = vld [vmem:[#allocation7 + $0xb40] sm:$0xff]  ;;  %v2453_v47 = vld [vmem:[#allocation7 + $0xb88] sm:$0xff] }
 0x257   : > { %v2957_v30 = vrot.slane %v1988_v48, %v6859_v2  ;;  %v1893_v19 = vpop.xlane.xlu1 %1892  ;;  %v2447_v48 = vld [vmem:[#allocation7 + $0xb58] sm:$0xff]  ;;  %v2461_v54 = vld [vmem:[#allocation7 + $0xbc8] sm:$0xff]  ;;  %v4796_v26 = vpack.c.bf16 %v2444_v0, %v2436_v16  ;;  %v2478_v0 = vld [vmem:[#allocation7 + $0xc50] sm:$0xff] }
 0x258   : > { %v1801_v43 = vpop.xlane.xlu0 %1800  ;;  %4781 = vmatpush1.bf16.msra.mxu0 %v4780_v53  ;;  %4909 = vmatpush1.bf16.msra.mxu1 %v4908_v34  ;;  %v2052_v39 = vmul.f32 0.0052083335, %v1893_v19  ;;  %v2437_v53 = vld [vmem:[#allocation7 + $0xb08] sm:$0xff]  ;;  %v4798_v40 = vpack.c.bf16 %v2461_v54, %v2453_v47 }
 0x259   : > { %v7192_v58 = vsel %vm2775_vm1, %v2961_v22, %v2957_v30  ;;  %v2006_v29 = vmul.f32 0.0052083335, %v1801_v43  ;;  %4783 = vmatprep.subr.bf16.mxu0 %v4782_v56  ;;  %4911 = vmatprep.subr.bf16.mxu1 %v4910_v42  ;;  %v2445_v34 = vld [vmem:[#allocation7 + $0xb48] sm:$0xff]  ;;  %v2438_v22 = vld [vmem:[#allocation7 + $0xb10] sm:$0xff] }
 0x25a   : > { %v3273_v42 = vrot.slane %v2052_v39, %v6859_v2  ;;  %v4794_v43 = vpack.c.bf16 %v2445_v34, %v2437_v53  ;;  %v2454_v39 = vld [vmem:[#allocation7 + $0xb90] sm:$0xff]  ;;  %v2471_v34 = vld [vmem:[#allocation7 + $0xc18] sm:$0xff] }
 0x25b   : > { %v3045_v35 = vrot.slane %v2006_v29, %v6874_v36  ;;  %v1929_v1 = vpop.xlane.xlu1 %1928 }
 0x25c   : > { %v1895_v57 = vpop.xlane.xlu0 %1894  ;;  %4785 = vmatpush1.bf16.msra.mxu0 %v4784_v17  ;;  %4913 = vmatpush1.bf16.msra.mxu1 %v4912_v4  ;;  %v2070_v21 = vmul.f32 0.0052083335, %v1929_v1  ;;  %v4922_v17 = vpack.c.bf16 %v2447_v48, %v2439_v8  ;;  %v2446_v4 = vld [vmem:[#allocation7 + $0xb50] sm:$0xff]  ;;  %v4800_v8 = vpack.c.bf16 %v2460_v13, %v2452_v45  ;;  %v2468_v48 = vld [vmem:[#allocation7 + $0xc00] sm:$0xff]  ;;  %v2501_v13 = vld [vmem:[#allocation7 + $0xd08] sm:$0xff] }
 0x25d   : > { %v3046_v56 = vsel %vm2782_vm2, %v3045_v35, %v7182_v59  ;;  %v2053_v61 = vmul.f32 0.0052083335, %v1895_v57  ;;  %4787 = vmatprep.subr.bf16.mxu0 %v4786_v50  ;;  %4915 = vmatprep.subr.bf16.mxu1 %v4914_v24  ;;  %v4920_v59 = vpack.c.bf16 %v2430_v46, %v2422_v14  ;;  %v2455_v50 = vld [vmem:[#allocation7 + $0xb98] sm:$0xff]  ;;  %v2462_v1 = vld [vmem:[#allocation7 + $0xbd0] sm:$0xff]  ;;  %v2469_v57 = vld [vmem:[#allocation7 + $0xc08] sm:$0xff] }
 0x25e   : > { %v3361_v10 = vrot.slane %v2070_v21, %v6874_v36  ;;  %v2463_v24 = vld [vmem:[#allocation7 + $0xbd8] sm:$0xff]  ;;  %v2494_v45 = vld [vmem:[#allocation7 + $0xcd0] sm:$0xff] }
 0x25f   : > { %v3277_v15 = vrot.slane %v2053_v61, %v6862_v31  ;;  %v1803_v30 = vpop.xlane.xlu1 %1802  ;;  %v4926_v14 = vpack.c.bf16 %v2463_v24, %v2455_v50  ;;  %v2479_v21 = vld [vmem:[#allocation7 + $0xc58] sm:$0xff]  ;;  %v2492_v50 = vld [vmem:[#allocation7 + $0xcc0] sm:$0xff]  ;;  %v2486_v24 = vld [vmem:[#allocation7 + $0xc90] sm:$0xff] }
 0x260   : > { %v1769_v19 = vpop.xlane.xlu0 %1768  ;;  %4789 = vmatpush1.bf16.msra.mxu0 %v4788_v41  ;;  %4917 = vmatpush1.bf16.msra.mxu1 %v4916_v23  ;;  %v3362_v2 = vsel %vm2782_vm2, %v3361_v10, %v7187_v51  ;;  %v2007_v31 = vmul.f32 0.0052083335, %v1803_v30  ;;  %v4924_v51 = vpack.c.bf16 %v2446_v4, %v2438_v22  ;;  %v2477_v41 = vld [vmem:[#allocation7 + $0xc48] sm:$0xff]  ;;  %v2470_v10 = vld [vmem:[#allocation7 + $0xc10] sm:$0xff]  ;;  %v4930_v16 = vpack.c.bf16 %v2479_v21, %v2471_v34  ;;  %v2495_v4 = vld [vmem:[#allocation7 + $0xcd8] sm:$0xff] }
 0x261   : > { %v3278_v37 = vsel %vm2775_vm1, %v3277_v15, %v3273_v42  ;;  %v1990_v29 = vmul.f32 0.0052083335, %v1769_v19  ;;  %4791 = vmatprep.subr.bf16.mxu0 %v4790_v12  ;;  %4919 = vmatprep.subr.bf16.mxu1 %v4918_v28  ;;  %v2476_v42 = vld [vmem:[#allocation7 + $0xc40] sm:$0xff]  ;;  %v2485_v22 = vld [vmem:[#allocation7 + $0xc88] sm:$0xff]  ;;  %v2502_v21 = vld [vmem:[#allocation7 + $0xd10] sm:$0xff]  ;;  %vm4453_vm1 = vcmask 0  }
 0x262   : > { %v3050_v60 = vrot.slane %v2007_v31, %v6881_v27  ;;  %v2493_v30 = vld [vmem:[#allocation7 + $0xcc8] sm:$0xff]  ;;  %v4804_v31 = vpack.c.bf16 %v2476_v42, %v2468_v48  ;;  %v2508_v34 = vld [vmem:[#allocation7 + $0xd40] sm:$0xff]  ;;  %v2510_v48 = vld [vmem:[#allocation7 + $0xd50] sm:$0xff] }
 0x263   : > { %v2966_v38 = vrot.slane %v1990_v29, %v6874_v36  ;;  %v1931_v35 = vpop.xlane.xlu1 %1930  ;;  %v2484_v29 = vld [vmem:[#allocation7 + $0xc80] sm:$0xff]  ;;  %v2517_v42 = vld [vmem:[#allocation7 + $0xd88] sm:$0xff] }
 0x264   : > { %v1897_v18 = vpop.xlane.xlu0 %1896  ;;  %4793 = vmatpush1.bf16.msra.mxu0 %v4792_v20  ;;  %4921 = vmatpush1.bf16.msra.mxu1 %v4920_v59  ;;  %v3051_v23 = vsel %vm2789_vm3, %v3050_v60, %v3046_v56  ;;  %v2071_v46 = vmul.f32 0.0052083335, %v1931_v35  ;;  %v4928_v56 = vpack.c.bf16 %v2462_v1, %v2454_v39  ;;  %v2509_v39 = vld [vmem:[#allocation7 + $0xd48] sm:$0xff]  ;;  %v2511_v1 = vld [vmem:[#allocation7 + $0xd58] sm:$0xff] }
 0x265   : > { %v2967_v12 = vsel %vm2782_vm2, %v2966_v38, %v7192_v58  ;;  %v2054_v53 = vmul.f32 0.0052083335, %v1897_v18  ;;  %4795 = vmatprep.subr.bf16.mxu0 %v4794_v43  ;;  %4923 = vmatprep.subr.bf16.mxu1 %v4922_v17  ;;  %v4802_v58 = vpack.c.bf16 %v2477_v41, %v2469_v57  ;;  %v2487_v17 = vld [vmem:[#allocation7 + $0xc98] sm:$0xff] }
 0x266   : > { %v3366_v61 = vrot.slane %v2071_v46, %v6881_v27  ;;  %v4808_v46 = vpack.c.bf16 %v2492_v50, %v2484_v29  ;;  %v2533_v29 = vld [vmem:[#allocation7 + $0xe08] sm:$0xff] }
 0x267   : > { %v3282_v28 = vrot.slane %v2054_v53, %v6874_v36  ;;  %v1805_v15 = vpop.xlane.xlu1 %1804  ;;  %v2500_v53 = vld [vmem:[#allocation7 + $0xd00] sm:$0xff]  ;;  %v2541_v50 = vld [vmem:[#allocation7 + $0xe48] sm:$0xff] }
 0x268   : > { %v1771_v20 = vpop.xlane.xlu0 %1770  ;;  %4797 = vmatpush1.bf16.msra.mxu0 %v4796_v26  ;;  %4925 = vmatpush1.bf16.msra.mxu1 %v4924_v51  ;;  %v3367_v19 = vsel %vm2789_vm3, %v3366_v61, %v3362_v2  ;;  %v2008_v43 = vmul.f32 0.0052083335, %v1805_v15  ;;  %v4932_v2 = vpack.c.bf16 %v2478_v0, %v2470_v10  ;;  %v4934_v26 = vpack.c.bf16 %v2495_v4, %v2487_v17  ;;  %v2525_v10 = vld [vmem:[#allocation7 + $0xdc8] sm:$0xff]  ;;  %v2518_v17 = vld [vmem:[#allocation7 + $0xd90] sm:$0xff] }
 0x269   : > { %v3283_v59 = vsel %vm2782_vm2, %v3282_v28, %v3278_v37  ;;  %v1991_v36 = vmul.f32 0.0052083335, %v1771_v20  ;;  %4799 = vmatprep.subr.bf16.mxu0 %v4798_v40  ;;  %4927 = vmatprep.subr.bf16.mxu1 %v4926_v14  ;;  %v4806_v37 = vpack.c.bf16 %v2493_v30, %v2485_v22  ;;  %v2503_v14 = vld [vmem:[#allocation7 + $0xd18] sm:$0xff]  ;;  %v4812_v30 = vpack.c.bf16 %v2508_v34, %v2500_v53 }
 0x26a   : > { %v3055_v47 = vrot.slane %v2008_v43, %v6896_v55  ;;  %v2516_v43 = vld [vmem:[#allocation7 + $0xd80] sm:$0xff] }
 0x26b   : > { %v2971_v54 = vrot.slane %v1991_v36, %v6881_v27  ;;  %v1933_v60 = vpop.xlane.xlu1 %1932  ;;  %v2524_v36 = vld [vmem:[#allocation7 + $0xdc0] sm:$0xff] }
 0x26c   : > { %v1899_v38 = vpop.xlane.xlu0 %1898  ;;  %4801 = vmatpush1.bf16.msra.mxu0 %v4800_v8  ;;  %4929 = vmatpush1.bf16.msra.mxu1 %v4928_v56  ;;  %v3056_v35 = vsel %vm2796_vm4, %v3055_v47, %v3051_v23  ;;  %v2072_v51 = vmul.f32 0.0052083335, %v1933_v60  ;;  %v4936_v23 = vpack.c.bf16 %v2494_v45, %v2486_v24  ;;  %v4938_v8 = vpack.c.bf16 %v2511_v1, %v2503_v14 }
 0x26d   : > { %v2972_v18 = vsel %vm2789_vm3, %v2971_v54, %v2967_v12  ;;  %v2055_v40 = vmul.f32 0.0052083335, %v1899_v38  ;;  %4803 = vmatprep.subr.bf16.mxu0 %v4802_v58  ;;  %4931 = vmatprep.subr.bf16.mxu1 %v4930_v16  ;;  %v4810_v12 = vpack.c.bf16 %v2509_v39, %v2501_v13  ;;  %v2519_v58 = vld [vmem:[#allocation7 + $0xd98] sm:$0xff]  ;;  %v4816_v39 = vpack.c.bf16 %v2524_v36, %v2516_v43  ;;  %v2550_v43 = vld [vmem:[#allocation7 + $0xe90] sm:$0xff] }
 0x26e   : > { %v3371_v57 = vrot.slane %v2072_v51, %v6896_v55  ;;  %v2527_v16 = vld [vmem:[#allocation7 + $0xdd8] sm:$0xff]  ;;  %v2532_v51 = vld [vmem:[#allocation7 + $0xe00] sm:$0xff]  ;;  %v2558_v36 = vld [vmem:[#allocation7 + $0xed0] sm:$0xff] }
 0x26f   : > { %v3287_v41 = vrot.slane %v2055_v40, %v6881_v27  ;;  %v1807_v61 = vpop.xlane.xlu1 %1806  ;;  %v4942_v54 = vpack.c.bf16 %v2527_v16, %v2519_v58  ;;  %v2556_v58 = vld [vmem:[#allocation7 + $0xec0] sm:$0xff] }
 0x270   : > { %v1773_v28 = vpop.xlane.xlu0 %1772  ;;  %4805 = vmatpush1.bf16.msra.mxu0 %v4804_v31  ;;  %4933 = vmatpush1.bf16.msra.mxu1 %v4932_v2  ;;  %v3372_v15 = vsel %vm2796_vm4, %v3371_v57, %v3367_v19  ;;  %v2009_v56 = vmul.f32 0.0052083335, %v1807_v61  ;;  %v4940_v19 = vpack.c.bf16 %v2510_v48, %v2502_v21  ;;  %v2526_v31 = vld [vmem:[#allocation7 + $0xdd0] sm:$0xff] }
 0x271   : > { %v3288_v20 = vsel %vm2789_vm3, %v3287_v41, %v3283_v59  ;;  %v1992_v27 = vmul.f32 0.0052083335, %v1773_v28  ;;  %4807 = vmatprep.subr.bf16.mxu0 %v4806_v37  ;;  %4935 = vmatprep.subr.bf16.mxu1 %v4934_v26  ;;  %v4814_v59 = vpack.c.bf16 %v2525_v10, %v2517_v42  ;;  %v2535_v37 = vld [vmem:[#allocation7 + $0xe18] sm:$0xff]  ;;  %v4944_v1 = vpack.c.bf16 %v2526_v31, %v2518_v17  ;;  %v2534_v41 = vld [vmem:[#allocation7 + $0xe10] sm:$0xff]  ;;  %v2557_v28 = vld [vmem:[#allocation7 + $0xec8] sm:$0xff] }
 0x272   : > { %v3060_v0 = vrot.slane %v2009_v56, %v6908_v9  ;;  %v2543_v26 = vld [vmem:[#allocation7 + $0xe58] sm:$0xff]  ;;  %v2565_v17 = vld [vmem:[#allocation7 + $0xf08] sm:$0xff] }
 0x273   : > { %v2976_v22 = vrot.slane %v1992_v27, %v6896_v55  ;;  %v1935_v4 = vpop.xlane.xlu1 %1934  ;;  %v4946_v57 = vpack.c.bf16 %v2543_v26, %v2535_v37  ;;  %v2548_v27 = vld [vmem:[#allocation7 + $0xe80] sm:$0xff]  ;;  %v2566_v26 = vld [vmem:[#allocation7 + $0xf10] sm:$0xff] }
 0x274   : > { %v1901_v47 = vpop.xlane.xlu0 %1900  ;;  %4809 = vmatpush1.bf16.msra.mxu0 %v4808_v46  ;;  %4937 = vmatpush1.bf16.msra.mxu1 %v4936_v23  ;;  %v3061_v24 = vsel %vm2803_vm5, %v3060_v0, %v3056_v35  ;;  %v2073_v38 = vmul.f32 0.0052083335, %v1935_v4  ;;  %v4818_v35 = vpack.c.bf16 %v2541_v50, %v2533_v29  ;;  %v2542_v46 = vld [vmem:[#allocation7 + $0xe50] sm:$0xff]  ;;  %v2551_v23 = vld [vmem:[#allocation7 + $0xe98] sm:$0xff]  ;;  %v2573_v4 = vld [vmem:[#allocation7 + $0xf48] sm:$0xff]  ;;  %v4824_v29 = vpack.c.bf16 %v2556_v58, %v2548_v27 }
 0x275   : > { %v2977_v60 = vsel %vm2796_vm4, %v2976_v22, %v2972_v18  ;;  %v2056_v2 = vmul.f32 0.0052083335, %v1901_v47  ;;  %4811 = vmatprep.subr.bf16.mxu0 %v4810_v12  ;;  %4939 = vmatprep.subr.bf16.mxu1 %v4938_v8  ;;  %v2540_v18 = vld [vmem:[#allocation7 + $0xe40] sm:$0xff]  ;;  %v2559_v12 = vld [vmem:[#allocation7 + $0xed8] sm:$0xff]  ;;  %v4948_v56 = vpack.c.bf16 %v2542_v46, %v2534_v41  ;;  %v4952_v50 = vpack.c.bf16 %v2558_v36, %v2550_v43 }
 0x276   : > { %v3376_v45 = vrot.slane %v2073_v38, %v6908_v9  ;;  %v2567_v47 = vld [vmem:[#allocation7 + $0xf18] sm:$0xff] }
 0x277   : > { %v3292_v13 = vrot.slane %v2056_v2, %v6896_v55  ;;  %v1809_v40 = vpop.xlane.xlu1 %1808  ;;  %v2549_v55 = vld [vmem:[#allocation7 + $0xe88] sm:$0xff]  ;;  %v4826_v2 = vpack.c.bf16 %v2573_v4, %v2565_v17 }
 0x278   : > { %v1775_v14 = vpop.xlane.xlu0 %1774  ;;  %4813 = vmatpush1.bf16.msra.mxu0 %v4812_v30  ;;  %4941 = vmatpush1.bf16.msra.mxu1 %v4940_v19  ;;  %v7227_v53 = vsel %vm2803_vm5, %v3376_v45, %v3372_v15  ;;  %v2010_v21 = vmul.f32 0.0052083335, %v1809_v40  ;;  %v4820_v15 = vpack.c.bf16 %v2540_v18, %v2532_v51  ;;  %v4950_v30 = vpack.c.bf16 %v2559_v12, %v2551_v23  ;;  %v2575_v19 = vld [vmem:[#allocation7 + $0xf58] sm:$0xff]  ;;  %v2574_v45 = vld [vmem:[#allocation7 + $0xf50] sm:$0xff]  ;;  %v2588_v18 = vld [vmem:[#allocation7 + $0xfc0] sm:$0xff] }
 0x279   : > { %v3293_v34 = vsel %vm2796_vm4, %v3292_v13, %v3288_v20  ;;  %v1993_v61 = vmul.f32 0.0052083335, %v1775_v14  ;;  %4815 = vmatprep.subr.bf16.mxu0 %v4814_v59  ;;  %4943 = vmatprep.subr.bf16.mxu1 %v4942_v54  ;;  %v4822_v20 = vpack.c.bf16 %v2557_v28, %v2549_v55  ;;  %v4954_v37 = vpack.c.bf16 %v2575_v19, %v2567_v47  ;;  %v2589_v13 = vld [vmem:[#allocation7 + $0xfc8] sm:$0xff]  ;;  %v2591_v51 = vld [vmem:[#allocation7 + $0xfd8] sm:$0xff] }
 0x27a   : > { %v3065_v8 = vrot.slane %v2010_v21, %v6920_v44  ;;  %v2590_v21 = vld [vmem:[#allocation7 + $0xfd0] sm:$0xff]  ;;  %v2097_v55 = vld [vmem:[#allocation7 + $0x68] sm:$0xff]  ;;  %v2091_v28 = vld [vmem:[#allocation7 + $0x38] sm:$0xff] }
 0x27b   : > { %v2981_v48 = vrot.slane %v1993_v61, %v6908_v9  ;;  %v7232_v42 = vpop.xlane.xlu1 %1936  ;;  %v2089_v61 = vld [vmem:[#allocation7 + $0x28] sm:$0xff]  ;;  %v2099_v23 = vld [vmem:[#allocation7 + $0x78] sm:$0xff] }
 0x27c   : > { %v1903_v10 = vpop.xlane.xlu0 %1902  ;;  %4817 = vmatpush1.bf16.msra.mxu0 %v4816_v39  ;;  %4945 = vmatpush1.bf16.msra.mxu1 %v4944_v1  ;;  %v7235_v16 = vsel %vm2810_vm6, %v3065_v8, %v3061_v24  ;;  %v2564_v24 = vld [vmem:[#allocation7 + $0xf00] sm:$0xff]  ;;  %v2583_v39 = vld [vmem:[#allocation7 + $0xf98] sm:$0xff] }
 0x27d   : > { %v7238_v0 = vsel %vm2803_vm5, %v2981_v48, %v2977_v60  ;;  %v2057_v22 = vmul.f32 0.0052083335, %v1903_v10  ;;  %4819 = vmatprep.subr.bf16.mxu0 %v4818_v35  ;;  %4947 = vmatprep.subr.bf16.mxu1 %v4946_v57  ;;  %v2572_v60 = vld [vmem:[#allocation7 + $0xf40] sm:$0xff]  ;;  %v4956_v35 = vpack.c.bf16 %v2574_v45, %v2566_v26  ;;  %v4958_v46 = vpack.c.bf16 %v2591_v51, %v2583_v39 }
 0x27e   : > { %v4828_v1 = vpack.c.bf16 %v2572_v60, %v2564_v24  ;;  %v2580_v57 = vld [vmem:[#allocation7 + $0xf80] sm:$0xff] }
 0x27f   : > { %v3297_v59 = vrot.slane %v2057_v22, %v6908_v9  ;;  %v7241_v54 = vpop.xlane.xlu1 %1810  ;;  %v2581_v9 = vld [vmem:[#allocation7 + $0xf88] sm:$0xff]  ;;  %v4832_v48 = vpack.c.bf16 %v2588_v18, %v2580_v57 }
 0x280   : > { %v7243_v31 = vpop.xlane.xlu0 %1776  ;;  %4821 = vmatpush1.bf16.msra.mxu0 %v4820_v15  ;;  %4949 = vmatpush1.bf16.msra.mxu1 %v4948_v56  ;;  %v4830_v41 = vpack.c.bf16 %v2589_v13, %v2581_v9  ;;  %v4962_v15 = vpack.c.bf16 %v2097_v55, %v2089_v61  ;;  %v5090_v56 = vpack.c.bf16 %v2099_v23, %v2091_v28 }
 0x281   : > { %v7246_v38 = vsel %vm2803_vm5, %v3297_v59, %v3293_v34  ;;  %4823 = vmatprep.subr.bf16.mxu0 %v4822_v20  ;;  %4951 = vmatprep.subr.bf16.mxu1 %v4950_v30  ;;  %v2582_v34 = vld [vmem:[#allocation7 + $0xf90] sm:$0xff]  ;;  %v1994_v26 = vmul.f32 0.0052083335, %v7243_v31 }
 0x282   : > { %v4960_v10 = vpack.c.bf16 %v2590_v21, %v2582_v34 }
 0x283   : > { %v1939_v40 = vpop.xlane.xlu1 %1938  ;;  %v2986_v57 = vrot.slane %v1994_v26, %v6920_v44 }
 0x284   : > { %v1905_v14 = vpop.xlane.xlu0 %1904  ;;  %4825 = vmatpush1.bf16.msra.mxu0 %v4824_v29  ;;  %4953 = vmatpush1.bf16.msra.mxu1 %v4952_v50  ;;  %v2075_v13 = vmul.f32 0.0052083335, %v1939_v40 }
 0x285   : > { %4827 = vmatprep.subr.bf16.mxu0 %v4826_v2  ;;  %4955 = vmatprep.subr.bf16.mxu1 %v4954_v37  ;;  %v2074_v2 = vmul.f32 0.0052083335, %v7232_v42  ;;  %v2011_v37 = vmul.f32 0.0052083335, %v7241_v54  ;;  %v2058_v39 = vmul.f32 0.0052083335, %v1905_v14  ;;  %v2987_v23 = vsel %vm2810_vm6, %v2986_v57, %v7238_v0 }
 0x286   : > { %v3386_v54 = vrot.slane %v2075_v13, %v6998_v11 }
 0x287   : > { %v1813_v12 = vpop.xlane.xlu1 %1812  ;;  %v3381_v51 = vrot.slane %v2074_v2, %v6920_v44  ;;  %v3302_v31 = vrot.slane %v2058_v39, %v6920_v44 }
 0x288   : > { %v1779_v8 = vpop.xlane.xlu0 %1778  ;;  %4829 = vmatpush1.bf16.msra.mxu0 %v4828_v1  ;;  %4957 = vmatpush1.bf16.msra.mxu1 %v4956_v35  ;;  %v3070_v1 = vrot.slane %v2011_v37, %v6998_v11  ;;  %v2012_v35 = vmul.f32 0.0052083335, %v1813_v12 }
 0x289   : > { %4831 = vmatprep.subr.bf16.mxu0 %v4830_v41  ;;  %4959 = vmatprep.subr.bf16.mxu1 %v4958_v46  ;;  %v1995_v18 = vmul.f32 0.0052083335, %v1779_v8  ;;  %v3382_v40 = vsel %vm2810_vm6, %v3381_v51, %v7227_v53 }
 0x28a   : > { %v3071_v21 = vsel %vm2817_vm7, %v3070_v1, %v7235_v16  ;;  %v3075_v61 = vrot.slane %v2012_v35, %v7016_v25  ;;  %v3387_v53 = vsel %vm2817_vm7, %v3386_v54, %v3382_v40 }
 0x28b   : > { %v1941_v20 = vpop.xlane.xlu1 %1940  ;;  %v2991_v12 = vrot.slane %v1995_v18, %v6998_v11 }
 0x28c   : > { %v1907_v27 = vpop.xlane.xlu0 %1906  ;;  %4833 = vmatpush1.bf16.msra.mxu0 %v4832_v48  ;;  %4961 = vmatpush1.bf16.msra.mxu1 %v4960_v10  ;;  %v2076_v46 = vmul.f32 0.0052083335, %v1941_v20 }
 0x28d   : > { %4963 = vmatprep.subr.bf16.mxu0 %v4962_v15  ;;  %5091 = vmatprep.subr.bf16.mxu1 %v5090_v56  ;;  %v2059_v14 = vmul.f32 0.0052083335, %v1907_v27  ;;  %v3303_v15 = vsel %vm2810_vm6, %v3302_v31, %v7246_v38  ;;  %v2992_v2 = vsel %vm2817_vm7, %v2991_v12, %v2987_v23 }
 0x28e   : > { %v3391_v16 = vrot.slane %v2076_v46, %v7016_v25 }
 0x28f   : > { %v1815_v58 = vpop.xlane.xlu1 %1814  ;;  %v3307_v20 = vrot.slane %v2059_v14, %v6998_v11 }
 0x290   : > { %v1781_v22 = vpop.xlane.xlu0 %1780  ;;  %v2013_v34 = vmul.f32 0.0052083335, %v1815_v58  ;;  %v3392_v13 = vsel %vm2824_vm8, %v3391_v16, %v3387_v53 }
 0x291   : > { %v1996_v55 = vmul.f32 0.0052083335, %v1781_v22  ;;  %v3076_v22 = vsel %vm2824_vm8, %v3075_v61, %v3071_v21  ;;  %v3308_v51 = vsel %vm2817_vm7, %v3307_v20, %v3303_v15 }
 0x292   : > { %v3080_v27 = vrot.slane %v2013_v34, %v7022_v62 }
 0x293   : > { %v1943_v30 = vpop.xlane.xlu1 %1942 }
 0x294   : > { %v1909_v43 = vpop.xlane.xlu0 %1908  ;;  %v2077_v28 = vmul.f32 0.0052083335, %v1943_v30  ;;  %v2996_v30 = vrot.slane %v1996_v55, %v7016_v25  ;;  %v3081_v1 = vsel %vm2831_vm9, %v3080_v27, %v3076_v22 }
 0x295   : > { %v2060_v8 = vmul.f32 0.0052083335, %v1909_v43 }
 0x296   : > { %v3396_v43 = vrot.slane %v2077_v28, %v7022_v62 }
 0x297   : > { %v1817_v36 = vpop.xlane.xlu1 %1816  ;;  %v3312_v38 = vrot.slane %v2060_v8, %v7016_v25  ;;  %v2997_v25 = vsel %vm2824_vm8, %v2996_v30, %v2992_v2 }
 0x298   : > { %v1783_v17 = vpop.xlane.xlu0 %1782  ;;  %v2014_v44 = vmul.f32 0.0052083335, %v1817_v36 }
 0x299   : > { %v1997_v56 = vmul.f32 0.0052083335, %v1783_v17  ;;  %v3313_v54 = vsel %vm2824_vm8, %v3312_v38, %v3308_v51 }
 0x29a   : > { %v3085_v37 = vrot.slane %v2014_v44, %v7028_v33 }
 0x29b   : > { %v1945_v4 = vpop.xlane.xlu1 %1944 }
 0x29c   : > { %v1911_v47 = vpop.xlane.xlu0 %1910  ;;  %v2078_v58 = vmul.f32 0.0052083335, %v1945_v4  ;;  %v3001_v4 = vrot.slane %v1997_v56, %v7022_v62 }
 0x29d   : > { %v2061_v0 = vmul.f32 0.0052083335, %v1911_v47 }
 0x29e   : > { %v3002_v14 = vsel %vm2831_vm9, %v3001_v4, %v2997_v25 }
 0x29f   : > { %v1819_v19 = vpop.xlane.xlu1 %1818  ;;  %v3317_v35 = vrot.slane %v2061_v0, %v7022_v62 }
 0x2a0   : > { %v1785_v59 = vpop.xlane.xlu0 %1784  ;;  %v2015_v36 = vmul.f32 0.0052083335, %v1819_v19  ;;  %v3401_v19 = vrot.slane %v2078_v58, %v7028_v33 }
 0x2a1   : > { %v1998_v17 = vmul.f32 0.0052083335, %v1785_v59  ;;  %v3397_v59 = vsel %vm2831_vm9, %v3396_v43, %v3392_v13  ;;  %v3318_v61 = vsel %vm2831_vm9, %v3317_v35, %v3313_v54 }
 0x2a2   : > { %v3090_v57 = vrot.slane %v2015_v36, %v7031_v52 }
 0x2a3   : > { %v1947_v29 = vpop.xlane.xlu1 %1946 }
 0x2a4   : > { %v1913_v50 = vpop.xlane.xlu0 %1912  ;;  %v2079_v47 = vmul.f32 0.0052083335, %v1947_v29  ;;  %v3086_v29 = vsel %vm2838_vm10, %v3085_v37, %v3081_v1 }
 0x2a5   : > { %v2062_v39 = vmul.f32 0.0052083335, %v1913_v50  ;;  %v3006_v50 = vrot.slane %v1998_v17, %v7028_v33  ;;  %v3091_v23 = vsel %vm2845_vm11, %v3090_v57, %v3086_v29 }
 0x2a6   : > { %v3406_v62 = vrot.slane %v2079_v47, %v7031_v52 }
 0x2a7   : > { %v1821_v24 = vpop.xlane.xlu1 %1820  ;;  %v3322_v34 = vrot.slane %v2062_v39, %v7028_v33  ;;  %v3007_v44 = vsel %vm2838_vm10, %v3006_v50, %v3002_v14  ;;  %v2088_v50 = vld [vmem:[#allocation7 + $0x20] sm:$0xff] }
 0x2a8   : > { %v7248_v60 = vpop.xlane.xlu0 %1786  ;;  %v2016_v18 = vmul.f32 0.0052083335, %v1821_v24  ;;  %v3402_v24 = vsel %vm2838_vm10, %v3401_v19, %v3397_v59 }
 0x2a9   : > { %v1999_v31 = vmul.f32 0.0052083335, %v7248_v60  ;;  %v3407_v56 = vsel %vm2845_vm11, %v3406_v62, %v3402_v24  ;;  %v2090_v62 = vld [vmem:[#allocation7 + $0x30] sm:$0xff] }
 0x2aa   : > { %v3095_v60 = vrot.slane %v2016_v18, %v7038_v5 }
 0x2ab   : > { %v7253_v45 = vpop.xlane.xlu1 %1948  ;;  %v3011_v33 = vrot.slane %v1999_v31, %v7031_v52  ;;  %v2096_v31 = vld [vmem:[#allocation7 + $0x60] sm:$0xff] }
 0x2ac   : > { %v7255_v9 = vpop.xlane.xlu0 %1914  ;;  %v2080_v21 = vmul.f32 0.0052083335, %v7253_v45  ;;  %v3096_v0 = vsel %vm2852_vm12, %v3095_v60, %v3091_v23  ;;  %v2113_v60 = vld [vmem:[#allocation7 + $0xe8] sm:$0xff] }
 0x2ad   : > { %v2063_v55 = vmul.f32 0.0052083335, %v7255_v9  ;;  %v3323_v9 = vsel %vm2838_vm10, %v3322_v34, %v3318_v61  ;;  %v3012_v36 = vsel %vm2845_vm11, %v3011_v33, %v3007_v44  ;;  %v2098_v34 = vld [vmem:[#allocation7 + $0x70] sm:$0xff] }
 0x2af   : > { %v1823_v41 = vpop.xlane.xlu1 %1822  ;;  %v3327_v27 = vrot.slane %v2063_v55, %v7031_v52 }
 0x2b0   : > { %v7260_v42 = vpop.xlane.xlu0 %1788  ;;  %v2017_v28 = vmul.f32 0.0052083335, %v1823_v41  ;;  %v3411_v41 = vrot.slane %v2080_v21, %v7038_v5 }
 0x2b1   : > { %v2000_v12 = vmul.f32 0.0052083335, %v7260_v42  ;;  %v3328_v4 = vsel %vm2845_vm11, %v3327_v27, %v3323_v9 }
 0x2b2   : > { %v3100_v42 = vrot.slane %v2017_v28, %v7041_v6 }
 0x2b3   : > { %v1951_v48 = vpop.xlane.xlu1 %1950  ;;  %v3016_v22 = vrot.slane %v2000_v12, %v7038_v5  ;;  %v2107_v12 = vld [vmem:[#allocation7 + $0xb8] sm:$0xff] }
 0x2b4   : > { %v1917_v10 = vpop.xlane.xlu0 %1916  ;;  %v2081_v8 = vmul.f32 0.0052083335, %v1951_v48  ;;  %v3101_v47 = vsel %vm2859_vm13, %v3100_v42, %v3096_v0  ;;  %v2123_v0 = vld [vmem:[#allocation7 + $0x138] sm:$0xff] }
 0x2b5   : > { %v2064_v48 = vmul.f32 0.0052083335, %v1917_v10  ;;  %v3017_v1 = vsel %vm2852_vm12, %v3016_v22, %v3012_v36  ;;  %v2131_v22 = vld [vmem:[#allocation7 + $0x178] sm:$0xff]  ;;  %v2120_v36 = vld [vmem:[#allocation7 + $0x120] sm:$0xff] }
 0x2b6   : > { %v3416_v30 = vrot.slane %v2081_v8, %v7041_v6  ;;  %v2115_v8 = vld [vmem:[#allocation7 + $0xf8] sm:$0xff] }
 0x2b7   : > { %v1825_v26 = vpop.xlane.xlu1 %1824  ;;  %v3332_v39 = vrot.slane %v2064_v48, %v7038_v5  ;;  %v5094_v48 = vpack.c.bf16 %v2115_v8, %v2107_v12  ;;  %v2170_v12 = vld [vmem:[#allocation7 + $0x2b0] sm:$0xff] }
 0x2b8   : > { %v1791_v11 = vpop.xlane.xlu0 %1790  ;;  %v2018_v53 = vmul.f32 0.0052083335, %v1825_v26  ;;  %v3412_v26 = vsel %vm2852_vm12, %v3411_v41, %v3407_v56  ;;  %v2114_v41 = vld [vmem:[#allocation7 + $0xf0] sm:$0xff] }
 0x2b9   : > { %v2001_v58 = vmul.f32 0.0052083335, %v1791_v11  ;;  %v3417_v19 = vsel %vm2859_vm13, %v3416_v30, %v3412_v26  ;;  %v3333_v21 = vsel %vm2852_vm12, %v3332_v39, %v3328_v4  ;;  %v2137_v26 = vld [vmem:[#allocation7 + $0x1a8] sm:$0xff]  ;;  %v2136_v39 = vld [vmem:[#allocation7 + $0x1a0] sm:$0xff]  ;;  %v2178_v8 = vld [vmem:[#allocation7 + $0x2f0] sm:$0xff] }
 0x2ba   : > { %v3105_v2 = vrot.slane %v2018_v53, %v7051_v63  ;;  %v4964_v53 = vpack.c.bf16 %v2096_v31, %v2088_v50  ;;  %v2160_v50 = vld [vmem:[#allocation7 + $0x260] sm:$0xff] }
 0x2bb   : > { %v1953_v46 = vpop.xlane.xlu1 %1952  ;;  %v3021_v51 = vrot.slane %v2001_v58, %v7041_v6  ;;  %v2129_v58 = vld [vmem:[#allocation7 + $0x168] sm:$0xff] }
 0x2bc   : > { %v1919_v40 = vpop.xlane.xlu0 %1918  ;;  %v2082_v45 = vmul.f32 0.0052083335, %v1953_v46  ;;  %v3106_v59 = vsel %vm2866_vm14, %v3105_v2, %v3101_v47  ;;  %v2128_v2 = vld [vmem:[#allocation7 + $0x160] sm:$0xff] }
 0x2bd   : > { %v2065_v43 = vmul.f32 0.0052083335, %v1919_v40  ;;  %v3022_v24 = vsel %vm2859_vm13, %v3021_v51, %v3017_v1  ;;  %v4972_v4 = vpack.c.bf16 %v2128_v2, %v2120_v36  ;;  %v2144_v51 = vld [vmem:[#allocation7 + $0x1e0] sm:$0xff] }
 0x2be   : > { %v3421_v38 = vrot.slane %v2082_v45, %v7051_v63  ;;  %v5092_v45 = vpack.c.bf16 %v2098_v34, %v2090_v62  ;;  %v2177_v62 = vld [vmem:[#allocation7 + $0x2e8] sm:$0xff]  ;;  %v2171_v34 = vld [vmem:[#allocation7 + $0x2b8] sm:$0xff]  ;;  %v2200_v36 = vld [vmem:[#allocation7 + $0x3a0] sm:$0xff] }
 0x2bf   : > { %v1827_v15 = vpop.xlane.xlu1 %1826  ;;  %v3337_v35 = vrot.slane %v2065_v43, %v7041_v6  ;;  %v2208_v2 = vld [vmem:[#allocation7 + $0x3e0] sm:$0xff] }
 0x2c0   : > { %v1793_v16 = vpop.xlane.xlu0 %1792  ;;  %v2019_v20 = vmul.f32 0.0052083335, %v1827_v15  ;;  %v3422_v57 = vsel %vm2866_vm14, %v3421_v38, %v3417_v19  ;;  %v2104_v15 = vld [vmem:[#allocation7 + $0xa0] sm:$0xff]  ;;  %v2138_v19 = vld [vmem:[#allocation7 + $0x1b0] sm:$0xff] }
 0x2c1   : > { %v2002_v37 = vmul.f32 0.0052083335, %v1793_v16  ;;  %v3338_v55 = vsel %vm2859_vm13, %v3337_v35, %v3333_v21  ;;  %v2112_v16 = vld [vmem:[#allocation7 + $0xe0] sm:$0xff]  ;;  %v2146_v35 = vld [vmem:[#allocation7 + $0x1f0] sm:$0xff]  ;;  %v2179_v21 = vld [vmem:[#allocation7 + $0x2f8] sm:$0xff] }
 0x2c2   : > { %v3110_v10 = vrot.slane %v2019_v20, %v7058_v7  ;;  %v2121_v20 = vld [vmem:[#allocation7 + $0x128] sm:$0xff]  ;;  %v4968_v30 = vpack.c.bf16 %v2112_v16, %v2104_v15  ;;  %v5112_v16 = vpack.c.bf16 %v2178_v8, %v2170_v12  ;;  %v2250_v12 = vld [vmem:[#allocation7 + $0x530] sm:$0xff] }
 0x2c3   : > { %v1955_v17 = vpop.xlane.xlu1 %1954  ;;  %v3026_v18 = vrot.slane %v2002_v37, %v7051_v63  ;;  %v4970_v38 = vpack.c.bf16 %v2129_v58, %v2121_v20  ;;  %v5098_v37 = vpack.c.bf16 %v2131_v22, %v2123_v0  ;;  %v2186_v20 = vld [vmem:[#allocation7 + $0x330] sm:$0xff]  ;;  %v2209_v58 = vld [vmem:[#allocation7 + $0x3e8] sm:$0xff]  ;;  %v2203_v0 = vld [vmem:[#allocation7 + $0x3b8] sm:$0xff] }
 0x2c4   : > { %v1921_v52 = vpop.xlane.xlu0 %1920  ;;  %v2083_v11 = vmul.f32 0.0052083335, %v1955_v17  ;;  %v3111_v14 = vsel %vm2873_vm15, %v3110_v10, %v3106_v59  ;;  %v2122_v17 = vld [vmem:[#allocation7 + $0x130] sm:$0xff]  ;;  %v2145_v10 = vld [vmem:[#allocation7 + $0x1e8] sm:$0xff]  ;;  %v2211_v22 = vld [vmem:[#allocation7 + $0x3f8] sm:$0xff] }
 0x2c5   : > { %v2066_v13 = vmul.f32 0.0052083335, %v1921_v52  ;;  %v3027_v44 = vsel %vm2866_vm14, %v3026_v18, %v3022_v24  ;;  %v2130_v52 = vld [vmem:[#allocation7 + $0x170] sm:$0xff]  ;;  %v4974_v1 = vpack.c.bf16 %v2145_v10, %v2137_v26  ;;  %v2161_v59 = vld [vmem:[#allocation7 + $0x268] sm:$0xff]  ;;  %v2163_v18 = vld [vmem:[#allocation7 + $0x278] sm:$0xff] }
 0x2c6   : > { %v3426_v25 = vrot.slane %v2083_v11, %v7058_v7  ;;  %v2139_v11 = vld [vmem:[#allocation7 + $0x1b8] sm:$0xff]  ;;  %v5100_v47 = vpack.c.bf16 %v2130_v52, %v2122_v17  ;;  %v2202_v17 = vld [vmem:[#allocation7 + $0x3b0] sm:$0xff]  ;;  %v2217_v26 = vld [vmem:[#allocation7 + $0x428] sm:$0xff] }
 0x2c7   : > { %v3342_v54 = vrot.slane %v2066_v13, %v7051_v63  ;;  %v1923_v29 = vpop.xlane.xlu1 %1922  ;;  %v2105_v63 = vld [vmem:[#allocation7 + $0xa8] sm:$0xff]  ;;  %v2147_v13 = vld [vmem:[#allocation7 + $0x1f8] sm:$0xff]  ;;  %v2210_v52 = vld [vmem:[#allocation7 + $0x3f0] sm:$0xff] }
 0x2c8   : > { %v1795_v5 = vpop.xlane.xlu0 %1794  ;;  %v2067_v46 = vmul.f32 0.0052083335, %v1923_v29  ;;  %v3427_v6 = vsel %vm2873_vm15, %v3426_v25, %v3422_v57  ;;  %v4966_v42 = vpack.c.bf16 %v2113_v60, %v2105_v63  ;;  %v2153_v25 = vld [vmem:[#allocation7 + $0x228] sm:$0xff]  ;;  %v2155_v57 = vld [vmem:[#allocation7 + $0x238] sm:$0xff]  ;;  %v5104_v29 = vpack.c.bf16 %v2146_v35, %v2138_v19  ;;  %v2218_v19 = vld [vmem:[#allocation7 + $0x430] sm:$0xff] }
 0x2c9   : > { %v2003_v40 = vmul.f32 0.0052083335, %v1795_v5  ;;  %v7339_v61 = vsel %vm3428_vm0, %v3427_v6, %v3111_v14  ;;  %v3343_v33 = vsel %vm2866_vm14, %v3342_v54, %v3338_v55  ;;  %v4976_v54 = vpack.c.bf16 %v2144_v51, %v2136_v39  ;;  %v2152_v5 = vld [vmem:[#allocation7 + $0x220] sm:$0xff]  ;;  %v2162_v14 = vld [vmem:[#allocation7 + $0x270] sm:$0xff]  ;;  %v2169_v6 = vld [vmem:[#allocation7 + $0x2a8] sm:$0xff] }
 0x2ca   : > { %v3347_v28 = vrot.slane %v2067_v46, %v7058_v7  ;;  %3572 = vmatprep.mubr.f32.mxu0 %v7339_v61  ;;  %3714 = vmatprep.mubr.f32.mxu1 %v7339_v61  ;;  %v4978_v31 = vpack.c.bf16 %v2161_v59, %v2153_v25  ;;  %v5106_v46 = vpack.c.bf16 %v2163_v18, %v2155_v57  ;;  %v2168_v55 = vld [vmem:[#allocation7 + $0x2a0] sm:$0xff]  ;;  %v2225_v10 = vld [vmem:[#allocation7 + $0x468] sm:$0xff]  ;;  %v2226_v35 = vld [vmem:[#allocation7 + $0x470] sm:$0xff] }
 0x2cb   : > { %v3031_v23 = vrot.slane %v2003_v40, %v7058_v7  ;;  %v2106_v7 = vld [vmem:[#allocation7 + $0xb0] sm:$0xff]  ;;  %v4980_v24 = vpack.c.bf16 %v2160_v50, %v2152_v5  ;;  %v5110_v60 = vpack.c.bf16 %v2179_v21, %v2171_v34  ;;  %v2216_v39 = vld [vmem:[#allocation7 + $0x420] sm:$0xff]  ;;  %v2233_v25 = vld [vmem:[#allocation7 + $0x4a8] sm:$0xff] }
 0x2cc   : > { %v3348_v9 = vsel %vm2873_vm15, %v3347_v28, %v3343_v33  ;;  %v5096_v43 = vpack.c.bf16 %v2114_v41, %v2106_v7  ;;  %v2154_v40 = vld [vmem:[#allocation7 + $0x230] sm:$0xff]  ;;  %v2176_v28 = vld [vmem:[#allocation7 + $0x2e0] sm:$0xff]  ;;  %v2193_v33 = vld [vmem:[#allocation7 + $0x368] sm:$0xff] }
 0x2cd   : > { %v3032_v56 = vsel %vm2873_vm15, %v3031_v23, %v3027_v44  ;;  %v5108_v63 = vpack.c.bf16 %v2162_v14, %v2154_v40  ;;  %v4982_v23 = vpack.c.bf16 %v2177_v62, %v2169_v6  ;;  %v2185_v44 = vld [vmem:[#allocation7 + $0x328] sm:$0xff]  ;;  %v4984_v15 = vpack.c.bf16 %v2176_v28, %v2168_v55  ;;  %v2224_v51 = vld [vmem:[#allocation7 + $0x460] sm:$0xff]  ;;  %v2235_v57 = vld [vmem:[#allocation7 + $0x4b8] sm:$0xff] }
 0x2ce   : > { %v7351_v27 = vsel %vm3428_vm0, %v3348_v9, %v3032_v56  ;;  %v2184_v56 = vld [vmem:[#allocation7 + $0x320] sm:$0xff]  ;;  %v4986_v7 = vpack.c.bf16 %v2193_v33, %v2185_v44  ;;  %v2241_v59 = vld [vmem:[#allocation7 + $0x4e8] sm:$0xff]  ;;  %v2243_v18 = vld [vmem:[#allocation7 + $0x4f8] sm:$0xff] }
 0x2cf   : > { %3573 = vmatmul.mubr.f32.vlgmr.msra.gmra.mrb[0].mxu0 %v7351_v27  ;;  %3715 = vmatmul.mubr.f32.vlgmr.msra.gmra.mrb[0].mxu1 %v7351_v27  ;;  %v2192_v9 = vld [vmem:[#allocation7 + $0x360] sm:$0xff]  ;;  %v2234_v40 = vld [vmem:[#allocation7 + $0x4b0] sm:$0xff]  ;;  %v2249_v6 = vld [vmem:[#allocation7 + $0x528] sm:$0xff] }
 0x2d0   : > { %4965 = vmatpush1.bf16.msra.mxu0 %v4964_v53  ;;  %5093 = vmatpush1.bf16.msra.mxu1 %v5092_v45  ;;  %v2187_v53 = vld [vmem:[#allocation7 + $0x338] sm:$0xff]  ;;  %v2232_v5 = vld [vmem:[#allocation7 + $0x4a0] sm:$0xff]  ;;  %v2242_v14 = vld [vmem:[#allocation7 + $0x4f0] sm:$0xff] }
 0x2d1   : > { %3785 = vmatprep.mubr.f32.mxu0 %v7160_v49  ;;  %3927 = vmatprep.mubr.f32.mxu1 %v7160_v49  ;;  %v5102_v49 = vpack.c.bf16 %v2147_v13, %v2139_v11  ;;  %v2195_v45 = vld [vmem:[#allocation7 + $0x378] sm:$0xff]  ;;  %v2240_v50 = vld [vmem:[#allocation7 + $0x4e0] sm:$0xff]  ;;  %v2257_v62 = vld [vmem:[#allocation7 + $0x568] sm:$0xff] }
 0x2d2   : > { %4967 = vmatprep.subr.bf16.mxu0 %v4966_v42  ;;  %5095 = vmatprep.subr.bf16.mxu1 %v5094_v48  ;;  %v5114_v41 = vpack.c.bf16 %v2195_v45, %v2187_v53  ;;  %v2194_v42 = vld [vmem:[#allocation7 + $0x370] sm:$0xff]  ;;  %v2201_v48 = vld [vmem:[#allocation7 + $0x3a8] sm:$0xff]  ;;  %v2219_v11 = vld [vmem:[#allocation7 + $0x438] sm:$0xff] }
 0x2d3   : > { %v2227_v13 = vld [vmem:[#allocation7 + $0x478] sm:$0xff]  ;;  %v2248_v55 = vld [vmem:[#allocation7 + $0x520] sm:$0xff]  ;;  %v2258_v8 = vld [vmem:[#allocation7 + $0x570] sm:$0xff] }
 0x2d4   : > { %4969 = vmatpush1.bf16.msra.mxu0 %v4968_v30  ;;  %5097 = vmatpush1.bf16.msra.mxu1 %v5096_v43  ;;  %v4988_v30 = vpack.c.bf16 %v2192_v9, %v2184_v56  ;;  %v5116_v43 = vpack.c.bf16 %v2194_v42, %v2186_v20  ;;  %v2251_v34 = vld [vmem:[#allocation7 + $0x538] sm:$0xff]  ;;  %v2256_v28 = vld [vmem:[#allocation7 + $0x560] sm:$0xff]  ;;  %v2265_v44 = vld [vmem:[#allocation7 + $0x5a8] sm:$0xff] }
 0x2d5   : > { %4971 = vmatprep.subr.bf16.mxu0 %v4970_v38  ;;  %5099 = vmatprep.subr.bf16.mxu1 %v5098_v37  ;;  %v4990_v38 = vpack.c.bf16 %v2209_v58, %v2201_v48  ;;  %v5118_v37 = vpack.c.bf16 %v2211_v22, %v2203_v0  ;;  %v2259_v21 = vld [vmem:[#allocation7 + $0x578] sm:$0xff]  ;;  %v2273_v33 = vld [vmem:[#allocation7 + $0x5e8] sm:$0xff]  ;;  %v2264_v56 = vld [vmem:[#allocation7 + $0x5a0] sm:$0xff] }
 0x2d6   : > { %v2267_v53 = vld [vmem:[#allocation7 + $0x5b8] sm:$0xff]  ;;  %v2272_v9 = vld [vmem:[#allocation7 + $0x5e0] sm:$0xff]  ;;  %v2266_v20 = vld [vmem:[#allocation7 + $0x5b0] sm:$0xff] }
 0x2d7   : > { %v2275_v45 = vld [vmem:[#allocation7 + $0x5f8] sm:$0xff]  ;;  %v2274_v42 = vld [vmem:[#allocation7 + $0x5f0] sm:$0xff]  ;;  %v2281_v48 = vld [vmem:[#allocation7 + $0x628] sm:$0xff] }
 0x2d8   : > { %4973 = vmatpush1.bf16.msra.mxu0 %v4972_v4  ;;  %5101 = vmatpush1.bf16.msra.mxu1 %v5100_v47  ;;  %v4992_v4 = vpack.c.bf16 %v2208_v2, %v2200_v36  ;;  %v5120_v47 = vpack.c.bf16 %v2210_v52, %v2202_v17  ;;  %v2289_v58 = vld [vmem:[#allocation7 + $0x668] sm:$0xff]  ;;  %v2283_v0 = vld [vmem:[#allocation7 + $0x638] sm:$0xff]  ;;  %v2280_v36 = vld [vmem:[#allocation7 + $0x620] sm:$0xff] }
 0x2d9   : > { %4975 = vmatprep.subr.bf16.mxu0 %v4974_v1  ;;  %5103 = vmatprep.subr.bf16.mxu1 %v5102_v49  ;;  %v4994_v1 = vpack.c.bf16 %v2225_v10, %v2217_v26  ;;  %v5122_v49 = vpack.c.bf16 %v2227_v13, %v2219_v11  ;;  %v2291_v22 = vld [vmem:[#allocation7 + $0x678] sm:$0xff]  ;;  %v2288_v2 = vld [vmem:[#allocation7 + $0x660] sm:$0xff]  ;;  %v2282_v17 = vld [vmem:[#allocation7 + $0x630] sm:$0xff] }
 0x2da   : > { %v2290_v52 = vld [vmem:[#allocation7 + $0x670] sm:$0xff]  ;;  %v2297_v26 = vld [vmem:[#allocation7 + $0x6a8] sm:$0xff]  ;;  %v2299_v11 = vld [vmem:[#allocation7 + $0x6b8] sm:$0xff] }
 0x2db   : > { %v2305_v10 = vld [vmem:[#allocation7 + $0x6e8] sm:$0xff]  ;;  %v2307_v13 = vld [vmem:[#allocation7 + $0x6f8] sm:$0xff] }
 0x2dc   : > { %4977 = vmatpush1.bf16.msra.mxu0 %v4976_v54  ;;  %5105 = vmatpush1.bf16.msra.mxu1 %v5104_v29  ;;  %v4996_v54 = vpack.c.bf16 %v2224_v51, %v2216_v39  ;;  %v5124_v29 = vpack.c.bf16 %v2226_v35, %v2218_v19  ;;  %v2296_v39 = vld [vmem:[#allocation7 + $0x6a0] sm:$0xff]  ;;  %v2298_v19 = vld [vmem:[#allocation7 + $0x6b0] sm:$0xff] }
 0x2dd   : > { %4979 = vmatprep.subr.bf16.mxu0 %v4978_v31  ;;  %5107 = vmatprep.subr.bf16.mxu1 %v5106_v46  ;;  %v4998_v31 = vpack.c.bf16 %v2241_v59, %v2233_v25  ;;  %v5126_v46 = vpack.c.bf16 %v2243_v18, %v2235_v57  ;;  %v2304_v51 = vld [vmem:[#allocation7 + $0x6e0] sm:$0xff]  ;;  %v2306_v35 = vld [vmem:[#allocation7 + $0x6f0] sm:$0xff]  ;;  %v2313_v25 = vld [vmem:[#allocation7 + $0x728] sm:$0xff] }
 0x2de   : > { %v2321_v59 = vld [vmem:[#allocation7 + $0x768] sm:$0xff]  ;;  %v2315_v57 = vld [vmem:[#allocation7 + $0x738] sm:$0xff] }
 0x2df   : > { %v2323_v18 = vld [vmem:[#allocation7 + $0x778] sm:$0xff] }
 0x2e0   : > { %4981 = vmatpush1.bf16.msra.mxu0 %v4980_v24  ;;  %5109 = vmatpush1.bf16.msra.mxu1 %v5108_v63  ;;  %v5000_v24 = vpack.c.bf16 %v2240_v50, %v2232_v5  ;;  %v5128_v63 = vpack.c.bf16 %v2242_v14, %v2234_v40  ;;  %v2312_v5 = vld [vmem:[#allocation7 + $0x720] sm:$0xff]  ;;  %v2314_v40 = vld [vmem:[#allocation7 + $0x730] sm:$0xff] }
 0x2e1   : > { %4983 = vmatprep.subr.bf16.mxu0 %v4982_v23  ;;  %5111 = vmatprep.subr.bf16.mxu1 %v5110_v60  ;;  %v5002_v23 = vpack.c.bf16 %v2257_v62, %v2249_v6  ;;  %v5130_v60 = vpack.c.bf16 %v2259_v21, %v2251_v34  ;;  %v2320_v50 = vld [vmem:[#allocation7 + $0x760] sm:$0xff]  ;;  %v2322_v14 = vld [vmem:[#allocation7 + $0x770] sm:$0xff]  ;;  %v2329_v6 = vld [vmem:[#allocation7 + $0x7a8] sm:$0xff] }
 0x2e2   : > { %v2337_v62 = vld [vmem:[#allocation7 + $0x7e8] sm:$0xff]  ;;  %v2331_v34 = vld [vmem:[#allocation7 + $0x7b8] sm:$0xff] }
 0x2e3   : > { %v2339_v21 = vld [vmem:[#allocation7 + $0x7f8] sm:$0xff] }
 0x2e4   : > { %4985 = vmatpush1.bf16.msra.mxu0 %v4984_v15  ;;  %5113 = vmatpush1.bf16.msra.mxu1 %v5112_v16  ;;  %v5004_v15 = vpack.c.bf16 %v2256_v28, %v2248_v55  ;;  %v5132_v16 = vpack.c.bf16 %v2258_v8, %v2250_v12  ;;  %v2328_v55 = vld [vmem:[#allocation7 + $0x7a0] sm:$0xff]  ;;  %v2330_v12 = vld [vmem:[#allocation7 + $0x7b0] sm:$0xff] }
 0x2e5   : > { %4987 = vmatprep.subr.bf16.mxu0 %v4986_v7  ;;  %5115 = vmatprep.subr.bf16.mxu1 %v5114_v41  ;;  %v5006_v7 = vpack.c.bf16 %v2273_v33, %v2265_v44  ;;  %v5134_v41 = vpack.c.bf16 %v2275_v45, %v2267_v53  ;;  %v2336_v28 = vld [vmem:[#allocation7 + $0x7e0] sm:$0xff]  ;;  %v2338_v8 = vld [vmem:[#allocation7 + $0x7f0] sm:$0xff]  ;;  %v2345_v44 = vld [vmem:[#allocation7 + $0x828] sm:$0xff] }
 0x2e6   : > { %v2353_v33 = vld [vmem:[#allocation7 + $0x868] sm:$0xff]  ;;  %v2347_v53 = vld [vmem:[#allocation7 + $0x838] sm:$0xff] }
 0x2e7   : > { %v2355_v45 = vld [vmem:[#allocation7 + $0x878] sm:$0xff] }
 0x2e8   : > { %4989 = vmatpush1.bf16.msra.mxu0 %v4988_v30  ;;  %5117 = vmatpush1.bf16.msra.mxu1 %v5116_v43  ;;  %v5008_v30 = vpack.c.bf16 %v2272_v9, %v2264_v56  ;;  %v5136_v43 = vpack.c.bf16 %v2274_v42, %v2266_v20  ;;  %v5026_v56 = vpack.c.bf16 %v2353_v33, %v2345_v44  ;;  %v2346_v20 = vld [vmem:[#allocation7 + $0x830] sm:$0xff]  ;;  %v2427_v44 = vld [vmem:[#allocation7 + $0xab8] sm:$0xff] }
 0x2e9   : > { %4991 = vmatprep.subr.bf16.mxu0 %v4990_v38  ;;  %5119 = vmatprep.subr.bf16.mxu1 %v5118_v37  ;;  %v5010_v38 = vpack.c.bf16 %v2289_v58, %v2281_v48  ;;  %v5138_v37 = vpack.c.bf16 %v2291_v22, %v2283_v0  ;;  %v5154_v9 = vpack.c.bf16 %v2355_v45, %v2347_v53  ;;  %v2354_v42 = vld [vmem:[#allocation7 + $0x870] sm:$0xff]  ;;  %v2361_v48 = vld [vmem:[#allocation7 + $0x8a8] sm:$0xff]  ;;  %v2363_v0 = vld [vmem:[#allocation7 + $0x8b8] sm:$0xff] }
 0x2ea   : > { %v2369_v58 = vld [vmem:[#allocation7 + $0x8e8] sm:$0xff]  ;;  %v2371_v22 = vld [vmem:[#allocation7 + $0x8f8] sm:$0xff] }
 0x2eb   : > { %v2435_v33 = vld [vmem:[#allocation7 + $0xaf8] sm:$0xff] }
 0x2ec   : > { %4993 = vmatpush1.bf16.msra.mxu0 %v4992_v4  ;;  %5121 = vmatpush1.bf16.msra.mxu1 %v5120_v47  ;;  %v5012_v4 = vpack.c.bf16 %v2288_v2, %v2280_v36  ;;  %v5140_v47 = vpack.c.bf16 %v2290_v52, %v2282_v17  ;;  %v2360_v36 = vld [vmem:[#allocation7 + $0x8a0] sm:$0xff]  ;;  %v5158_v17 = vpack.c.bf16 %v2371_v22, %v2363_v0  ;;  %v2370_v52 = vld [vmem:[#allocation7 + $0x8f0] sm:$0xff] }
 0x2ed   : > { %4995 = vmatprep.subr.bf16.mxu0 %v4994_v1  ;;  %5123 = vmatprep.subr.bf16.mxu1 %v5122_v49  ;;  %v5014_v1 = vpack.c.bf16 %v2305_v10, %v2297_v26  ;;  %v5142_v49 = vpack.c.bf16 %v2307_v13, %v2299_v11  ;;  %v2368_v2 = vld [vmem:[#allocation7 + $0x8e0] sm:$0xff]  ;;  %v2377_v26 = vld [vmem:[#allocation7 + $0x928] sm:$0xff]  ;;  %v2379_v11 = vld [vmem:[#allocation7 + $0x938] sm:$0xff] }
 0x2ee   : > { %v2385_v10 = vld [vmem:[#allocation7 + $0x968] sm:$0xff]  ;;  %v2387_v13 = vld [vmem:[#allocation7 + $0x978] sm:$0xff] }
 0x2f0   : > { %4997 = vmatpush1.bf16.msra.mxu0 %v4996_v54  ;;  %5125 = vmatpush1.bf16.msra.mxu1 %v5124_v29  ;;  %v5016_v54 = vpack.c.bf16 %v2304_v51, %v2296_v39  ;;  %v5144_v29 = vpack.c.bf16 %v2306_v35, %v2298_v19  ;;  %v5034_v39 = vpack.c.bf16 %v2385_v10, %v2377_v26  ;;  %v2376_v51 = vld [vmem:[#allocation7 + $0x920] sm:$0xff]  ;;  %v2386_v35 = vld [vmem:[#allocation7 + $0x970] sm:$0xff]  ;;  %v2459_v26 = vld [vmem:[#allocation7 + $0xbb8] sm:$0xff] }
 0x2f1   : > { %4999 = vmatprep.subr.bf16.mxu0 %v4998_v31  ;;  %5127 = vmatprep.subr.bf16.mxu1 %v5126_v46  ;;  %v5018_v31 = vpack.c.bf16 %v2321_v59, %v2313_v25  ;;  %v5146_v46 = vpack.c.bf16 %v2323_v18, %v2315_v57  ;;  %v5162_v19 = vpack.c.bf16 %v2387_v13, %v2379_v11  ;;  %v2393_v25 = vld [vmem:[#allocation7 + $0x9a8] sm:$0xff]  ;;  %v2395_v59 = vld [vmem:[#allocation7 + $0x9b8] sm:$0xff] }
 0x2f2   : > { %v2403_v57 = vld [vmem:[#allocation7 + $0x9f8] sm:$0xff] }
 0x2f3   : > { %v2467_v10 = vld [vmem:[#allocation7 + $0xbf8] sm:$0xff] }
 0x2f4   : > { %5001 = vmatpush1.bf16.msra.mxu0 %v5000_v24  ;;  %5129 = vmatpush1.bf16.msra.mxu1 %v5128_v63  ;;  %v5020_v24 = vpack.c.bf16 %v2320_v50, %v2312_v5  ;;  %v5148_v63 = vpack.c.bf16 %v2322_v14, %v2314_v40  ;;  %v2400_v5 = vld [vmem:[#allocation7 + $0x9e0] sm:$0xff]  ;;  %v2394_v50 = vld [vmem:[#allocation7 + $0x9b0] sm:$0xff]  ;;  %v2409_v40 = vld [vmem:[#allocation7 + $0xa28] sm:$0xff] }
 0x2f5   : > { %5003 = vmatprep.subr.bf16.mxu0 %v5002_v23  ;;  %5131 = vmatprep.subr.bf16.mxu1 %v5130_v60  ;;  %v5022_v23 = vpack.c.bf16 %v2337_v62, %v2329_v6  ;;  %v5150_v60 = vpack.c.bf16 %v2339_v21, %v2331_v34  ;;  %v2417_v14 = vld [vmem:[#allocation7 + $0xa68] sm:$0xff]  ;;  %v2411_v6 = vld [vmem:[#allocation7 + $0xa38] sm:$0xff] }
 0x2f6   : > { %v2419_v62 = vld [vmem:[#allocation7 + $0xa78] sm:$0xff] }
 0x2f8   : > { %5005 = vmatpush1.bf16.msra.mxu0 %v5004_v15  ;;  %5133 = vmatpush1.bf16.msra.mxu1 %v5132_v16  ;;  %v5024_v15 = vpack.c.bf16 %v2336_v28, %v2328_v55  ;;  %v5152_v16 = vpack.c.bf16 %v2338_v8, %v2330_v12  ;;  %v2416_v55 = vld [vmem:[#allocation7 + $0xa60] sm:$0xff]  ;;  %v2410_v28 = vld [vmem:[#allocation7 + $0xa30] sm:$0xff]  ;;  %v2425_v12 = vld [vmem:[#allocation7 + $0xaa8] sm:$0xff] }
 0x2f9   : > { %5007 = vmatprep.subr.bf16.mxu0 %v5006_v7  ;;  %5135 = vmatprep.subr.bf16.mxu1 %v5134_v41  ;;  %v2344_v7 = vld [vmem:[#allocation7 + $0x820] sm:$0xff]  ;;  %v2433_v8 = vld [vmem:[#allocation7 + $0xae8] sm:$0xff] }
 0x2fa   : > { %v2352_v41 = vld [vmem:[#allocation7 + $0x860] sm:$0xff] }
 0x2fc   : > { %5009 = vmatpush1.bf16.msra.mxu0 %v5008_v30  ;;  %5137 = vmatpush1.bf16.msra.mxu1 %v5136_v43  ;;  %v5028_v30 = vpack.c.bf16 %v2352_v41, %v2344_v7  ;;  %v5156_v43 = vpack.c.bf16 %v2354_v42, %v2346_v20  ;;  %v5174_v7 = vpack.c.bf16 %v2435_v33, %v2427_v44  ;;  %v2434_v41 = vld [vmem:[#allocation7 + $0xaf0] sm:$0xff]  ;;  %v2441_v20 = vld [vmem:[#allocation7 + $0xb28] sm:$0xff] }
 0x2fd   : > { %5011 = vmatprep.subr.bf16.mxu0 %v5010_v38  ;;  %5139 = vmatprep.subr.bf16.mxu1 %v5138_v37  ;;  %v2362_v38 = vld [vmem:[#allocation7 + $0x8b0] sm:$0xff]  ;;  %v5030_v37 = vpack.c.bf16 %v2369_v58, %v2361_v48  ;;  %v2449_v42 = vld [vmem:[#allocation7 + $0xb68] sm:$0xff]  ;;  %v2443_v48 = vld [vmem:[#allocation7 + $0xb38] sm:$0xff] }
 0x2fe   : > { %v2451_v58 = vld [vmem:[#allocation7 + $0xb78] sm:$0xff] }
 0x300   : > { %5013 = vmatpush1.bf16.msra.mxu0 %v5012_v4  ;;  %5141 = vmatpush1.bf16.msra.mxu1 %v5140_v47  ;;  %v5032_v4 = vpack.c.bf16 %v2368_v2, %v2360_v36  ;;  %v5160_v47 = vpack.c.bf16 %v2370_v52, %v2362_v38  ;;  %v2448_v36 = vld [vmem:[#allocation7 + $0xb60] sm:$0xff]  ;;  %v2442_v2 = vld [vmem:[#allocation7 + $0xb30] sm:$0xff]  ;;  %v5178_v38 = vpack.c.bf16 %v2451_v58, %v2443_v48  ;;  %v2465_v52 = vld [vmem:[#allocation7 + $0xbe8] sm:$0xff] }
 0x301   : > { %5015 = vmatprep.subr.bf16.mxu0 %v5014_v1  ;;  %5143 = vmatprep.subr.bf16.mxu1 %v5142_v49  ;;  %v2384_v1 = vld [vmem:[#allocation7 + $0x960] sm:$0xff]  ;;  %v2378_v49 = vld [vmem:[#allocation7 + $0x930] sm:$0xff] }
 0x302   : > { %v5036_v18 = vpack.c.bf16 %v2384_v1, %v2376_v51  ;;  %v2458_v51 = vld [vmem:[#allocation7 + $0xbb0] sm:$0xff]  ;;  %v5182_v1 = vpack.c.bf16 %v2467_v10, %v2459_v26 }
 0x304   : > { %5017 = vmatpush1.bf16.msra.mxu0 %v5016_v54  ;;  %5145 = vmatpush1.bf16.msra.mxu1 %v5144_v29  ;;  %v5164_v54 = vpack.c.bf16 %v2386_v35, %v2378_v49  ;;  %v2466_v49 = vld [vmem:[#allocation7 + $0xbf0] sm:$0xff]  ;;  %v2481_v35 = vld [vmem:[#allocation7 + $0xc68] sm:$0xff] }
 0x305   : > { %5019 = vmatprep.subr.bf16.mxu0 %v5018_v31  ;;  %5147 = vmatprep.subr.bf16.mxu1 %v5146_v46  ;;  %v5166_v31 = vpack.c.bf16 %v2403_v57, %v2395_v59  ;;  %v2402_v46 = vld [vmem:[#allocation7 + $0x9f0] sm:$0xff]  ;;  %v5184_v57 = vpack.c.bf16 %v2466_v49, %v2458_v51  ;;  %v2561_v49 = vld [vmem:[#allocation7 + $0xee8] sm:$0xff] }
 0x306   : > { %v5168_v21 = vpack.c.bf16 %v2402_v46, %v2394_v50  ;;  %v2482_v50 = vld [vmem:[#allocation7 + $0xc70] sm:$0xff]  ;;  %v2497_v46 = vld [vmem:[#allocation7 + $0xce8] sm:$0xff] }
 0x307   : > { %v2546_v51 = vld [vmem:[#allocation7 + $0xe70] sm:$0xff] }
 0x308   : > { %5021 = vmatpush1.bf16.msra.mxu0 %v5020_v24  ;;  %5149 = vmatpush1.bf16.msra.mxu1 %v5148_v63  ;;  %v5042_v24 = vpack.c.bf16 %v2417_v14, %v2409_v40  ;;  %v2408_v63 = vld [vmem:[#allocation7 + $0xa20] sm:$0xff]  ;;  %v2491_v40 = vld [vmem:[#allocation7 + $0xcb8] sm:$0xff] }
 0x309   : > { %5023 = vmatprep.subr.bf16.mxu0 %v5022_v23  ;;  %5151 = vmatprep.subr.bf16.mxu1 %v5150_v60  ;;  %v5170_v23 = vpack.c.bf16 %v2419_v62, %v2411_v6  ;;  %v2418_v60 = vld [vmem:[#allocation7 + $0xa70] sm:$0xff]  ;;  %v5044_v53 = vpack.c.bf16 %v2416_v55, %v2408_v63  ;;  %v2499_v14 = vld [vmem:[#allocation7 + $0xcf8] sm:$0xff] }
 0x30a   : > { %v5172_v45 = vpack.c.bf16 %v2418_v60, %v2410_v28  ;;  %v2490_v63 = vld [vmem:[#allocation7 + $0xcb0] sm:$0xff]  ;;  %v5190_v55 = vpack.c.bf16 %v2499_v14, %v2491_v40  ;;  %v2513_v60 = vld [vmem:[#allocation7 + $0xd68] sm:$0xff] }
 0x30b   : > { %v2498_v28 = vld [vmem:[#allocation7 + $0xcf0] sm:$0xff] }
 0x30c   : > { %5025 = vmatpush1.bf16.msra.mxu0 %v5024_v15  ;;  %5153 = vmatpush1.bf16.msra.mxu1 %v5152_v16  ;;  %v5046_v15 = vpack.c.bf16 %v2433_v8, %v2425_v12  ;;  %v2424_v16 = vld [vmem:[#allocation7 + $0xaa0] sm:$0xff]  ;;  %v2507_v12 = vld [vmem:[#allocation7 + $0xd38] sm:$0xff]  ;;  %v5192_v33 = vpack.c.bf16 %v2498_v28, %v2490_v63  ;;  %v2578_v63 = vld [vmem:[#allocation7 + $0xf70] sm:$0xff] }
 0x30d   : > { %5027 = vmatprep.subr.bf16.mxu0 %v5026_v56  ;;  %5155 = vmatprep.subr.bf16.mxu1 %v5154_v9  ;;  %v2432_v56 = vld [vmem:[#allocation7 + $0xae0] sm:$0xff]  ;;  %v2426_v9 = vld [vmem:[#allocation7 + $0xab0] sm:$0xff]  ;;  %v2515_v8 = vld [vmem:[#allocation7 + $0xd78] sm:$0xff] }
 0x30e   : > { %v5048_v0 = vpack.c.bf16 %v2432_v56, %v2424_v16  ;;  %v5176_v22 = vpack.c.bf16 %v2434_v41, %v2426_v9  ;;  %v2506_v16 = vld [vmem:[#allocation7 + $0xd30] sm:$0xff]  ;;  %v5194_v56 = vpack.c.bf16 %v2515_v8, %v2507_v12  ;;  %v2529_v41 = vld [vmem:[#allocation7 + $0xde8] sm:$0xff] }
 0x30f   : > { %3786 = vmatmul.mubr.f32.vlgmr.msra.gmra.mrb[2].mxu0 %v7172_v32  ;;  %3928 = vmatmul.mubr.f32.vlgmr.msra.gmra.mrb[2].mxu1 %v7172_v32  ;;  %v2401_v32 = vld [vmem:[#allocation7 + $0x9e8] sm:$0xff]  ;;  %v2514_v9 = vld [vmem:[#allocation7 + $0xd70] sm:$0xff] }
 0x310   : > { %5029 = vmatpush1.bf16.msra.mxu0 %v5028_v30  ;;  %3856 = vmatprep.mubr.f32.mxu0 %v7339_v61  ;;  %v5038_v29 = vpack.c.bf16 %v2401_v32, %v2393_v25  ;;  %v5050_v30 = vpack.c.bf16 %v2449_v42, %v2441_v20  ;;  %v2475_v25 = vld [vmem:[#allocation7 + $0xc38] sm:$0xff]  ;;  %v5196_v58 = vpack.c.bf16 %v2514_v9, %v2506_v16  ;;  %v2593_v28 = vld [vmem:[#allocation7 + $0xfe8] sm:$0xff]  ;;  %v2594_v16 = vld [vmem:[#allocation7 + $0xff0] sm:$0xff] }
 0x311   : > { %5157 = vmatpush1.bf16.msra.mxu1 %v5156_v43  ;;  %3998 = vmatprep.mubr.f32.mxu1 %v7339_v61  ;;  %v2392_v61 = vld [vmem:[#allocation7 + $0x9a0] sm:$0xff]  ;;  %v2483_v32 = vld [vmem:[#allocation7 + $0xc78] sm:$0xff]  ;;  %v4030_v9 = vld [vmem:[#allocation10 + $0x88] sm:$0xff] }
 0x312   : > { %5031 = vmatprep.subr.bf16.mxu0 %v5030_v37  ;;  %5159 = vmatprep.subr.bf16.mxu1 %v5158_v17  ;;  %v5040_v34 = vpack.c.bf16 %v2400_v5, %v2392_v61  ;;  %v2440_v43 = vld [vmem:[#allocation7 + $0xb20] sm:$0xff]  ;;  %v2450_v37 = vld [vmem:[#allocation7 + $0xb70] sm:$0xff]  ;;  %v2457_v17 = vld [vmem:[#allocation7 + $0xba8] sm:$0xff]  ;;  %v5186_v5 = vpack.c.bf16 %v2483_v32, %v2475_v25 }
 0x313   : > { %v5052_v11 = vpack.c.bf16 %v2448_v36, %v2440_v43  ;;  %v5180_v13 = vpack.c.bf16 %v2450_v37, %v2442_v2  ;;  %v2474_v61 = vld [vmem:[#allocation7 + $0xc30] sm:$0xff]  ;;  %v2523_v20 = vld [vmem:[#allocation7 + $0xdb8] sm:$0xff]  ;;  %v2545_v37 = vld [vmem:[#allocation7 + $0xe68] sm:$0xff] }
 0x314   : > { %5033 = vmatpush1.bf16.msra.mxu0 %v5032_v4  ;;  %v5054_v4 = vpack.c.bf16 %v2465_v52, %v2457_v17  ;;  %v5188_v62 = vpack.c.bf16 %v2482_v50, %v2474_v61  ;;  %v2531_v42 = vld [vmem:[#allocation7 + $0xdf8] sm:$0xff]  ;;  %v2522_v43 = vld [vmem:[#allocation7 + $0xdb0] sm:$0xff]  ;;  %v2577_v50 = vld [vmem:[#allocation7 + $0xf68] sm:$0xff] }
 0x315   : > { %5161 = vmatpush1.bf16.msra.mxu1 %v5160_v47  ;;  %5035 = vmatprep.subr.bf16.mxu0 %v5034_v39  ;;  %v2456_v47 = vld [vmem:[#allocation7 + $0xba0] sm:$0xff]  ;;  %v5198_v36 = vpack.c.bf16 %v2531_v42, %v2523_v20  ;;  %v2530_v2 = vld [vmem:[#allocation7 + $0xdf0] sm:$0xff]  ;;  %v2539_v17 = vld [vmem:[#allocation7 + $0xe38] sm:$0xff] }
 0x316   : > { %5163 = vmatprep.subr.bf16.mxu1 %v5162_v19  ;;  %v2464_v39 = vld [vmem:[#allocation7 + $0xbe0] sm:$0xff]  ;;  %v2473_v19 = vld [vmem:[#allocation7 + $0xc28] sm:$0xff]  ;;  %v2547_v52 = vld [vmem:[#allocation7 + $0xe78] sm:$0xff]  ;;  %v5200_v10 = vpack.c.bf16 %v2530_v2, %v2522_v43 }
 0x317   : > { %v5056_v59 = vpack.c.bf16 %v2464_v39, %v2456_v47  ;;  %v2538_v47 = vld [vmem:[#allocation7 + $0xe30] sm:$0xff]  ;;  %v5202_v39 = vpack.c.bf16 %v2547_v52, %v2539_v17  ;;  %v4032_v2 = vld [vmem:[#allocation10 + $0x98] sm:$0xff] }
 0x318   : > { %5037 = vmatpush1.bf16.msra.mxu0 %v5036_v18  ;;  %v5058_v18 = vpack.c.bf16 %v2481_v35, %v2473_v19  ;;  %v2555_v19 = vld [vmem:[#allocation7 + $0xeb8] sm:$0xff]  ;;  %v5204_v32 = vpack.c.bf16 %v2546_v51, %v2538_v47  ;;  %v2562_v61 = vld [vmem:[#allocation7 + $0xef0] sm:$0xff]  ;;  %v4048_v47 = vld [vmem:[#allocation10 + $0x118] sm:$0xff] }
 0x319   : > { %5165 = vmatpush1.bf16.msra.mxu1 %v5164_v54  ;;  %5039 = vmatprep.subr.bf16.mxu0 %v5038_v29  ;;  %v2472_v54 = vld [vmem:[#allocation7 + $0xc20] sm:$0xff]  ;;  %v2563_v35 = vld [vmem:[#allocation7 + $0xef8] sm:$0xff]  ;;  %v4046_v43 = vld [vmem:[#allocation10 + $0x108] sm:$0xff] }
 0x31a   : > { %5167 = vmatprep.subr.bf16.mxu1 %v5166_v31  ;;  %v2480_v29 = vld [vmem:[#allocation7 + $0xc60] sm:$0xff]  ;;  %v2489_v31 = vld [vmem:[#allocation7 + $0xca8] sm:$0xff]  ;;  %v4034_v51 = vld [vmem:[#allocation10 + $0xa8] sm:$0xff] }
 0x31b   : > { %v5060_v6 = vpack.c.bf16 %v2480_v29, %v2472_v54  ;;  %v2554_v54 = vld [vmem:[#allocation7 + $0xeb0] sm:$0xff]  ;;  %v5206_v29 = vpack.c.bf16 %v2563_v35, %v2555_v19 }
 0x31c   : > { %5041 = vmatpush1.bf16.msra.mxu0 %v5040_v34  ;;  %v5062_v34 = vpack.c.bf16 %v2497_v46, %v2489_v31  ;;  %v2571_v31 = vld [vmem:[#allocation7 + $0xf38] sm:$0xff]  ;;  %v5208_v14 = vpack.c.bf16 %v2562_v61, %v2554_v54  ;;  %v4050_v54 = vld [vmem:[#allocation10 + $0x128] sm:$0xff]  ;;  %v4036_v61 = vld [vmem:[#allocation10 + $0xb8] sm:$0xff] }
 0x31d   : > { %5169 = vmatpush1.bf16.msra.mxu1 %v5168_v21  ;;  %5043 = vmatprep.subr.bf16.mxu0 %v5042_v24  ;;  %v2488_v21 = vld [vmem:[#allocation7 + $0xca0] sm:$0xff]  ;;  %v2579_v46 = vld [vmem:[#allocation7 + $0xf78] sm:$0xff] }
 0x31e   : > { %5171 = vmatprep.subr.bf16.mxu1 %v5170_v23  ;;  %v2496_v24 = vld [vmem:[#allocation7 + $0xce0] sm:$0xff]  ;;  %v2505_v23 = vld [vmem:[#allocation7 + $0xd28] sm:$0xff] }
 0x31f   : > { %v5064_v44 = vpack.c.bf16 %v2496_v24, %v2488_v21  ;;  %v2570_v21 = vld [vmem:[#allocation7 + $0xf30] sm:$0xff]  ;;  %v5210_v24 = vpack.c.bf16 %v2579_v46, %v2571_v31 }
 0x320   : > { %5045 = vmatpush1.bf16.msra.mxu0 %v5044_v53  ;;  %v5066_v53 = vpack.c.bf16 %v2513_v60, %v2505_v23  ;;  %v2587_v23 = vld [vmem:[#allocation7 + $0xfb8] sm:$0xff]  ;;  %v5212_v8 = vpack.c.bf16 %v2578_v63, %v2570_v21  ;;  %v4037_v21 = vld [vmem:[#allocation10 + $0xc0] sm:$0xff] }
 0x321   : > { %5173 = vmatpush1.bf16.msra.mxu1 %v5172_v45  ;;  %5047 = vmatprep.subr.bf16.mxu0 %v5046_v15  ;;  %v2504_v45 = vld [vmem:[#allocation7 + $0xd20] sm:$0xff]  ;;  %v2595_v60 = vld [vmem:[#allocation7 + $0xff8] sm:$0xff]  ;;  %v4069_v63 = vld [vmem:[#allocation10 + $0x1c0] sm:$0xff] }
 0x322   : > { %5175 = vmatprep.subr.bf16.mxu1 %v5174_v7  ;;  %v2512_v15 = vld [vmem:[#allocation7 + $0xd60] sm:$0xff]  ;;  %v2521_v7 = vld [vmem:[#allocation7 + $0xda8] sm:$0xff] }
 0x323   : > { %v5068_v48 = vpack.c.bf16 %v2512_v15, %v2504_v45  ;;  %v2586_v45 = vld [vmem:[#allocation7 + $0xfb0] sm:$0xff]  ;;  %v5214_v15 = vpack.c.bf16 %v2595_v60, %v2587_v23 }
 0x324   : > { %5049 = vmatpush1.bf16.msra.mxu0 %v5048_v0  ;;  %v5070_v0 = vpack.c.bf16 %v2529_v41, %v2521_v7  ;;  %v4061_v7 = vld [vmem:[#allocation10 + $0x180] sm:$0xff]  ;;  %v4062_v41 = vld [vmem:[#allocation10 + $0x188] sm:$0xff]  ;;  %v5216_v42 = vpack.c.bf16 %v2594_v16, %v2586_v45  ;;  %v4039_v45 = vld [vmem:[#allocation10 + $0xd0] sm:$0xff] }
 0x325   : > { %5177 = vmatpush1.bf16.msra.mxu1 %v5176_v22  ;;  %5051 = vmatprep.subr.bf16.mxu0 %v5050_v30  ;;  %v2520_v22 = vld [vmem:[#allocation7 + $0xda0] sm:$0xff]  ;;  %v4071_v16 = vld [vmem:[#allocation10 + $0x1d0] sm:$0xff] }
 0x326   : > { %5179 = vmatprep.subr.bf16.mxu1 %v5178_v38  ;;  %v2528_v30 = vld [vmem:[#allocation7 + $0xde0] sm:$0xff]  ;;  %v2537_v38 = vld [vmem:[#allocation7 + $0xe28] sm:$0xff] }
 0x327   : > { %v5072_v26 = vpack.c.bf16 %v2528_v30, %v2520_v22  ;;  %v4045_v22 = vld [vmem:[#allocation10 + $0x100] sm:$0xff]  ;;  %v5250_v30 = vpack.c.bf16 %v4062_v41, %v4061_v7 }
 0x328   : > { %5053 = vmatpush1.bf16.msra.mxu0 %v5052_v11  ;;  %v5074_v11 = vpack.c.bf16 %v2545_v37, %v2537_v38  ;;  %v4063_v38 = vld [vmem:[#allocation10 + $0x190] sm:$0xff]  ;;  %v4064_v37 = vld [vmem:[#allocation10 + $0x198] sm:$0xff]  ;;  %v5252_v52 = vpack.c.bf16 %v4046_v43, %v4045_v22  ;;  %v4041_v22 = vld [vmem:[#allocation10 + $0xe0] sm:$0xff] }
 0x329   : > { %5181 = vmatpush1.bf16.msra.mxu1 %v5180_v13  ;;  %5055 = vmatprep.subr.bf16.mxu0 %v5054_v4  ;;  %v2536_v13 = vld [vmem:[#allocation7 + $0xe20] sm:$0xff]  ;;  %v4073_v43 = vld [vmem:[#allocation10 + $0x1e0] sm:$0xff] }
 0x32a   : > { %5183 = vmatprep.subr.bf16.mxu1 %v5182_v1  ;;  %v2544_v4 = vld [vmem:[#allocation7 + $0xe60] sm:$0xff]  ;;  %v2553_v1 = vld [vmem:[#allocation7 + $0xea8] sm:$0xff] }
 0x32b   : > { %v5076_v25 = vpack.c.bf16 %v2544_v4, %v2536_v13  ;;  %v4047_v13 = vld [vmem:[#allocation10 + $0x110] sm:$0xff]  ;;  %v5254_v4 = vpack.c.bf16 %v4064_v37, %v4063_v38 }
 0x32c   : > { %5057 = vmatpush1.bf16.msra.mxu0 %v5056_v59  ;;  %v5078_v59 = vpack.c.bf16 %v2561_v49, %v2553_v1  ;;  %v4065_v1 = vld [vmem:[#allocation10 + $0x1a0] sm:$0xff]  ;;  %v4066_v49 = vld [vmem:[#allocation10 + $0x1a8] sm:$0xff]  ;;  %v5256_v35 = vpack.c.bf16 %v4048_v47, %v4047_v13  ;;  %v4043_v13 = vld [vmem:[#allocation10 + $0xf0] sm:$0xff] }
 0x32d   : > { %5185 = vmatpush1.bf16.msra.mxu1 %v5184_v57  ;;  %5059 = vmatprep.subr.bf16.mxu0 %v5058_v18  ;;  %v2552_v57 = vld [vmem:[#allocation7 + $0xea0] sm:$0xff]  ;;  %v4075_v47 = vld [vmem:[#allocation10 + $0x1f0] sm:$0xff] }
 0x32e   : > { %5187 = vmatprep.subr.bf16.mxu1 %v5186_v5  ;;  %v2560_v18 = vld [vmem:[#allocation7 + $0xee0] sm:$0xff]  ;;  %v2569_v5 = vld [vmem:[#allocation7 + $0xf28] sm:$0xff] }
 0x32f   : > { %v5080_v40 = vpack.c.bf16 %v2560_v18, %v2552_v57  ;;  %v4049_v57 = vld [vmem:[#allocation10 + $0x120] sm:$0xff]  ;;  %v5258_v18 = vpack.c.bf16 %v4066_v49, %v4065_v1 }
 0x330   : > { %5061 = vmatpush1.bf16.msra.mxu0 %v5060_v6  ;;  %v5082_v6 = vpack.c.bf16 %v2577_v50, %v2569_v5  ;;  %v4067_v5 = vld [vmem:[#allocation10 + $0x1b0] sm:$0xff]  ;;  %v4068_v50 = vld [vmem:[#allocation10 + $0x1b8] sm:$0xff] }
 0x331   : > { %5189 = vmatpush1.bf16.msra.mxu1 %v5188_v62  ;;  %5063 = vmatprep.subr.bf16.mxu0 %v5062_v34  ;;  %v2568_v62 = vld [vmem:[#allocation7 + $0xf20] sm:$0xff] }
 0x332   : > { %5191 = vmatprep.subr.bf16.mxu1 %v5190_v55  ;;  %v2576_v34 = vld [vmem:[#allocation7 + $0xf60] sm:$0xff]  ;;  %v2585_v55 = vld [vmem:[#allocation7 + $0xfa8] sm:$0xff] }
 0x333   : > { %v5084_v12 = vpack.c.bf16 %v2576_v34, %v2568_v62  ;;  %v5262_v62 = vpack.c.bf16 %v4068_v50, %v4067_v5  ;;  %v4052_v34 = vld [vmem:[#allocation10 + $0x138] sm:$0xff] }
 0x334   : > { %5065 = vmatpush1.bf16.msra.mxu0 %v5064_v44  ;;  %v5086_v44 = vpack.c.bf16 %v2593_v28, %v2585_v55  ;;  %v4070_v55 = vld [vmem:[#allocation10 + $0x1c8] sm:$0xff] }
 0x335   : > { %5193 = vmatpush1.bf16.msra.mxu1 %v5192_v33  ;;  %5067 = vmatprep.subr.bf16.mxu0 %v5066_v53  ;;  %v2584_v33 = vld [vmem:[#allocation7 + $0xfa0] sm:$0xff] }
 0x336   : > { %5195 = vmatprep.subr.bf16.mxu1 %v5194_v56  ;;  %v2592_v53 = vld [vmem:[#allocation7 + $0xfe0] sm:$0xff]  ;;  %v4029_v56 = vld [vmem:[#allocation10 + $0x80] sm:$0xff] }
 0x337   : > { %v5088_v20 = vpack.c.bf16 %v2592_v53, %v2584_v33  ;;  %v5266_v33 = vpack.c.bf16 %v4070_v55, %v4069_v63  ;;  %v4054_v53 = vld [vmem:[#allocation10 + $0x148] sm:$0xff] }
 0x338   : > { %5069 = vmatpush1.bf16.msra.mxu0 %v5068_v48  ;;  %v5218_v48 = vpack.c.bf16 %v4030_v9, %v4029_v56  ;;  %v4072_v56 = vld [vmem:[#allocation10 + $0x1d8] sm:$0xff] }
 0x339   : > { %5197 = vmatpush1.bf16.msra.mxu1 %v5196_v58  ;;  %5071 = vmatprep.subr.bf16.mxu0 %v5070_v0  ;;  %v4013_v58 = vld [vmem:[#allocation10] sm:$0xff]  ;;  %v4014_v0 = vld [vmem:[#allocation10 + $0x8] sm:$0xff] }
 0x33a   : > { %5199 = vmatprep.subr.bf16.mxu1 %v5198_v36  ;;  %v4031_v36 = vld [vmem:[#allocation10 + $0x90] sm:$0xff]  ;;  %v5220_v17 = vpack.c.bf16 %v4014_v0, %v4013_v58  ;;  %v5270_v58 = vpack.c.bf16 %v4072_v56, %v4071_v16  ;;  %v4056_v0 = vld [vmem:[#allocation10 + $0x158] sm:$0xff] }
 0x33b   : > { %v4096_v56 = vld [vmem:[#allocation10 + $0x298] sm:$0xff] }
 0x33c   : > { %5073 = vmatpush1.bf16.msra.mxu0 %v5072_v26  ;;  %v5222_v26 = vpack.c.bf16 %v4032_v2, %v4031_v36  ;;  %v4074_v36 = vld [vmem:[#allocation10 + $0x1e8] sm:$0xff] }
 0x33d   : > { %5201 = vmatpush1.bf16.msra.mxu1 %v5200_v10  ;;  %5075 = vmatprep.subr.bf16.mxu0 %v5074_v11  ;;  %v4015_v10 = vld [vmem:[#allocation10 + $0x10] sm:$0xff]  ;;  %v4016_v11 = vld [vmem:[#allocation10 + $0x18] sm:$0xff] }
 0x33e   : > { %5203 = vmatprep.subr.bf16.mxu1 %v5202_v39  ;;  %v4033_v39 = vld [vmem:[#allocation10 + $0xa0] sm:$0xff]  ;;  %v5224_v19 = vpack.c.bf16 %v4016_v11, %v4015_v10  ;;  %v5274_v10 = vpack.c.bf16 %v4074_v36, %v4073_v43  ;;  %v4058_v11 = vld [vmem:[#allocation10 + $0x168] sm:$0xff] }
 0x340   : > { %5077 = vmatpush1.bf16.msra.mxu0 %v5076_v25  ;;  %v5226_v25 = vpack.c.bf16 %v4034_v51, %v4033_v39  ;;  %v4076_v39 = vld [vmem:[#allocation10 + $0x1f8] sm:$0xff] }
 0x341   : > { %5205 = vmatpush1.bf16.msra.mxu1 %v5204_v32  ;;  %5079 = vmatprep.subr.bf16.mxu0 %v5078_v59  ;;  %v4017_v32 = vld [vmem:[#allocation10 + $0x20] sm:$0xff]  ;;  %v4018_v59 = vld [vmem:[#allocation10 + $0x28] sm:$0xff] }
 0x342   : > { %5207 = vmatprep.subr.bf16.mxu1 %v5206_v29  ;;  %v4035_v29 = vld [vmem:[#allocation10 + $0xb0] sm:$0xff]  ;;  %v5228_v31 = vpack.c.bf16 %v4018_v59, %v4017_v32  ;;  %v5278_v32 = vpack.c.bf16 %v4076_v39, %v4075_v47  ;;  %v4060_v59 = vld [vmem:[#allocation10 + $0x178] sm:$0xff] }
 0x343   : > { %v5230_v46 = vpack.c.bf16 %v4036_v61, %v4035_v29  ;;  %v4126_v29 = vld [vmem:[#allocation10 + $0x388] sm:$0xff] }
 0x344   : > { %5081 = vmatpush1.bf16.msra.mxu0 %v5080_v40  ;;  %v4019_v40 = vld [vmem:[#allocation10 + $0x30] sm:$0xff] }
 0x345   : > { %5209 = vmatpush1.bf16.msra.mxu1 %v5208_v14  ;;  %5083 = vmatprep.subr.bf16.mxu0 %v5082_v6  ;;  %v4020_v14 = vld [vmem:[#allocation10 + $0x38] sm:$0xff]  ;;  %v4051_v6 = vld [vmem:[#allocation10 + $0x130] sm:$0xff] }
 0x346   : > { %5211 = vmatprep.subr.bf16.mxu1 %v5210_v24  ;;  %v4038_v24 = vld [vmem:[#allocation10 + $0xc8] sm:$0xff]  ;;  %v5232_v28 = vpack.c.bf16 %v4020_v14, %v4019_v40  ;;  %v5264_v23 = vpack.c.bf16 %v4052_v34, %v4051_v6  ;;  %v7365_v40 = vld [vmem:[#allocation9] sm:$0xff]  ;;  %v2604_v14 = vsub.s32 1, %v6854_v3  ;;  %v2612_v6 = vsub.s32 3, %v6854_v3 }
 0x347   : > { %v5234_v60 = vpack.c.bf16 %v4038_v24, %v4037_v21 }
 0x348   : > { %5085 = vmatpush1.bf16.msra.mxu0 %v5084_v12  ;;  %v4021_v12 = vld [vmem:[#allocation10 + $0x40] sm:$0xff]  ;;  %v2605_v21 = vrot.slane %v7365_v40, %v2604_v14  ;;  %v2613_v24 = vrot.slane %v7365_v40, %v2612_v6 }
 0x349   : > { %5213 = vmatpush1.bf16.msra.mxu1 %v5212_v8  ;;  %5087 = vmatprep.subr.bf16.mxu0 %v5086_v44  ;;  %v4022_v8 = vld [vmem:[#allocation10 + $0x48] sm:$0xff]  ;;  %v4053_v44 = vld [vmem:[#allocation10 + $0x140] sm:$0xff] }
 0x34a   : > { %5215 = vmatprep.subr.bf16.mxu1 %v5214_v15  ;;  %v4040_v15 = vld [vmem:[#allocation10 + $0xd8] sm:$0xff]  ;;  %v5236_v9 = vpack.c.bf16 %v4022_v8, %v4021_v12  ;;  %v5268_v7 = vpack.c.bf16 %v4054_v53, %v4053_v44  ;;  %v4110_v53 = vld [vmem:[#allocation10 + $0x308] sm:$0xff] }
 0x34b   : > { %v5238_v41 = vpack.c.bf16 %v4040_v15, %v4039_v45  ;;  %v4095_v45 = vld [vmem:[#allocation10 + $0x290] sm:$0xff] }
 0x34c   : > { %5089 = vmatpush1.bf16.msra.mxu0 %v5088_v20  ;;  %v4023_v20 = vld [vmem:[#allocation10 + $0x50] sm:$0xff]  ;;  %v5286_v43 = vpack.c.bf16 %v4096_v56, %v4095_v45  ;;  %v4120_v56 = vld [vmem:[#allocation10 + $0x358] sm:$0xff] }
 0x34d   : > { %5217 = vmatpush1.bf16.msra.mxu1 %v5216_v42  ;;  %5219 = vmatprep.subr.bf16.mxu0 %v5218_v48  ;;  %v4024_v42 = vld [vmem:[#allocation10 + $0x58] sm:$0xff]  ;;  %v4055_v48 = vld [vmem:[#allocation10 + $0x150] sm:$0xff] }
 0x34e   : > { %5251 = vmatprep.subr.bf16.mxu1 %v5250_v30  ;;  %v4042_v30 = vld [vmem:[#allocation10 + $0xe8] sm:$0xff]  ;;  %v5240_v2 = vpack.c.bf16 %v4024_v42, %v4023_v20  ;;  %v5272_v38 = vpack.c.bf16 %v4056_v0, %v4055_v48  ;;  %v4080_v0 = vld [vmem:[#allocation10 + $0x218] sm:$0xff] }
 0x34f   : > { %3857 = vmatmul.mubr.f32.vlgmr.msra.gmra.mrb[2].mxu0 %v7351_v27  ;;  %v5242_v37 = vpack.c.bf16 %v4042_v30, %v4041_v22 }
 0x350   : > { %3999 = vmatmul.mubr.f32.vlgmr.msra.gmra.mrb[2].mxu1 %v7351_v27  ;;  %5221 = vmatpush3.bf16.msra.mxu0 %v5220_v17  ;;  %v5260_v27 = vpack.c.bf16 %v4050_v54, %v4049_v57  ;;  %v4025_v17 = vld [vmem:[#allocation10 + $0x60] sm:$0xff] }
 0x351   : > { %5253 = vmatpush3.bf16.msra.mxu1 %v5252_v52  ;;  %5223 = vmatprep.subr.bf16.mxu0 %v5222_v26  ;;  %v4026_v52 = vld [vmem:[#allocation10 + $0x68] sm:$0xff]  ;;  %v4057_v26 = vld [vmem:[#allocation10 + $0x160] sm:$0xff] }
 0x352   : > { %5255 = vmatprep.subr.bf16.mxu1 %v5254_v4  ;;  %v4044_v4 = vld [vmem:[#allocation10 + $0xf8] sm:$0xff]  ;;  %v5244_v51 = vpack.c.bf16 %v4026_v52, %v4025_v17  ;;  %v5276_v1 = vpack.c.bf16 %v4058_v11, %v4057_v26  ;;  %v4093_v57 = vld [vmem:[#allocation10 + $0x280] sm:$0xff]  ;;  %v4098_v17 = vld [vmem:[#allocation10 + $0x2a8] sm:$0xff] }
 0x353   : > { %v5246_v49 = vpack.c.bf16 %v4044_v4, %v4043_v13  ;;  %v4125_v54 = vld [vmem:[#allocation10 + $0x380] sm:$0xff]  ;;  %v4130_v26 = vld [vmem:[#allocation10 + $0x3a8] sm:$0xff] }
 0x354   : > { %5225 = vmatpush3.bf16.msra.mxu0 %v5224_v19  ;;  %v4027_v19 = vld [vmem:[#allocation10 + $0x70] sm:$0xff]  ;;  %v4129_v52 = vld [vmem:[#allocation10 + $0x3a0] sm:$0xff]  ;;  %v4082_v4 = vld [vmem:[#allocation10 + $0x228] sm:$0xff] }
 0x355   : > { %5257 = vmatpush3.bf16.msra.mxu1 %v5256_v35  ;;  %5227 = vmatprep.subr.bf16.mxu0 %v5226_v25  ;;  %v4028_v35 = vld [vmem:[#allocation10 + $0x78] sm:$0xff]  ;;  %v4059_v25 = vld [vmem:[#allocation10 + $0x170] sm:$0xff]  ;;  %v4081_v13 = vld [vmem:[#allocation10 + $0x220] sm:$0xff]  ;;  %v5322_v39 = vpack.c.bf16 %v4130_v26, %v4129_v52 }
 0x356   : > { %5259 = vmatprep.subr.bf16.mxu1 %v5258_v18  ;;  %v4094_v18 = vld [vmem:[#allocation10 + $0x288] sm:$0xff]  ;;  %v5248_v61 = vpack.c.bf16 %v4028_v35, %v4027_v19  ;;  %v5280_v5 = vpack.c.bf16 %v4060_v59, %v4059_v25  ;;  %v4100_v19 = vld [vmem:[#allocation10 + $0x2b8] sm:$0xff]  ;;  %v4131_v35 = vld [vmem:[#allocation10 + $0x3b0] sm:$0xff] }
 0x357   : > { %v5282_v50 = vpack.c.bf16 %v4094_v18, %v4093_v57  ;;  %v4132_v25 = vld [vmem:[#allocation10 + $0x3b8] sm:$0xff]  ;;  %v4083_v57 = vld [vmem:[#allocation10 + $0x230] sm:$0xff] }
 0x358   : > { %5229 = vmatpush3.bf16.msra.mxu0 %v5228_v31  ;;  %v5314_v31 = vpack.c.bf16 %v4126_v29, %v4125_v54  ;;  %v4084_v18 = vld [vmem:[#allocation10 + $0x238] sm:$0xff]  ;;  %v5326_v29 = vpack.c.bf16 %v4132_v25, %v4131_v35  ;;  %v2620_v35 = vsub.s32 5, %v6854_v3  ;;  %v2628_v25 = vsub.s32 7, %v6854_v3 }
 0x359   : > { %5261 = vmatpush3.bf16.msra.mxu1 %v5260_v27  ;;  %5231 = vmatprep.subr.bf16.mxu0 %v5230_v46  ;;  %v2600_v27 = vsub.s32 0, %v6854_v3  ;;  %v2608_v46 = vsub.s32 2, %v6854_v3  ;;  %v5296_v14 = vpack.c.bf16 %v4084_v18, %v4083_v57 }
 0x35a   : > { %5263 = vmatprep.subr.bf16.mxu1 %v5262_v62  ;;  %v2621_v57 = vrot.slane %v7365_v40, %v2620_v35  ;;  %v2629_v18 = vrot.slane %v7365_v40, %v2628_v25 }
 0x35b   : > { %v2601_v62 = vrot.slane %v7365_v40, %v2600_v27  ;;  %v2609_v34 = vrot.slane %v7365_v40, %v2608_v46  ;;  %v4133_v27 = vld [vmem:[#allocation10 + $0x3c0] sm:$0xff]  ;;  %v4134_v46 = vld [vmem:[#allocation10 + $0x3c8] sm:$0xff] }
 0x35c   : > { %5233 = vmatpush3.bf16.msra.mxu0 %v5232_v28  ;;  %v4077_v28 = vld [vmem:[#allocation10 + $0x200] sm:$0xff] }
 0x35d   : > { %5265 = vmatpush3.bf16.msra.mxu1 %v5264_v23  ;;  %5235 = vmatprep.subr.bf16.mxu0 %v5234_v60  ;;  %v4078_v23 = vld [vmem:[#allocation10 + $0x208] sm:$0xff] }
 0x35e   : > { %5267 = vmatprep.subr.bf16.mxu1 %v5266_v33  ;;  %v4109_v33 = vld [vmem:[#allocation10 + $0x300] sm:$0xff]  ;;  %v5284_v42 = vpack.c.bf16 %v4078_v23, %v4077_v28  ;;  %v4103_v28 = vld [vmem:[#allocation10 + $0x2d0] sm:$0xff]  ;;  %v4104_v23 = vld [vmem:[#allocation10 + $0x2d8] sm:$0xff] }
 0x35f   : > { %v5316_v48 = vpack.c.bf16 %v4110_v53, %v4109_v33  ;;  %v4087_v33 = vld [vmem:[#allocation10 + $0x250] sm:$0xff]  ;;  %v4088_v53 = vld [vmem:[#allocation10 + $0x258] sm:$0xff]  ;;  %v5302_v45 = vpack.c.bf16 %v4104_v23, %v4103_v28 }
 0x360   : > { %5237 = vmatpush3.bf16.msra.mxu0 %v5236_v9  ;;  %v4127_v9 = vld [vmem:[#allocation10 + $0x390] sm:$0xff] }
 0x361   : > { %5269 = vmatpush3.bf16.msra.mxu1 %v5268_v7  ;;  %5239 = vmatprep.subr.bf16.mxu0 %v5238_v41  ;;  %v4128_v7 = vld [vmem:[#allocation10 + $0x398] sm:$0xff] }
 0x362   : > { %5271 = vmatprep.subr.bf16.mxu1 %v5270_v58  ;;  %v4079_v58 = vld [vmem:[#allocation10 + $0x210] sm:$0xff]  ;;  %v5318_v36 = vpack.c.bf16 %v4128_v7, %v4127_v9  ;;  %v4105_v9 = vld [vmem:[#allocation10 + $0x2e0] sm:$0xff]  ;;  %v4106_v7 = vld [vmem:[#allocation10 + $0x2e8] sm:$0xff] }
 0x364   : > { %5241 = vmatpush3.bf16.msra.mxu0 %v5240_v2  ;;  %v4111_v2 = vld [vmem:[#allocation10 + $0x310] sm:$0xff] }
 0x365   : > { %5273 = vmatpush3.bf16.msra.mxu1 %v5272_v38  ;;  %5243 = vmatprep.subr.bf16.mxu0 %v5242_v37  ;;  %v4112_v38 = vld [vmem:[#allocation10 + $0x318] sm:$0xff]  ;;  %v4097_v37 = vld [vmem:[#allocation10 + $0x2a0] sm:$0xff] }
 0x366   : > { %5275 = vmatprep.subr.bf16.mxu1 %v5274_v10  ;;  %v5288_v10 = vpack.c.bf16 %v4080_v0, %v4079_v58  ;;  %v5320_v11 = vpack.c.bf16 %v4112_v38, %v4111_v2  ;;  %v5290_v47 = vpack.c.bf16 %v4098_v17, %v4097_v37  ;;  %v4089_v58 = vld [vmem:[#allocation10 + $0x260] sm:$0xff]  ;;  %v4090_v0 = vld [vmem:[#allocation10 + $0x268] sm:$0xff]  ;;  %v4107_v2 = vld [vmem:[#allocation10 + $0x2f0] sm:$0xff] }
 0x367   : > { %v4108_v38 = vld [vmem:[#allocation10 + $0x2f8] sm:$0xff]  ;;  %v4139_v37 = vld [vmem:[#allocation10 + $0x3f0] sm:$0xff]  ;;  %v5308_v52 = vpack.c.bf16 %v4090_v0, %v4089_v58 }
 0x368   : > { %5245 = vmatpush3.bf16.msra.mxu0 %v5244_v51  ;;  %v4113_v51 = vld [vmem:[#allocation10 + $0x320] sm:$0xff]  ;;  %v4140_v17 = vld [vmem:[#allocation10 + $0x3f8] sm:$0xff] }
 0x369   : > { %5277 = vmatpush3.bf16.msra.mxu1 %v5276_v1  ;;  %5247 = vmatprep.subr.bf16.mxu0 %v5246_v49  ;;  %v4114_v1 = vld [vmem:[#allocation10 + $0x328] sm:$0xff]  ;;  %v4099_v49 = vld [vmem:[#allocation10 + $0x2b0] sm:$0xff] }
 0x36a   : > { %5279 = vmatprep.subr.bf16.mxu1 %v5278_v32  ;;  %v5292_v32 = vpack.c.bf16 %v4082_v4, %v4081_v13  ;;  %v5324_v59 = vpack.c.bf16 %v4114_v1, %v4113_v51  ;;  %v5294_v54 = vpack.c.bf16 %v4100_v19, %v4099_v49  ;;  %v5342_v13 = vpack.c.bf16 %v4140_v17, %v4139_v37  ;;  %v4092_v4 = vld [vmem:[#allocation10 + $0x278] sm:$0xff] }
 0x36b   : > { %v2616_v49 = vsub.s32 4, %v6854_v3  ;;  %v2624_v19 = vsub.s32 6, %v6854_v3 }
 0x36c   : > { %5249 = vmatpush3.bf16.msra.mxu0 %v5248_v61  ;;  %v4115_v61 = vld [vmem:[#allocation10 + $0x330] sm:$0xff] }
 0x36d   : > { %5281 = vmatpush3.bf16.msra.mxu1 %v5280_v5  ;;  %5283 = vmatprep.subr.bf16.mxu0 %v5282_v50  ;;  %v4116_v5 = vld [vmem:[#allocation10 + $0x338] sm:$0xff]  ;;  %v4101_v50 = vld [vmem:[#allocation10 + $0x2c0] sm:$0xff] }
 0x36e   : > { %5315 = vmatprep.subr.bf16.mxu1 %v5314_v31  ;;  %v4102_v31 = vld [vmem:[#allocation10 + $0x2c8] sm:$0xff]  ;;  %v5328_v6 = vpack.c.bf16 %v4116_v5, %v4115_v61 }
 0x3a2   : > { %v3574_v63 = vpop.f32.mrb[0].mxu0  ;;  %v3716_v55 = vpop.f32.mrb[0].mxu1 }
 0x3a3   : > { %v5346_v60 = vadd.f32 %v3574_v63, %v2601_v62  ;;  %v5348_v12 = vadd.f32 %v3716_v55, %v2609_v34  ;;  %v3576_v8 = vpop.f32.mrb[1].mxu0  ;;  %v3718_v44 = vpop.f32.mrb[1].mxu1  ;;  %v4085_v62 = vld [vmem:[#allocation10 + $0x240] sm:$0xff]  ;;  %v4086_v34 = vld [vmem:[#allocation10 + $0x248] sm:$0xff] }
 0x3a4   : > { %v5347_v15 = vadd.f32 %v3576_v8, %v2605_v21  ;;  %v5349_v16 = vadd.f32 %v3718_v44, %v2613_v24  ;;  %v5298_v21 = vpack.c.bf16 %v4102_v31, %v4101_v50  ;;  %v5330_v24 = vpack.c.bf16 %v4134_v46, %v4133_v27  ;;  %v4117_v63 = vld [vmem:[#allocation10 + $0x340] sm:$0xff]  ;;  %v4118_v55 = vld [vmem:[#allocation10 + $0x348] sm:$0xff] }
 0x3a5   : > { %v4005_v22 = vmax.f32 %v5346_v60, 0.0  ;;  %v4007_v30 = vmax.f32 %v5348_v12, 0.0  ;;  %v4135_v60 = vld [vmem:[#allocation10 + $0x3d0] sm:$0xff]  ;;  %v4136_v12 = vld [vmem:[#allocation10 + $0x3d8] sm:$0xff]  ;;  %v5300_v8 = vpack.c.bf16 %v4086_v34, %v4085_v62  ;;  %v5332_v44 = vpack.c.bf16 %v4118_v55, %v4117_v63 }
 0x3a6   : > { %v4006_v41 = vmax.f32 %v5347_v15, 0.0  ;;  %v4008_v20 = vmax.f32 %v5349_v16, 0.0  ;;  %v5334_v15 = vpack.c.bf16 %v4136_v12, %v4135_v60  ;;  %v4119_v16 = vld [vmem:[#allocation10 + $0x350] sm:$0xff] }
 0x3a7   : > { %v4561_v63 = vld [vmem:[#allocation3] ss:$0 sm:$0xff] }
 0x3a8   : > { %4212 = vmatprep.mubr.f32.mxu0 %v4006_v41  ;;  %4282 = vmatprep.mubr.f32.mxu1 %v4008_v20  ;;  %v4137_v41 = vld [vmem:[#allocation10 + $0x3e0] sm:$0xff]  ;;  %v4138_v20 = vld [vmem:[#allocation10 + $0x3e8] sm:$0xff] }
 0x3a9   : > { %4213 = vmatmul.mubr.f32.vlgmr.msra.gmra.mrb[4].mxu0 %v4005_v22  ;;  %4283 = vmatmul.mubr.f32.vlgmr.msra.gmra.mrb[4].mxu1 %v4007_v30  ;;  %v5306_v22 = vpack.c.bf16 %v4106_v7, %v4105_v9  ;;  %v5338_v30 = vpack.c.bf16 %v4138_v20, %v4137_v41 }
 0x3aa   : > { %5285 = vmatpush3.bf16.msra.mxu0 %v5284_v42  ;;  %5317 = vmatpush3.bf16.msra.mxu1 %v5316_v48  ;;  %v5304_v42 = vpack.c.bf16 %v4088_v53, %v4087_v33  ;;  %v5336_v48 = vpack.c.bf16 %v4120_v56, %v4119_v16 }
 0x3ab   : > { %5287 = vmatprep.subr.bf16.mxu0 %v5286_v43  ;;  %5319 = vmatprep.subr.bf16.mxu1 %v5318_v36  ;;  %v4121_v43 = vld [vmem:[#allocation10 + $0x360] sm:$0xff]  ;;  %v4122_v36 = vld [vmem:[#allocation10 + $0x368] sm:$0xff] }
 0x3ac   : > { %v5340_v26 = vpack.c.bf16 %v4122_v36, %v4121_v43 }
 0x3ae   : > { %5289 = vmatpush3.bf16.msra.mxu0 %v5288_v10  ;;  %5321 = vmatpush3.bf16.msra.mxu1 %v5320_v11  ;;  %v4091_v10 = vld [vmem:[#allocation10 + $0x270] sm:$0xff]  ;;  %v5310_v11 = vpack.c.bf16 %v4108_v38, %v4107_v2 }
 0x3af   : > { %5291 = vmatprep.subr.bf16.mxu0 %v5290_v47  ;;  %5323 = vmatprep.subr.bf16.mxu1 %v5322_v39  ;;  %v4123_v47 = vld [vmem:[#allocation10 + $0x370] sm:$0xff]  ;;  %v4124_v39 = vld [vmem:[#allocation10 + $0x378] sm:$0xff]  ;;  %v5312_v51 = vpack.c.bf16 %v4092_v4, %v4091_v10 }
 0x3b0   : > { %v5344_v1 = vpack.c.bf16 %v4124_v39, %v4123_v47 }
 0x3b2   : > { %5293 = vmatpush3.bf16.msra.mxu0 %v5292_v32  ;;  %5325 = vmatpush3.bf16.msra.mxu1 %v5324_v59  ;;  %v2617_v32 = vrot.slane %v7365_v40, %v2616_v49  ;;  %v2625_v59 = vrot.slane %v7365_v40, %v2624_v19 }
 0x3b3   : > { %5295 = vmatprep.subr.bf16.mxu0 %v5294_v54  ;;  %5327 = vmatprep.subr.bf16.mxu1 %v5326_v29 }
 0x3b6   : > { %5297 = vmatpush3.bf16.msra.mxu0 %v5296_v14  ;;  %5329 = vmatpush3.bf16.msra.mxu1 %v5328_v6 }
 0x3b7   : > { %5299 = vmatprep.subr.bf16.mxu0 %v5298_v21  ;;  %5331 = vmatprep.subr.bf16.mxu1 %v5330_v24 }
 0x3ba   : > { %5301 = vmatpush3.bf16.msra.mxu0 %v5300_v8  ;;  %5333 = vmatpush3.bf16.msra.mxu1 %v5332_v44  ;;  %v5694_v8 = vmov 1966171168  }
 0x3bb   : > { %5303 = vmatprep.subr.bf16.mxu0 %v5302_v45  ;;  %5335 = vmatprep.subr.bf16.mxu1 %v5334_v15  ;;  %v4430_v44 = vunpack.c.l.s4 %v5694_v8 }
 0x3bd   : > { %v4431_v53 = vunpack.c.0.s8 %v4430_v44 }
 0x3be   : > { %5305 = vmatpush3.bf16.msra.mxu0 %v5304_v42  ;;  %5337 = vmatpush3.bf16.msra.mxu1 %v5336_v48 }
 0x3bf   : > { %5307 = vmatprep.subr.bf16.mxu0 %v5306_v22  ;;  %5339 = vmatprep.subr.bf16.mxu1 %v5338_v30  ;;  %v4434_v41 = vsub.s32 %v4431_v53, %v6854_v3 }
 0x3c2   : > { %5309 = vmatpush3.bf16.msra.mxu0 %v5308_v52  ;;  %5341 = vmatpush3.bf16.msra.mxu1 %v5340_v26 }
 0x3c3   : > { %5311 = vmatprep.subr.bf16.mxu0 %v5310_v11  ;;  %5343 = vmatprep.subr.bf16.mxu1 %v5342_v13 }
 0x3c6   : > { %5313 = vmatpush3.bf16.msra.mxu0 %v5312_v51  ;;  %5345 = vmatpush3.bf16.msra.mxu1 %v5344_v1 }
 0x422   : > { %v3858_v54 = vpop.f32.mrb[2].mxu0 }
 0x423   : > { %v5350_v29 = vadd.f32 %v3858_v54, %v2617_v32  ;;  %v4000_v61 = vpop.f32.mrb[2].mxu1  ;;  %v3860_v5 = vpop.f32.mrb[3].mxu0 }
 0x424   : > { %v5352_v50 = vadd.f32 %v4000_v61, %v2625_v59  ;;  %v5351_v31 = vadd.f32 %v3860_v5, %v2621_v57  ;;  %v4002_v27 = vpop.f32.mrb[3].mxu1 }
 0x425   : > { %v5353_v46 = vadd.f32 %v4002_v27, %v2629_v18  ;;  %v4009_v6 = vmax.f32 %v5350_v29, 0.0 }
 0x426   : > { %v4010_v14 = vmax.f32 %v5351_v31, 0.0  ;;  %v4011_v34 = vmax.f32 %v5352_v50, 0.0 }
 0x427   : > { %v4012_v62 = vmax.f32 %v5353_v46, 0.0 }
 0x428   : > { %4352 = vmatprep.mubr.f32.mxu0 %v4010_v14 }
 0x429   : > { %4422 = vmatprep.mubr.f32.mxu1 %v4012_v62  ;;  %4353 = vmatmul.mubr.f32.vlgmr.msra.gmra.mrb[6].mxu0 %v4009_v6 }
 0x42a   : > { %4423 = vmatmul.mubr.f32.vlgmr.msra.gmra.mrb[6].mxu1 %v4011_v34 }
 0x47c   : > { %v4598_v21 = vpop.f32.mrb[4].mxu0  ;;  %v4633_v24 = vpop.f32.mrb[4].mxu1 }
 0x47d   : > { %v4599_v40 = vpop.f32.mrb[5].mxu0  ;;  %v4634_v55 = vpop.f32.mrb[5].mxu1 }
 0x47e   : > { %v4600_v28 = vadd.f32 %v4599_v40, %v4598_v21  ;;  %v4635_v23 = vadd.f32 %v4634_v55, %v4633_v24 }
 0x480   : > { %v4215_v60 = vadd.f32 %v4600_v28, %v4561_v63 }
 0x482   : > { %v4285_v12 = vadd.f32 %v4635_v23, %v4215_v60 }
 0x4fc   : > { %v4668_v33 = vpop.f32.mrb[6].mxu0 }
 0x4fd   : > { %v4703_v45 = vpop.f32.mrb[6].mxu1  ;;  %v4669_v15 = vpop.f32.mrb[7].mxu0 }
 0x4fe   : > { %v4670_v16 = vadd.f32 %v4669_v15, %v4668_v33  ;;  %v4704_v56 = vpop.f32.mrb[7].mxu1 }
 0x4ff   : > { %v4705_v9 = vadd.f32 %v4704_v56, %v4703_v45 }
 0x500   : > { %v4355_v7 = vadd.f32 %v4670_v16, %v4285_v12 }
 0x502   : > { %v4425_v20 = vadd.f32 %v4705_v9, %v4355_v7 }
 0x504   : > { %v4435_v42 = vrot.slane %v4425_v20, %v4434_v41 }
 0x506   : > { %v4436_v48 = vcombine.high %v4435_v42, %v4435_v42  ;;  %v4443_v58 = vrot.slane %v4435_v42, %v4434_v41 }
 0x508   : > { %v4450_v0 = vrot.slane %v4436_v48, %v4434_v41  ;;  %4454 = vst.msk [vmem:[#allocation12] sm:$0x1] %vm4453_vm1, %v4443_v58 }
 0x50a   : > { %4455 = vst.msk [vmem:[#allocation12 + $0x1] sm:$0x1] %vm4453_vm1, %v4450_v0 }
 0x50b PF: > { %p5401_p13 = scmp.eq.s32.totalorder %s5750_s4, 1  ;;  %s5695_s30 = smov [#allocation12]  }
 0x50c   : > { %s4462_s9 = sshll.u32 %s5695_s30, 4  ;;  %s4463_s9 = int_to_ptr.vmem [resolvable:$true] %s4462_s9 }
 0x50d   : > { %s5610_s16 = scalar_lea.vmem %s4463_s9, 32  ;;  %p5617_p0 = scmp.lt.s32.totalorder %s4463_s9, %s4463_s9 }
 0x50e   : > { %p5611_p2 = scmp.ne.s32.totalorder %s4463_s9, %s5610_s16  ;;  %p5618_p5 = scmp.lt.s32.totalorder %s5610_s16, %s5610_s16 }
 0x510   : > { %p5612_p8 = pnand %p5611_p2, %p5401_p13  ;;  %p5619_p9 = por %p5618_p5, %p5617_p0 }
 0x512   : > { %p5613_p10 = pneg %p5612_p8 }
 0x514   : > { %p5620_p1 = pnand %p5619_p9, %p5613_p10 }
 0x516   : > { %5623 = shalt.err (!%p5620_p1)
}
 0x517   : > { %s5624_s8 = scalar_lea.hbm %s7423_s5, 32 }
 0x518   : > { %p5625_p12 = scmp.ne.s32.totalorder %s7423_s5, %s5624_s8  ;;  %p5630_p6 = scmp.lt.u32.totalorder %s5624_s8, %s7423_s5 }
 0x51a   : > { %p5626_p3 = pnand %p5625_p12, %p5401_p13 }
 0x51c   : > { %p5627_p4 = pneg %p5626_p3 }
 0x51e   : > { %p5632_p7 = pnand %p5630_p6, %p5627_p4 }
 0x520   : > { %5635 = shalt.err (!%p5632_p7)
}
 0x521   : > { %s5696_s14 = smov 16   ;;  %s5697_s6 = smov 1  }
 0x522   : > { %5377 = dma.vmem_to_hbm [thread:$0]  (%p5401_p13), %s4463_s9, 32, %s7423_s5, [#allocation6], %s5696_s14, %s5696_s14, %s5697_s6  }
 0x523   : > { %5665 = dma.done.wait (%p5401_p13), [#allocation6], 32  }
 0x524   : > { %5667 = vsyncadd (%p5401_p13), [#allocation6], 4294967264 }
 0x525 PF: > { %s7443_s7 = sld [smem:[#allocation17_spill]]  ;;  %p20_p11 = scmp.ge.s32.totalorder %s5753_s24, 4  }
 0x526   : > { %s7444_s20 = smov %s5674_s21  ;;  %s7445_s21 = smov %s5678_s22 }
 0x527   : > { %s7447_s23 = smov %s5753_s24  ;;  %22 = sbr.rel (!%p20_p11) target bundleno = 9 (0x9), region = 101 }
 0x52b   : > { %s7446_s22 = smov %s7443_s7 }
 0x52e   :  { %4478 = vsyncpa [#allocation5], 1 }
 0x52f   :  { %4480 = vsyncpa [#allocation5 + $0x1], 1 }
 0x530   :  { %4481 = vsyncpa [#allocation8], 1 }
 0x531   :  { %4482 = vsyncpa [#allocation11], 1 }
 0x532   :  { %4483 = vsyncpa [#allocation6], 1 }
 0x533   :  { %4485 = vsyncpa [#allocation6 + $0x1], 1 }

</bundles_post_ra>
